<compile_context>
chip_gen: v7x
topology: tpu7x:2x2x1
jax: 0.10.0
libtpu: 0.0.40
codegen_flags: <defaults>
</compile_context>

<pallas_src>
import functools

import jax
import jax.numpy as jnp
from jax.experimental import pallas as pl
from jax.experimental.pallas import tpu as pltpu

LN_EPS = 1e-5          # nn.LayerNorm default
MIXER_H_CHUNK = 512    # bound on the fp32 (TM, H-chunk) mixer intermediate


# ----------------------------- kernels --------------------------------------


def _ln_mixer(residual, w_ref, b_ref, w1_ref, b1_ref, w2_ref, b2_ref,
              mix_out_ref, res_out_ref):
    """LayerNorm + mixer body.  `residual` is an fp32 (TM, D) value."""
    # --- LayerNorm in fp32 (biased variance, PyTorch semantics) ---
    mean = jnp.mean(residual, axis=-1, keepdims=True)
    centered = residual - mean
    var = jnp.mean(centered * centered, axis=-1, keepdims=True)
    normed = centered * jax.lax.rsqrt(var + LN_EPS)
    normed = normed * w_ref[...] + b_ref[...]               # (TM,D)*(1,D)+(1,D)
    normed_bf16 = normed.astype(jnp.bfloat16)

    # --- mixer (stand-in): SiLU-gated 2-layer projection, bf16 operands / fp32 acc ---
    # TODO(synk): the real Vim mixer is the Mamba SSM (causal conv1d + selective scan);
    #             mixer_cls is an injected constructor argument in PyTorch, so a compact
    #             projection mixer stands in here.
    tm = residual.shape[0]
    h_dim = w1_ref.shape[-1]
    d_dim = w2_ref.shape[-1]
    if h_dim > MIXER_H_CHUNK and h_dim % MIXER_H_CHUNK == 0:
        hc = MIXER_H_CHUNK                                   # chunk H to bound fp32 scratch
    else:
        hc = h_dim

    out = jnp.zeros((tm, d_dim), jnp.float32)
    for c in range(h_dim // hc):                             # static (unrolled) chunk loop
        lo = c * hc
        hi = lo + hc
        h = jnp.dot(normed_bf16, w1_ref[:, lo:hi],
                    preferred_element_type=jnp.float32) + b1_ref[:, lo:hi]
        h = h * jax.nn.sigmoid(h)                            # SiLU (fp32)
        out = out + jnp.dot(h.astype(jnp.bfloat16), w2_ref[lo:hi, :],
                            preferred_element_type=jnp.float32)
    out = out + b2_ref[...]

    mix_out_ref[...] = out.astype(mix_out_ref.dtype)
    res_out_ref[...] = residual.astype(res_out_ref.dtype)    # residual_in_fp32


def _block_kernel_res(hs_ref, res_ref, w_ref, b_ref, w1_ref, b1_ref, w2_ref, b2_ref,
                      mix_out_ref, res_out_ref):
    residual = res_ref[...].astype(jnp.float32) + hs_ref[...].astype(jnp.float32)
    _ln_mixer(residual, w_ref, b_ref, w1_ref, b1_ref, w2_ref, b2_ref,
              mix_out_ref, res_out_ref)


def _block_kernel_nores(hs_ref, w_ref, b_ref, w1_ref, b1_ref, w2_ref, b2_ref,
                        mix_out_ref, res_out_ref):
    residual = hs_ref[...].astype(jnp.float32)
    _ln_mixer(residual, w_ref, b_ref, w1_ref, b1_ref, w2_ref, b2_ref,
              mix_out_ref, res_out_ref)


# ----------------------------- wrapper ---------------------------------------


def _round_up(n, m):
    return ((n + m - 1) // m) * m


@functools.lru_cache(maxsize=None)
def _tpu_vmem_capacity_bytes():
    try:
        return int(pltpu.get_tpu_info().vmem_capacity_bytes)
    except Exception:
        return 64 * 1024 * 1024          # most constrained generation (v7x per-TC VMEM)


def _pick_tm(n_tokens):
    """Token-tile size: large tiles (HBM roofline), >=2 grid steps when there is enough work."""
    cap = 1024 if _tpu_vmem_capacity_bytes() >= (100 << 20) else 512
    if n_tokens >= 2 * cap:
        return cap
    if n_tokens >= 256:
        # Split into (at least) two roughly even tiles -> both v7x TensorCores get work,
        # and the pipeline still has multiple steps.
        return min(cap, _round_up(pl.cdiv(n_tokens, 2), 8))
    return n_tokens                      # tiny token count: one full-extent tile (layout-legal)


def _vmem_limit_bytes(tm, d, h, hs_bytes, has_res):
    """Double-buffered I/O + weights + compiler scratch footprint, with headroom."""
    tok = tm * d
    io = 2 * tok * hs_bytes                                  # hidden_states in
    if has_res:
        io += 2 * tok * 4                                    # residual in (fp32)
    io += 2 * tok * hs_bytes                                 # mixer out
    io += 2 * tok * 4                                        # residual out (fp32)
    weights = 2 * (2 * d * h * 2 + (3 * d + h) * 4)          # bf16 w1/w2 + fp32 vectors, x2 buf
    hc = MIXER_H_CHUNK if (h > MIXER_H_CHUNK and h % MIXER_H_CHUNK == 0) else h
    scratch = tm * hc * (4 + 2) + 4 * tok * 4                # h fp32 + bf16 copy + (TM,D) temps
    budget = int(1.5 * (io + weights + scratch)) + (8 << 20)
    budget = max(budget, 32 << 20)
    budget = min(budget, _tpu_vmem_capacity_bytes() - (8 << 20))
    return budget


def _pallas_block(hs, res, norm_w, norm_b, w1, b1, w2, b2):
    """hs: (B, L, D); res: (B, L, D) or None. Returns (mixer_out, residual_fp32)."""
    B, L, D = hs.shape
    H = w1.shape[-1]
    N = B * L

    TM = _pick_tm(N)
    grid = (pl.cdiv(N, TM),)             # partial last block: reads are row-independent,
                                         # out-of-bounds writeback is masked by Pallas.

    tok_spec = pl.BlockSpec((TM, D), lambda i: (i, 0))
    const2d = lambda i: (0, 0)

    inputs = [hs.reshape(N, D)]          # merging contiguous leading dims: no HBM copy
    in_specs = [tok_spec]
    if res is not None:
        inputs.append(res.reshape(N, D))
        in_specs.append(tok_spec)

    # Grid-invariant params: prepared (cast/reshaped) once by the caller, no per-call casts.
    inputs += [norm_w, norm_b, w1, b1, w2, b2]
    in_specs += [
        pl.BlockSpec((1, D), const2d),
        pl.BlockSpec((1, D), const2d),
        pl.BlockSpec((D, H), const2d),
        pl.BlockSpec((1, H), const2d),
        pl.BlockSpec((H, D), const2d),
        pl.BlockSpec((1, D), const2d),
    ]

    kernel = _block_kernel_res if res is not None else _block_kernel_nores

    mix_out, res_out = pl.pallas_call(
        kernel,
        out_shape=(
            jax.ShapeDtypeStruct((N, D), hs.dtype),      # mixer output (model dtype)
            jax.ShapeDtypeStruct((N, D), jnp.float32),   # residual (residual_in_fp32)
        ),
        grid_spec=pltpu.PrefetchScalarGridSpec(
            num_scalar_prefetch=0,
            grid=grid,
            in_specs=in_specs,
            out_specs=[tok_spec, tok_spec],
        ),
        compiler_params=pltpu.CompilerParams(
            dimension_semantics=("parallel",),
            vmem_limit_bytes=_vmem_limit_bytes(TM, D, H, hs.dtype.itemsize,
                                               res is not None),
        ),
    )(*inputs)

    return mix_out.reshape(B, L, D), res_out.reshape(B, L, D)


@jax.jit
def _block_forward_res(hs, res, norm_w, norm_b, w1, b1, w2, b2):
    return _pallas_block(hs, res, norm_w, norm_b, w1, b1, w2, b2)


@jax.jit
def _block_forward_nores(hs, norm_w, norm_b, w1, b1, w2, b2):
    return _pallas_block(hs, None, norm_w, norm_b, w1, b1, w2, b2)


def prepare_params(norm_w, norm_b, w1, b1, w2, b2):
    """One-time prep: bf16 MXU weights, fp32 (1, .) LN params / biases (no per-call casts)."""
    return {
        "norm_w": jnp.asarray(norm_w, jnp.float32).reshape(1, -1),
        "norm_b": jnp.asarray(norm_b, jnp.float32).reshape(1, -1),
        "w1": jnp.asarray(w1, jnp.bfloat16),
        "b1": jnp.asarray(b1, jnp.float32).reshape(1, -1),
        "w2": jnp.asarray(w2, jnp.bfloat16),
        "b2": jnp.asarray(b2, jnp.float32).reshape(1, -1),
    }


def block_apply(hidden_states, residual, params):
    """Matches Block.forward(hidden_states, residual=None) -> (mixer_out, residual).

    drop_path is Identity (rate 0.0 / inference); residual_in_fp32=True semantics.
    """
    if residual is None:
        return _block_forward_nores(hidden_states,
                                    params["norm_w"], params["norm_b"],
                                    params["w1"], params["b1"],
                                    params["w2"], params["b2"])
    return _block_forward_res(hidden_states, residual,
                              params["norm_w"], params["norm_b"],
                              params["w1"], params["b1"],
                              params["w2"], params["b2"])


# ----------------------------- reference -------------------------------------


def _reference(hidden_states, residual, params):
    """Pure-JAX reference with identical numerics (fp32 LN, bf16 matmul operands)."""
    if residual is None:
        residual = hidden_states
    else:
        residual = residual + hidden_states
    residual = residual.astype(jnp.float32)
    mean = jnp.mean(residual, axis=-1, keepdims=True)
    var = jnp.mean((residual - mean) ** 2, axis=-1, keepdims=True)
    normed = (residual - mean) * jax.lax.rsqrt(var + LN_EPS)
    normed = normed * params["norm_w"] + params["norm_b"]
    h = jnp.dot(normed.astype(jnp.bfloat16), params["w1"],
                preferred_element_type=jnp.float32) + params["b1"]
    h = h * jax.nn.sigmoid(h)
    out = jnp.dot(h.astype(jnp.bfloat16), params["w2"],
                  preferred_element_type=jnp.float32) + params["b2"]
    return out.astype(hidden_states.dtype), residual


# ----------------------------- test ------------------------------------------


if __name__ == "__main__":
    # Lane-dense D; token count chosen so the grid has 2 steps with a partial last block
    # (exercises the masked writeback path); H large enough to exercise the chunked mixer.
    B, L, D, H = 2, 333, 128, 1024

    key = jax.random.PRNGKey(0)
    k_hs, k_res, k_nw, k_nb, k_w1, k_w2 = jax.random.split(key, 6)

    hidden_states = jax.random.normal(k_hs, (B, L, D), dtype=jnp.float32)
    residual = jax.random.normal(k_res, (B, L, D), dtype=jnp.float32)

    params = prepare_params(
        norm_w=1.0 + 0.1 * jax.random.normal(k_nw, (D,), jnp.float32),
        norm_b=0.05 * jax.random.normal(k_nb, (D,), jnp.float32),
        w1=jax.random.normal(k_w1, (D, H), jnp.float32) * (1.0 / jnp.sqrt(D)),
        b1=jnp.zeros((H,), jnp.float32),
        w2=jax.random.normal(k_w2, (H, D), jnp.float32) * (1.0 / jnp.sqrt(H)),
        b2=jnp.zeros((D,), jnp.float32),
    )

    # General case (residual provided) and first-block case (residual=None).
    out, res_out = block_apply(hidden_states, residual, params)
    out0, res_out0 = block_apply(hidden_states, None, params)

    # bf16 model-dtype path (hidden_states / mixer output bf16, residual stream stays fp32).
    hs_bf16 = hidden_states.astype(jnp.bfloat16)
    out_bf, res_bf = block_apply(hs_bf16, residual, params)

    jax.block_until_ready((out, res_out, out0, res_out0, out_bf, res_bf))

    ref_out, ref_res = _reference(hidden_states, residual, params)
    ref_out0, ref_res0 = _reference(hidden_states, None, params)
    ref_out_bf, ref_res_bf = _reference(hs_bf16, residual, params)

    assert out.shape == (B, L, D) and res_out.dtype == jnp.float32
    assert jnp.allclose(out, ref_out, atol=5e-3, rtol=5e-3)
    assert jnp.allclose(res_out, ref_res, atol=1e-6, rtol=1e-6)
    assert jnp.allclose(out0, ref_out0, atol=5e-3, rtol=5e-3)
    assert jnp.allclose(res_out0, ref_res0, atol=1e-6, rtol=1e-6)
    assert out_bf.dtype == jnp.bfloat16 and res_bf.dtype == jnp.float32
    assert jnp.allclose(out_bf.astype(jnp.float32), ref_out_bf.astype(jnp.float32),
                        atol=5e-2, rtol=5e-2)
    assert jnp.allclose(res_bf, ref_res_bf, atol=1e-6, rtol=1e-6)

    print("KERNEL_OK")
</pallas_src>

<mosaic_0001>
module attributes {stable_mosaic.version = 11 : i64} {
  func.func @_block_kernel_res(%arg0: i32, %arg1: memref<336x128xf32, #tpu.memory_space<vmem>>, %arg2: memref<336x128xf32, #tpu.memory_space<vmem>>, %arg3: memref<1x128xf32, #tpu.memory_space<vmem>>, %arg4: memref<1x128xf32, #tpu.memory_space<vmem>>, %arg5: memref<128x1024xbf16, #tpu.memory_space<vmem>>, %arg6: memref<1x1024xf32, #tpu.memory_space<vmem>>, %arg7: memref<1024x128xbf16, #tpu.memory_space<vmem>>, %arg8: memref<1x128xf32, #tpu.memory_space<vmem>>, %arg9: memref<336x128xf32, #tpu.memory_space<vmem>>, %arg10: memref<336x128xf32, #tpu.memory_space<vmem>>) attributes {dimension_semantics = [#tpu.dimension_semantics<parallel>], iteration_bounds = array<i64: 2>, scalar_prefetch = 0 : i64, scratch_operands = 0 : i64, tpu.core_type = #tpu.core_type<tc>, window_params = [{transform_indices = @transform_0, window_bounds = array<i64: 336, 128>}, {transform_indices = @transform_1, window_bounds = array<i64: 336, 128>}, {pipeline_mode = #tpu.pipeline_mode<synchronous>, transform_indices = @transform_2, window_bounds = array<i64: 1, 128>}, {pipeline_mode = #tpu.pipeline_mode<synchronous>, transform_indices = @transform_3, window_bounds = array<i64: 1, 128>}, {pipeline_mode = #tpu.pipeline_mode<synchronous>, transform_indices = @transform_4, window_bounds = array<i64: 128, 1024>}, {pipeline_mode = #tpu.pipeline_mode<synchronous>, transform_indices = @transform_5, window_bounds = array<i64: 1, 1024>}, {pipeline_mode = #tpu.pipeline_mode<synchronous>, transform_indices = @transform_6, window_bounds = array<i64: 1024, 128>}, {pipeline_mode = #tpu.pipeline_mode<synchronous>, transform_indices = @transform_7, window_bounds = array<i64: 1, 128>}, {transform_indices = @transform_8, window_bounds = array<i64: 336, 128>}, {transform_indices = @transform_9, window_bounds = array<i64: 336, 128>}]} {
    %c0 = arith.constant 0 : index
    %c0_0 = arith.constant 0 : index
    %0 = vector.load %arg2[%c0, %c0_0] : memref<336x128xf32, #tpu.memory_space<vmem>>, vector<336x128xf32>
    %c0_1 = arith.constant 0 : index
    %c0_2 = arith.constant 0 : index
    %1 = vector.load %arg1[%c0_1, %c0_2] : memref<336x128xf32, #tpu.memory_space<vmem>>, vector<336x128xf32>
    %2 = arith.addf %0, %1 : vector<336x128xf32>
    %cst = arith.constant dense<0.000000e+00> : vector<336xf32>
    %3 = vector.multi_reduction <add>, %2, %cst [1] : vector<336x128xf32> to vector<336xf32>
    %4 = vector.shape_cast %3 : vector<336xf32> to vector<336x1xf32>
    %cst_3 = arith.constant 1.280000e+02 : f32
    %5 = vector.broadcast %cst_3 : f32 to vector<336x1xf32>
    %6 = arith.divf %4, %5 : vector<336x1xf32>
    %7 = vector.broadcast %6 : vector<336x1xf32> to vector<336x128xf32>
    %8 = arith.subf %2, %7 : vector<336x128xf32>
    %9 = arith.mulf %8, %8 : vector<336x128xf32>
    %cst_4 = arith.constant dense<0.000000e+00> : vector<336xf32>
    %10 = vector.multi_reduction <add>, %9, %cst_4 [1] : vector<336x128xf32> to vector<336xf32>
    %11 = vector.shape_cast %10 : vector<336xf32> to vector<336x1xf32>
    %cst_5 = arith.constant 1.280000e+02 : f32
    %12 = vector.broadcast %cst_5 : f32 to vector<336x1xf32>
    %13 = arith.divf %11, %12 : vector<336x1xf32>
    %cst_6 = arith.constant 9.99999974E-6 : f32
    %14 = vector.broadcast %cst_6 : f32 to vector<336x1xf32>
    %15 = arith.addf %13, %14 : vector<336x1xf32>
    %16 = math.rsqrt %15 : vector<336x1xf32>
    %17 = vector.broadcast %16 : vector<336x1xf32> to vector<336x128xf32>
    %18 = arith.mulf %8, %17 : vector<336x128xf32>
    %c0_7 = arith.constant 0 : index
    %c0_8 = arith.constant 0 : index
    %19 = vector.load %arg3[%c0_7, %c0_8] : memref<1x128xf32, #tpu.memory_space<vmem>>, vector<1x128xf32>
    %20 = vector.broadcast %19 : vector<1x128xf32> to vector<336x128xf32>
    %21 = arith.mulf %18, %20 : vector<336x128xf32>
    %c0_9 = arith.constant 0 : index
    %c0_10 = arith.constant 0 : index
    %22 = vector.load %arg4[%c0_9, %c0_10] : memref<1x128xf32, #tpu.memory_space<vmem>>, vector<1x128xf32>
    %23 = vector.broadcast %22 : vector<1x128xf32> to vector<336x128xf32>
    %24 = arith.addf %21, %23 : vector<336x128xf32>
    %25 = arith.truncf %24 : vector<336x128xf32> to vector<336x128xbf16>
    %cst_11 = arith.constant 0.000000e+00 : f32
    %26 = vector.broadcast %cst_11 : f32 to vector<336x128xf32>
    %c0_12 = arith.constant 0 : index
    %c0_13 = arith.constant 0 : index
    %27 = vector.load %arg5[%c0_12, %c0_13] : memref<128x1024xbf16, #tpu.memory_space<vmem>>, vector<128x512xbf16>
    %cst_14 = arith.constant dense<0.000000e+00> : vector<336x512xf32>
    %28 = tpu.matmul %25, %27, %cst_14 {dimension_numbers = #tpu.dot_dimension_numbers<[1], [0], [0], [1], [0, 0, 1, 1], [], []>} : vector<336x128xbf16>, vector<128x512xbf16>, vector<336x512xf32> -> vector<336x512xf32>
    %c0_15 = arith.constant 0 : index
    %c0_16 = arith.constant 0 : index
    %29 = vector.load %arg6[%c0_15, %c0_16] : memref<1x1024xf32, #tpu.memory_space<vmem>>, vector<1x512xf32>
    %30 = vector.broadcast %29 : vector<1x512xf32> to vector<336x512xf32>
    %31 = arith.addf %28, %30 : vector<336x512xf32>
    %32 = arith.negf %31 : vector<336x512xf32>
    %33 = math.exp %32 : vector<336x512xf32>
    %cst_17 = arith.constant 1.000000e+00 : f32
    %34 = vector.broadcast %cst_17 : f32 to vector<336x512xf32>
    %35 = arith.addf %34, %33 : vector<336x512xf32>
    %36 = arith.divf %34, %35 : vector<336x512xf32>
    %37 = arith.mulf %31, %36 : vector<336x512xf32>
    %38 = arith.truncf %37 : vector<336x512xf32> to vector<336x512xbf16>
    %c0_18 = arith.constant 0 : index
    %c0_19 = arith.constant 0 : index
    %39 = vector.load %arg7[%c0_18, %c0_19] : memref<1024x128xbf16, #tpu.memory_space<vmem>>, vector<512x128xbf16>
    %cst_20 = arith.constant dense<0.000000e+00> : vector<336x128xf32>
    %40 = tpu.matmul %38, %39, %cst_20 {dimension_numbers = #tpu.dot_dimension_numbers<[1], [0], [0], [1], [0, 0, 1, 1], [], []>} : vector<336x512xbf16>, vector<512x128xbf16>, vector<336x128xf32> -> vector<336x128xf32>
    %41 = arith.addf %26, %40 : vector<336x128xf32>
    %c0_21 = arith.constant 0 : index
    %c512 = arith.constant 512 : index
    %42 = vector.load %arg5[%c0_21, %c512] : memref<128x1024xbf16, #tpu.memory_space<vmem>>, vector<128x512xbf16>
    %cst_22 = arith.constant dense<0.000000e+00> : vector<336x512xf32>
    %43 = tpu.matmul %25, %42, %cst_22 {dimension_numbers = #tpu.dot_dimension_numbers<[1], [0], [0], [1], [0, 0, 1, 1], [], []>} : vector<336x128xbf16>, vector<128x512xbf16>, vector<336x512xf32> -> vector<336x512xf32>
    %c0_23 = arith.constant 0 : index
    %c512_24 = arith.constant 512 : index
    %44 = vector.load %arg6[%c0_23, %c512_24] : memref<1x1024xf32, #tpu.memory_space<vmem>>, vector<1x512xf32>
    %45 = vector.broadcast %44 : vector<1x512xf32> to vector<336x512xf32>
    %46 = arith.addf %43, %45 : vector<336x512xf32>
    %47 = arith.negf %46 : vector<336x512xf32>
    %48 = math.exp %47 : vector<336x512xf32>
    %cst_25 = arith.constant 1.000000e+00 : f32
    %49 = vector.broadcast %cst_25 : f32 to vector<336x512xf32>
    %50 = arith.addf %49, %48 : vector<336x512xf32>
    %51 = arith.divf %49, %50 : vector<336x512xf32>
    %52 = arith.mulf %46, %51 : vector<336x512xf32>
    %53 = arith.truncf %52 : vector<336x512xf32> to vector<336x512xbf16>
    %c512_26 = arith.constant 512 : index
    %c0_27 = arith.constant 0 : index
    %54 = vector.load %arg7[%c512_26, %c0_27] : memref<1024x128xbf16, #tpu.memory_space<vmem>>, vector<512x128xbf16>
    %cst_28 = arith.constant dense<0.000000e+00> : vector<336x128xf32>
    %55 = tpu.matmul %53, %54, %cst_28 {dimension_numbers = #tpu.dot_dimension_numbers<[1], [0], [0], [1], [0, 0, 1, 1], [], []>} : vector<336x512xbf16>, vector<512x128xbf16>, vector<336x128xf32> -> vector<336x128xf32>
    %56 = arith.addf %41, %55 : vector<336x128xf32>
    %c0_29 = arith.constant 0 : index
    %c0_30 = arith.constant 0 : index
    %57 = vector.load %arg8[%c0_29, %c0_30] : memref<1x128xf32, #tpu.memory_space<vmem>>, vector<1x128xf32>
    %58 = vector.broadcast %57 : vector<1x128xf32> to vector<336x128xf32>
    %59 = arith.addf %56, %58 : vector<336x128xf32>
    %c0_31 = arith.constant 0 : index
    %c0_32 = arith.constant 0 : index
    %60 = vector.load %arg9[%c0_31, %c0_32] : memref<336x128xf32, #tpu.memory_space<vmem>>, vector<336x128xf32>
    tpu.vector_store %arg9[%c0_31, %c0_32], %59 {strides = array<i32>} : memref<336x128xf32, #tpu.memory_space<vmem>>, vector<336x128xf32>,
    %c0_33 = arith.constant 0 : index
    %c0_34 = arith.constant 0 : index
    %61 = vector.load %arg10[%c0_33, %c0_34] : memref<336x128xf32, #tpu.memory_space<vmem>>, vector<336x128xf32>
    tpu.vector_store %arg10[%c0_33, %c0_34], %2 {strides = array<i32>} : memref<336x128xf32, #tpu.memory_space<vmem>>, vector<336x128xf32>,
    return
  }
  func.func @transform_0(%arg0: i32) -> (i32, i32) {
    %c0_i32 = arith.constant 0 : i32
    %c0_i32_0 = arith.constant 0 : i32
    return %arg0, %c0_i32 : i32, i32
  }
  func.func @transform_1(%arg0: i32) -> (i32, i32) {
    %c0_i32 = arith.constant 0 : i32
    %c0_i32_0 = arith.constant 0 : i32
    return %arg0, %c0_i32 : i32, i32
  }
  func.func @transform_2(%arg0: i32) -> (i32, i32) {
    %c0_i32 = arith.constant 0 : i32
    %c0_i32_0 = arith.constant 0 : i32
    %c0_i32_1 = arith.constant 0 : i32
    return %c0_i32, %c0_i32_0 : i32, i32
  }
  func.func @transform_3(%arg0: i32) -> (i32, i32) {
    %c0_i32 = arith.constant 0 : i32
    %c0_i32_0 = arith.constant 0 : i32
    %c0_i32_1 = arith.constant 0 : i32
    return %c0_i32, %c0_i32_0 : i32, i32
  }
  func.func @transform_4(%arg0: i32) -> (i32, i32) {
    %c0_i32 = arith.constant 0 : i32
    %c0_i32_0 = arith.constant 0 : i32
    %c0_i32_1 = arith.constant 0 : i32
    return %c0_i32, %c0_i32_0 : i32, i32
  }
  func.func @transform_5(%arg0: i32) -> (i32, i32) {
    %c0_i32 = arith.constant 0 : i32
    %c0_i32_0 = arith.constant 0 : i32
    %c0_i32_1 = arith.constant 0 : i32
    return %c0_i32, %c0_i32_0 : i32, i32
  }
  func.func @transform_6(%arg0: i32) -> (i32, i32) {
    %c0_i32 = arith.constant 0 : i32
    %c0_i32_0 = arith.constant 0 : i32
    %c0_i32_1 = arith.constant 0 : i32
    return %c0_i32, %c0_i32_0 : i32, i32
  }
  func.func @transform_7(%arg0: i32) -> (i32, i32) {
    %c0_i32 = arith.constant 0 : i32
    %c0_i32_0 = arith.constant 0 : i32
    %c0_i32_1 = arith.constant 0 : i32
    return %c0_i32, %c0_i32_0 : i32, i32
  }
  func.func @transform_8(%arg0: i32) -> (i32, i32) {
    %c0_i32 = arith.constant 0 : i32
    %c0_i32_0 = arith.constant 0 : i32
    return %arg0, %c0_i32 : i32, i32
  }
  func.func @transform_9(%arg0: i32) -> (i32, i32) {
    %c0_i32 = arith.constant 0 : i32
    %c0_i32_0 = arith.constant 0 : i32
    return %arg0, %c0_i32 : i32, i32
  }
}

</mosaic_0001>

<bundles_post_ra>
// kernel: _block_forward_res.1
= control target key start
LH: loop header
LB: loop body
LE: loop exit
PB: predicated region body
PF: predicated region fallthrough
CT: control target
= control target key end

     0   :  { %s8596_s30 = smov 0   ;;  %s13860_s0 = inlined_call_operand.vmem [shape: f32[666,128], index: 0, kind: input, shape index: {}]   ;;  %s13861_s1 = inlined_call_operand.vmem [shape: f32[666,128], index: 1, kind: input, shape index: {}]   ;;  %s13862_s2 = inlined_call_operand.vmem [shape: f32[1,128], index: 2, kind: input, shape index: {}]   ;;  %s13863_s3 = inlined_call_operand.vmem [shape: f32[1,128], index: 3, kind: input, shape index: {}]   ;;  %s13864_s4 = inlined_call_operand.vmem [shape: bf16[128,1024], index: 4, kind: input, shape index: {}]   ;;  %s13865_s5 = inlined_call_operand.vmem [shape: f32[1,1024], index: 5, kind: input, shape index: {}]   ;;  %s13866_s6 = inlined_call_operand.vmem [shape: bf16[1024,128], index: 6, kind: input, shape index: {}]   ;;  %s13867_s7 = inlined_call_operand.vmem [shape: f32[1,128], index: 7, kind: input, shape index: {}]   ;;  %s13868_s8 = inlined_call_operand.vmem [shape: f32[666,128], index: 8, kind: output, shape index: {0}]   ;;  %s13869_s9 = inlined_call_operand.vmem [shape: f32[666,128], index: 9, kind: output, shape index: {1}]  }
   0x1 LB: > { %s6552_s10 = sadd.s32 4294967295, %s8543_s30   ;;  %p6556_p0 = scmp.ge.s32.totalorder %s8543_s30, 1  ;;  %s8543_s30 = sphi %s8596_s30, %s20_s30  }
   0x2   : > { %p302_p1 = scmp.lt.s32.totalorder %s8543_s30, 3 }
   0x4   : > { %p303_p2 = pnand %p6556_p0, %p302_p1 }
   0x6   : > { %306 = sbr.rel (%p303_p2) target bundleno = 1709 (0x6ad), region = 52 }
   0xd   : > { %s348_s11 = smul.u32 42, %s6552_s10 }
   0xf   : > { %p349_p3 = scmp.lt.s32.totalorder %s348_s11, 83 }
  0x11   : > { %s15140_s11 = smov (!%p349_p3, %s348_s11), 83 }
  0x12   : > { %s8604_s12 = sshll.u32 %s15140_s11, 3 }
  0x13   : > { %s8610_s15 = scalar_lea.vmem %s13860_s0, %s8604_s12  ;;  %s8616_s18 = scalar_lea.vmem %s13861_s1, %s8604_s12 }
  0x14   : > { %s8622_s21 = scalar_lea.vmem %s13869_s9, %s8604_s12  ;;  %v373_v0 = vld [vmem:[%s8616_s18] sm:$0xff]  ;;  %v374_v2 = vld [vmem:[%s8616_s18 + $0x8] sm:$0xff]  ;;  %v375_v5 = vld [vmem:[%s8616_s18 + $0x10] sm:$0xff]  ;;  %s13731_s23 = scalar_lea.vmem %s13868_s8, %s8604_s12 }
  0x15   : > { %v415_v1 = vld [vmem:[%s8610_s15] sm:$0xff]  ;;  %v416_v4 = vld [vmem:[%s8610_s15 + $0x8] sm:$0xff]  ;;  %v417_v6 = vld [vmem:[%s8610_s15 + $0x10] sm:$0xff] }
  0x16   : > { %v8627_v3 = vadd.f32 %v415_v1, %v373_v0  ;;  %v8632_v7 = vadd.f32 %v416_v4, %v374_v2  ;;  %v8634_v8 = vadd.f32 %v417_v6, %v375_v5  ;;  %v376_v9 = vld [vmem:[%s8616_s18 + $0x18] sm:$0xff]  ;;  %v377_v11 = vld [vmem:[%s8616_s18 + $0x20] sm:$0xff]  ;;  %v378_v14 = vld [vmem:[%s8616_s18 + $0x28] sm:$0xff] }
  0x17   : > { %v418_v10 = vld [vmem:[%s8610_s15 + $0x18] sm:$0xff]  ;;  %v419_v13 = vld [vmem:[%s8610_s15 + $0x20] sm:$0xff]  ;;  %v420_v15 = vld [vmem:[%s8610_s15 + $0x28] sm:$0xff] }
  0x18   : > { %499 = vadd.xlane.f32.xlu0 %v8627_v3  ;;  %6408 = vst [vmem:[%s8622_s21] sm:$0xff] %v8627_v3  ;;  %v8642_v12 = vadd.f32 %v418_v10, %v376_v9  ;;  %6409 = vst [vmem:[%s8622_s21 + $0x8] sm:$0xff] %v8632_v7  ;;  %503 = vadd.xlane.f32.xlu1 %v8634_v8  ;;  %v8652_v16 = vadd.f32 %v419_v13, %v377_v11  ;;  %v379_v18 = vld [vmem:[%s8616_s18 + $0x30] sm:$0xff]  ;;  %v380_v20 = vld [vmem:[%s8616_s18 + $0x38] sm:$0xff] }
  0x19   : > { %6410 = vst [vmem:[%s8622_s21 + $0x10] sm:$0xff] %v8634_v8  ;;  %v8654_v17 = vadd.f32 %v420_v15, %v378_v14  ;;  %v421_v19 = vld [vmem:[%s8610_s15 + $0x30] sm:$0xff]  ;;  %v422_v22 = vld [vmem:[%s8610_s15 + $0x38] sm:$0xff]  ;;  %v381_v23 = vld [vmem:[%s8616_s18 + $0x40] sm:$0xff] }
  0x1a   : > { %6411 = vst [vmem:[%s8622_s21 + $0x18] sm:$0xff] %v8642_v12  ;;  %v8661_v21 = vadd.f32 %v421_v19, %v379_v18  ;;  %v423_v24 = vld [vmem:[%s8610_s15 + $0x40] sm:$0xff]  ;;  %6412 = vst [vmem:[%s8622_s21 + $0x20] sm:$0xff] %v8652_v16  ;;  %v8670_v25 = vadd.f32 %v422_v22, %v380_v20  ;;  %v382_v27 = vld [vmem:[%s8616_s18 + $0x48] sm:$0xff] }
  0x1b   : > { %6413 = vst [vmem:[%s8622_s21 + $0x28] sm:$0xff] %v8654_v17  ;;  %v8672_v26 = vadd.f32 %v423_v24, %v381_v23  ;;  %v424_v28 = vld [vmem:[%s8610_s15 + $0x48] sm:$0xff]  ;;  %v383_v29 = vld [vmem:[%s8616_s18 + $0x50] sm:$0xff]  ;;  %v384_v32 = vld [vmem:[%s8616_s18 + $0x58] sm:$0xff] }
  0x1c   : > { %501 = vadd.xlane.f32.xlu0 %v8632_v7  ;;  %6414 = vst [vmem:[%s8622_s21 + $0x30] sm:$0xff] %v8661_v21  ;;  %v8680_v30 = vadd.f32 %v424_v28, %v382_v27  ;;  %v425_v31 = vld [vmem:[%s8610_s15 + $0x50] sm:$0xff]  ;;  %v426_v33 = vld [vmem:[%s8610_s15 + $0x58] sm:$0xff]  ;;  %505 = vadd.xlane.f32.xlu1 %v8642_v12  ;;  %6415 = vst [vmem:[%s8622_s21 + $0x38] sm:$0xff] %v8670_v25 }
  0x1d   : > { %6416 = vst [vmem:[%s8622_s21 + $0x40] sm:$0xff] %v8672_v26  ;;  %v8690_v34 = vadd.f32 %v425_v31, %v383_v29  ;;  %v8692_v35 = vadd.f32 %v426_v33, %v384_v32  ;;  %v385_v36 = vld [vmem:[%s8616_s18 + $0x60] sm:$0xff]  ;;  %v386_v38 = vld [vmem:[%s8616_s18 + $0x68] sm:$0xff]  ;;  %v387_v41 = vld [vmem:[%s8616_s18 + $0x70] sm:$0xff] }
  0x1e   : > { %v427_v37 = vld [vmem:[%s8610_s15 + $0x60] sm:$0xff]  ;;  %6417 = vst [vmem:[%s8622_s21 + $0x48] sm:$0xff] %v8680_v30  ;;  %v428_v40 = vld [vmem:[%s8610_s15 + $0x68] sm:$0xff]  ;;  %v429_v42 = vld [vmem:[%s8610_s15 + $0x70] sm:$0xff] }
  0x1f   : > { %v8699_v39 = vadd.f32 %v427_v37, %v385_v36  ;;  %6418 = vst [vmem:[%s8622_s21 + $0x50] sm:$0xff] %v8690_v34  ;;  %6419 = vst [vmem:[%s8622_s21 + $0x58] sm:$0xff] %v8692_v35  ;;  %v8708_v43 = vadd.f32 %v428_v40, %v386_v38  ;;  %v8710_v44 = vadd.f32 %v429_v42, %v387_v41  ;;  %v388_v45 = vld [vmem:[%s8616_s18 + $0x78] sm:$0xff]  ;;  %v389_v47 = vld [vmem:[%s8616_s18 + $0x80] sm:$0xff] }
  0x20   : > { %v430_v46 = vld [vmem:[%s8610_s15 + $0x78] sm:$0xff]  ;;  %507 = vadd.xlane.f32.xlu0 %v8652_v16  ;;  %v431_v49 = vld [vmem:[%s8610_s15 + $0x80] sm:$0xff]  ;;  %v390_v50 = vld [vmem:[%s8616_s18 + $0x88] sm:$0xff]  ;;  %509 = vadd.xlane.f32.xlu1 %v8654_v17 }
  0x21   : > { %6420 = vst [vmem:[%s8622_s21 + $0x60] sm:$0xff] %v8699_v39  ;;  %v8718_v48 = vadd.f32 %v430_v46, %v388_v45  ;;  %v432_v51 = vld [vmem:[%s8610_s15 + $0x88] sm:$0xff]  ;;  %6421 = vst [vmem:[%s8622_s21 + $0x68] sm:$0xff] %v8708_v43  ;;  %v8728_v52 = vadd.f32 %v431_v49, %v389_v47  ;;  %v391_v54 = vld [vmem:[%s8616_s18 + $0x90] sm:$0xff] }
  0x22   : > { %6422 = vst [vmem:[%s8622_s21 + $0x70] sm:$0xff] %v8710_v44  ;;  %v8730_v53 = vadd.f32 %v432_v51, %v390_v50  ;;  %v433_v55 = vld [vmem:[%s8610_s15 + $0x90] sm:$0xff]  ;;  %v392_v56 = vld [vmem:[%s8616_s18 + $0x98] sm:$0xff]  ;;  %v393_v60 = vld [vmem:[%s8616_s18 + $0xa0] sm:$0xff] }
  0x23   : > { %6423 = vst [vmem:[%s8622_s21 + $0x78] sm:$0xff] %v8718_v48  ;;  %v8737_v57 = vadd.f32 %v433_v55, %v391_v54  ;;  %v434_v58 = vld [vmem:[%s8610_s15 + $0x98] sm:$0xff]  ;;  %6424 = vst [vmem:[%s8622_s21 + $0x80] sm:$0xff] %v8728_v52  ;;  %v435_v61 = vld [vmem:[%s8610_s15 + $0xa0] sm:$0xff] }
  0x24   : > { %6425 = vst [vmem:[%s8622_s21 + $0x88] sm:$0xff] %v8730_v53  ;;  %v8744_v59 = vadd.f32 %v434_v58, %v392_v56  ;;  %511 = vadd.xlane.f32.xlu0 %v8661_v21  ;;  %513 = vadd.xlane.f32.xlu1 %v8670_v25  ;;  %v8758_v62 = vadd.f32 %v435_v61, %v393_v60  ;;  %v394_v63 = vld [vmem:[%s8616_s18 + $0xa8] sm:$0xff]  ;;  %v395_v2 = vld [vmem:[%s8616_s18 + $0xb0] sm:$0xff]  ;;  %v396_v6 = vld [vmem:[%s8616_s18 + $0xb8] sm:$0xff] }
  0x25   : > { %6426 = vst [vmem:[%s8622_s21 + $0x90] sm:$0xff] %v8737_v57  ;;  %v436_v0 = vld [vmem:[%s8610_s15 + $0xa8] sm:$0xff]  ;;  %v437_v4 = vld [vmem:[%s8610_s15 + $0xb0] sm:$0xff]  ;;  %v438_v9 = vld [vmem:[%s8610_s15 + $0xb8] sm:$0xff] }
  0x26   : > { %6427 = vst [vmem:[%s8622_s21 + $0x98] sm:$0xff] %v8744_v59  ;;  %6428 = vst [vmem:[%s8622_s21 + $0xa0] sm:$0xff] %v8758_v62  ;;  %v8766_v1 = vadd.f32 %v436_v0, %v394_v63  ;;  %v8774_v5 = vadd.f32 %v437_v4, %v395_v2  ;;  %v8782_v10 = vadd.f32 %v438_v9, %v396_v6  ;;  %v397_v11 = vld [vmem:[%s8616_s18 + $0xc0] sm:$0xff]  ;;  %v398_v15 = vld [vmem:[%s8616_s18 + $0xc8] sm:$0xff] }
  0x27   : > { %v439_v13 = vld [vmem:[%s8610_s15 + $0xc0] sm:$0xff]  ;;  %v440_v18 = vld [vmem:[%s8610_s15 + $0xc8] sm:$0xff]  ;;  %v399_v20 = vld [vmem:[%s8616_s18 + $0xd0] sm:$0xff] }
  0x28   : > { %515 = vadd.xlane.f32.xlu0 %v8672_v26  ;;  %517 = vadd.xlane.f32.xlu1 %v8680_v30  ;;  %6429 = vst [vmem:[%s8622_s21 + $0xa8] sm:$0xff] %v8766_v1  ;;  %6430 = vst [vmem:[%s8622_s21 + $0xb0] sm:$0xff] %v8774_v5  ;;  %v8790_v14 = vadd.f32 %v439_v13, %v397_v11  ;;  %v8796_v19 = vadd.f32 %v440_v18, %v398_v15  ;;  %v441_v22 = vld [vmem:[%s8610_s15 + $0xd0] sm:$0xff]  ;;  %v400_v24 = vld [vmem:[%s8616_s18 + $0xd8] sm:$0xff] }
  0x29   : > { %6431 = vst [vmem:[%s8622_s21 + $0xb8] sm:$0xff] %v8782_v10  ;;  %v8802_v23 = vadd.f32 %v441_v22, %v399_v20  ;;  %v442_v27 = vld [vmem:[%s8610_s15 + $0xd8] sm:$0xff]  ;;  %v401_v29 = vld [vmem:[%s8616_s18 + $0xe0] sm:$0xff]  ;;  %v402_v33 = vld [vmem:[%s8616_s18 + $0xe8] sm:$0xff] }
  0x2a   : > { %6432 = vst [vmem:[%s8622_s21 + $0xc0] sm:$0xff] %v8790_v14  ;;  %6433 = vst [vmem:[%s8622_s21 + $0xc8] sm:$0xff] %v8796_v19  ;;  %v8808_v28 = vadd.f32 %v442_v27, %v400_v24  ;;  %v443_v31 = vld [vmem:[%s8610_s15 + $0xe0] sm:$0xff]  ;;  %v444_v36 = vld [vmem:[%s8610_s15 + $0xe8] sm:$0xff] }
  0x2b   : > { %6434 = vst [vmem:[%s8622_s21 + $0xd0] sm:$0xff] %v8802_v23  ;;  %v8814_v32 = vadd.f32 %v443_v31, %v401_v29  ;;  %v8820_v37 = vadd.f32 %v444_v36, %v402_v33  ;;  %v403_v38 = vld [vmem:[%s8616_s18 + $0xf0] sm:$0xff]  ;;  %v404_v42 = vld [vmem:[%s8616_s18 + $0xf8] sm:$0xff]  ;;  %v405_v47 = vld [vmem:[%s8616_s18 + $0x100] sm:$0xff] }
  0x2c   : > { %519 = vadd.xlane.f32.xlu0 %v8690_v34  ;;  %521 = vadd.xlane.f32.xlu1 %v8692_v35  ;;  %6435 = vst [vmem:[%s8622_s21 + $0xd8] sm:$0xff] %v8808_v28  ;;  %v445_v40 = vld [vmem:[%s8610_s15 + $0xf0] sm:$0xff]  ;;  %v446_v45 = vld [vmem:[%s8610_s15 + $0xf8] sm:$0xff]  ;;  %v447_v49 = vld [vmem:[%s8610_s15 + $0x100] sm:$0xff] }
  0x2d   : > { %6436 = vst [vmem:[%s8622_s21 + $0xe0] sm:$0xff] %v8814_v32  ;;  %6437 = vst [vmem:[%s8622_s21 + $0xe8] sm:$0xff] %v8820_v37  ;;  %v8826_v41 = vadd.f32 %v445_v40, %v403_v38  ;;  %v8832_v46 = vadd.f32 %v446_v45, %v404_v42  ;;  %v8838_v50 = vadd.f32 %v447_v49, %v405_v47  ;;  %v406_v51 = vld [vmem:[%s8616_s18 + $0x108] sm:$0xff]  ;;  %v407_v56 = vld [vmem:[%s8616_s18 + $0x110] sm:$0xff] }
  0x2e   : > { %v448_v54 = vld [vmem:[%s8610_s15 + $0x108] sm:$0xff]  ;;  %v449_v58 = vld [vmem:[%s8610_s15 + $0x110] sm:$0xff]  ;;  %v408_v61 = vld [vmem:[%s8616_s18 + $0x118] sm:$0xff] }
  0x2f   : > { %6438 = vst [vmem:[%s8622_s21 + $0xf0] sm:$0xff] %v8826_v41  ;;  %6439 = vst [vmem:[%s8622_s21 + $0xf8] sm:$0xff] %v8832_v46  ;;  %v8844_v55 = vadd.f32 %v448_v54, %v406_v51  ;;  %v8850_v60 = vadd.f32 %v449_v58, %v407_v56  ;;  %v450_v63 = vld [vmem:[%s8610_s15 + $0x118] sm:$0xff]  ;;  %v409_v2 = vld [vmem:[%s8616_s18 + $0x120] sm:$0xff] }
  0x30   : > { %523 = vadd.xlane.f32.xlu0 %v8699_v39  ;;  %525 = vadd.xlane.f32.xlu1 %v8708_v43  ;;  %6440 = vst [vmem:[%s8622_s21 + $0x100] sm:$0xff] %v8838_v50  ;;  %v8856_v0 = vadd.f32 %v450_v63, %v408_v61  ;;  %v451_v4 = vld [vmem:[%s8610_s15 + $0x120] sm:$0xff]  ;;  %v410_v9 = vld [vmem:[%s8616_s18 + $0x128] sm:$0xff]  ;;  %v411_v15 = vld [vmem:[%s8616_s18 + $0x130] sm:$0xff] }
  0x31   : > { %6441 = vst [vmem:[%s8622_s21 + $0x108] sm:$0xff] %v8844_v55  ;;  %6442 = vst [vmem:[%s8622_s21 + $0x110] sm:$0xff] %v8850_v60  ;;  %v8862_v6 = vadd.f32 %v451_v4, %v409_v2  ;;  %v452_v11 = vld [vmem:[%s8610_s15 + $0x128] sm:$0xff]  ;;  %v453_v18 = vld [vmem:[%s8610_s15 + $0x130] sm:$0xff] }
  0x32   : > { %6443 = vst [vmem:[%s8622_s21 + $0x118] sm:$0xff] %v8856_v0  ;;  %v8868_v13 = vadd.f32 %v452_v11, %v410_v9  ;;  %v8874_v20 = vadd.f32 %v453_v18, %v411_v15  ;;  %v412_v22 = vld [vmem:[%s8616_s18 + $0x138] sm:$0xff]  ;;  %v1081_v29 = vld [vmem:[%s13864_s4] sm:$0xff]  ;;  %v1082_v33 = vld [vmem:[%s13864_s4 + $0x8] sm:$0xff] }
  0x33   : > { %6444 = vst [vmem:[%s8622_s21 + $0x120] sm:$0xff] %v8862_v6  ;;  %v454_v24 = vld [vmem:[%s8610_s15 + $0x138] sm:$0xff]  ;;  %v1083_v31 = vld [vmem:[%s13864_s4 + $0x20] sm:$0xff]  ;;  %v1084_v38 = vld [vmem:[%s13864_s4 + $0x28] sm:$0xff] }
  0x34   : > { %527 = vadd.xlane.f32.xlu0 %v8710_v44  ;;  %529 = vadd.xlane.f32.xlu1 %v8718_v48  ;;  %6445 = vst [vmem:[%s8622_s21 + $0x128] sm:$0xff] %v8868_v13  ;;  %6446 = vst [vmem:[%s8622_s21 + $0x130] sm:$0xff] %v8874_v20  ;;  %v8880_v27 = vadd.f32 %v454_v24, %v412_v22  ;;  %v6564_v36 = vcombine.high %v1081_v29, %v1083_v31  ;;  %v1085_v42 = vld [vmem:[%s13864_s4 + $0x40] sm:$0xff]  ;;  %v1086_v54 = vld [vmem:[%s13864_s4 + $0x48] sm:$0xff] }
  0x35   : > { %v6563_v40 = vcombine.low %v1081_v29, %v1083_v31  ;;  %v1087_v45 = vld [vmem:[%s13864_s4 + $0x60] sm:$0xff]  ;;  %v6566_v47 = vcombine.high %v1082_v33, %v1084_v38  ;;  %v6565_v49 = vcombine.low %v1082_v33, %v1084_v38  ;;  %v1088_v56 = vld [vmem:[%s13864_s4 + $0x68] sm:$0xff] }
  0x36   : > { %6447 = vst [vmem:[%s8622_s21 + $0x138] sm:$0xff] %v8880_v27  ;;  %v6568_v51 = vcombine.high %v1085_v42, %v1087_v45  ;;  %1295 = vmatprep.subr.bf16.mxu0 %v6564_v36  ;;  %v6570_v58 = vcombine.high %v1086_v54, %v1088_v56 }
  0x37   : > { %1538 = vmatprep.subr.bf16.mxu1 %v6566_v47  ;;  %1296 = vmatpush1.bf16.msra.mxu0 %v6563_v40 }
  0x38   : > { %531 = vadd.xlane.f32.xlu0 %v8728_v52  ;;  %533 = vadd.xlane.f32.xlu1 %v8730_v53 }
  0x39   : > { %1539 = vmatpush1.bf16.msra.mxu1 %v6565_v49  ;;  %1297 = vmatprep.subr.bf16.mxu0 %v6568_v51 }
  0x3a   : > { %1540 = vmatprep.subr.bf16.mxu1 %v6570_v58 }
  0x3c   : > { %535 = vadd.xlane.f32.xlu0 %v8737_v57  ;;  %537 = vadd.xlane.f32.xlu1 %v8744_v59 }
  0xa5   : > { %v500_v61 = vpop.xlane.xlu0 %499  ;;  %v504_v2 = vpop.xlane.xlu1 %503 }
  0xa6   : > { %v584_v63 = vmul.f32 0.0078125, %v500_v61  ;;  %v586_v9 = vmul.f32 0.0078125, %v504_v2  ;;  %v6567_v2 = vcombine.low %v1085_v42, %v1087_v45  ;;  %v1092_v45 = vld [vmem:[%s13864_s4 + $0xa8] sm:$0xff] }
  0xa8   : > { %v8909_v4 = vsub.f32 %v8627_v3, %v584_v63  ;;  %v8917_v29 = vsub.f32 %v8634_v8, %v586_v9  ;;  %v6569_v9 = vcombine.low %v1086_v54, %v1088_v56  ;;  %1298 = vmatpush1.bf16.msra.mxu0 %v6567_v2 }
  0xa9   : > { %v502_v11 = vpop.xlane.xlu0 %501  ;;  %v506_v22 = vpop.xlane.xlu1 %505 }
  0xaa   : > { %v585_v15 = vmul.f32 0.0078125, %v502_v11  ;;  %v668_v18 = vmul.f32 %v8909_v4, %v8909_v4  ;;  %v587_v31 = vmul.f32 0.0078125, %v506_v22  ;;  %v670_v38 = vmul.f32 %v8917_v29, %v8917_v29  ;;  %1541 = vmatpush1.bf16.msra.mxu1 %v6569_v9  ;;  %v1090_v11 = vld [vmem:[%s13864_s4 + $0x88] sm:$0xff]  ;;  %v1099_v9 = vld [vmem:[%s13864_s4 + $0x120] sm:$0xff] }
  0xab   : > { %v6574_v56 = vcombine.high %v1090_v11, %v1092_v45 }
  0xac   : > { %v8914_v24 = vsub.f32 %v8632_v7, %v585_v15  ;;  %710 = vadd.xlane.f32.xlu0 %v668_v18  ;;  %v8923_v36 = vsub.f32 %v8642_v12, %v587_v31 }
  0xad   : > { %v508_v33 = vpop.xlane.xlu0 %507  ;;  %v510_v40 = vpop.xlane.xlu1 %509  ;;  %1542 = vmatprep.subr.bf16.mxu1 %v6574_v56 }
  0xae   : > { %v669_v3 = vmul.f32 %v8914_v24, %v8914_v24  ;;  %v588_v7 = vmul.f32 0.0078125, %v508_v33  ;;  %v589_v47 = vmul.f32 0.0078125, %v510_v40  ;;  %v671_v49 = vmul.f32 %v8923_v36, %v8923_v36 }
  0xaf   : > { %v6573_v33 = vcombine.low %v1090_v11, %v1092_v45 }
  0xb0   : > { %539 = vadd.xlane.f32.xlu0 %v8758_v62  ;;  %712 = vadd.xlane.f32.xlu1 %v669_v3  ;;  %v8929_v8 = vsub.f32 %v8652_v16, %v588_v7  ;;  %v8934_v58 = vsub.f32 %v8654_v17, %v589_v47  ;;  %v1089_v16 = vld [vmem:[%s13864_s4 + $0x80] sm:$0xff]  ;;  %v1096_v47 = vld [vmem:[%s13864_s4 + $0xe8] sm:$0xff] }
  0xb1   : > { %v512_v51 = vpop.xlane.xlu0 %511  ;;  %v514_v63 = vpop.xlane.xlu1 %513  ;;  %v1091_v17 = vld [vmem:[%s13864_s4 + $0xa0] sm:$0xff]  ;;  %1543 = vmatpush1.bf16.msra.mxu1 %v6573_v33 }
  0xb2   : > { %v672_v12 = vmul.f32 %v8929_v8, %v8929_v8  ;;  %v590_v61 = vmul.f32 0.0078125, %v512_v51  ;;  %v673_v15 = vmul.f32 %v8934_v58, %v8934_v58  ;;  %v591_v18 = vmul.f32 0.0078125, %v514_v63  ;;  %v1093_v3 = vld [vmem:[%s13864_s4 + $0xc0] sm:$0xff] }
  0xb3   : > { %v6572_v42 = vcombine.high %v1089_v16, %v1091_v17  ;;  %v6571_v22 = vcombine.low %v1089_v16, %v1091_v17  ;;  %v1098_v16 = vld [vmem:[%s13864_s4 + $0x108] sm:$0xff]  ;;  %v413_v33 = vld [vmem:[%s8616_s18 + $0x140] sm:$0xff] }
  0xb4   : > { %714 = vadd.xlane.f32.xlu0 %v670_v38  ;;  %541 = vadd.xlane.f32.xlu1 %v8766_v1  ;;  %v8955_v54 = vsub.f32 %v8661_v21, %v590_v61  ;;  %v1095_v38 = vld [vmem:[%s13864_s4 + $0xe0] sm:$0xff]  ;;  %v1094_v21 = vld [vmem:[%s13864_s4 + $0xc8] sm:$0xff]  ;;  %v8967_v7 = vsub.f32 %v8670_v25, %v591_v18 }
  0xb5   : > { %v516_v31 = vpop.xlane.xlu0 %515  ;;  %1299 = vmatprep.subr.bf16.mxu0 %v6572_v42  ;;  %v6576_v40 = vcombine.high %v1093_v3, %v1095_v38  ;;  %v6578_v61 = vcombine.high %v1094_v21, %v1096_v47  ;;  %v6575_v63 = vcombine.low %v1093_v3, %v1095_v38  ;;  %v6577_v2 = vcombine.low %v1094_v21, %v1096_v47  ;;  %v1097_v25 = vld [vmem:[%s13864_s4 + $0x100] sm:$0xff]  ;;  %v1100_v18 = vld [vmem:[%s13864_s4 + $0x128] sm:$0xff] }
  0xb6   : > { %1300 = vmatpush1.bf16.msra.mxu0 %v6571_v22  ;;  %v592_v51 = vmul.f32 0.0078125, %v516_v31  ;;  %v675_v17 = vmul.f32 %v8967_v7, %v8967_v7  ;;  %v6582_v56 = vcombine.high %v1098_v16, %v1100_v18  ;;  %v6579_v22 = vcombine.low %v1097_v25, %v1099_v9  ;;  %v455_v3 = vld [vmem:[%s8610_s15 + $0x140] sm:$0xff] }
  0xb7   : > { %1301 = vmatprep.subr.bf16.mxu0 %v6576_v40  ;;  %1544 = vmatprep.subr.bf16.mxu1 %v6578_v61  ;;  %v6581_v31 = vcombine.low %v1098_v16, %v1100_v18  ;;  %v8995_v38 = vadd.f32 %v455_v3, %v413_v33  ;;  %v1101_v21 = vld [vmem:[%s13864_s4 + $0x140] sm:$0xff]  ;;  %v1102_v40 = vld [vmem:[%s13864_s4 + $0x148] sm:$0xff] }
  0xb8   : > { %543 = vadd.xlane.f32.xlu0 %v8774_v5  ;;  %716 = vadd.xlane.f32.xlu1 %v671_v49  ;;  %v674_v49 = vmul.f32 %v8955_v54, %v8955_v54  ;;  %v8991_v42 = vsub.f32 %v8672_v26, %v592_v51  ;;  %v1103_v26 = vld [vmem:[%s13864_s4 + $0x160] sm:$0xff]  ;;  %v456_v16 = vld [vmem:[%s8610_s15 + $0x148] sm:$0xff] }
  0xb9   : > { %1545 = vmatpush1.bf16.msra.mxu1 %v6577_v2  ;;  %v520_v45 = vpop.xlane.xlu0 %519  ;;  %v6584_v51 = vcombine.high %v1101_v21, %v1103_v26  ;;  %6448 = vst [vmem:[%s8622_s21 + $0x140] sm:$0xff] %v8995_v38  ;;  %v1106_v18 = vld [vmem:[%s13864_s4 + $0x188] sm:$0xff] }
  0xba   : > { %1302 = vmatpush1.bf16.msra.mxu0 %v6575_v63  ;;  %1546 = vmatprep.subr.bf16.mxu1 %v6582_v56  ;;  %v676_v61 = vmul.f32 %v8991_v42, %v8991_v42 }
  0xbc   : > { %545 = vadd.xlane.f32.xlu1 %v8782_v10  ;;  %718 = vadd.xlane.f32.xlu0 %v672_v12  ;;  %v518_v12 = vpop.xlane.xlu1 %517 }
  0xbd   : > { %v593_v11 = vmul.f32 0.0078125, %v518_v12  ;;  %1547 = vmatpush1.bf16.msra.mxu1 %v6581_v31  ;;  %v1104_v12 = vld [vmem:[%s13864_s4 + $0x168] sm:$0xff] }
  0xbe   : > { %v6586_v2 = vcombine.high %v1102_v40, %v1104_v12  ;;  %v1108_v31 = vld [vmem:[%s13864_s4 + $0x1a8] sm:$0xff] }
  0xbf   : > { %v9007_v47 = vsub.f32 %v8680_v30, %v593_v11  ;;  %v6585_v30 = vcombine.low %v1102_v40, %v1104_v12  ;;  %v6590_v3 = vcombine.high %v1106_v18, %v1108_v31  ;;  %v1109_v40 = vld [vmem:[%s13864_s4 + $0x1c0] sm:$0xff] }
  0xc0   : > { %720 = vadd.xlane.f32.xlu1 %v673_v15  ;;  %547 = vadd.xlane.f32.xlu0 %v8790_v14  ;;  %v6580_v15 = vcombine.high %v1097_v25, %v1099_v9  ;;  %v522_v63 = vpop.xlane.xlu1 %521  ;;  %v6583_v25 = vcombine.low %v1101_v21, %v1103_v26  ;;  %v414_v9 = vld [vmem:[%s8616_s18 + $0x148] sm:$0xff]  ;;  %v524_v26 = vpop.xlane.xlu0 %523 }
  0xc1   : > { %1548 = vmatprep.subr.bf16.mxu1 %v6586_v2  ;;  %v9019_v11 = vadd.f32 %v456_v16, %v414_v9  ;;  %v595_v56 = vmul.f32 0.0078125, %v522_v63  ;;  %v677_v33 = vmul.f32 %v9007_v47, %v9007_v47  ;;  %v1112_v2 = vld [vmem:[%s13864_s4 + $0x1e8] sm:$0xff] }
  0xc2   : > { %1303 = vmatprep.subr.bf16.mxu0 %v6580_v15  ;;  %v1107_v15 = vld [vmem:[%s13864_s4 + $0x1a0] sm:$0xff]  ;;  %1549 = vmatpush1.bf16.msra.mxu1 %v6585_v30 }
  0xc3   : > { %1304 = vmatpush1.bf16.msra.mxu0 %v6579_v22  ;;  %6449 = vst [vmem:[%s8622_s21 + $0x148] sm:$0xff] %v9019_v11  ;;  %1550 = vmatprep.subr.bf16.mxu1 %v6590_v3  ;;  %v9051_v12 = vsub.f32 %v8692_v35, %v595_v56 }
  0xc4   : > { %549 = vadd.xlane.f32.xlu1 %v8796_v19  ;;  %722 = vadd.xlane.f32.xlu0 %v674_v49  ;;  %v594_v49 = vmul.f32 0.0078125, %v520_v45  ;;  %v528_v56 = vpop.xlane.xlu0 %527 }
  0xc5   : > { %1305 = vmatprep.subr.bf16.mxu0 %v6584_v51  ;;  %v1110_v51 = vld [vmem:[%s13864_s4 + $0x1c8] sm:$0xff] }
  0xc6   : > { %v9031_v45 = vsub.f32 %v8690_v34, %v594_v49  ;;  %v6589_v34 = vcombine.low %v1106_v18, %v1108_v31  ;;  %v1111_v49 = vld [vmem:[%s13864_s4 + $0x1e0] sm:$0xff]  ;;  %v6594_v30 = vcombine.high %v1110_v51, %v1112_v2  ;;  %v6593_v16 = vcombine.low %v1110_v51, %v1112_v2 }
  0xc7   : > { %1306 = vmatpush1.bf16.msra.mxu0 %v6583_v25  ;;  %v6592_v63 = vcombine.high %v1109_v40, %v1111_v49  ;;  %v596_v25 = vmul.f32 0.0078125, %v524_v26  ;;  %v6591_v9 = vcombine.low %v1109_v40, %v1111_v49 }
  0xc8   : > { %724 = vadd.xlane.f32.xlu1 %v675_v17  ;;  %551 = vadd.xlane.f32.xlu0 %v8802_v23  ;;  %v1105_v17 = vld [vmem:[%s13864_s4 + $0x180] sm:$0xff]  ;;  %v532_v40 = vpop.xlane.xlu0 %531 }
  0xc9   : > { %v6588_v22 = vcombine.high %v1105_v17, %v1107_v15  ;;  %v6587_v21 = vcombine.low %v1105_v17, %v1107_v15  ;;  %1551 = vmatpush1.bf16.msra.mxu1 %v6589_v34  ;;  %v526_v17 = vpop.xlane.xlu1 %525  ;;  %v9061_v35 = vsub.f32 %v8699_v39, %v596_v25  ;;  %v679_v15 = vmul.f32 %v9051_v12, %v9051_v12 }
  0xca   : > { %1552 = vmatprep.subr.bf16.mxu1 %v6594_v30  ;;  %v597_v18 = vmul.f32 0.0078125, %v526_v17  ;;  %v600_v51 = vmul.f32 0.0078125, %v532_v40 }
  0xcb   : > { %1307 = vmatprep.subr.bf16.mxu0 %v6588_v22  ;;  %v13872_v22 = vmov 0   ;;  %v680_v39 = vmul.f32 %v9061_v35, %v9061_v35 }
  0xcc   : > { %553 = vadd.xlane.f32.xlu1 %v8808_v28  ;;  %726 = vadd.xlane.f32.xlu0 %v676_v61  ;;  %v678_v61 = vmul.f32 %v9031_v45, %v9031_v45  ;;  %v9069_v31 = vsub.f32 %v8708_v43, %v597_v18  ;;  %v536_v25 = vpop.xlane.xlu0 %535 }
  0xcd   : > { %1308 = vmatpush1.bf16.msra.mxu0 %v6587_v21  ;;  %1553 = vmatpush1.bf16.msra.mxu1 %v6593_v16  ;;  %v530_v3 = vpop.xlane.xlu1 %529 }
  0xce   : > { %1309 = vmatprep.subr.bf16.mxu0 %v6592_v63  ;;  %1327 = vmatprep.mubr.bf16.mxu0 %v13872_v22  ;;  %v681_v26 = vmul.f32 %v9069_v31, %v9069_v31  ;;  %v599_v34 = vmul.f32 0.0078125, %v530_v3 }
  0xcf   : > { %1570 = vmatprep.mubr.bf16.mxu1 %v13872_v22 }
  0xd0   : > { %728 = vadd.xlane.f32.xlu1 %v677_v33  ;;  %555 = vadd.xlane.f32.xlu0 %v8814_v32  ;;  %v598_v33 = vmul.f32 0.0078125, %v528_v56  ;;  %v9081_v43 = vsub.f32 %v8718_v48, %v599_v34 }
  0xd1   : > { %1310 = vmatpush1.bf16.msra.mxu0 %v6591_v9  ;;  %v602_v9 = vmul.f32 0.0078125, %v536_v25 }
  0xd2   : > { %v9075_v21 = vsub.f32 %v8710_v44, %v598_v33  ;;  %v9087_v44 = vsub.f32 %v8728_v52, %v600_v51  ;;  %v683_v63 = vmul.f32 %v9081_v43, %v9081_v43 }
  0xd3   : > { %v9099_v52 = vsub.f32 %v8737_v57, %v602_v9 }
  0xd4   : > { %557 = vadd.xlane.f32.xlu1 %v8820_v37  ;;  %730 = vadd.xlane.f32.xlu0 %v678_v61  ;;  %v682_v49 = vmul.f32 %v9075_v21, %v9075_v21  ;;  %v534_v61 = vpop.xlane.xlu1 %533  ;;  %v684_v30 = vmul.f32 %v9087_v44, %v9087_v44 }
  0xd5   : > { %v601_v2 = vmul.f32 0.0078125, %v534_v61  ;;  %v686_v18 = vmul.f32 %v9099_v52, %v9099_v52 }
  0xd7   : > { %v9093_v48 = vsub.f32 %v8730_v53, %v601_v2 }
  0xd8   : > { %732 = vadd.xlane.f32.xlu1 %v679_v15  ;;  %559 = vadd.xlane.f32.xlu0 %v8826_v41  ;;  %v538_v16 = vpop.xlane.xlu1 %537 }
  0xd9   : > { %v685_v17 = vmul.f32 %v9093_v48, %v9093_v48  ;;  %v603_v15 = vmul.f32 0.0078125, %v538_v16 }
  0xdb   : > { %v9105_v53 = vsub.f32 %v8744_v59, %v603_v15 }
  0xdc   : > { %561 = vadd.xlane.f32.xlu1 %v8832_v46  ;;  %734 = vadd.xlane.f32.xlu0 %v680_v39 }
  0xdd   : > { %v687_v57 = vmul.f32 %v9105_v53, %v9105_v53 }
  0xe0   : > { %736 = vadd.xlane.f32.xlu1 %v681_v26  ;;  %563 = vadd.xlane.f32.xlu0 %v8838_v50 }
  0xe4   : > { %565 = vadd.xlane.f32.xlu1 %v8844_v55  ;;  %738 = vadd.xlane.f32.xlu0 %v682_v49 }
  0xe8   : > { %740 = vadd.xlane.f32.xlu1 %v683_v63  ;;  %567 = vadd.xlane.f32.xlu0 %v8850_v60 }
  0xec   : > { %569 = vadd.xlane.f32.xlu1 %v8856_v0  ;;  %742 = vadd.xlane.f32.xlu0 %v684_v30 }
  0xf0   : > { %744 = vadd.xlane.f32.xlu1 %v685_v17  ;;  %571 = vadd.xlane.f32.xlu0 %v8862_v6 }
  0xf4   : > { %573 = vadd.xlane.f32.xlu1 %v8868_v13  ;;  %746 = vadd.xlane.f32.xlu0 %v686_v18 }
  0xf8   : > { %748 = vadd.xlane.f32.xlu1 %v687_v57  ;;  %575 = vadd.xlane.f32.xlu0 %v8874_v20 }
  0xfc   : > { %577 = vadd.xlane.f32.xlu1 %v8880_v27 }
 0x139   : > { %v711_v56 = vpop.xlane.xlu0 %710 }
 0x13a   : > { %v794_v39 = vmul.f32 0.0078125, %v711_v56 }
 0x13c   : > { %v836_v33 = vadd.f32 1e-05, %v794_v39 }
 0x13d   : > { %v713_v3 = vpop.xlane.xlu1 %712  ;;  %v540_v59 = vpop.xlane.xlu0 %539 }
 0x13e   : > { %7103 = vrsqrt.f32 %v836_v33  ;;  %v795_v26 = vmul.f32 0.0078125, %v713_v3  ;;  %v604_v34 = vmul.f32 0.0078125, %v540_v59 }
 0x140   : > { %v837_v40 = vadd.f32 1e-05, %v795_v26  ;;  %v9115_v49 = vsub.f32 %v8758_v62, %v604_v34  ;;  %v9134_v26 = vld [vmem:[%s13862_s2] ss:$0 sm:$0xff] }
 0x141   : > { %v542_v51 = vpop.xlane.xlu1 %541  ;;  %v715_v61 = vpop.xlane.xlu0 %714 }
 0x142   : > { %7105 = vrsqrt.f32 %v837_v40  ;;  %v605_v63 = vmul.f32 0.0078125, %v542_v51  ;;  %v796_v2 = vmul.f32 0.0078125, %v715_v61  ;;  %v688_v20 = vmul.f32 %v9115_v49, %v9115_v49 }
 0x144   : > { %v9120_v27 = vsub.f32 %v8766_v1, %v605_v63  ;;  %v838_v25 = vadd.f32 1e-05, %v796_v2  ;;  %750 = vadd.xlane.f32.xlu0 %v688_v20 }
 0x145   : > { %v717_v30 = vpop.xlane.xlu1 %716  ;;  %v544_v9 = vpop.xlane.xlu0 %543 }
 0x146   : > { %7107 = vrsqrt.f32 %v838_v25  ;;  %v797_v16 = vmul.f32 0.0078125, %v717_v30  ;;  %v606_v17 = vmul.f32 0.0078125, %v544_v9  ;;  %v689_v62 = vmul.f32 %v9120_v27, %v9120_v27 }
 0x148   : > { %v7104_v15 = vpop.eup %7103  ;;  %v839_v18 = vadd.f32 1e-05, %v797_v16  ;;  %v9125_v57 = vsub.f32 %v8774_v5, %v606_v17  ;;  %752 = vadd.xlane.f32.xlu1 %v689_v62  ;;  %579 = vadd.xlane.f32.xlu0 %v8995_v38 }
 0x149   : > { %v920_v1 = vmul.f32 %v7104_v15, %v8909_v4  ;;  %v546_v56 = vpop.xlane.xlu1 %545  ;;  %v719_v39 = vpop.xlane.xlu0 %718 }
 0x14a   : > { %7109 = vrsqrt.f32 %v839_v18  ;;  %v607_v33 = vmul.f32 0.0078125, %v546_v56  ;;  %v798_v3 = vmul.f32 0.0078125, %v719_v39  ;;  %v690_v59 = vmul.f32 %v9125_v57, %v9125_v57 }
 0x14b   : > { %v969_v63 = vmul.f32 %v9134_v26, %v920_v1 }
 0x14c   : > { %v7106_v5 = vpop.eup %7105  ;;  %v9137_v34 = vsub.f32 %v8782_v10, %v607_v33  ;;  %v840_v40 = vadd.f32 1e-05, %v798_v3  ;;  %581 = vadd.xlane.f32.xlu1 %v9019_v11  ;;  %754 = vadd.xlane.f32.xlu0 %v690_v59  ;;  %v9147_v10 = vld [vmem:[%s13863_s3] ss:$0 sm:$0xff] }
 0x14d   : > { %v921_v4 = vmul.f32 %v7106_v5, %v8914_v24  ;;  %v721_v51 = vpop.xlane.xlu1 %720  ;;  %v548_v61 = vpop.xlane.xlu0 %547  ;;  %v1018_v18 = vadd.f32 %v9147_v10, %v969_v63 }
 0x14e   : > { %7111 = vrsqrt.f32 %v840_v40  ;;  %v799_v2 = vmul.f32 0.0078125, %v721_v51  ;;  %v608_v20 = vmul.f32 0.0078125, %v548_v61  ;;  %v691_v25 = vmul.f32 %v9137_v34, %v9137_v34 }
 0x14f   : > { %v970_v30 = vmul.f32 %v9134_v26, %v921_v4 }
 0x150   : > { %v7108_v9 = vpop.eup %7107  ;;  %v841_v16 = vadd.f32 1e-05, %v799_v2  ;;  %v9151_v24 = vsub.f32 %v8790_v14, %v608_v20  ;;  %756 = vadd.xlane.f32.xlu1 %v691_v25 }
 0x151   : > { %v922_v17 = vmul.f32 %v7108_v9, %v8917_v29  ;;  %v550_v62 = vpop.xlane.xlu1 %549  ;;  %v723_v15 = vpop.xlane.xlu0 %722  ;;  %v1019_v1 = vadd.f32 %v9147_v10, %v970_v30 }
 0x152   : > { %7113 = vrsqrt.f32 %v841_v16  ;;  %v609_v56 = vmul.f32 0.0078125, %v550_v62  ;;  %v800_v39 = vmul.f32 0.0078125, %v723_v15  ;;  %v692_v33 = vmul.f32 %v9151_v24, %v9151_v24 }
 0x153   : > { %v9158_v3 = vpack.c.bf16 %v1019_v1, %v1018_v18  ;;  %v971_v51 = vmul.f32 %v9134_v26, %v922_v17 }
 0x154   : > { %v7110_v59 = vpop.eup %7109  ;;  %v9161_v14 = vsub.f32 %v8796_v19, %v609_v56  ;;  %v842_v5 = vadd.f32 1e-05, %v800_v39  ;;  %758 = vadd.xlane.f32.xlu0 %v692_v33 }
 0x155   : > { %14153 = vst [vmem:[#allocation2_spill] sm:$0xff] %v9158_v3  ;;  %v923_v29 = vmul.f32 %v7110_v59, %v8923_v36  ;;  %v725_v40 = vpop.xlane.xlu1 %724  ;;  %1328 = vmatmul.mubr.bf16.vlgmr.msra.gmra.mrb[0].mxu0 %v9158_v3  ;;  %1571 = vmatmul.mubr.bf16.vlgmr.msra.gmra.mrb[0].mxu1 %v9158_v3  ;;  %v552_v4 = vpop.xlane.xlu0 %551  ;;  %v1020_v17 = vadd.f32 %v9147_v10, %v971_v51 }
 0x156   : > { %7115 = vrsqrt.f32 %v842_v5  ;;  %v801_v61 = vmul.f32 0.0078125, %v725_v40  ;;  %v610_v63 = vmul.f32 0.0078125, %v552_v4  ;;  %v693_v2 = vmul.f32 %v9161_v14, %v9161_v14  ;;  %1337 = vmatprep.mubr.bf16.mxu0 %v13872_v22  ;;  %1580 = vmatprep.mubr.bf16.mxu1 %v13872_v22 }
 0x157   : > { %v972_v19 = vmul.f32 %v9134_v26, %v923_v29 }
 0x158   : > { %v7112_v36 = vpop.eup %7111  ;;  %v843_v20 = vadd.f32 1e-05, %v801_v61  ;;  %v9173_v25 = vsub.f32 %v8802_v23, %v610_v63  ;;  %760 = vadd.xlane.f32.xlu1 %v693_v2 }
 0x159   : > { %v924_v30 = vmul.f32 %v7112_v36, %v8929_v8  ;;  %v554_v9 = vpop.xlane.xlu1 %553  ;;  %v727_v16 = vpop.xlane.xlu0 %726  ;;  %v1021_v62 = vadd.f32 %v9147_v10, %v972_v19 }
 0x15a   : > { %7117 = vrsqrt.f32 %v843_v20  ;;  %v611_v15 = vmul.f32 0.0078125, %v554_v9  ;;  %v802_v18 = vmul.f32 0.0078125, %v727_v16  ;;  %v694_v1 = vmul.f32 %v9173_v25, %v9173_v25 }
 0x15b   : > { %v9180_v56 = vpack.c.bf16 %v1021_v62, %v1020_v17  ;;  %v973_v29 = vmul.f32 %v9134_v26, %v924_v30 }
 0x15c   : > { %v7114_v39 = vpop.eup %7113  ;;  %v9183_v23 = vsub.f32 %v8808_v28, %v611_v15  ;;  %v844_v33 = vadd.f32 1e-05, %v802_v18  ;;  %762 = vadd.xlane.f32.xlu0 %v694_v1 }
 0x15d   : > { %14154 = vst [vmem:[#allocation3_spill] sm:$0xff] %v9180_v56  ;;  %v925_v8 = vmul.f32 %v7114_v39, %v8934_v58  ;;  %v729_v59 = vpop.xlane.xlu1 %728  ;;  %1338 = vmatmul.mubr.bf16.gmra.mrb[4].mxu0 %v9180_v56  ;;  %1581 = vmatmul.mubr.bf16.gmra.mrb[4].mxu1 %v9180_v56  ;;  %v556_v5 = vpop.xlane.xlu0 %555  ;;  %v1022_v20 = vadd.f32 %v9147_v10, %v973_v29 }
 0x15e   : > { %7119 = vrsqrt.f32 %v844_v33  ;;  %v803_v40 = vmul.f32 0.0078125, %v729_v59  ;;  %v612_v4 = vmul.f32 0.0078125, %v556_v5  ;;  %v695_v51 = vmul.f32 %v9183_v23, %v9183_v23  ;;  %1347 = vmatprep.mubr.bf16.mxu0 %v13872_v22  ;;  %1590 = vmatprep.mubr.bf16.mxu1 %v13872_v22 }
 0x15f   : > { %v974_v28 = vmul.f32 %v9134_v26, %v925_v8 }
 0x160   : > { %v7116_v58 = vpop.eup %7115  ;;  %v845_v61 = vadd.f32 1e-05, %v803_v40  ;;  %v9195_v63 = vsub.f32 %v8814_v32, %v612_v4  ;;  %764 = vadd.xlane.f32.xlu1 %v695_v51 }
 0x161   : > { %v926_v2 = vmul.f32 %v7116_v58, %v8955_v54  ;;  %v558_v19 = vpop.xlane.xlu1 %557  ;;  %v731_v36 = vpop.xlane.xlu0 %730  ;;  %v1023_v30 = vadd.f32 %v9147_v10, %v974_v28 }
 0x162   : > { %7121 = vrsqrt.f32 %v845_v61  ;;  %v613_v9 = vmul.f32 0.0078125, %v558_v19  ;;  %v804_v16 = vmul.f32 0.0078125, %v731_v36  ;;  %v696_v17 = vmul.f32 %v9195_v63, %v9195_v63 }
 0x163   : > { %v9202_v62 = vpack.c.bf16 %v1023_v30, %v1022_v20  ;;  %v975_v33 = vmul.f32 %v9134_v26, %v926_v2 }
 0x164   : > { %v7118_v15 = vpop.eup %7117  ;;  %v9205_v32 = vsub.f32 %v8820_v37, %v613_v9  ;;  %v846_v18 = vadd.f32 1e-05, %v804_v16  ;;  %766 = vadd.xlane.f32.xlu0 %v696_v17 }
 0x165   : > { %14155 = vst [vmem:[#allocation4_spill] sm:$0xff] %v9202_v62  ;;  %v927_v54 = vmul.f32 %v7118_v15, %v8967_v7  ;;  %v733_v1 = vpop.xlane.xlu1 %732  ;;  %1348 = vmatmul.mubr.bf16.gmra.mrb[8].mxu0 %v9202_v62  ;;  %1591 = vmatmul.mubr.bf16.gmra.mrb[8].mxu1 %v9202_v62  ;;  %v560_v39 = vpop.xlane.xlu0 %559  ;;  %v1024_v58 = vadd.f32 %v9147_v10, %v975_v33 }
 0x166   : > { %7123 = vrsqrt.f32 %v846_v18  ;;  %v805_v8 = vmul.f32 0.0078125, %v733_v1  ;;  %v614_v59 = vmul.f32 0.0078125, %v560_v39  ;;  %v697_v5 = vmul.f32 %v9205_v32, %v9205_v32  ;;  %1357 = vmatprep.mubr.bf16.mxu0 %v13872_v22  ;;  %1600 = vmatprep.mubr.bf16.mxu1 %v13872_v22 }
 0x167   : > { %v976_v37 = vmul.f32 %v9134_v26, %v927_v54 }
 0x168   : > { %v7120_v7 = vpop.eup %7119  ;;  %v847_v29 = vadd.f32 1e-05, %v805_v8  ;;  %v9217_v40 = vsub.f32 %v8826_v41, %v614_v59  ;;  %768 = vadd.xlane.f32.xlu1 %v697_v5 }
 0x169   : > { %v928_v4 = vmul.f32 %v7120_v7, %v8991_v42  ;;  %v562_v51 = vpop.xlane.xlu1 %561  ;;  %v735_v28 = vpop.xlane.xlu0 %734  ;;  %v1025_v61 = vadd.f32 %v9147_v10, %v976_v37 }
 0x16a   : > { %7125 = vrsqrt.f32 %v847_v29  ;;  %v615_v2 = vmul.f32 0.0078125, %v562_v51  ;;  %v806_v19 = vmul.f32 0.0078125, %v735_v28  ;;  %v698_v36 = vmul.f32 %v9217_v40, %v9217_v40  ;;  %v3105_v29 = vld [vmem:[%s13864_s4 + $0x10] sm:$0xff] }
 0x16b   : > { %v9224_v20 = vpack.c.bf16 %v1025_v61, %v1024_v58  ;;  %v977_v15 = vmul.f32 %v9134_v26, %v928_v4  ;;  %v3107_v4 = vld [vmem:[%s13864_s4 + $0x30] sm:$0xff] }
 0x16c   : > { %v7122_v30 = vpop.eup %7121  ;;  %v9227_v41 = vsub.f32 %v8832_v46, %v615_v2  ;;  %v848_v9 = vadd.f32 1e-05, %v806_v19  ;;  %770 = vadd.xlane.f32.xlu0 %v698_v36  ;;  %v6764_v58 = vcombine.high %v3105_v29, %v3107_v4  ;;  %v6763_v36 = vcombine.low %v3105_v29, %v3107_v4 }
 0x16d   : > { %14156 = vst [vmem:[#allocation5_spill] sm:$0xff] %v9224_v20  ;;  %v929_v42 = vmul.f32 %v7122_v30, %v9007_v47  ;;  %v737_v16 = vpop.xlane.xlu1 %736  ;;  %1358 = vmatmul.mubr.bf16.gmra.mrb[12].mxu0 %v9224_v20  ;;  %1601 = vmatmul.mubr.bf16.gmra.mrb[12].mxu1 %v9224_v20  ;;  %v564_v17 = vpop.xlane.xlu0 %563  ;;  %v1026_v37 = vadd.f32 %v9147_v10, %v977_v15 }
 0x16e   : > { %7127 = vrsqrt.f32 %v848_v9  ;;  %v807_v18 = vmul.f32 0.0078125, %v737_v16  ;;  %v616_v54 = vmul.f32 0.0078125, %v564_v17  ;;  %v699_v1 = vmul.f32 %v9227_v41, %v9227_v41  ;;  %1367 = vmatprep.mubr.bf16.mxu0 %v13872_v22  ;;  %1610 = vmatprep.mubr.bf16.mxu1 %v13872_v22  ;;  %v3106_v17 = vld [vmem:[%s13864_s4 + $0x18] sm:$0xff] }
 0x16f   : > { %v978_v46 = vmul.f32 %v9134_v26, %v929_v42  ;;  %3319 = vmatprep.subr.bf16.mxu0 %v6764_v58 }
 0x170   : > { %v7124_v47 = vpop.eup %7123  ;;  %v849_v39 = vadd.f32 1e-05, %v807_v18  ;;  %v9239_v33 = vsub.f32 %v8838_v50, %v616_v54  ;;  %772 = vadd.xlane.f32.xlu1 %v699_v1  ;;  %3320 = vmatpush1.bf16.msra.mxu0 %v6763_v36 }
 0x171   : > { %v930_v8 = vmul.f32 %v7124_v47, %v9031_v45  ;;  %v566_v59 = vpop.xlane.xlu1 %565  ;;  %v739_v5 = vpop.xlane.xlu0 %738  ;;  %v1027_v7 = vadd.f32 %v9147_v10, %v978_v46 }
 0x172   : > { %7129 = vrsqrt.f32 %v849_v39  ;;  %v617_v50 = vmul.f32 0.0078125, %v566_v59  ;;  %v808_v51 = vmul.f32 0.0078125, %v739_v5  ;;  %v700_v45 = vmul.f32 %v9239_v33, %v9239_v33 }
 0x173   : > { %v9252_v28 = vpack.c.bf16 %v1027_v7, %v1026_v37  ;;  %v979_v16 = vmul.f32 %v9134_v26, %v930_v8 }
 0x174   : > { %v7126_v61 = vpop.eup %7125  ;;  %v9255_v2 = vsub.f32 %v8844_v55, %v617_v50  ;;  %v850_v19 = vadd.f32 1e-05, %v808_v51  ;;  %774 = vadd.xlane.f32.xlu0 %v700_v45  ;;  %v3108_v55 = vld [vmem:[%s13864_s4 + $0x38] sm:$0xff] }
 0x175   : > { %14157 = vst [vmem:[#allocation6_spill] sm:$0xff] %v9252_v28  ;;  %v931_v30 = vmul.f32 %v7126_v61, %v9051_v12  ;;  %v741_v9 = vpop.xlane.xlu1 %740  ;;  %1368 = vmatmul.mubr.bf16.gmra.mrb[16].mxu0 %v9252_v28  ;;  %1611 = vmatmul.mubr.bf16.gmra.mrb[16].mxu1 %v9252_v28  ;;  %v568_v42 = vpop.xlane.xlu0 %567  ;;  %v6765_v1 = vcombine.low %v3106_v17, %v3108_v55 }
 0x176   : > { %7131 = vrsqrt.f32 %v850_v19  ;;  %v809_v15 = vmul.f32 0.0078125, %v741_v9  ;;  %v618_v18 = vmul.f32 0.0078125, %v568_v42  ;;  %v701_v12 = vmul.f32 %v9255_v2, %v9255_v2  ;;  %1377 = vmatprep.mubr.bf16.mxu0 %v13872_v22  ;;  %1620 = vmatprep.mubr.bf16.mxu1 %v13872_v22 }
 0x177   : > { %v980_v54 = vmul.f32 %v9134_v26, %v931_v30  ;;  %v6766_v46 = vcombine.high %v3106_v17, %v3108_v55  ;;  %v1028_v7 = vadd.f32 %v9147_v10, %v979_v16 }
 0x178   : > { %v7128_v47 = vpop.eup %7127  ;;  %v851_v39 = vadd.f32 1e-05, %v809_v15  ;;  %v9273_v8 = vsub.f32 %v8850_v60, %v618_v18  ;;  %776 = vadd.xlane.f32.xlu1 %v701_v12 }
 0x179   : > { %v932_v59 = vmul.f32 %v7128_v47, %v9061_v35  ;;  %v570_v5 = vpop.xlane.xlu1 %569  ;;  %v743_v37 = vpop.xlane.xlu0 %742  ;;  %v1029_v29 = vadd.f32 %v9147_v10, %v980_v54  ;;  %3562 = vmatprep.subr.bf16.mxu1 %v6766_v46 }
 0x17a   : > { %7133 = vrsqrt.f32 %v851_v39  ;;  %v619_v4 = vmul.f32 0.0078125, %v570_v5  ;;  %v810_v50 = vmul.f32 0.0078125, %v743_v37  ;;  %v702_v51 = vmul.f32 %v9273_v8, %v9273_v8  ;;  %3563 = vmatpush1.bf16.msra.mxu1 %v6765_v1 }
 0x17b   : > { %v9280_v60 = vpack.c.bf16 %v1029_v29, %v1028_v7  ;;  %v981_v30 = vmul.f32 %v9134_v26, %v932_v59 }
 0x17c   : > { %v7130_v45 = vpop.eup %7129  ;;  %v9283_v58 = vsub.f32 %v8856_v0, %v619_v4  ;;  %v852_v35 = vadd.f32 1e-05, %v810_v50  ;;  %778 = vadd.xlane.f32.xlu0 %v702_v51  ;;  %v3109_v50 = vld [vmem:[%s13864_s4 + $0x50] sm:$0xff] }
 0x17d   : > { %14158 = vst [vmem:[#allocation7_spill] sm:$0xff] %v9280_v60  ;;  %v933_v61 = vmul.f32 %v7130_v45, %v9069_v31  ;;  %v745_v19 = vpop.xlane.xlu1 %744  ;;  %1378 = vmatmul.mubr.bf16.gmra.mrb[20].mxu0 %v9280_v60  ;;  %1621 = vmatmul.mubr.bf16.gmra.mrb[20].mxu1 %v9280_v60  ;;  %v572_v36 = vpop.xlane.xlu0 %571  ;;  %v1030_v54 = vadd.f32 %v9147_v10, %v981_v30 }
 0x17e   : > { %7135 = vrsqrt.f32 %v852_v35  ;;  %v811_v9 = vmul.f32 0.0078125, %v745_v19  ;;  %v620_v42 = vmul.f32 0.0078125, %v572_v36  ;;  %v703_v16 = vmul.f32 %v9283_v58, %v9283_v58  ;;  %1387 = vmatprep.mubr.bf16.mxu0 %v13872_v22  ;;  %1630 = vmatprep.mubr.bf16.mxu1 %v13872_v22 }
 0x17f   : > { %v982_v0 = vmul.f32 %v9134_v26, %v933_v61 }
 0x180   : > { %v7132_v31 = vpop.eup %7131  ;;  %v853_v17 = vadd.f32 1e-05, %v811_v9  ;;  %v9295_v55 = vsub.f32 %v8862_v6, %v620_v42  ;;  %780 = vadd.xlane.f32.xlu1 %v703_v16  ;;  %v8531_v9 = vld [vmem:[%s8622_s21 + $0x130] sm:$0xff] }
 0x181   : > { %v934_v15 = vmul.f32 %v7132_v31, %v9075_v21  ;;  %v574_v18 = vpop.xlane.xlu1 %573  ;;  %v747_v12 = vpop.xlane.xlu0 %746  ;;  %v1031_v1 = vadd.f32 %v9147_v10, %v982_v0 }
 0x182   : > { %7137 = vrsqrt.f32 %v853_v17  ;;  %v621_v46 = vmul.f32 0.0078125, %v574_v18  ;;  %v812_v47 = vmul.f32 0.0078125, %v747_v12  ;;  %v704_v39 = vmul.f32 %v9295_v55, %v9295_v55  ;;  %v3112_v18 = vld [vmem:[%s13864_s4 + $0x78] sm:$0xff] }
 0x183   : > { %v9302_v59 = vpack.c.bf16 %v1031_v1, %v1030_v54  ;;  %v983_v4 = vmul.f32 %v9134_v26, %v934_v15  ;;  %v3110_v15 = vld [vmem:[%s13864_s4 + $0x58] sm:$0xff] }
 0x184   : > { %v7134_v5 = vpop.eup %7133  ;;  %v9305_v6 = vsub.f32 %v8868_v13, %v621_v46  ;;  %v854_v37 = vadd.f32 1e-05, %v812_v47  ;;  %782 = vadd.xlane.f32.xlu0 %v704_v39  ;;  %v3111_v13 = vld [vmem:[%s13864_s4 + $0x70] sm:$0xff]  ;;  %v6770_v1 = vcombine.high %v3110_v15, %v3112_v18  ;;  %v8532_v47 = vld [vmem:[%s8622_s21 + $0x138] sm:$0xff] }
 0x185   : > { %14159 = vst [vmem:[#allocation8_spill] sm:$0xff] %v9302_v59  ;;  %v935_v21 = vmul.f32 %v7134_v5, %v9081_v43  ;;  %v749_v7 = vpop.xlane.xlu1 %748  ;;  %1388 = vmatmul.mubr.bf16.gmra.mrb[24].mxu0 %v9302_v59  ;;  %1631 = vmatmul.mubr.bf16.gmra.mrb[24].mxu1 %v9302_v59  ;;  %v576_v29 = vpop.xlane.xlu0 %575  ;;  %v6767_v61 = vcombine.low %v3109_v50, %v3111_v13 }
 0x186   : > { %7139 = vrsqrt.f32 %v854_v37  ;;  %v813_v51 = vmul.f32 0.0078125, %v749_v7  ;;  %v622_v43 = vmul.f32 0.0078125, %v576_v29  ;;  %v705_v45 = vmul.f32 %v9305_v6, %v9305_v6  ;;  %1397 = vmatprep.mubr.bf16.mxu0 %v13872_v22  ;;  %1640 = vmatprep.mubr.bf16.mxu1 %v13872_v22 }
 0x187   : > { %v984_v35 = vmul.f32 %v9134_v26, %v935_v21  ;;  %v6768_v19 = vcombine.high %v3109_v50, %v3111_v13  ;;  %v1032_v31 = vadd.f32 %v9147_v10, %v983_v4  ;;  %v6769_v5 = vcombine.low %v3110_v15, %v3112_v18  ;;  %3564 = vmatprep.subr.bf16.mxu1 %v6770_v1  ;;  %v3117_v18 = vld [vmem:[%s13864_s4 + $0xd0] sm:$0xff] }
 0x188   : > { %v7136_v36 = vpop.eup %7135  ;;  %v855_v30 = vadd.f32 1e-05, %v813_v51  ;;  %v9323_v42 = vsub.f32 %v8531_v9, %v622_v43  ;;  %784 = vadd.xlane.f32.xlu1 %v705_v45  ;;  %v3114_v9 = vld [vmem:[%s13864_s4 + $0x98] sm:$0xff] }
 0x189   : > { %v936_v16 = vmul.f32 %v7136_v36, %v9087_v44  ;;  %v578_v0 = vpop.xlane.xlu1 %577  ;;  %v1033_v17 = vadd.f32 %v9147_v10, %v984_v35  ;;  %3321 = vmatprep.subr.bf16.mxu0 %v6768_v19  ;;  %3565 = vmatpush1.bf16.msra.mxu1 %v6769_v5 }
 0x18a   : > { %7141 = vrsqrt.f32 %v855_v30  ;;  %v623_v12 = vmul.f32 0.0078125, %v578_v0  ;;  %v706_v54 = vmul.f32 %v9323_v42, %v9323_v42  ;;  %3322 = vmatpush1.bf16.msra.mxu0 %v6767_v61  ;;  %v3115_v30 = vld [vmem:[%s13864_s4 + $0xb0] sm:$0xff] }
 0x18b   : > { %v9336_v44 = vpack.c.bf16 %v1033_v17, %v1032_v31  ;;  %v985_v21 = vmul.f32 %v9134_v26, %v936_v16  ;;  %v3116_v31 = vld [vmem:[%s13864_s4 + $0xb8] sm:$0xff] }
 0x18c   : > { %v7138_v46 = vpop.eup %7137  ;;  %v9339_v39 = vsub.f32 %v8532_v47, %v623_v12  ;;  %786 = vadd.xlane.f32.xlu0 %v706_v54  ;;  %v6773_v17 = vcombine.low %v3114_v9, %v3116_v31  ;;  %v6774_v15 = vcombine.high %v3114_v9, %v3116_v31  ;;  %v3119_v12 = vld [vmem:[%s13864_s4 + $0xf0] sm:$0xff]  ;;  %v3118_v54 = vld [vmem:[%s13864_s4 + $0xd8] sm:$0xff] }
 0x18d   : > { %14160 = vst [vmem:[#allocation9_spill] sm:$0xff] %v9336_v44  ;;  %v937_v37 = vmul.f32 %v7138_v46, %v9093_v48  ;;  %1398 = vmatmul.mubr.bf16.gmra.mrb[28].mxu0 %v9336_v44  ;;  %1641 = vmatmul.mubr.bf16.gmra.mrb[28].mxu1 %v9336_v44  ;;  %v1034_v50 = vadd.f32 %v9147_v10, %v985_v21  ;;  %v3120_v47 = vld [vmem:[%s13864_s4 + $0xf8] sm:$0xff] }
 0x18e   : > { %v707_v7 = vmul.f32 %v9339_v39, %v9339_v39  ;;  %1407 = vmatprep.mubr.bf16.mxu0 %v13872_v22  ;;  %1650 = vmatprep.mubr.bf16.mxu1 %v13872_v22  ;;  %v6775_v1 = vcombine.low %v3117_v18, %v3119_v12  ;;  %v6776_v46 = vcombine.high %v3117_v18, %v3119_v12 }
 0x18f   : > { %v986_v29 = vmul.f32 %v9134_v26, %v937_v37  ;;  %3566 = vmatprep.subr.bf16.mxu1 %v6774_v15  ;;  %v6777_v5 = vcombine.low %v3118_v54, %v3120_v47  ;;  %v6778_v37 = vcombine.high %v3118_v54, %v3120_v47  ;;  %v3123_v54 = vld [vmem:[%s13864_s4 + $0x130] sm:$0xff] }
 0x190   : > { %v7140_v4 = vpop.eup %7139  ;;  %788 = vadd.xlane.f32.xlu1 %v707_v7  ;;  %3567 = vmatpush1.bf16.msra.mxu1 %v6773_v17 }
 0x191   : > { %v938_v48 = vmul.f32 %v7140_v4, %v9099_v52  ;;  %v1035_v13 = vadd.f32 %v9147_v10, %v986_v29  ;;  %3568 = vmatprep.subr.bf16.mxu1 %v6778_v37 }
 0x193   : > { %v9353_v51 = vpack.c.bf16 %v1035_v13, %v1034_v50  ;;  %v987_v35 = vmul.f32 %v9134_v26, %v938_v48 }
 0x194   : > { %v7142_v43 = vpop.eup %7141  ;;  %3569 = vmatpush1.bf16.msra.mxu1 %v6777_v5 }
 0x195   : > { %14161 = vst [vmem:[#allocation10_spill] sm:$0xff] %v9353_v51  ;;  %v939_v45 = vmul.f32 %v7142_v43, %v9105_v53  ;;  %1408 = vmatmul.mubr.bf16.gmra.mrb[32].mxu0 %v9353_v51  ;;  %1651 = vmatmul.mubr.bf16.gmra.mrb[32].mxu1 %v9353_v51  ;;  %v1036_v61 = vadd.f32 %v9147_v10, %v987_v35  ;;  %v3113_v53 = vld [vmem:[%s13864_s4 + $0x90] sm:$0xff] }
 0x196   : > { %1417 = vmatprep.mubr.bf16.mxu0 %v13872_v22  ;;  %1660 = vmatprep.mubr.bf16.mxu1 %v13872_v22  ;;  %v6771_v16 = vcombine.low %v3113_v53, %v3115_v30  ;;  %v6772_v0 = vcombine.high %v3113_v53, %v3115_v30 }
 0x197   : > { %v988_v52 = vmul.f32 %v9134_v26, %v939_v45 }
 0x198   : > { %3323 = vmatprep.subr.bf16.mxu0 %v6772_v0 }
 0x199   : > { %v1037_v19 = vadd.f32 %v9147_v10, %v988_v52  ;;  %3324 = vmatpush1.bf16.msra.mxu0 %v6771_v16 }
 0x19a   : > { %3325 = vmatprep.subr.bf16.mxu0 %v6776_v46 }
 0x19b   : > { %v9364_v36 = vpack.c.bf16 %v1037_v19, %v1036_v61 }
 0x19d   : > { %14162 = vst [vmem:[#allocation11_spill] sm:$0xff] %v9364_v36  ;;  %1418 = vmatmul.mubr.bf16.gmra.mrb[36].mxu0 %v9364_v36  ;;  %1661 = vmatmul.mubr.bf16.gmra.mrb[36].mxu1 %v9364_v36 }
 0x19e   : > { %1427 = vmatprep.mubr.bf16.mxu0 %v13872_v22  ;;  %1670 = vmatprep.mubr.bf16.mxu1 %v13872_v22 }
 0x19f   : > { %3326 = vmatpush1.bf16.msra.mxu0 %v6775_v1 }
 0x1d1   : > { %v751_v21 = vpop.xlane.xlu0 %750 }
 0x1d2   : > { %v814_v7 = vmul.f32 0.0078125, %v751_v21 }
 0x1d4   : > { %v856_v29 = vadd.f32 1e-05, %v814_v7 }
 0x1d5   : > { %v753_v4 = vpop.xlane.xlu1 %752  ;;  %v580_v48 = vpop.xlane.xlu0 %579 }
 0x1d6   : > { %7143 = vrsqrt.f32 %v856_v29  ;;  %v815_v50 = vmul.f32 0.0078125, %v753_v4  ;;  %v624_v13 = vmul.f32 0.0078125, %v580_v48 }
 0x1d8   : > { %v857_v43 = vadd.f32 1e-05, %v815_v50  ;;  %v9395_v45 = vsub.f32 %v8995_v38, %v624_v13 }
 0x1d9   : > { %v582_v35 = vpop.xlane.xlu1 %581  ;;  %v755_v52 = vpop.xlane.xlu0 %754 }
 0x1da   : > { %14163 = vst [vmem:[#allocation12_spill] sm:$0xff] %v9395_v45  ;;  %7145 = vrsqrt.f32 %v857_v43  ;;  %v625_v61 = vmul.f32 0.0078125, %v582_v35  ;;  %v816_v19 = vmul.f32 0.0078125, %v755_v52  ;;  %v708_v53 = vmul.f32 %v9395_v45, %v9395_v45  ;;  %v3124_v52 = vld [vmem:[%s13864_s4 + $0x138] sm:$0xff] }
 0x1dc   : > { %v9400_v30 = vsub.f32 %v9019_v11, %v625_v61  ;;  %v858_v9 = vadd.f32 1e-05, %v816_v19  ;;  %790 = vadd.xlane.f32.xlu0 %v708_v53  ;;  %v3121_v11 = vld [vmem:[%s13864_s4 + $0x110] sm:$0xff] }
 0x1dd   : > { %v757_v16 = vpop.xlane.xlu1 %756  ;;  %v6779_v47 = vcombine.low %v3121_v11, %v3123_v54  ;;  %v6780_v5 = vcombine.high %v3121_v11, %v3123_v54 }
 0x1de   : > { %14164 = vst [vmem:[#allocation13_spill] sm:$0xff] %v9400_v30  ;;  %7147 = vrsqrt.f32 %v858_v9  ;;  %v817_v0 = vmul.f32 0.0078125, %v757_v16  ;;  %v709_v38 = vmul.f32 %v9400_v30, %v9400_v30 }
 0x1df   : > { %3327 = vmatprep.subr.bf16.mxu0 %v6780_v5 }
 0x1e0   : > { %v7144_v31 = vpop.eup %7143  ;;  %v859_v17 = vadd.f32 1e-05, %v817_v0  ;;  %792 = vadd.xlane.f32.xlu1 %v709_v38  ;;  %3328 = vmatpush1.bf16.msra.mxu0 %v6779_v47 }
 0x1e1   : > { %v940_v15 = vmul.f32 %v7144_v31, %v9115_v49  ;;  %v759_v18 = vpop.xlane.xlu0 %758 }
 0x1e2   : > { %7149 = vrsqrt.f32 %v859_v17  ;;  %v818_v12 = vmul.f32 0.0078125, %v759_v18 }
 0x1e3   : > { %v989_v49 = vmul.f32 %v9134_v26, %v940_v15 }
 0x1e4   : > { %v7146_v1 = vpop.eup %7145  ;;  %v860_v46 = vadd.f32 1e-05, %v818_v12 }
 0x1e5   : > { %v941_v37 = vmul.f32 %v7146_v1, %v9120_v27  ;;  %v761_v21 = vpop.xlane.xlu1 %760  ;;  %v1038_v43 = vadd.f32 %v9147_v10, %v989_v49  ;;  %v3122_v27 = vld [vmem:[%s13864_s4 + $0x118] sm:$0xff] }
 0x1e6   : > { %7151 = vrsqrt.f32 %v860_v46  ;;  %v819_v7 = vmul.f32 0.0078125, %v761_v21  ;;  %v6782_v19 = vcombine.high %v3122_v27, %v3124_v52  ;;  %v6781_v9 = vcombine.low %v3122_v27, %v3124_v52 }
 0x1e7   : > { %v990_v29 = vmul.f32 %v9134_v26, %v941_v37 }
 0x1e8   : > { %v7148_v4 = vpop.eup %7147  ;;  %v861_v48 = vadd.f32 1e-05, %v819_v7  ;;  %3570 = vmatprep.subr.bf16.mxu1 %v6782_v19 }
 0x1e9   : > { %v942_v50 = vmul.f32 %v7148_v4, %v9125_v57  ;;  %v763_v13 = vpop.xlane.xlu0 %762  ;;  %v1039_v35 = vadd.f32 %v9147_v10, %v990_v29  ;;  %3571 = vmatpush1.bf16.msra.mxu1 %v6781_v9 }
 0x1ea   : > { %7153 = vrsqrt.f32 %v861_v48  ;;  %v820_v61 = vmul.f32 0.0078125, %v763_v13 }
 0x1eb   : > { %v9423_v53 = vpack.c.bf16 %v1039_v35, %v1038_v43  ;;  %v991_v31 = vmul.f32 %v9134_v26, %v942_v50 }
 0x1ec   : > { %v7150_v57 = vpop.eup %7149  ;;  %v862_v16 = vadd.f32 1e-05, %v820_v61 }
 0x1ed   : > { %14165 = vst [vmem:[#allocation14_spill] sm:$0xff] %v9423_v53  ;;  %v943_v0 = vmul.f32 %v7150_v57, %v9137_v34  ;;  %v765_v38 = vpop.xlane.xlu1 %764  ;;  %1428 = vmatmul.mubr.bf16.gmra.mrb[40].mxu0 %v9423_v53  ;;  %1671 = vmatmul.mubr.bf16.gmra.mrb[40].mxu1 %v9423_v53  ;;  %v1040_v54 = vadd.f32 %v9147_v10, %v991_v31 }
 0x1ee   : > { %7155 = vrsqrt.f32 %v862_v16  ;;  %v821_v17 = vmul.f32 0.0078125, %v765_v38  ;;  %1437 = vmatprep.mubr.bf16.mxu0 %v13872_v22  ;;  %1680 = vmatprep.mubr.bf16.mxu1 %v13872_v22 }
 0x1ef   : > { %v992_v15 = vmul.f32 %v9134_v26, %v943_v0 }
 0x1f0   : > { %v7152_v18 = vpop.eup %7151  ;;  %v863_v12 = vadd.f32 1e-05, %v821_v17 }
 0x1f1   : > { %v944_v34 = vmul.f32 %v7152_v18, %v9151_v24  ;;  %v767_v11 = vpop.xlane.xlu0 %766  ;;  %v1041_v1 = vadd.f32 %v9147_v10, %v992_v15 }
 0x1f2   : > { %7157 = vrsqrt.f32 %v863_v12  ;;  %v822_v46 = vmul.f32 0.0078125, %v767_v11 }
 0x1f3   : > { %v9435_v47 = vpack.c.bf16 %v1041_v1, %v1040_v54  ;;  %v993_v24 = vmul.f32 %v9134_v26, %v944_v34 }
 0x1f4   : > { %v7154_v5 = vpop.eup %7153  ;;  %v864_v37 = vadd.f32 1e-05, %v822_v46 }
 0x1f5   : > { %14166 = vst [vmem:[#allocation15_spill] sm:$0xff] %v9435_v47  ;;  %v945_v21 = vmul.f32 %v7154_v5, %v9161_v14  ;;  %v769_v49 = vpop.xlane.xlu1 %768  ;;  %1438 = vmatmul.mubr.bf16.gmra.mrb[44].mxu0 %v9435_v47  ;;  %1681 = vmatmul.mubr.bf16.gmra.mrb[44].mxu1 %v9435_v47  ;;  %v1042_v13 = vadd.f32 %v9147_v10, %v993_v24 }
 0x1f6   : > { %7159 = vrsqrt.f32 %v864_v37  ;;  %v823_v7 = vmul.f32 0.0078125, %v769_v49  ;;  %1447 = vmatprep.mubr.bf16.mxu0 %v13872_v22  ;;  %1690 = vmatprep.mubr.bf16.mxu1 %v13872_v22 }
 0x1f7   : > { %v994_v29 = vmul.f32 %v9134_v26, %v945_v21 }
 0x1f8   : > { %v7156_v4 = vpop.eup %7155  ;;  %v865_v48 = vadd.f32 1e-05, %v823_v7 }
 0x1f9   : > { %v946_v50 = vmul.f32 %v7156_v4, %v9173_v25  ;;  %v771_v14 = vpop.xlane.xlu0 %770  ;;  %v1043_v43 = vadd.f32 %v9147_v10, %v994_v29 }
 0x1fa   : > { %7161 = vrsqrt.f32 %v865_v48  ;;  %v824_v35 = vmul.f32 0.0078125, %v771_v14 }
 0x1fb   : > { %v9447_v27 = vpack.c.bf16 %v1043_v43, %v1042_v13  ;;  %v995_v25 = vmul.f32 %v9134_v26, %v946_v50 }
 0x1fc   : > { %v7158_v52 = vpop.eup %7157  ;;  %v866_v61 = vadd.f32 1e-05, %v824_v35 }
 0x1fd   : > { %14167 = vst [vmem:[#allocation16_spill] sm:$0xff] %v9447_v27  ;;  %v947_v19 = vmul.f32 %v7158_v52, %v9183_v23  ;;  %v773_v9 = vpop.xlane.xlu1 %772  ;;  %1448 = vmatmul.mubr.bf16.gmra.mrb[48].mxu0 %v9447_v27  ;;  %1691 = vmatmul.mubr.bf16.gmra.mrb[48].mxu1 %v9447_v27  ;;  %v1044_v17 = vadd.f32 %v9147_v10, %v995_v25 }
 0x1fe   : > { %7163 = vrsqrt.f32 %v866_v61  ;;  %v825_v57 = vmul.f32 0.0078125, %v773_v9  ;;  %1457 = vmatprep.mubr.bf16.mxu0 %v13872_v22  ;;  %1700 = vmatprep.mubr.bf16.mxu1 %v13872_v22 }
 0x1ff   : > { %v996_v16 = vmul.f32 %v9134_v26, %v947_v19 }
 0x200   : > { %v7160_v0 = vpop.eup %7159  ;;  %v867_v38 = vadd.f32 1e-05, %v825_v57 }
 0x201   : > { %v948_v31 = vmul.f32 %v7160_v0, %v9195_v63  ;;  %v775_v23 = vpop.xlane.xlu0 %774  ;;  %v1045_v15 = vadd.f32 %v9147_v10, %v996_v16  ;;  %v3125_v0 = vld [vmem:[%s13864_s4 + $0x150] sm:$0xff] }
 0x202   : > { %7165 = vrsqrt.f32 %v867_v38  ;;  %v826_v18 = vmul.f32 0.0078125, %v775_v23  ;;  %v3127_v38 = vld [vmem:[%s13864_s4 + $0x170] sm:$0xff] }
 0x203   : > { %v9459_v12 = vpack.c.bf16 %v1045_v15, %v1044_v17  ;;  %v997_v63 = vmul.f32 %v9134_v26, %v948_v31  ;;  %v6783_v17 = vcombine.low %v3125_v0, %v3127_v38  ;;  %v6784_v15 = vcombine.high %v3125_v0, %v3127_v38 }
 0x204   : > { %v7162_v34 = vpop.eup %7161  ;;  %v868_v11 = vadd.f32 1e-05, %v826_v18  ;;  %v3128_v18 = vld [vmem:[%s13864_s4 + $0x178] sm:$0xff] }
 0x205   : > { %14168 = vst [vmem:[#allocation17_spill] sm:$0xff] %v9459_v12  ;;  %v949_v54 = vmul.f32 %v7162_v34, %v9205_v32  ;;  %v777_v1 = vpop.xlane.xlu1 %776  ;;  %1458 = vmatmul.mubr.bf16.gmra.mrb[52].mxu0 %v9459_v12  ;;  %1701 = vmatmul.mubr.bf16.gmra.mrb[52].mxu1 %v9459_v12  ;;  %v1046_v24 = vadd.f32 %v9147_v10, %v997_v63 }
 0x206   : > { %7167 = vrsqrt.f32 %v868_v11  ;;  %v827_v46 = vmul.f32 0.0078125, %v777_v1  ;;  %1467 = vmatprep.mubr.bf16.mxu0 %v13872_v22  ;;  %1710 = vmatprep.mubr.bf16.mxu1 %v13872_v22 }
 0x207   : > { %v998_v5 = vmul.f32 %v9134_v26, %v949_v54  ;;  %3329 = vmatprep.subr.bf16.mxu0 %v6784_v15 }
 0x208   : > { %v7164_v37 = vpop.eup %7163  ;;  %v869_v21 = vadd.f32 1e-05, %v827_v46  ;;  %3330 = vmatpush1.bf16.msra.mxu0 %v6783_v17 }
 0x209   : > { %v950_v49 = vmul.f32 %v7164_v37, %v9217_v40  ;;  %v779_v32 = vpop.xlane.xlu0 %778  ;;  %v1047_v7 = vadd.f32 %v9147_v10, %v998_v5 }
 0x20a   : > { %7169 = vrsqrt.f32 %v869_v21  ;;  %v828_v29 = vmul.f32 0.0078125, %v779_v32 }
 0x20b   : > { %v9471_v4 = vpack.c.bf16 %v1047_v7, %v1046_v24  ;;  %v999_v40 = vmul.f32 %v9134_v26, %v950_v49  ;;  %v1115_v7 = vlaneseq }
 0x20c   : > { %v7166_v48 = vpop.eup %7165  ;;  %v870_v50 = vadd.f32 1e-05, %v828_v29 }
 0x20d   : > { %14169 = vst [vmem:[#allocation18_spill] sm:$0xff] %v9471_v4  ;;  %v951_v14 = vmul.f32 %v7166_v48, %v9227_v41  ;;  %v781_v13 = vpop.xlane.xlu1 %780  ;;  %1468 = vmatmul.mubr.bf16.gmra.mrb[56].mxu0 %v9471_v4  ;;  %1711 = vmatmul.mubr.bf16.gmra.mrb[56].mxu1 %v9471_v4  ;;  %v1048_v9 = vadd.f32 %v9147_v10, %v999_v40  ;;  %v9515_v40 = vshrl.u32 %v1115_v7, 7 }
 0x20e   : > { %7171 = vrsqrt.f32 %v870_v50  ;;  %v829_v43 = vmul.f32 0.0078125, %v781_v13  ;;  %1477 = vmatprep.mubr.bf16.mxu0 %v13872_v22  ;;  %1720 = vmatprep.mubr.bf16.mxu1 %v13872_v22 }
 0x20f   : > { %v1000_v35 = vmul.f32 %v9134_v26, %v951_v14  ;;  %14172 = vst [vmem:[#allocation21_spill] sm:$0xff] %v9515_v40 }
 0x210   : > { %v7168_v52 = vpop.eup %7167  ;;  %v871_v61 = vadd.f32 1e-05, %v829_v43 }
 0x211   : > { %v952_v19 = vmul.f32 %v7168_v52, %v9239_v33  ;;  %v783_v41 = vpop.xlane.xlu0 %782  ;;  %v1049_v25 = vadd.f32 %v9147_v10, %v1000_v35  ;;  %v3126_v33 = vld [vmem:[%s13864_s4 + $0x158] sm:$0xff] }
 0x212   : > { %7173 = vrsqrt.f32 %v871_v61  ;;  %v830_v57 = vmul.f32 0.0078125, %v783_v41  ;;  %v6785_v1 = vcombine.low %v3126_v33, %v3128_v18  ;;  %v6786_v46 = vcombine.high %v3126_v33, %v3128_v18  ;;  %v9522_v61 = vld [vmem:[%s13863_s3] ss:$0 sm:$0xff] }
 0x213   : > { %v9483_v16 = vpack.c.bf16 %v1049_v25, %v1048_v9  ;;  %v1001_v54 = vmul.f32 %v9134_v26, %v952_v19  ;;  %v13871_v9 = vsub.s32 0, %v9515_v40  ;;  %v13870_v25 = vsub.s32 2, %v9515_v40 }
 0x214   : > { %v7170_v31 = vpop.eup %7169  ;;  %v872_v23 = vadd.f32 1e-05, %v830_v57  ;;  %3572 = vmatprep.subr.bf16.mxu1 %v6786_v46  ;;  %v9531_v57 = vld [vmem:[%s13865_s5] sm:$0xf] }
 0x215   : > { %14170 = vst [vmem:[#allocation19_spill] sm:$0xff] %v9483_v16  ;;  %v953_v34 = vmul.f32 %v7170_v31, %v9255_v2  ;;  %v785_v11 = vpop.xlane.xlu1 %784  ;;  %1478 = vmatmul.mubr.bf16.gmra.mrb[60].mxu0 %v9483_v16  ;;  %1721 = vmatmul.mubr.bf16.gmra.mrb[60].mxu1 %v9483_v16  ;;  %v1050_v32 = vadd.f32 %v9147_v10, %v1001_v54  ;;  %v14179_v16 = vsub.s32 3, %v9515_v40 }
 0x216   : > { %v831_v63 = vmul.f32 0.0078125, %v785_v11  ;;  %1487 = vmatprep.mubr.bf16.mxu0 %v13872_v22  ;;  %1730 = vmatprep.mubr.bf16.mxu1 %v13872_v22  ;;  %7175 = vrsqrt.f32 %v872_v23  ;;  %v9542_v23 = vrot.slane %v9531_v57, %v13871_v9  ;;  %v9547_v17 = vrot.slane %v9531_v57, %v13870_v25 }
 0x217   : > { %v1002_v5 = vmul.f32 %v9134_v26, %v953_v34  ;;  %3573 = vmatpush1.bf16.msra.mxu1 %v6785_v1 }
 0x218   : > { %v7172_v37 = vpop.eup %7171  ;;  %v873_v2 = vadd.f32 1e-05, %v831_v63  ;;  %14174 = vst [vmem:[#allocation23_spill] sm:$0xff] %v9542_v23  ;;  %14175 = vst [vmem:[#allocation24_spill] sm:$0xff] %v9547_v17 }
 0x219   : > { %v954_v21 = vmul.f32 %v7172_v37, %v9273_v8  ;;  %v787_v49 = vpop.xlane.xlu0 %786  ;;  %v1051_v24 = vadd.f32 %v9147_v10, %v1002_v5  ;;  %v8533_v8 = vld [vmem:[%s13862_s2] ss:$0 sm:$0xff] }
 0x21a   : > { %7177 = vrsqrt.f32 %v873_v2  ;;  %v832_v29 = vmul.f32 0.0078125, %v787_v49 }
 0x21b   : > { %v9507_v48 = vpack.c.bf16 %v1051_v24, %v1050_v32  ;;  %v1003_v10 = vmul.f32 %v8533_v8, %v954_v21 }
 0x21c   : > { %v7174_v50 = vpop.eup %7173  ;;  %v874_v26 = vadd.f32 1e-05, %v832_v29 }
 0x21d   : > { %14171 = vst [vmem:[#allocation20_spill] sm:$0xff] %v9507_v48  ;;  %v955_v14 = vmul.f32 %v7174_v50, %v9283_v58  ;;  %v789_v13 = vpop.xlane.xlu1 %788  ;;  %1488 = vmatmul.mubr.bf16.gmra.mrb[64].mxu0 %v9507_v48  ;;  %1731 = vmatmul.mubr.bf16.gmra.mrb[64].mxu1 %v9507_v48  ;;  %v1052_v19 = vadd.f32 %v9522_v61, %v1003_v10 }
 0x21e   : > { %v833_v43 = vmul.f32 0.0078125, %v789_v13  ;;  %1497 = vmatprep.mubr.bf16.mxu0 %v13872_v22  ;;  %1740 = vmatprep.mubr.bf16.mxu1 %v13872_v22  ;;  %7179 = vrsqrt.f32 %v874_v26 }
 0x21f   : > { %v1004_v35 = vmul.f32 %v8533_v8, %v955_v14 }
 0x220   : > { %v875_v58 = vadd.f32 1e-05, %v833_v43  ;;  %v7176_v52 = vpop.eup %7175 }
 0x221   : > { %v1053_v41 = vadd.f32 %v9522_v61, %v1004_v35  ;;  %v956_v33 = vmul.f32 %v7176_v52, %v9295_v55 }
 0x222   : > { %7181 = vrsqrt.f32 %v875_v58 }
 0x223   : > { %v9533_v0 = vpack.c.bf16 %v1053_v41, %v1052_v19  ;;  %v1005_v18 = vmul.f32 %v8533_v8, %v956_v33 }
 0x224   : > { %v7178_v38 = vpop.eup %7177 }
 0x225   : > { %14173 = vst [vmem:[#allocation22_spill] sm:$0xff] %v9533_v0  ;;  %v957_v31 = vmul.f32 %v7178_v38, %v9305_v6  ;;  %1498 = vmatmul.mubr.bf16.gmra.mrb[68].mxu0 %v9533_v0  ;;  %1741 = vmatmul.mubr.bf16.gmra.mrb[68].mxu1 %v9533_v0  ;;  %v1054_v26 = vadd.f32 %v9522_v61, %v1005_v18 }
 0x226   : > { %1507 = vmatprep.mubr.bf16.mxu0 %v13872_v22  ;;  %1750 = vmatprep.mubr.bf16.mxu1 %v13872_v22 }
 0x227   : > { %v1006_v55 = vmul.f32 %v8533_v8, %v957_v31 }
 0x228   : > { %v1329_v6 = vpop.f32.mrb[0].mxu0  ;;  %v1572_v15 = vpop.f32.mrb[0].mxu1 }
 0x229   : > { %v7180_v34 = vpop.eup %7179  ;;  %v9552_v11 = vadd.f32 %v1329_v6, %v9542_v23  ;;  %v9555_v54 = vadd.f32 %v1572_v15, %v9547_v17  ;;  %v9557_v1 = vpop.f32.mrb[1].mxu0  ;;  %v1055_v37 = vadd.f32 %v9522_v61, %v1006_v55 }
 0x22a   : > { %v9559_v63 = vpop.f32.mrb[1].mxu1  ;;  %v1333_v46 = vpop.f32.mrb[2].mxu0  ;;  %v958_v50 = vmul.f32 %v7180_v34, %v9323_v42 }
 0x22b   : > { %v1576_v5 = vpop.f32.mrb[2].mxu1  ;;  %v6595_v2 = vmul.f32 -1.442695, %v9552_v11  ;;  %v6597_v21 = vmul.f32 -1.442695, %v9555_v54  ;;  %v9565_v49 = vadd.f32 %v1333_v46, %v9542_v23  ;;  %v9570_v24 = vpop.f32.mrb[3].mxu0  ;;  %v9579_v43 = vpack.c.bf16 %v1055_v37, %v1054_v26 }
 0x22c   : > { %v9568_v32 = vadd.f32 %v1576_v5, %v9547_v17  ;;  %v9572_v7 = vpop.f32.mrb[3].mxu1  ;;  %v7182_v29 = vpop.eup %7181  ;;  %v1007_v42 = vmul.f32 %v8533_v8, %v958_v50 }
 0x22d   : > { %v959_v14 = vmul.f32 %v7182_v29, %v9339_v39  ;;  %7183 = vpow2.f32 %v6595_v2  ;;  %v6599_v13 = vmul.f32 -1.442695, %v9565_v49  ;;  %14176 = vst [vmem:[#allocation25_spill] sm:$0xff] %v9579_v43  ;;  %1508 = vmatmul.mubr.bf16.gmra.mrb[72].mxu0 %v9579_v43  ;;  %1751 = vmatmul.mubr.bf16.gmra.mrb[72].mxu1 %v9579_v43 }
 0x22e   : > { %7185 = vpow2.f32 %v6597_v21  ;;  %v6601_v10 = vmul.f32 -1.442695, %v9568_v32  ;;  %1517 = vmatprep.mubr.bf16.mxu0 %v13872_v22  ;;  %1760 = vmatprep.mubr.bf16.mxu1 %v13872_v22  ;;  %v1056_v18 = vadd.f32 %v9522_v61, %v1007_v42 }
 0x22f   : > { %v1008_v35 = vmul.f32 %v8533_v8, %v959_v14  ;;  %7187 = vpow2.f32 %v6599_v13 }
 0x230   : > { %v1339_v58 = vpop.f32.mrb[4].mxu0  ;;  %v1582_v52 = vpop.f32.mrb[4].mxu1  ;;  %7189 = vpow2.f32 %v6601_v10 }
 0x231   : > { %v9584_v19 = vadd.f32 %v1339_v58, %v9542_v23  ;;  %v9586_v39 = vpop.f32.mrb[5].mxu0  ;;  %v9588_v41 = vpop.f32.mrb[5].mxu1  ;;  %v1057_v31 = vadd.f32 %v9522_v61, %v1008_v35  ;;  %v9608_v26 = vadd.f32 %v1582_v52, %v9547_v17 }
 0x232   : > { %v1343_v38 = vpop.f32.mrb[6].mxu0  ;;  %v1586_v33 = vpop.f32.mrb[6].mxu1 }
 0x233   : > { %v6603_v55 = vmul.f32 -1.442695, %v9584_v19  ;;  %v9595_v8 = vadd.f32 %v1343_v38, %v9542_v23  ;;  %v9597_v6 = vpop.f32.mrb[7].mxu0  ;;  %v9599_v15 = vpop.f32.mrb[7].mxu1  ;;  %v9603_v46 = vpack.c.bf16 %v1057_v31, %v1056_v18 }
 0x235   : > { %7191 = vpow2.f32 %v6603_v55  ;;  %v6607_v34 = vmul.f32 -1.442695, %v9595_v8  ;;  %14177 = vst [vmem:[#allocation26_spill] sm:$0xff] %v9603_v46  ;;  %1518 = vmatmul.mubr.bf16.gmra.mrb[76].mxu0 %v9603_v46  ;;  %1761 = vmatmul.mubr.bf16.gmra.mrb[76].mxu1 %v9603_v46  ;;  %v6605_v55 = vmul.f32 -1.442695, %v9608_v26  ;;  %v14178_v46 = vsub.s32 1, %v9515_v40 }
 0x236   : > { %1527 = vmatprep.mubr.bf16.mxu0 %v13872_v22  ;;  %1770 = vmatprep.mubr.bf16.mxu1 %v13872_v22 }
 0x237   : > { %v7184_v5 = vpop.eup %7183  ;;  %7193 = vpow2.f32 %v6607_v34  ;;  %v9622_v34 = vadd.f32 %v1586_v33, %v9547_v17  ;;  %v9652_v43 = vrot.slane %v9531_v57, %v14178_v46 }
 0x238   : > { %v7186_v37 = vpop.eup %7185  ;;  %v2285_v2 = vadd.f32 1.0, %v7184_v5  ;;  %v1349_v21 = vpop.f32.mrb[8].mxu0 }
 0x239   : > { %v1592_v29 = vpop.f32.mrb[8].mxu1  ;;  %v2287_v50 = vadd.f32 1.0, %v7186_v37  ;;  %v9610_v61 = vpop.f32.mrb[9].mxu0  ;;  %v9676_v40 = vadd.f32 %v9557_v1, %v9652_v43  ;;  %v9712_v36 = vadd.f32 %v9570_v24, %v9652_v43 }
 0x23a   : > { %v9612_v14 = vpop.f32.mrb[9].mxu1  ;;  %v1353_v13 = vpop.f32.mrb[10].mxu0  ;;  %7195 = vrcp.f32 %v2285_v2  ;;  %v9641_v9 = vadd.f32 %v1592_v29, %v9547_v17 }
 0x23b   : > { %v1596_v10 = vpop.f32.mrb[10].mxu1  ;;  %v7188_v35 = vpop.eup %7187  ;;  %7197 = vrcp.f32 %v2287_v50  ;;  %v9632_v50 = vadd.f32 %v1349_v21, %v9542_v23  ;;  %v9656_v29 = vadd.f32 %v1353_v13, %v9542_v23  ;;  %14181 = vst [vmem:[#allocation28_spill] sm:$0xff] %v9676_v40  ;;  %14186 = vst [vmem:[#allocation33_spill] sm:$0xff] %v9712_v36  ;;  %v6600_v24 = vmul.f32 -1.442695, %v9712_v36 }
 0x23c   : > { %v9616_v58 = vpop.f32.mrb[11].mxu0  ;;  %v7190_v42 = vpop.eup %7189  ;;  %v2289_v38 = vadd.f32 1.0, %v7188_v35  ;;  %v9665_v4 = vadd.f32 %v1596_v10, %v9547_v17 }
 0x23d   : > { %v9618_v31 = vpop.f32.mrb[11].mxu1  ;;  %v2291_v52 = vadd.f32 1.0, %v7190_v42  ;;  %v6611_v33 = vmul.f32 -1.442695, %v9632_v50 }
 0x23e   : > { %7199 = vrcp.f32 %v2289_v38 }
 0x23f   : > { %v7192_v18 = vpop.eup %7191  ;;  %7201 = vrcp.f32 %v2291_v52 }
 0x240   : > { %v2293_v5 = vadd.f32 1.0, %v7192_v18  ;;  %v9624_v37 = vpop.f32.mrb[12].mxu0  ;;  %7203 = vpow2.f32 %v6605_v55  ;;  %v9627_v2 = vpop.f32.mrb[12].mxu1  ;;  %v6609_v18 = vmul.f32 -1.442695, %v9622_v34 }
 0x241   : > { %v9629_v35 = vpop.f32.mrb[13].mxu0  ;;  %v9634_v42 = vpop.f32.mrb[13].mxu1 }
 0x242   : > { %v9636_v38 = vpop.f32.mrb[14].mxu0  ;;  %v7194_v52 = vpop.eup %7193  ;;  %7205 = vrcp.f32 %v2293_v5  ;;  %v9661_v5 = vrot.slane %v9531_v57, %v14179_v16 }
 0x243   : > { %v9643_v55 = vpop.f32.mrb[14].mxu1  ;;  %v9645_v22 = vpop.f32.mrb[15].mxu0  ;;  %v2297_v25 = vadd.f32 1.0, %v7194_v52  ;;  %v6613_v52 = vmul.f32 -1.442695, %v9641_v9 }
 0x244   : > { %v9647_v21 = vpop.f32.mrb[15].mxu1  ;;  %v7196_v0 = vpop.eup %7195 }
 0x245   : > { %7207 = vrcp.f32 %v2297_v25  ;;  %v7198_v48 = vpop.eup %7197  ;;  %v9672_v13 = vmul.f32 %v7196_v0, %v9552_v11  ;;  %v6615_v0 = vmul.f32 -1.442695, %v9656_v29 }
 0x246   : > { %7209 = vpow2.f32 %v6609_v18  ;;  %v9686_v18 = vmul.f32 %v7198_v48, %v9555_v54  ;;  %v6617_v48 = vmul.f32 -1.442695, %v9665_v4 }
 0x247   : > { %14180 = vst [vmem:[#allocation27_spill] sm:$0xff] %v9672_v13  ;;  %7211 = vpow2.f32 %v6611_v33  ;;  %v6596_v33 = vmul.f32 -1.442695, %v9676_v40  ;;  %v9717_v13 = vadd.f32 %v9572_v7, %v9661_v5 }
 0x248   : > { %v7200_v46 = vpop.eup %7199  ;;  %v9667_v12 = vpop.f32.mrb[16].mxu0  ;;  %14183 = vst [vmem:[#allocation30_spill] sm:$0xff] %v9686_v18  ;;  %7213 = vpow2.f32 %v6613_v52 }
 0x249   : > { %v9669_v25 = vpop.f32.mrb[16].mxu1  ;;  %v7202_v27 = vpop.eup %7201  ;;  %v9679_v16 = vmul.f32 %v7200_v46, %v9565_v49  ;;  %v9698_v49 = vadd.f32 %v9559_v63, %v9661_v5  ;;  %7215 = vpow2.f32 %v6615_v0  ;;  %14187 = vst [vmem:[#allocation34_spill] sm:$0xff] %v9717_v13 }
 0x24a   : > { %v9681_v57 = vpop.f32.mrb[17].mxu0  ;;  %v9683_v10 = vpop.f32.mrb[17].mxu1  ;;  %v9689_v47 = vmul.f32 %v7202_v27, %v9568_v32  ;;  %7217 = vpow2.f32 %v6617_v48 }
 0x24b   : > { %14182 = vst [vmem:[#allocation29_spill] sm:$0xff] %v9679_v16  ;;  %v9692_v11 = vpop.f32.mrb[18].mxu0  ;;  %v9694_v1 = vpop.f32.mrb[18].mxu1  ;;  %14185 = vst [vmem:[#allocation32_spill] sm:$0xff] %v9698_v49  ;;  %v6598_v52 = vmul.f32 -1.442695, %v9698_v49  ;;  %7219 = vpow2.f32 %v6596_v33 }
 0x24c   : > { %14184 = vst [vmem:[#allocation31_spill] sm:$0xff] %v9689_v47  ;;  %v7204_v53 = vpop.eup %7203  ;;  %v9703_v27 = vpop.f32.mrb[19].mxu0 }
 0x24d   : > { %v9705_v54 = vpop.f32.mrb[19].mxu1  ;;  %v7206_v63 = vpop.eup %7205  ;;  %v2295_v51 = vadd.f32 1.0, %v7204_v53 }
 0x24e   : > { %v9725_v47 = vmul.f32 %v7206_v63, %v9584_v19 }
 0x24f   : > { %v7208_v46 = vpop.eup %7207  ;;  %7221 = vrcp.f32 %v2295_v51 }
 0x250   : > { %v9719_v16 = vpop.f32.mrb[20].mxu0  ;;  %v9721_v32 = vpop.f32.mrb[20].mxu1  ;;  %14188 = vst [vmem:[#allocation35_spill] sm:$0xff] %v9725_v47  ;;  %v9728_v53 = vmul.f32 %v7208_v46, %v9595_v8  ;;  %7223 = vpow2.f32 %v6598_v52  ;;  %v6602_v46 = vmul.f32 -1.442695, %v9717_v13  ;;  %v9751_v52 = vadd.f32 %v9627_v2, %v9547_v17 }
 0x251   : > { %v7210_v18 = vpop.eup %7209  ;;  %v9730_v0 = vpop.f32.mrb[21].mxu0  ;;  %v9755_v47 = vadd.f32 %v9586_v39, %v9652_v43 }
 0x252   : > { %14189 = vst [vmem:[#allocation36_spill] sm:$0xff] %v9728_v53  ;;  %v9732_v48 = vpop.f32.mrb[21].mxu1  ;;  %v2299_v7 = vadd.f32 1.0, %v7210_v18  ;;  %v9734_v44 = vpop.f32.mrb[22].mxu0  ;;  %v9747_v18 = vadd.f32 %v9624_v37, %v9542_v23  ;;  %v6621_v39 = vmul.f32 -1.442695, %v9751_v52 }
 0x253   : > { %v9736_v59 = vpop.f32.mrb[22].mxu1  ;;  %v9740_v60 = vpop.f32.mrb[23].mxu0  ;;  %14190 = vst [vmem:[#allocation37_spill] sm:$0xff] %v9755_v47  ;;  %v6604_v3 = vmul.f32 -1.442695, %v9755_v47  ;;  %v9798_v47 = vadd.f32 %v9667_v12, %v9542_v23 }
 0x254   : > { %v9742_v19 = vpop.f32.mrb[23].mxu1  ;;  %v7212_v8 = vpop.eup %7211  ;;  %7225 = vrcp.f32 %v2299_v7 }
 0x255   : > { %v7214_v63 = vpop.eup %7213  ;;  %7227 = vpow2.f32 %v6600_v24  ;;  %v2301_v51 = vadd.f32 1.0, %v7212_v8  ;;  %v9761_v24 = vadd.f32 %v9588_v41, %v9661_v5  ;;  %v6619_v8 = vmul.f32 -1.442695, %v9747_v18 }
 0x256   : > { %v2303_v28 = vadd.f32 1.0, %v7214_v63  ;;  %v7216_v33 = vpop.eup %7215  ;;  %7229 = vpow2.f32 %v6602_v46  ;;  %v9775_v41 = vadd.f32 %v9636_v38, %v9542_v23 }
 0x257   : > { %v7218_v7 = vpop.eup %7217  ;;  %14191 = vst [vmem:[#allocation38_spill] sm:$0xff] %v9761_v24  ;;  %7231 = vrcp.f32 %v2301_v51  ;;  %v2305_v37 = vadd.f32 1.0, %v7216_v33  ;;  %v6606_v45 = vmul.f32 -1.442695, %v9761_v24 }
 0x258   : > { %v9757_v53 = vpop.f32.mrb[24].mxu0  ;;  %v9764_v63 = vpop.f32.mrb[24].mxu1  ;;  %7233 = vrcp.f32 %v2303_v28  ;;  %v2307_v46 = vadd.f32 1.0, %v7218_v7  ;;  %v9782_v28 = vadd.f32 %v9643_v55, %v9547_v17  ;;  %v6623_v55 = vmul.f32 -1.442695, %v9775_v41 }
 0x259   : > { %v9766_v2 = vpop.f32.mrb[25].mxu0  ;;  %v9769_v20 = vpop.f32.mrb[25].mxu1  ;;  %7235 = vrcp.f32 %v2305_v37 }
 0x25a   : > { %14192 = vst [vmem:[#allocation39_spill] sm:$0xff] %v9769_v20  ;;  %v9771_v62 = vpop.f32.mrb[26].mxu0  ;;  %v7220_v56 = vpop.eup %7219  ;;  %7237 = vrcp.f32 %v2307_v46 }
 0x25b   : > { %v9777_v33 = vpop.f32.mrb[26].mxu1  ;;  %v7222_v51 = vpop.eup %7221  ;;  %7239 = vpow2.f32 %v6619_v8  ;;  %v2286_v49 = vadd.f32 1.0, %v7220_v56  ;;  %v6625_v8 = vmul.f32 -1.442695, %v9782_v28  ;;  %v9803_v56 = vadd.f32 %v9669_v25, %v9547_v17 }
 0x25c   : > { %v9784_v7 = vpop.f32.mrb[27].mxu0  ;;  %v7224_v30 = vpop.eup %7223  ;;  %7241 = vpow2.f32 %v6621_v39  ;;  %v9790_v13 = vmul.f32 %v7222_v51, %v9608_v26  ;;  %v9817_v25 = vadd.f32 %v9597_v6, %v9652_v43 }
 0x25d   : > { %14193 = vst [vmem:[#allocation40_spill] sm:$0xff] %v9784_v7  ;;  %v9787_v37 = vpop.f32.mrb[27].mxu1  ;;  %7243 = vpow2.f32 %v6604_v3  ;;  %v2288_v51 = vadd.f32 1.0, %v7224_v30  ;;  %v6629_v6 = vmul.f32 -1.442695, %v9803_v56 }
 0x25e   : > { %14194 = vst [vmem:[#allocation41_spill] sm:$0xff] %v9787_v37  ;;  %v7226_v38 = vpop.eup %7225  ;;  %14195 = vst [vmem:[#allocation42_spill] sm:$0xff] %v9790_v13  ;;  %7245 = vpow2.f32 %v6606_v45  ;;  %v6627_v45 = vmul.f32 -1.442695, %v9798_v47 }
 0x25f   : > { %v7228_v40 = vpop.eup %7227  ;;  %v9793_v46 = vmul.f32 %v7226_v38, %v9622_v34  ;;  %7247 = vrcp.f32 %v2286_v49  ;;  %14199 = vst [vmem:[#allocation46_spill] sm:$0xff] %v9817_v25  ;;  %v9826_v34 = vadd.f32 %v9692_v11, %v9542_v23 }
 0x260   : > { %v9805_v39 = vpop.f32.mrb[28].mxu0  ;;  %v9807_v26 = vpop.f32.mrb[28].mxu1  ;;  %v2290_v24 = vadd.f32 1.0, %v7228_v40  ;;  %7249 = vpow2.f32 %v6623_v55 }
 0x261   : > { %14196 = vst [vmem:[#allocation43_spill] sm:$0xff] %v9793_v46  ;;  %v9811_v38 = vpop.f32.mrb[29].mxu0  ;;  %v9813_v12 = vpop.f32.mrb[29].mxu1  ;;  %7251 = vpow2.f32 %v6625_v8  ;;  %v9835_v46 = vadd.f32 %v9694_v1, %v9547_v17  ;;  %v3129_v1 = vld [vmem:[%s13864_s4 + $0x190] sm:$0xff] }
 0x262   : > { %14197 = vst [vmem:[#allocation44_spill] sm:$0xff] %v9811_v38  ;;  %14198 = vst [vmem:[#allocation45_spill] sm:$0xff] %v9813_v12  ;;  %v7230_v3 = vpop.eup %7229  ;;  %v9819_v37 = vpop.f32.mrb[30].mxu0  ;;  %7253 = vrcp.f32 %v2288_v51  ;;  %v9839_v38 = vadd.f32 %v9599_v15, %v9661_v5  ;;  %v3131_v51 = vld [vmem:[%s13864_s4 + $0x1b0] sm:$0xff] }
 0x263   : > { %v9821_v36 = vpop.f32.mrb[30].mxu1  ;;  %v7232_v30 = vpop.eup %7231  ;;  %v2292_v55 = vadd.f32 1.0, %v7230_v3  ;;  %7255 = vrcp.f32 %v2290_v24 }
 0x264   : > { %v9828_v13 = vpop.f32.mrb[31].mxu0  ;;  %v9830_v49 = vpop.f32.mrb[31].mxu1  ;;  %14202 = vst [vmem:[#allocation49_spill] sm:$0xff] %v9839_v38  ;;  %7257 = vpow2.f32 %v6627_v45  ;;  %v6787_v45 = vcombine.low %v3129_v1, %v3131_v51 }
 0x265   : > { %14200 = vst [vmem:[#allocation47_spill] sm:$0xff] %v9828_v13  ;;  %14201 = vst [vmem:[#allocation48_spill] sm:$0xff] %v9830_v49  ;;  %v7234_v40 = vpop.eup %7233  ;;  %v6608_v13 = vmul.f32 -1.442695, %v9817_v25  ;;  %v9843_v49 = vmul.f32 %v7232_v30, %v9632_v50  ;;  %v6631_v50 = vmul.f32 -1.442695, %v9826_v34  ;;  %7259 = vpow2.f32 %v6629_v6 }
 0x266   : > { %v7236_v12 = vpop.eup %7235  ;;  %v9855_v3 = vmul.f32 %v7234_v40, %v9641_v9  ;;  %v6633_v30 = vmul.f32 -1.442695, %v9835_v46  ;;  %7261 = vrcp.f32 %v2292_v55  ;;  %v6610_v9 = vmul.f32 -1.442695, %v9839_v38  ;;  %v3130_v40 = vld [vmem:[%s13864_s4 + $0x198] sm:$0xff] }
 0x267   : > { %v7238_v11 = vpop.eup %7237  ;;  %14203 = vst [vmem:[#allocation50_spill] sm:$0xff] %v9843_v49  ;;  %v9846_v8 = vmul.f32 %v7236_v12, %v9656_v29  ;;  %v3132_v6 = vld [vmem:[%s13864_s4 + $0x1b8] sm:$0xff]  ;;  %7263 = vpow2.f32 %v6608_v13  ;;  %v9883_v55 = vadd.f32 %v9610_v61, %v9652_v43  ;;  %v9889_v38 = vadd.f32 %v9612_v14, %v9661_v5 }
 0x268   : > { %v7240_v15 = vpop.eup %7239  ;;  %14205 = vst [vmem:[#allocation52_spill] sm:$0xff] %v9855_v3  ;;  %v9858_v24 = vmul.f32 %v7238_v11, %v9665_v4  ;;  %v9864_v25 = vpop.f32.mrb[32].mxu0  ;;  %v6788_v3 = vcombine.high %v3129_v1, %v3131_v51  ;;  %7265 = vpow2.f32 %v6631_v50  ;;  %v9899_v61 = vadd.f32 %v9616_v58, %v9652_v43 }
 0x269   : > { %14204 = vst [vmem:[#allocation51_spill] sm:$0xff] %v9846_v8  ;;  %v7242_v29 = vpop.eup %7241  ;;  %v9866_v7 = vpop.f32.mrb[32].mxu1  ;;  %14209 = vst [vmem:[#allocation56_spill] sm:$0xff] %v9883_v55  ;;  %v2309_v4 = vadd.f32 1.0, %v7240_v15  ;;  %7267 = vpow2.f32 %v6633_v30  ;;  %v6789_v1 = vcombine.low %v3130_v40, %v3132_v6  ;;  %v6790_v51 = vcombine.high %v3130_v40, %v3132_v6 }
 0x26a   : > { %14206 = vst [vmem:[#allocation53_spill] sm:$0xff] %v9858_v24  ;;  %v9877_v11 = vpop.f32.mrb[33].mxu0  ;;  %v9879_v12 = vpop.f32.mrb[33].mxu1  ;;  %14210 = vst [vmem:[#allocation57_spill] sm:$0xff] %v9889_v38  ;;  %v2311_v20 = vadd.f32 1.0, %v7242_v29  ;;  %3331 = vmatprep.subr.bf16.mxu0 %v6788_v3  ;;  %7269 = vpow2.f32 %v6610_v9  ;;  %v9905_v50 = vadd.f32 %v9618_v31, %v9661_v5 }
 0x26b   : > { %14207 = vst [vmem:[#allocation54_spill] sm:$0xff] %v9877_v11  ;;  %14208 = vst [vmem:[#allocation55_spill] sm:$0xff] %v9879_v12  ;;  %v7244_v49 = vpop.eup %7243  ;;  %v9885_v24 = vpop.f32.mrb[34].mxu0  ;;  %3332 = vmatpush1.bf16.msra.mxu0 %v6787_v45  ;;  %7271 = vrcp.f32 %v2309_v4  ;;  %3574 = vmatprep.subr.bf16.mxu1 %v6790_v51  ;;  %v6614_v3 = vmul.f32 -1.442695, %v9889_v38 }
 0x26c   : > { %v7246_v8 = vpop.eup %7245  ;;  %v9891_v11 = vpop.f32.mrb[34].mxu1  ;;  %14213 = vst [vmem:[#allocation60_spill] sm:$0xff] %v9899_v61  ;;  %14215 = vst [vmem:[#allocation62_spill] sm:$0xff] %v9905_v50  ;;  %7273 = vrcp.f32 %v2311_v20  ;;  %3575 = vmatpush1.bf16.msra.mxu1 %v6789_v1  ;;  %v6616_v9 = vmul.f32 -1.442695, %v9899_v61 }
 0x26d   : > { %v9893_v12 = vpop.f32.mrb[35].mxu0  ;;  %v9895_v13 = vpop.eup %7247  ;;  %v6618_v6 = vmul.f32 -1.442695, %v9905_v50  ;;  %v9937_v50 = vadd.f32 %v9721_v32, %v9547_v17 }
 0x26e   : > { %14211 = vst [vmem:[#allocation58_spill] sm:$0xff] %v9893_v12  ;;  %14212 = vst [vmem:[#allocation59_spill] sm:$0xff] %v9895_v13  ;;  %v9901_v15 = vpop.f32.mrb[35].mxu1  ;;  %v7250_v14 = vpop.eup %7249  ;;  %v6612_v12 = vmul.f32 -1.442695, %v9883_v55 }
 0x26f   : > { %14214 = vst [vmem:[#allocation61_spill] sm:$0xff] %v9901_v15  ;;  %v7252_v29 = vpop.eup %7251  ;;  %v2313_v13 = vadd.f32 1.0, %v7250_v14 }
 0x270   : > { %v9908_v58 = vpop.eup %7253  ;;  %v2315_v30 = vadd.f32 1.0, %v7252_v29  ;;  %v9914_v31 = vpop.f32.mrb[36].mxu0 }
 0x271   : > { %14216 = vst [vmem:[#allocation63_spill] sm:$0xff] %v9908_v58  ;;  %v9911_v40 = vpop.eup %7255  ;;  %7275 = vrcp.f32 %v2313_v13  ;;  %v9917_v4 = vpop.f32.mrb[36].mxu1 }
 0x272   : > { %v7258_v45 = vpop.eup %7257  ;;  %7277 = vrcp.f32 %v2315_v30  ;;  %v9919_v38 = vpop.f32.mrb[37].mxu0  ;;  %v9931_v30 = vadd.f32 %v9719_v16, %v9542_v23 }
 0x273   : > { %v7260_v51 = vpop.eup %7259  ;;  %7279 = vpow2.f32 %v6612_v12  ;;  %v2317_v14 = vadd.f32 1.0, %v7258_v45  ;;  %14217 = vst [vmem:[#allocation64_spill] sm:$0xff] %v9919_v38  ;;  %v9921_v20 = vpop.f32.mrb[37].mxu1 }
 0x274   : > { %14218 = vst [vmem:[#allocation65_spill] sm:$0xff] %v9921_v20  ;;  %v9923_v1 = vpop.eup %7261  ;;  %7281 = vpow2.f32 %v6614_v3  ;;  %v2319_v29 = vadd.f32 1.0, %v7260_v51  ;;  %v9925_v13 = vpop.f32.mrb[38].mxu0  ;;  %v2294_v20 = vadd.f32 1.0, %v7244_v49  ;;  %v9949_v49 = vadd.f32 %v9736_v59, %v9547_v17 }
 0x275   : > { %v9927_v61 = vpop.f32.mrb[38].mxu1  ;;  %v7264_v55 = vpop.eup %7263  ;;  %7283 = vpow2.f32 %v6616_v9  ;;  %v2296_v9 = vadd.f32 1.0, %v7246_v8 }
 0x276   : > { %14219 = vst [vmem:[#allocation66_spill] sm:$0xff] %v9927_v61  ;;  %v9933_v12 = vpop.f32.mrb[39].mxu0  ;;  %v7266_v45 = vpop.eup %7265  ;;  %7285 = vpow2.f32 %v6618_v6  ;;  %v9944_v6 = vadd.f32 %v9734_v44, %v9542_v23  ;;  %v2298_v8 = vadd.f32 1.0, %v7264_v55 }
 0x277   : > { %14220 = vst [vmem:[#allocation67_spill] sm:$0xff] %v9933_v12  ;;  %v9939_v3 = vpop.f32.mrb[39].mxu1  ;;  %v7268_v51 = vpop.eup %7267  ;;  %7287 = vrcp.f32 %v2317_v14  ;;  %v2321_v38 = vadd.f32 1.0, %v7266_v45  ;;  %v6635_v12 = vmul.f32 -1.442695, %v9931_v30 }
 0x278   : > { %14221 = vst [vmem:[#allocation68_spill] sm:$0xff] %v9939_v3  ;;  %v7270_v15 = vpop.eup %7269  ;;  %7289 = vrcp.f32 %v2319_v29  ;;  %v2323_v61 = vadd.f32 1.0, %v7268_v51  ;;  %v6637_v3 = vmul.f32 -1.442695, %v9937_v50  ;;  %v9957_v29 = vadd.f32 %v9634_v42, %v9661_v5 }
 0x279   : > { %v7272_v16 = vpop.eup %7271  ;;  %7291 = vrcp.f32 %v2321_v38  ;;  %v9953_v38 = vadd.f32 %v9629_v35, %v9652_v43  ;;  %v6639_v42 = vmul.f32 -1.442695, %v9944_v6 }
 0x27a   : > { %v7274_v32 = vpop.eup %7273  ;;  %7293 = vrcp.f32 %v2323_v61  ;;  %14223 = vst [vmem:[#allocation70_spill] sm:$0xff] %v9957_v29  ;;  %v2300_v61 = vadd.f32 1.0, %v7270_v15  ;;  %v9960_v45 = vmul.f32 %v7272_v16, %v9747_v18  ;;  %v9976_v18 = vadd.f32 %v9645_v22, %v9652_v43 }
 0x27b   : > { %v7276_v14 = vpop.eup %7275  ;;  %7295 = vrcp.f32 %v2294_v20  ;;  %14222 = vst [vmem:[#allocation69_spill] sm:$0xff] %v9953_v38  ;;  %v9966_v55 = vmul.f32 %v7274_v32, %v9751_v52  ;;  %v3133_v52 = vld [vmem:[%s13864_s4 + $0x1d0] sm:$0xff]  ;;  %v9991_v32 = vadd.f32 %v9647_v21, %v9661_v5 }
 0x27c   : > { %v7278_v44 = vpop.eup %7277  ;;  %7297 = vrcp.f32 %v2296_v9  ;;  %14224 = vst [vmem:[#allocation71_spill] sm:$0xff] %v9960_v45  ;;  %v9963_v59 = vmul.f32 %v7276_v14, %v9775_v41  ;;  %v6641_v41 = vmul.f32 -1.442695, %v9949_v49  ;;  %v6620_v9 = vmul.f32 -1.442695, %v9953_v38  ;;  %v3134_v14 = vld [vmem:[%s13864_s4 + $0x1d8] sm:$0xff] }
 0x27d   : > { %v7280_v51 = vpop.eup %7279  ;;  %14226 = vst [vmem:[#allocation73_spill] sm:$0xff] %v9966_v55  ;;  %v9969_v35 = vmul.f32 %v7278_v44, %v9782_v28  ;;  %7299 = vpow2.f32 %v6635_v12  ;;  %v3135_v28 = vld [vmem:[%s13864_s4 + $0x1f0] sm:$0xff]  ;;  %v6624_v45 = vmul.f32 -1.442695, %v9976_v18 }
 0x27e   : > { %14225 = vst [vmem:[#allocation72_spill] sm:$0xff] %v9963_v59  ;;  %v7282_v20 = vpop.eup %7281  ;;  %7301 = vpow2.f32 %v6637_v3  ;;  %v6622_v3 = vmul.f32 -1.442695, %v9957_v29  ;;  %v2302_v15 = vadd.f32 1.0, %v7280_v51  ;;  %v6791_v16 = vcombine.low %v3133_v52, %v3135_v28 }
 0x27f   : > { %14227 = vst [vmem:[#allocation74_spill] sm:$0xff] %v9969_v35  ;;  %v7284_v12 = vpop.eup %7283  ;;  %7303 = vrcp.f32 %v2298_v8  ;;  %v3136_v8 = vld [vmem:[%s13864_s4 + $0x1f8] sm:$0xff]  ;;  %v6792_v55 = vcombine.high %v3133_v52, %v3135_v28  ;;  %v2304_v35 = vadd.f32 1.0, %v7282_v20  ;;  %v10002_v59 = vadd.f32 %v9681_v57, %v9652_v43 }
 0x280   : > { %v7286_v22 = vpop.eup %7285  ;;  %7305 = vrcp.f32 %v2300_v61  ;;  %v6793_v29 = vcombine.low %v3134_v14, %v3136_v8  ;;  %v6794_v38 = vcombine.high %v3134_v14, %v3136_v8  ;;  %v6626_v51 = vmul.f32 -1.442695, %v9991_v32 }
 0x281   : > { %v7288_v44 = vpop.eup %7287  ;;  %7307 = vpow2.f32 %v6639_v42  ;;  %3333 = vmatprep.subr.bf16.mxu0 %v6792_v55  ;;  %v2306_v52 = vadd.f32 1.0, %v7284_v12  ;;  %v14232_v28 = vmov 0  }
 0x282   : > { %v7290_v61 = vpop.eup %7289  ;;  %7309 = vpow2.f32 %v6641_v41  ;;  %v10006_v42 = vmul.f32 %v7288_v44, %v9798_v47  ;;  %3334 = vmatpush1.bf16.msra.mxu0 %v6791_v16  ;;  %3576 = vmatprep.subr.bf16.mxu1 %v6794_v38  ;;  %v2308_v47 = vadd.f32 1.0, %v7286_v22  ;;  %v10030_v38 = vadd.f32 %v9757_v53, %v9542_v23 }
 0x283   : > { %v7292_v21 = vpop.eup %7291  ;;  %7311 = vpow2.f32 %v6620_v9  ;;  %v10014_v57 = vmul.f32 %v7290_v61, %v9803_v56  ;;  %5321 = vmatprep.subr.bf16.mxu0 %v14232_v28  ;;  %3577 = vmatpush1.bf16.msra.mxu1 %v6793_v29  ;;  %v10042_v22 = vadd.f32 %v9683_v10, %v9661_v5  ;;  %v10046_v53 = vadd.f32 %v9703_v27, %v9652_v43 }
 0x284   : > { %v7294_v58 = vpop.eup %7293  ;;  %7313 = vpow2.f32 %v6622_v3  ;;  %14228 = vst [vmem:[#allocation75_spill] sm:$0xff] %v10006_v42  ;;  %v10009_v20 = vmul.f32 %v7292_v21, %v9826_v34  ;;  %5522 = vmatprep.subr.bf16.mxu1 %v14232_v28  ;;  %v6643_v44 = vmul.f32 -1.442695, %v10030_v38  ;;  %v10085_v56 = vadd.f32 %v9819_v37, %v9542_v23 }
 0x285   : > { %v10011_v41 = vpop.eup %7295  ;;  %7315 = vrcp.f32 %v2302_v15  ;;  %14230 = vst [vmem:[#allocation77_spill] sm:$0xff] %v10014_v57  ;;  %v10017_v55 = vmul.f32 %v7294_v58, %v9835_v46  ;;  %v6628_v15 = vmul.f32 -1.442695, %v10002_v59  ;;  %14233 = vst [vmem:[#allocation79_spill] sm:$0xff] %v10042_v22  ;;  %v6630_v10 = vmul.f32 -1.442695, %v10042_v22 }
 0x286   : > { %14229 = vst [vmem:[#allocation76_spill] sm:$0xff] %v10009_v20  ;;  %v10020_v9 = vpop.eup %7297  ;;  %7317 = vrcp.f32 %v2304_v35  ;;  %14234 = vst [vmem:[#allocation80_spill] sm:$0xff] %v10046_v53 }
 0x287   : > { %14231 = vst [vmem:[#allocation78_spill] sm:$0xff] %v10017_v55  ;;  %v7300_v16 = vpop.eup %7299  ;;  %7319 = vpow2.f32 %v6624_v45  ;;  %v10036_v45 = vadd.f32 %v9764_v63, %v9547_v17 }
 0x288   : > { %v7302_v46 = vpop.eup %7301  ;;  %7321 = vpow2.f32 %v6626_v51  ;;  %v2325_v58 = vadd.f32 1.0, %v7300_v16  ;;  %v10060_v16 = vadd.f32 %v9777_v33, %v9547_v17 }
 0x289   : > { %v10032_v35 = vpop.eup %7303  ;;  %7323 = vrcp.f32 %v2306_v52  ;;  %v2327_v29 = vadd.f32 1.0, %v7302_v46  ;;  %v6645_v21 = vmul.f32 -1.442695, %v10036_v45  ;;  %v10053_v52 = vadd.f32 %v9771_v62, %v9542_v23 }
 0x28a   : > { %v10038_v12 = vpop.eup %7305  ;;  %7325 = vrcp.f32 %v2308_v47  ;;  %v6632_v47 = vmul.f32 -1.442695, %v10046_v53  ;;  %v6649_v33 = vmul.f32 -1.442695, %v10060_v16 }
 0x28b   : > { %v7308_v3 = vpop.eup %7307  ;;  %7327 = vpow2.f32 %v6628_v15  ;;  %v6647_v62 = vmul.f32 -1.442695, %v10053_v52 }
 0x28c   : > { %v7310_v14 = vpop.eup %7309  ;;  %7329 = vrcp.f32 %v2325_v58  ;;  %v2329_v8 = vadd.f32 1.0, %v7308_v3 }
 0x28d   : > { %v7312_v63 = vpop.eup %7311  ;;  %7331 = vrcp.f32 %v2327_v29  ;;  %v2331_v61 = vadd.f32 1.0, %v7310_v14  ;;  %v10067_v14 = vadd.f32 %v9805_v39, %v9542_v23  ;;  %v10080_v39 = vadd.f32 %v9705_v54, %v9661_v5 }
 0x28e   : > { %v7314_v51 = vpop.eup %7313  ;;  %7333 = vrcp.f32 %v2329_v8  ;;  %v2310_v46 = vadd.f32 1.0, %v7312_v63  ;;  %v10074_v63 = vadd.f32 %v9807_v26, %v9547_v17 }
 0x28f   : > { %v10055_v27 = vpop.eup %7315  ;;  %7335 = vrcp.f32 %v2331_v61  ;;  %v2312_v29 = vadd.f32 1.0, %v7314_v51  ;;  %14235 = vst [vmem:[#allocation81_spill] sm:$0xff] %v10080_v39  ;;  %v6634_v37 = vmul.f32 -1.442695, %v10080_v39 }
 0x290   : > { %v10062_v15 = vpop.eup %7317  ;;  %7337 = vpow2.f32 %v6643_v44 }
 0x291   : > { %v7320_v58 = vpop.eup %7319  ;;  %7339 = vpow2.f32 %v6645_v21 }
 0x292   : > { %v7322_v3 = vpop.eup %7321  ;;  %7341 = vpow2.f32 %v6630_v10  ;;  %v2314_v61 = vadd.f32 1.0, %v7320_v58  ;;  %v10090_v58 = vadd.f32 %v9821_v36, %v9547_v17 }
 0x293   : > { %v10069_v8 = vpop.eup %7323  ;;  %7343 = vpow2.f32 %v6632_v47  ;;  %v2316_v51 = vadd.f32 1.0, %v7322_v3  ;;  %v6651_v47 = vmul.f32 -1.442695, %v10067_v14  ;;  %v10094_v3 = vadd.f32 %v9730_v0, %v9652_v43 }
 0x294   : > { %v10076_v44 = vpop.eup %7325  ;;  %7345 = vrcp.f32 %v2310_v46  ;;  %v6653_v46 = vmul.f32 -1.442695, %v10074_v63  ;;  %v6655_v0 = vmul.f32 -1.442695, %v10085_v56 }
 0x295   : > { %v7328_v21 = vpop.eup %7327  ;;  %7347 = vrcp.f32 %v2312_v29  ;;  %14236 = vst [vmem:[#allocation82_spill] sm:$0xff] %v10094_v3 }
 0x296   : > { %v7330_v10 = vpop.eup %7329  ;;  %7349 = vpow2.f32 %v6647_v62  ;;  %v2318_v54 = vadd.f32 1.0, %v7328_v21 }
 0x297   : > { %v7332_v26 = vpop.eup %7331  ;;  %7351 = vpow2.f32 %v6649_v33  ;;  %v10098_v34 = vmul.f32 %v7330_v10, %v9931_v30  ;;  %v6657_v30 = vmul.f32 -1.442695, %v10090_v58 }
 0x298   : > { %v7334_v29 = vpop.eup %7333  ;;  %7353 = vrcp.f32 %v2314_v61  ;;  %v10104_v36 = vmul.f32 %v7332_v26, %v9937_v50  ;;  %v10130_v50 = vadd.f32 %v9742_v19, %v9661_v5 }
 0x299   : > { %v7336_v62 = vpop.eup %7335  ;;  %7355 = vrcp.f32 %v2316_v51  ;;  %14237 = vst [vmem:[#allocation83_spill] sm:$0xff] %v10098_v34  ;;  %v10101_v33 = vmul.f32 %v7334_v29, %v9944_v6  ;;  %v6636_v6 = vmul.f32 -1.442695, %v10094_v3 }
 0x29a   : > { %v7338_v57 = vpop.eup %7337  ;;  %14239 = vst [vmem:[#allocation85_spill] sm:$0xff] %v10104_v36  ;;  %v10107_v61 = vmul.f32 %v7336_v62, %v9949_v49  ;;  %7357 = vpow2.f32 %v6651_v47  ;;  %v10118_v49 = vadd.f32 %v9732_v48, %v9661_v5  ;;  %14243 = vst [vmem:[#allocation89_spill] sm:$0xff] %v10130_v50  ;;  %v10134_v48 = vadd.f32 %v9864_v25, %v9542_v23 }
 0x29b   : > { %14238 = vst [vmem:[#allocation84_spill] sm:$0xff] %v10101_v33  ;;  %v7340_v21 = vpop.eup %7339  ;;  %7359 = vpow2.f32 %v6653_v46  ;;  %v2333_v47 = vadd.f32 1.0, %v7338_v57  ;;  %v10124_v46 = vadd.f32 %v9740_v60, %v9652_v43 }
 0x29c   : > { %14240 = vst [vmem:[#allocation86_spill] sm:$0xff] %v10107_v61  ;;  %v7342_v10 = vpop.eup %7341  ;;  %7361 = vrcp.f32 %v2318_v54  ;;  %14241 = vst [vmem:[#allocation87_spill] sm:$0xff] %v10118_v49  ;;  %v2335_v62 = vadd.f32 1.0, %v7340_v21  ;;  %v6638_v51 = vmul.f32 -1.442695, %v10118_v49 }
 0x29d   : > { %v7344_v26 = vpop.eup %7343  ;;  %7363 = vpow2.f32 %v6634_v37  ;;  %14242 = vst [vmem:[#allocation88_spill] sm:$0xff] %v10124_v46  ;;  %v6659_v25 = vmul.f32 -1.442695, %v10134_v48  ;;  %v8536_v49 = vld [vmem:[%s13863_s3] ss:$0 sm:$0xff] }
 0x29e   : > { %v10120_v29 = vpop.eup %7345  ;;  %7365 = vpow2.f32 %v6655_v0  ;;  %v6640_v0 = vmul.f32 -1.442695, %v10124_v46 }
 0x29f   : > { %v10126_v54 = vpop.eup %7347  ;;  %7367 = vpow2.f32 %v6657_v30  ;;  %v6642_v30 = vmul.f32 -1.442695, %v10130_v50 }
 0x2a0   : > { %v7350_v37 = vpop.eup %7349  ;;  %7369 = vpow2.f32 %v6636_v6 }
 0x2a1   : > { %v7352_v57 = vpop.eup %7351  ;;  %7371 = vrcp.f32 %v2333_v47  ;;  %v2337_v60 = vadd.f32 1.0, %v7350_v37 }
 0x2a2   : > { %v10137_v21 = vpop.eup %7353  ;;  %7373 = vrcp.f32 %v2335_v62  ;;  %v2339_v36 = vadd.f32 1.0, %v7352_v57  ;;  %v10148_v62 = vadd.f32 %v9766_v2, %v9652_v43 }
 0x2a3   : > { %v10140_v19 = vpop.eup %7355  ;;  %7375 = vrcp.f32 %v2337_v60  ;;  %v791_v60 = vpop.xlane.xlu0 %790 }
 0x2a4   : > { %v7358_v6 = vpop.eup %7357  ;;  %7377 = vrcp.f32 %v2339_v36  ;;  %14244 = vst [vmem:[#allocation90_spill] sm:$0xff] %v10148_v62  ;;  %v10152_v36 = vadd.f32 %v9866_v7, %v9547_v17  ;;  %v834_v50 = vmul.f32 0.0078125, %v791_v60 }
 0x2a5   : > { %v7360_v61 = vpop.eup %7359  ;;  %7379 = vpow2.f32 %v6638_v51  ;;  %v2341_v34 = vadd.f32 1.0, %v7358_v6  ;;  %v2320_v51 = vadd.f32 1.0, %v7342_v10  ;;  %v14245_v6 = vld [vmem:[#allocation39_spill] sm:$0xff]  ;;  %v10162_v10 = vadd.f32 %v9885_v24, %v9542_v23 }
 0x2a6   : > { %v10144_v47 = vpop.eup %7361  ;;  %7381 = vpow2.f32 %v6640_v0  ;;  %v2343_v37 = vadd.f32 1.0, %v7360_v61  ;;  %v10156_v42 = vadd.f32 %v14245_v6, %v9661_v5  ;;  %v6661_v46 = vmul.f32 -1.442695, %v10152_v36 }
 0x2a7   : > { %v7364_v33 = vpop.eup %7363  ;;  %7383 = vpow2.f32 %v6642_v30  ;;  %v2322_v30 = vadd.f32 1.0, %v7344_v26  ;;  %v793_v26 = vpop.xlane.xlu1 %792 }
 0x2a8   : > { %v7366_v57 = vpop.eup %7365  ;;  %7385 = vpow2.f32 %v6659_v25  ;;  %14246 = vst [vmem:[#allocation39_spill] sm:$0xff] %v10156_v42  ;;  %v6644_v25 = vmul.f32 -1.442695, %v10148_v62 }
 0x2a9   : > { %v7368_v55 = vpop.eup %7367  ;;  %7387 = vrcp.f32 %v2341_v34  ;;  %v2345_v61 = vadd.f32 1.0, %v7366_v57  ;;  %v6646_v34 = vmul.f32 -1.442695, %v10156_v42  ;;  %v2324_v57 = vadd.f32 1.0, %v7364_v33 }
 0x2aa   : > { %v7370_v0 = vpop.eup %7369  ;;  %7389 = vrcp.f32 %v2343_v37  ;;  %v2347_v2 = vadd.f32 1.0, %v7368_v55  ;;  %v10167_v55 = vadd.f32 %v9891_v11, %v9547_v17  ;;  %v876_v11 = vadd.f32 1e-05, %v834_v50 }
 0x2ab   : > { %v7372_v20 = vpop.eup %7371  ;;  %7391 = vrcp.f32 %v2345_v61  ;;  %v10189_v50 = vadd.f32 %v9914_v31, %v9542_v23  ;;  %v10201_v31 = vadd.f32 %v9917_v4, %v9547_v17 }
 0x2ac   : > { %v7374_v7 = vpop.eup %7373  ;;  %7393 = vrcp.f32 %v2347_v2  ;;  %v10170_v60 = vmul.f32 %v7372_v20, %v10030_v38  ;;  %v6663_v20 = vmul.f32 -1.442695, %v10162_v10  ;;  %v835_v38 = vmul.f32 0.0078125, %v793_v26  ;;  %v14251_v26 = vld [vmem:[#allocation40_spill] sm:$0xff] }
 0x2ad   : > { %v7376_v6 = vpop.eup %7375  ;;  %7395 = vrcp.f32 %v2320_v51  ;;  %v10176_v2 = vmul.f32 %v7374_v7, %v10036_v45  ;;  %v6665_v45 = vmul.f32 -1.442695, %v10167_v55 }
 0x2ae   : > { %v7378_v37 = vpop.eup %7377  ;;  %7397 = vrcp.f32 %v2322_v30  ;;  %14247 = vst [vmem:[#allocation91_spill] sm:$0xff] %v10170_v60  ;;  %v10173_v61 = vmul.f32 %v7376_v6, %v10053_v52  ;;  %v14253_v30 = vld [vmem:[#allocation33_spill] sm:$0xff] }
 0x2af   : > { %v7380_v24 = vpop.eup %7379  ;;  %14249 = vst [vmem:[#allocation93_spill] sm:$0xff] %v10176_v2  ;;  %7399 = vpow2.f32 %v6644_v25  ;;  %v10179_v51 = vmul.f32 %v7378_v37, %v10060_v16  ;;  %v2326_v16 = vadd.f32 1.0, %v7370_v0  ;;  %v10193_v37 = vadd.f32 %v14251_v26, %v9652_v43 }
 0x2b0   : > { %14248 = vst [vmem:[#allocation92_spill] sm:$0xff] %v10173_v61  ;;  %v7382_v42 = vpop.eup %7381  ;;  %7401 = vpow2.f32 %v6661_v46  ;;  %v2328_v6 = vadd.f32 1.0, %v7380_v24  ;;  %v10197_v2 = vmul.f32 %v9911_v40, %v14253_v30 }
 0x2b1   : > { %14250 = vst [vmem:[#allocation94_spill] sm:$0xff] %v10179_v51  ;;  %v7384_v33 = vpop.eup %7383  ;;  %7403 = vpow2.f32 %v6646_v34  ;;  %14252 = vst [vmem:[#allocation40_spill] sm:$0xff] %v10193_v37  ;;  %v877_v34 = vadd.f32 1e-05, %v835_v38  ;;  %v2330_v0 = vadd.f32 1.0, %v7382_v42  ;;  %v14277_v51 = vld [vmem:[#allocation45_spill] sm:$0xff] }
 0x2b2   : > { %v7386_v25 = vpop.eup %7385  ;;  %7405 = vrcp.f32 %v2324_v57  ;;  %14254 = vst [vmem:[#allocation33_spill] sm:$0xff] %v10197_v2  ;;  %v2332_v40 = vadd.f32 1.0, %v7384_v33  ;;  %v14261_v33 = vld [vmem:[#allocation34_spill] sm:$0xff]  ;;  %v10268_v60 = vadd.f32 %v14277_v51, %v9661_v5 }
 0x2b3   : > { %v7388_v7 = vpop.eup %7387  ;;  %7407 = vrsqrt.f32 %v876_v11 }
 0x2b4   : > { %v7390_v46 = vpop.eup %7389  ;;  %7409 = vpow2.f32 %v6663_v20  ;;  %v10204_v24 = vmul.f32 %v7388_v7, %v10067_v14  ;;  %v6667_v20 = vmul.f32 -1.442695, %v10189_v50  ;;  %v6648_v14 = vmul.f32 -1.442695, %v10193_v37 }
 0x2b5   : > { %v7392_v52 = vpop.eup %7391  ;;  %7411 = vpow2.f32 %v6665_v45  ;;  %v10213_v42 = vmul.f32 %v7390_v46, %v10074_v63  ;;  %v10229_v63 = vmul.f32 %v9923_v1, %v14261_v33  ;;  %v14264_v46 = vld [vmem:[#allocation59_spill] sm:$0xff]  ;;  %v14269_v1 = vld [vmem:[#allocation41_spill] sm:$0xff] }
 0x2b6   : > { %v7394_v57 = vpop.eup %7393  ;;  %7413 = vrcp.f32 %v2326_v16  ;;  %14255 = vst [vmem:[#allocation95_spill] sm:$0xff] %v10204_v24  ;;  %v10207_v11 = vmul.f32 %v7392_v52, %v10085_v56  ;;  %v10225_v52 = vadd.f32 %v9925_v13, %v9542_v23  ;;  %v2349_v16 = vadd.f32 1.0, %v7386_v25  ;;  %v14267_v56 = vld [vmem:[#allocation63_spill] sm:$0xff] }
 0x2b7   : > { %v10210_v38 = vpop.eup %7395  ;;  %7415 = vrcp.f32 %v2328_v6  ;;  %14258 = vst [vmem:[#allocation98_spill] sm:$0xff] %v10213_v42  ;;  %v10216_v4 = vmul.f32 %v7394_v57, %v10090_v58  ;;  %14262 = vst [vmem:[#allocation34_spill] sm:$0xff] %v10229_v63  ;;  %v14263_v6 = vld [vmem:[#allocation28_spill] sm:$0xff] }
 0x2b8   : > { %14256 = vst [vmem:[#allocation96_spill] sm:$0xff] %v10207_v11  ;;  %14257 = vst [vmem:[#allocation97_spill] sm:$0xff] %v10210_v38  ;;  %v10218_v30 = vpop.eup %7397  ;;  %7417 = vrsqrt.f32 %v877_v34  ;;  %v10235_v26 = vmul.f32 %v14264_v46, %v14263_v6  ;;  %v6669_v34 = vmul.f32 -1.442695, %v10201_v31  ;;  %v14266_v57 = vld [vmem:[#allocation32_spill] sm:$0xff] }
 0x2b9   : > { %14259 = vst [vmem:[#allocation99_spill] sm:$0xff] %v10216_v4  ;;  %14260 = vst [vmem:[#allocation100_spill] sm:$0xff] %v10218_v30  ;;  %v7400_v45 = vpop.eup %7399  ;;  %7419 = vrcp.f32 %v2330_v0  ;;  %v10240_v24 = vmul.f32 %v14267_v56, %v14266_v57  ;;  %v10244_v0 = vadd.f32 %v14269_v1, %v9661_v5  ;;  %v14272_v6 = vld [vmem:[#allocation44_spill] sm:$0xff]  ;;  %v14274_v56 = vld [vmem:[#allocation66_spill] sm:$0xff] }
 0x2ba   : > { %v7402_v7 = vpop.eup %7401  ;;  %14265 = vst [vmem:[#allocation28_spill] sm:$0xff] %v10235_v26  ;;  %7421 = vpow2.f32 %v6667_v20  ;;  %v10250_v46 = vadd.f32 %v14272_v6, %v9652_v43  ;;  %v6671_v20 = vmul.f32 -1.442695, %v10225_v52  ;;  %v10255_v57 = vadd.f32 %v14274_v56, %v9547_v17  ;;  %v14275_v42 = vld [vmem:[#allocation12_spill] sm:$0xff]  ;;  %14278 = vst [vmem:[#allocation66_spill] sm:$0xff] %v10268_v60 }
 0x2bb   : > { %v7404_v13 = vpop.eup %7403  ;;  %14268 = vst [vmem:[#allocation59_spill] sm:$0xff] %v10240_v24  ;;  %7423 = vrcp.f32 %v2332_v40  ;;  %14270 = vst [vmem:[#allocation32_spill] sm:$0xff] %v10244_v0  ;;  %v2351_v33 = vadd.f32 1.0, %v7402_v7  ;;  %v6650_v6 = vmul.f32 -1.442695, %v10244_v0  ;;  %v2334_v24 = vadd.f32 1.0, %v7400_v45 }
 0x2bc   : > { %v10246_v25 = vpop.eup %7405  ;;  %7425 = vpow2.f32 %v6648_v14  ;;  %14273 = vst [vmem:[#allocation41_spill] sm:$0xff] %v10250_v46  ;;  %v6652_v56 = vmul.f32 -1.442695, %v10250_v46  ;;  %v14282_v63 = vld [vmem:[#allocation48_spill] sm:$0xff]  ;;  %v8535_v46 = vld [vmem:[%s13862_s2] ss:$0 sm:$0xff] }
 0x2bd   : > { %14271 = vst [vmem:[#allocation63_spill] sm:$0xff] %v10246_v25  ;;  %v7408_v58 = vpop.eup %7407  ;;  %7427 = vrcp.f32 %v2349_v16  ;;  %v10279_v26 = vadd.f32 %v14282_v63, %v9661_v5 }
 0x2be   : > { %v7410_v1 = vpop.eup %7409  ;;  %7429 = vpow2.f32 %v6669_v34  ;;  %v960_v4 = vmul.f32 %v7408_v58, %v14275_v42  ;;  %v14280_v34 = vld [vmem:[#allocation47_spill] sm:$0xff]  ;;  %v6673_v42 = vmul.f32 -1.442695, %v10255_v57 }
 0x2bf   : > { %v7412_v14 = vpop.eup %7411  ;;  %7431 = vrcp.f32 %v2351_v33  ;;  %v2353_v11 = vadd.f32 1.0, %v7410_v1  ;;  %v10274_v61 = vadd.f32 %v14280_v34, %v9652_v43  ;;  %14283 = vst [vmem:[#allocation47_spill] sm:$0xff] %v10279_v26  ;;  %v2336_v34 = vadd.f32 1.0, %v7404_v13 }
 0x2c0   : > { %v10263_v16 = vpop.eup %7413  ;;  %v2355_v40 = vadd.f32 1.0, %v7412_v14  ;;  %7433 = vpow2.f32 %v6671_v20  ;;  %v1429_v58 = vpop.f32.mrb[40].mxu0  ;;  %v1009_v45 = vmul.f32 %v8535_v46, %v960_v4 }
 0x2c1   : > { %14276 = vst [vmem:[#allocation44_spill] sm:$0xff] %v10263_v16  ;;  %v10270_v7 = vpop.eup %7415  ;;  %14281 = vst [vmem:[#allocation45_spill] sm:$0xff] %v10274_v61  ;;  %7435 = vrcp.f32 %v2353_v11  ;;  %v1672_v33 = vpop.f32.mrb[40].mxu1  ;;  %v14285_v11 = vld [vmem:[#allocation13_spill] sm:$0xff]  ;;  %v10293_v62 = vadd.f32 %v1429_v58, %v9542_v23 }
 0x2c2   : > { %14279 = vst [vmem:[#allocation12_spill] sm:$0xff] %v10270_v7  ;;  %v7418_v1 = vpop.eup %7417  ;;  %7437 = vrcp.f32 %v2355_v40  ;;  %v10281_v51 = vpop.f32.mrb[41].mxu0  ;;  %v6654_v40 = vmul.f32 -1.442695, %v10268_v60  ;;  %v1058_v16 = vadd.f32 %v8536_v49, %v1009_v45 }
 0x2c3   : > { %v10283_v20 = vpop.f32.mrb[41].mxu1  ;;  %v10285_v14 = vpop.eup %7419  ;;  %7439 = vpow2.f32 %v6650_v6  ;;  %v961_v2 = vmul.f32 %v7418_v1, %v14285_v11  ;;  %v6656_v1 = vmul.f32 -1.442695, %v10274_v61 }
 0x2c4   : > { %14284 = vst [vmem:[#allocation48_spill] sm:$0xff] %v10285_v14  ;;  %v1433_v0 = vpop.f32.mrb[42].mxu0  ;;  %v1676_v37 = vpop.f32.mrb[42].mxu1  ;;  %7441 = vpow2.f32 %v6652_v56  ;;  %v6658_v14 = vmul.f32 -1.442695, %v10279_v26  ;;  %v10304_v56 = vadd.f32 %v1672_v33, %v9547_v17 }
 0x2c5   : > { %v7422_v63 = vpop.eup %7421  ;;  %v10295_v7 = vpop.f32.mrb[43].mxu0  ;;  %7443 = vpow2.f32 %v6673_v42  ;;  %v1010_v11 = vmul.f32 %v8535_v46, %v961_v2  ;;  %v6675_v2 = vmul.f32 -1.442695, %v10293_v62  ;;  %v10313_v42 = vadd.f32 %v1433_v0, %v9542_v23 }
 0x2c6   : > { %v10297_v13 = vpop.f32.mrb[43].mxu1  ;;  %v10299_v6 = vpop.eup %7423  ;;  %7445 = vrcp.f32 %v2334_v24  ;;  %v2357_v58 = vadd.f32 1.0, %v7422_v63  ;;  %v6677_v26 = vmul.f32 -1.442695, %v10304_v56  ;;  %v10325_v0 = vadd.f32 %v1676_v37, %v9547_v17 }
 0x2c7   : > { %14286 = vst [vmem:[#allocation13_spill] sm:$0xff] %v10299_v6  ;;  %v7426_v4 = vpop.eup %7425  ;;  %7447 = vrcp.f32 %v2336_v34  ;;  %v1059_v6 = vadd.f32 %v8536_v49, %v1010_v11 }
 0x2c8   : > { %v7428_v60 = vpop.eup %7427  ;;  %7449 = vpow2.f32 %v6654_v40  ;;  %v1439_v33 = vpop.f32.mrb[44].mxu0  ;;  %v2338_v11 = vadd.f32 1.0, %v7426_v4 }
 0x2c9   : > { %v7430_v3 = vpop.eup %7429  ;;  %7451 = vpow2.f32 %v6656_v1  ;;  %v10310_v24 = vpack.c.bf16 %v1059_v6, %v1058_v16  ;;  %v10315_v34 = vpop.f32.mrb[44].mxu1  ;;  %v10332_v61 = vmul.f32 %v7428_v60, %v10134_v48  ;;  %v14294_v60 = vld [vmem:[#allocation54_spill] sm:$0xff] }
 0x2ca   : > { %v7432_v46 = vpop.eup %7431  ;;  %7453 = vpow2.f32 %v6658_v14  ;;  %v10318_v45 = vpop.f32.mrb[45].mxu0  ;;  %v2359_v4 = vadd.f32 1.0, %v7430_v3 }
 0x2cb   : > { %14287 = vst [vmem:[#allocation101_spill] sm:$0xff] %v10310_v24  ;;  %v7434_v63 = vpop.eup %7433  ;;  %v10320_v49 = vpop.f32.mrb[45].mxu1  ;;  %7455 = vrcp.f32 %v2357_v58  ;;  %1528 = vmatmul.mubr.bf16.gmra.mrb[80].mxu0 %v10310_v24  ;;  %1771 = vmatmul.mubr.bf16.gmra.mrb[80].mxu1 %v10310_v24  ;;  %14288 = vst [vmem:[#allocation102_spill] sm:$0xff] %v10332_v61  ;;  %v10344_v24 = vmul.f32 %v7432_v46, %v10152_v36  ;;  %v14296_v36 = vld [vmem:[#allocation55_spill] sm:$0xff] }
 0x2cc   : > { %v7436_v40 = vpop.eup %7435  ;;  %v2361_v1 = vadd.f32 1.0, %v7434_v63  ;;  %v10327_v16 = vpop.f32.mrb[46].mxu0  ;;  %3351 = vmatprep.mubr.bf16.mxu0 %v14232_v28  ;;  %3594 = vmatprep.mubr.bf16.mxu1 %v14232_v28  ;;  %7457 = vpow2.f32 %v6675_v2  ;;  %v10358_v46 = vadd.f32 %v14296_v36, %v9661_v5 }
 0x2cd   : > { %v10329_v14 = vpop.f32.mrb[46].mxu1  ;;  %v7438_v6 = vpop.eup %7437  ;;  %v10335_v25 = vmul.f32 %v7436_v40, %v10162_v10  ;;  %14292 = vst [vmem:[#allocation106_spill] sm:$0xff] %v10344_v24  ;;  %v6679_v10 = vmul.f32 -1.442695, %v10313_v42  ;;  %v10352_v40 = vadd.f32 %v14294_v60, %v9652_v43  ;;  %v14299_v60 = vld [vmem:[#allocation58_spill] sm:$0xff] }
 0x2ce   : > { %v10339_v58 = vpop.f32.mrb[47].mxu0  ;;  %v10341_v37 = vpop.f32.mrb[47].mxu1  ;;  %v10347_v48 = vmul.f32 %v7438_v6, %v10167_v55  ;;  %7459 = vrcp.f32 %v2361_v1  ;;  %14297 = vst [vmem:[#allocation55_spill] sm:$0xff] %v10358_v46  ;;  %v6681_v1 = vmul.f32 -1.442695, %v10325_v0  ;;  %v10367_v39 = vadd.f32 %v14299_v60, %v9652_v43  ;;  %v7039_v55 = vld [vmem:[%s13866_s6 + $0x100] sm:$0xff]  }
 0x2cf   : > { %14289 = vst [vmem:[#allocation103_spill] sm:$0xff] %v10335_v25  ;;  %14290 = vst [vmem:[#allocation104_spill] sm:$0xff] %v10339_v58  ;;  %v7440_v63 = vpop.eup %7439  ;;  %7461 = vpow2.f32 %v6677_v26  ;;  %v6662_v25 = vmul.f32 -1.442695, %v10358_v46 }
 0x2d0   : > { %14291 = vst [vmem:[#allocation105_spill] sm:$0xff] %v10341_v37  ;;  %14293 = vst [vmem:[#allocation107_spill] sm:$0xff] %v10347_v48  ;;  %v7442_v3 = vpop.eup %7441  ;;  %7463 = vrcp.f32 %v2338_v11  ;;  %v2340_v58 = vadd.f32 1.0, %v7440_v63  ;;  %v10371_v36 = vpop.f32.mrb[48].mxu0  ;;  %v7040_v63 = vld [vmem:[%s13866_s6 + $0x180] sm:$0xff]  }
 0x2d1   : > { %14295 = vst [vmem:[#allocation54_spill] sm:$0xff] %v10352_v40  ;;  %v7444_v37 = vpop.eup %7443  ;;  %14300 = vst [vmem:[#allocation58_spill] sm:$0xff] %v10367_v39  ;;  %7465 = vrcp.f32 %v2359_v4  ;;  %v2342_v11 = vadd.f32 1.0, %v7442_v3  ;;  %v10373_v61 = vpop.f32.mrb[48].mxu1  ;;  %v6660_v4 = vmul.f32 -1.442695, %v10352_v40 }
 0x2d2   : > { %v10363_v6 = vpop.eup %7445  ;;  %v2363_v26 = vadd.f32 1.0, %v7444_v37  ;;  %7467 = vpow2.f32 %v6679_v10  ;;  %v14302_v37 = vld [vmem:[#allocation61_spill] sm:$0xff]  ;;  %v10386_v10 = vpop.f32.mrb[49].mxu0 }
 0x2d3   : > { %14298 = vst [vmem:[#allocation108_spill] sm:$0xff] %v10363_v6  ;;  %v10369_v2 = vpop.eup %7447  ;;  %v10384_v24 = vadd.f32 %v14302_v37, %v9661_v5  ;;  %14304 = vst [vmem:[#allocation110_spill] sm:$0xff] %v10386_v10  ;;  %v10388_v3 = vpop.f32.mrb[49].mxu1  ;;  %v10394_v6 = vadd.f32 %v1439_v33, %v9542_v23  ;;  %v7041_v10 = vld [vmem:[%s13866_s6 + $0x108] sm:$0xff]  }
 0x2d4   : > { %14301 = vst [vmem:[#allocation109_spill] sm:$0xff] %v10369_v2  ;;  %v7450_v60 = vpop.eup %7449  ;;  %7469 = vrcp.f32 %v2363_v26  ;;  %14305 = vst [vmem:[#allocation111_spill] sm:$0xff] %v10388_v3  ;;  %v14306_v2 = vld [vmem:[#allocation2_spill] sm:$0xff]  ;;  %v10396_v40 = vpop.f32.mrb[50].mxu0  ;;  %v6664_v3 = vmul.f32 -1.442695, %v10367_v39 }
 0x2d5   : > { %14303 = vst [vmem:[#allocation61_spill] sm:$0xff] %v10384_v24  ;;  %v7452_v48 = vpop.eup %7451  ;;  %3352 = vmatmul.mubr.bf16.vlgmr.msra.gmra.mrb[84].mxu0 %v14306_v2  ;;  %3595 = vmatmul.mubr.bf16.vlgmr.msra.gmra.mrb[84].mxu1 %v14306_v2  ;;  %7471 = vpow2.f32 %v6681_v1  ;;  %v10398_v37 = vpop.f32.mrb[50].mxu1  ;;  %v2344_v33 = vadd.f32 1.0, %v7450_v60  ;;  %v6666_v30 = vmul.f32 -1.442695, %v10384_v24 }
 0x2d6   : > { %v10400_v26 = vpop.eup %7453  ;;  %7473 = vrcp.f32 %v2340_v58  ;;  %3361 = vmatprep.mubr.bf16.mxu0 %v14232_v28  ;;  %3604 = vmatprep.mubr.bf16.mxu1 %v14232_v28  ;;  %v10405_v46 = vpop.f32.mrb[51].mxu0  ;;  %v7042_v58 = vld [vmem:[%s13866_s6 + $0x188] sm:$0xff]  }
 0x2d7   : > { %14307 = vst [vmem:[#allocation2_spill] sm:$0xff] %v10405_v46  ;;  %v10407_v2 = vpop.f32.mrb[51].mxu1  ;;  %v7456_v1 = vpop.eup %7455  ;;  %7475 = vrcp.f32 %v2342_v11  ;;  %5322 = vmatpush1.bf16.msra.mxu0 %v7039_v55  ;;  %5523 = vmatpush1.bf16.msra.mxu1 %v7040_v63  ;;  %v6683_v55 = vmul.f32 -1.442695, %v10394_v6  ;;  %v10421_v63 = vadd.f32 %v10315_v34, %v9547_v17  ;;  %v7043_v34 = vld [vmem:[%s13866_s6 + $0x110] sm:$0xff]  }
 0x2d8   : > { %14308 = vst [vmem:[#allocation112_spill] sm:$0xff] %v10407_v2  ;;  %v7458_v39 = vpop.eup %7457  ;;  %7477 = vpow2.f32 %v6660_v4  ;;  %5323 = vmatprep.subr.bf16.mxu0 %v14232_v28  ;;  %5524 = vmatprep.subr.bf16.mxu1 %v14232_v28  ;;  %v10424_v2 = vmul.f32 %v7456_v1, %v10189_v50  ;;  %v10433_v38 = vpop.f32.mrb[52].mxu1  ;;  %v7044_v50 = vld [vmem:[%s13866_s6 + $0x190] sm:$0xff]  }
 0x2d9   : > { %v7460_v11 = vpop.eup %7459  ;;  %7479 = vpow2.f32 %v6662_v25  ;;  %v2365_v24 = vadd.f32 1.0, %v7458_v39  ;;  %v10431_v25 = vpop.f32.mrb[52].mxu0 }
 0x2da   : > { %v7462_v60 = vpop.eup %7461  ;;  %7481 = vpow2.f32 %v6664_v3  ;;  %14309 = vst [vmem:[#allocation113_spill] sm:$0xff] %v10424_v2  ;;  %v10427_v4 = vmul.f32 %v7460_v11, %v10225_v52  ;;  %v10443_v3 = vpop.f32.mrb[53].mxu0  ;;  %v14316_v11 = vld [vmem:[#allocation3_spill] sm:$0xff]  ;;  %v2346_v2 = vadd.f32 1.0, %v7452_v48 }
 0x2db   : > { %v10429_v46 = vpop.eup %7463  ;;  %7483 = vrcp.f32 %v2344_v33  ;;  %v2367_v53 = vadd.f32 1.0, %v7462_v60  ;;  %5324 = vmatpush1.bf16.msra.mxu0 %v7041_v10  ;;  %5525 = vmatpush1.bf16.msra.mxu1 %v7042_v58  ;;  %14312 = vst [vmem:[#allocation116_spill] sm:$0xff] %v10443_v3  ;;  %v10445_v1 = vpop.f32.mrb[53].mxu1  ;;  %v14314_v33 = vld [vmem:[#allocation64_spill] sm:$0xff] }
 0x2dc   : > { %14310 = vst [vmem:[#allocation114_spill] sm:$0xff] %v10427_v4  ;;  %14311 = vst [vmem:[#allocation115_spill] sm:$0xff] %v10429_v46  ;;  %v7466_v52 = vpop.eup %7465  ;;  %7485 = vpow2.f32 %v6666_v30  ;;  %5325 = vmatprep.subr.bf16.mxu0 %v14232_v28  ;;  %5526 = vmatprep.subr.bf16.mxu1 %v14232_v28  ;;  %v10451_v58 = vadd.f32 %v14314_v33, %v9652_v43  ;;  %v6685_v30 = vmul.f32 -1.442695, %v10421_v63  ;;  %v10456_v60 = vpop.f32.mrb[54].mxu0  ;;  %v14317_v4 = vld [vmem:[#allocation65_spill] sm:$0xff] }
 0x2dd   : > { %14313 = vst [vmem:[#allocation117_spill] sm:$0xff] %v10445_v1  ;;  %v7468_v10 = vpop.eup %7467  ;;  %3362 = vmatmul.mubr.bf16.gmra.mrb[88].mxu0 %v14316_v11  ;;  %3605 = vmatmul.mubr.bf16.gmra.mrb[88].mxu1 %v14316_v11  ;;  %7487 = vpow2.f32 %v6683_v55  ;;  %v10460_v1 = vadd.f32 %v14317_v4, %v9661_v5  ;;  %v10464_v3 = vpop.f32.mrb[54].mxu1  ;;  %v10469_v46 = vmul.f32 %v7466_v52, %v10201_v31 }
 0x2de   : > { %14315 = vst [vmem:[#allocation64_spill] sm:$0xff] %v10451_v58  ;;  %v7470_v39 = vpop.eup %7469  ;;  %3371 = vmatprep.mubr.bf16.mxu0 %v14232_v28  ;;  %3614 = vmatprep.mubr.bf16.mxu1 %v14232_v28  ;;  %7489 = vrcp.f32 %v2365_v24  ;;  %v2369_v33 = vadd.f32 1.0, %v7468_v10  ;;  %v10466_v11 = vpop.f32.mrb[55].mxu0  ;;  %v10476_v4 = vadd.f32 %v10327_v16, %v9542_v23  ;;  %v2348_v10 = vadd.f32 1.0, %v10400_v26 }
 0x2df   : > { %14318 = vst [vmem:[#allocation3_spill] sm:$0xff] %v10460_v1  ;;  %14319 = vst [vmem:[#allocation65_spill] sm:$0xff] %v10466_v11  ;;  %v7472_v55 = vpop.eup %7471  ;;  %v10472_v48 = vmul.f32 %v7470_v39, %v10255_v57  ;;  %7491 = vrcp.f32 %v2367_v53  ;;  %v10478_v22 = vpop.f32.mrb[55].mxu1  ;;  %5326 = vmatpush1.bf16.msra.mxu0 %v7043_v34  ;;  %5527 = vmatpush1.bf16.msra.mxu1 %v7044_v50  ;;  %v10485_v31 = vadd.f32 %v10329_v14, %v9547_v17 }
 0x2e0   : > { %14320 = vst [vmem:[#allocation118_spill] sm:$0xff] %v10469_v46  ;;  %14322 = vst [vmem:[#allocation120_spill] sm:$0xff] %v10478_v22  ;;  %v10480_v24 = vpop.eup %7473  ;;  %7493 = vrcp.f32 %v2369_v33  ;;  %v2371_v11 = vadd.f32 1.0, %v7472_v55  ;;  %5327 = vmatprep.subr.bf16.mxu0 %v14232_v28  ;;  %5528 = vmatprep.subr.bf16.mxu1 %v14232_v28  ;;  %v6668_v57 = vmul.f32 -1.442695, %v10451_v58  ;;  %v10496_v52 = vpop.f32.mrb[56].mxu0  ;;  %v10503_v16 = vadd.f32 %v10371_v36, %v9542_v23 }
 0x2e1   : > { %14321 = vst [vmem:[#allocation119_spill] sm:$0xff] %v10472_v48  ;;  %14323 = vst [vmem:[#allocation121_spill] sm:$0xff] %v10480_v24  ;;  %v10489_v53 = vpop.eup %7475  ;;  %7495 = vpow2.f32 %v6685_v30  ;;  %v6670_v26 = vmul.f32 -1.442695, %v10460_v1  ;;  %v6687_v14 = vmul.f32 -1.442695, %v10476_v4 }
 0x2e2   : > { %14324 = vst [vmem:[#allocation122_spill] sm:$0xff] %v10489_v53  ;;  %v7478_v34 = vpop.eup %7477  ;;  %7497 = vrcp.f32 %v2371_v11  ;;  %v10498_v39 = vpop.f32.mrb[56].mxu1  ;;  %v6689_v55 = vmul.f32 -1.442695, %v10485_v31  ;;  %v14328_v48 = vld [vmem:[#allocation4_spill] sm:$0xff]  ;;  %v10545_v53 = vadd.f32 %v10398_v37, %v9547_v17 }
 0x2e3   : > { %v7480_v50 = vpop.eup %7479  ;;  %7499 = vrcp.f32 %v2346_v2  ;;  %v10505_v30 = vpop.f32.mrb[57].mxu0  ;;  %v2350_v2 = vadd.f32 1.0, %v7478_v34 }
 0x2e4   : > { %v7482_v33 = vpop.eup %7481  ;;  %7501 = vrcp.f32 %v2348_v10  ;;  %14325 = vst [vmem:[#allocation123_spill] sm:$0xff] %v10505_v30  ;;  %v10507_v46 = vpop.f32.mrb[57].mxu1  ;;  %v10515_v10 = vadd.f32 %v10373_v61, %v9547_v17  ;;  %v2352_v30 = vadd.f32 1.0, %v7480_v50  ;;  %v14333_v61 = vld [vmem:[#allocation67_spill] sm:$0xff]  ;;  %v7045_v50 = vld [vmem:[%s13866_s6 + $0x118] sm:$0xff]  }
 0x2e5   : > { %14326 = vst [vmem:[#allocation124_spill] sm:$0xff] %v10507_v46  ;;  %v10509_v11 = vpop.eup %7483  ;;  %7503 = vpow2.f32 %v6668_v57  ;;  %3372 = vmatmul.mubr.bf16.gmra.mrb[92].mxu0 %v14328_v48  ;;  %3615 = vmatmul.mubr.bf16.gmra.mrb[92].mxu1 %v14328_v48  ;;  %v10517_v22 = vpop.f32.mrb[58].mxu0  ;;  %v2354_v46 = vadd.f32 1.0, %v7482_v33  ;;  %v10529_v58 = vadd.f32 %v14333_v61, %v9652_v43  ;;  %v10540_v33 = vadd.f32 %v10396_v40, %v9542_v23 }
 0x2e6   : > { %14327 = vst [vmem:[#allocation125_spill] sm:$0xff] %v10509_v11  ;;  %14329 = vst [vmem:[#allocation4_spill] sm:$0xff] %v10517_v22  ;;  %v10519_v36 = vpop.f32.mrb[58].mxu1  ;;  %v7486_v1 = vpop.eup %7485  ;;  %7505 = vpow2.f32 %v6670_v26  ;;  %3381 = vmatprep.mubr.bf16.mxu0 %v14232_v28  ;;  %3624 = vmatprep.mubr.bf16.mxu1 %v14232_v28  ;;  %v7046_v26 = vld [vmem:[%s13866_s6 + $0x198] sm:$0xff]  }
 0x2e7   : > { %14330 = vst [vmem:[#allocation126_spill] sm:$0xff] %v10519_v36  ;;  %v10523_v57 = vpop.f32.mrb[59].mxu0  ;;  %v10525_v34 = vpop.f32.mrb[59].mxu1  ;;  %14334 = vst [vmem:[#allocation67_spill] sm:$0xff] %v10529_v58  ;;  %7507 = vpow2.f32 %v6687_v14  ;;  %v6693_v14 = vmul.f32 -1.442695, %v10515_v10  ;;  %5328 = vmatpush1.bf16.msra.mxu0 %v7045_v50  ;;  %5529 = vmatpush1.bf16.msra.mxu1 %v7046_v26 }
 0x2e8   : > { %14331 = vst [vmem:[#allocation127_spill] sm:$0xff] %v10523_v57  ;;  %14332 = vst [vmem:[#allocation128_spill] sm:$0xff] %v10525_v34  ;;  %v7488_v48 = vpop.eup %7487  ;;  %7509 = vpow2.f32 %v6689_v55  ;;  %v6691_v57 = vmul.f32 -1.442695, %v10503_v16  ;;  %v2356_v11 = vadd.f32 1.0, %v7486_v1  ;;  %5329 = vmatprep.subr.bf16.mxu0 %v14232_v28  ;;  %5530 = vmatprep.subr.bf16.mxu1 %v14232_v28  ;;  %v10558_v1 = vpop.f32.mrb[60].mxu1 }
 0x2e9   : > { %v7490_v36 = vpop.eup %7489  ;;  %7511 = vrcp.f32 %v2350_v2  ;;  %v6672_v40 = vmul.f32 -1.442695, %v10529_v58  ;;  %v2373_v26 = vadd.f32 1.0, %v7488_v48  ;;  %v6695_v22 = vmul.f32 -1.442695, %v10540_v33 }
 0x2ea   : > { %v7492_v34 = vpop.eup %7491  ;;  %7513 = vrcp.f32 %v2352_v30  ;;  %v10551_v2 = vmul.f32 %v7490_v36, %v10293_v62  ;;  %v10556_v30 = vpop.f32.mrb[60].mxu0  ;;  %v14339_v62 = vld [vmem:[#allocation5_spill] sm:$0xff] }
 0x2eb   : > { %v7494_v61 = vpop.eup %7493  ;;  %7515 = vrcp.f32 %v2354_v46  ;;  %v10561_v24 = vpop.f32.mrb[61].mxu0 }
 0x2ec   : > { %v7496_v55 = vpop.eup %7495  ;;  %14335 = vst [vmem:[#allocation129_spill] sm:$0xff] %v10551_v2  ;;  %v10554_v50 = vmul.f32 %v7494_v61, %v10313_v42  ;;  %7517 = vpow2.f32 %v6691_v57  ;;  %14337 = vst [vmem:[#allocation131_spill] sm:$0xff] %v10561_v24  ;;  %v10563_v46 = vpop.f32.mrb[61].mxu1  ;;  %v10570_v42 = vmul.f32 %v7492_v34, %v10304_v56  ;;  %v14343_v24 = vld [vmem:[#allocation68_spill] sm:$0xff]  ;;  %v6697_v56 = vmul.f32 -1.442695, %v10545_v53 }
 0x2ed   : > { %v7498_v37 = vpop.eup %7497  ;;  %14338 = vst [vmem:[#allocation132_spill] sm:$0xff] %v10563_v46  ;;  %3382 = vmatmul.mubr.bf16.gmra.mrb[96].mxu0 %v14339_v62  ;;  %3625 = vmatmul.mubr.bf16.gmra.mrb[96].mxu1 %v14339_v62  ;;  %7519 = vpow2.f32 %v6693_v14  ;;  %v10577_v48 = vpop.f32.mrb[62].mxu0  ;;  %v10585_v62 = vadd.f32 %v14343_v24, %v9661_v5  ;;  %v10600_v24 = vadd.f32 %v10281_v51, %v9652_v43  ;;  %v7047_v2 = vld [vmem:[%s13866_s6 + $0x120] sm:$0xff]  }
 0x2ee   : > { %14336 = vst [vmem:[#allocation130_spill] sm:$0xff] %v10554_v50  ;;  %v10565_v58 = vpop.eup %7499  ;;  %14340 = vst [vmem:[#allocation5_spill] sm:$0xff] %v10570_v42  ;;  %v10575_v57 = vmul.f32 %v7498_v37, %v10325_v0  ;;  %v10579_v61 = vpop.f32.mrb[62].mxu1  ;;  %7521 = vrcp.f32 %v2356_v11  ;;  %3391 = vmatprep.mubr.bf16.mxu0 %v14232_v28  ;;  %3634 = vmatprep.mubr.bf16.mxu1 %v14232_v28  ;;  %v2375_v11 = vadd.f32 1.0, %v7496_v55 }
 0x2ef   : > { %14342 = vst [vmem:[#allocation134_spill] sm:$0xff] %v10579_v61  ;;  %v10581_v46 = vpop.eup %7501  ;;  %v10590_v0 = vpop.f32.mrb[63].mxu0  ;;  %7523 = vpow2.f32 %v6672_v40  ;;  %14346 = vst [vmem:[#allocation136_spill] sm:$0xff] %v10600_v24  ;;  %v6674_v55 = vmul.f32 -1.442695, %v10585_v62  ;;  %v10612_v37 = vadd.f32 %v10295_v7, %v9652_v43  ;;  %5330 = vmatpush1.bf16.msra.mxu0 %v7047_v2  ;;  %v14364_v61 = vld [vmem:[#allocation49_spill] sm:$0xff] }
 0x2f0   : > { %14341 = vst [vmem:[#allocation133_spill] sm:$0xff] %v10575_v57  ;;  %14344 = vst [vmem:[#allocation68_spill] sm:$0xff] %v10590_v0  ;;  %v10592_v34 = vpop.f32.mrb[63].mxu1  ;;  %v7504_v14 = vpop.eup %7503  ;;  %7525 = vrcp.f32 %v2373_v26  ;;  %v10618_v57 = vadd.f32 %v10297_v13, %v9661_v5  ;;  %5331 = vmatprep.subr.bf16.mxu0 %v14232_v28  ;;  %v6676_v7 = vmul.f32 -1.442695, %v10600_v24  ;;  %v14356_v24 = vld [vmem:[#allocation37_spill] sm:$0xff] }
 0x2f1   : > { %14345 = vst [vmem:[#allocation135_spill] sm:$0xff] %v10592_v34  ;;  %v10596_v36 = vpop.eup %7505  ;;  %v10607_v34 = vadd.f32 %v10283_v20, %v9661_v5  ;;  %7527 = vpow2.f32 %v6695_v22  ;;  %14348 = vst [vmem:[#allocation138_spill] sm:$0xff] %v10612_v37  ;;  %v2358_v42 = vadd.f32 1.0, %v7504_v14  ;;  %v10620_v22 = vpop.f32.mrb[64].mxu0  ;;  %v14353_v14 = vld [vmem:[#allocation6_spill] sm:$0xff] }
 0x2f2   : > { %v7508_v50 = vpop.eup %7507  ;;  %7529 = vpow2.f32 %v6697_v56  ;;  %14349 = vst [vmem:[#allocation139_spill] sm:$0xff] %v10618_v57  ;;  %14350 = vst [vmem:[#allocation140_spill] sm:$0xff] %v10620_v22  ;;  %v10628_v2 = vpop.f32.mrb[65].mxu0 }
 0x2f3   : > { %14347 = vst [vmem:[#allocation137_spill] sm:$0xff] %v10607_v34  ;;  %v7510_v40 = vpop.eup %7509  ;;  %v2377_v51 = vadd.f32 1.0, %v7508_v50  ;;  %7531 = vrcp.f32 %v2375_v11  ;;  %v10626_v50 = vpop.f32.mrb[64].mxu1  ;;  %14352 = vst [vmem:[#allocation142_spill] sm:$0xff] %v10628_v2  ;;  %v6678_v13 = vmul.f32 -1.442695, %v10607_v34 }
 0x2f4   : > { %v10614_v26 = vpop.eup %7511  ;;  %v2379_v20 = vadd.f32 1.0, %v7510_v40  ;;  %14351 = vst [vmem:[#allocation141_spill] sm:$0xff] %v10626_v50  ;;  %v10635_v11 = vpop.f32.mrb[65].mxu1  ;;  %v6680_v2 = vmul.f32 -1.442695, %v10612_v37  ;;  %v10663_v37 = vmul.f32 %v10038_v12, %v14364_v61  ;;  %v14369_v61 = vld [vmem:[#allocation57_spill] sm:$0xff] }
 0x2f5   : > { %v10623_v0 = vpop.eup %7513  ;;  %7533 = vrcp.f32 %v2377_v51  ;;  %3392 = vmatmul.mubr.bf16.gmra.mrb[100].mxu0 %v14353_v14  ;;  %3635 = vmatmul.mubr.bf16.gmra.mrb[100].mxu1 %v14353_v14  ;;  %14354 = vst [vmem:[#allocation6_spill] sm:$0xff] %v10635_v11  ;;  %v10637_v40 = vpop.f32.mrb[66].mxu0  ;;  %v10641_v51 = vmul.f32 %v10011_v41, %v14356_v24  ;;  %v6682_v41 = vmul.f32 -1.442695, %v10618_v57  ;;  %v10677_v57 = vadd.f32 %v10433_v38, %v9547_v17  ;;  %v14376_v38 = vld [vmem:[#allocation69_spill] sm:$0xff] }
 0x2f6   : > { %v10630_v56 = vpop.eup %7515  ;;  %7535 = vrcp.f32 %v2379_v20  ;;  %14355 = vst [vmem:[#allocation143_spill] sm:$0xff] %v10637_v40  ;;  %3401 = vmatprep.mubr.bf16.mxu0 %v14232_v28  ;;  %3644 = vmatprep.mubr.bf16.mxu1 %v14232_v28  ;;  %v10646_v14 = vpop.f32.mrb[66].mxu1  ;;  %v14359_v20 = vld [vmem:[#allocation38_spill] sm:$0xff]  ;;  %14365 = vst [vmem:[#allocation49_spill] sm:$0xff] %v10663_v37 }
 0x2f7   : > { %v7518_v22 = vpop.eup %7517  ;;  %14357 = vst [vmem:[#allocation37_spill] sm:$0xff] %v10641_v51  ;;  %7537 = vpow2.f32 %v6674_v55  ;;  %14358 = vst [vmem:[#allocation144_spill] sm:$0xff] %v10646_v14  ;;  %v10650_v11 = vmul.f32 %v10020_v9, %v14359_v20  ;;  %v14361_v40 = vld [vmem:[#allocation46_spill] sm:$0xff]  ;;  %v10657_v24 = vpop.f32.mrb[67].mxu0  ;;  %v10667_v9 = vadd.f32 %v10431_v25, %v9542_v23  ;;  %v14371_v25 = vld [vmem:[#allocation60_spill] sm:$0xff] }
 0x2f8   : > { %v7520_v34 = vpop.eup %7519  ;;  %v10654_v50 = vmul.f32 %v10032_v35, %v14361_v40  ;;  %7539 = vrcp.f32 %v2358_v42  ;;  %14363 = vst [vmem:[#allocation145_spill] sm:$0xff] %v10657_v24  ;;  %v2381_v14 = vadd.f32 1.0, %v7518_v22  ;;  %v10669_v20 = vpop.f32.mrb[67].mxu1  ;;  %v14367_v42 = vld [vmem:[#allocation56_spill] sm:$0xff]  ;;  %v10681_v22 = vmul.f32 %v10062_v15, %v14369_v61  ;;  %v14378_v15 = vld [vmem:[#allocation70_spill] sm:$0xff] }
 0x2f9   : > { %14360 = vst [vmem:[#allocation38_spill] sm:$0xff] %v10650_v11  ;;  %v10659_v55 = vpop.eup %7521  ;;  %7541 = vpow2.f32 %v6676_v7  ;;  %14366 = vst [vmem:[#allocation146_spill] sm:$0xff] %v10669_v20  ;;  %v10673_v40 = vmul.f32 %v10055_v27, %v14367_v42  ;;  %v2383_v24 = vadd.f32 1.0, %v7520_v34  ;;  %v10685_v7 = vmul.f32 %v10069_v8, %v14371_v25  ;;  %v14374_v34 = vld [vmem:[#allocation62_spill] sm:$0xff]  ;;  %v10703_v8 = vpop.f32.mrb[68].mxu0 }
 0x2fa   : > { %14362 = vst [vmem:[#allocation46_spill] sm:$0xff] %v10654_v50  ;;  %v7524_v35 = vpop.eup %7523  ;;  %7543 = vpow2.f32 %v6678_v13  ;;  %14370 = vst [vmem:[#allocation57_spill] sm:$0xff] %v10681_v22  ;;  %v10689_v27 = vadd.f32 %v10318_v45, %v9652_v43  ;;  %v10693_v42 = vmul.f32 %v10076_v44, %v14374_v34  ;;  %v10697_v20 = vmul.f32 %v10120_v29, %v14376_v38  ;;  %v10710_v34 = vpop.f32.mrb[68].mxu1  ;;  %v14384_v38 = vld [vmem:[#allocation7_spill] sm:$0xff] }
 0x2fb   : > { %14368 = vst [vmem:[#allocation56_spill] sm:$0xff] %v10673_v40  ;;  %v7526_v12 = vpop.eup %7525  ;;  %14372 = vst [vmem:[#allocation60_spill] sm:$0xff] %v10685_v7  ;;  %7545 = vpow2.f32 %v6680_v2  ;;  %v10701_v61 = vmul.f32 %v10126_v54, %v14378_v15  ;;  %v10707_v45 = vmul.f32 %v10137_v21, %v9976_v18  ;;  %v6699_v44 = vmul.f32 -1.442695, %v10667_v9  ;;  %v10712_v29 = vpop.f32.mrb[69].mxu0  ;;  %v7048_v54 = vld [vmem:[%s13866_s6 + $0x1a0] sm:$0xff]  }
 0x2fc   : > { %14373 = vst [vmem:[#allocation147_spill] sm:$0xff] %v10689_v27  ;;  %v7528_v13 = vpop.eup %7527  ;;  %14375 = vst [vmem:[#allocation62_spill] sm:$0xff] %v10693_v42  ;;  %7547 = vpow2.f32 %v6682_v41  ;;  %v6701_v21 = vmul.f32 -1.442695, %v10677_v57  ;;  %v10726_v15 = vpop.f32.mrb[70].mxu0  ;;  %5531 = vmatpush1.bf16.msra.mxu1 %v7048_v54 }
 0x2fd   : > { %14377 = vst [vmem:[#allocation69_spill] sm:$0xff] %v10697_v20  ;;  %14379 = vst [vmem:[#allocation70_spill] sm:$0xff] %v10701_v61  ;;  %v7530_v2 = vpop.eup %7529  ;;  %7549 = vrcp.f32 %v2381_v14  ;;  %v2385_v25 = vadd.f32 1.0, %v7528_v13  ;;  %3402 = vmatmul.mubr.bf16.gmra.mrb[104].mxu0 %v14384_v38  ;;  %3645 = vmatmul.mubr.bf16.gmra.mrb[104].mxu1 %v14384_v38  ;;  %v10722_v14 = vadd.f32 %v10456_v60, %v9542_v23  ;;  %v10724_v13 = vpop.f32.mrb[69].mxu1 }
 0x2fe   : > { %14380 = vst [vmem:[#allocation148_spill] sm:$0xff] %v10703_v8  ;;  %14381 = vst [vmem:[#allocation149_spill] sm:$0xff] %v10707_v45  ;;  %v7532_v41 = vpop.eup %7531  ;;  %7551 = vrcp.f32 %v2383_v24  ;;  %v2387_v18 = vadd.f32 1.0, %v7530_v2  ;;  %3411 = vmatprep.mubr.bf16.mxu0 %v14232_v28  ;;  %3654 = vmatprep.mubr.bf16.mxu1 %v14232_v28  ;;  %v6684_v24 = vmul.f32 -1.442695, %v10689_v27  ;;  %v10734_v2 = vadd.f32 %v10464_v3, %v9547_v17  ;;  %v10736_v60 = vpop.f32.mrb[70].mxu1 }
 0x2ff   : > { %14382 = vst [vmem:[#allocation150_spill] sm:$0xff] %v10710_v34  ;;  %14383 = vst [vmem:[#allocation151_spill] sm:$0xff] %v10712_v29  ;;  %v7534_v29 = vpop.eup %7533  ;;  %v2360_v34 = vadd.f32 1.0, %v10596_v36  ;;  %7553 = vrcp.f32 %v2385_v25  ;;  %v10738_v38 = vpop.f32.mrb[71].mxu0  ;;  %v10741_v8 = vmul.f32 %v7526_v12, %v10394_v6  ;;  %v10749_v3 = vmul.f32 %v7532_v41, %v10421_v63  ;;  %5532 = vmatprep.subr.bf16.mxu1 %v14232_v28 }
 0x300   : > { %14385 = vst [vmem:[#allocation7_spill] sm:$0xff] %v10724_v13  ;;  %14386 = vst [vmem:[#allocation152_spill] sm:$0xff] %v10726_v15  ;;  %v7536_v13 = vpop.eup %7535  ;;  %v2362_v15 = vadd.f32 1.0, %v7524_v35  ;;  %v10744_v36 = vmul.f32 %v7534_v29, %v10476_v4  ;;  %7555 = vrcp.f32 %v2387_v18  ;;  %v10746_v61 = vpop.f32.mrb[71].mxu1  ;;  %v10753_v27 = vadd.f32 %v10320_v49, %v9661_v5  ;;  %v14400_v18 = vld [vmem:[#allocation80_spill] sm:$0xff] }
 0x301   : > { %14387 = vst [vmem:[#allocation153_spill] sm:$0xff] %v10736_v60  ;;  %14388 = vst [vmem:[#allocation154_spill] sm:$0xff] %v10738_v38  ;;  %v7538_v25 = vpop.eup %7537  ;;  %v10756_v35 = vmul.f32 %v7536_v13, %v10485_v31  ;;  %7557 = vpow2.f32 %v6699_v44  ;;  %v10763_v4 = vmul.f32 %v10140_v19, %v9991_v32  ;;  %v6703_v12 = vmul.f32 -1.442695, %v10722_v14  ;;  %v14397_v32 = vld [vmem:[#allocation79_spill] sm:$0xff]  ;;  %v14398_v19 = vld [vmem:[#allocation97_spill] sm:$0xff] }
 0x302   : > { %14389 = vst [vmem:[#allocation155_spill] sm:$0xff] %v10741_v8  ;;  %14390 = vst [vmem:[#allocation156_spill] sm:$0xff] %v10744_v36  ;;  %v10759_v6 = vpop.eup %7539  ;;  %7559 = vpow2.f32 %v6701_v21  ;;  %v10770_v31 = vmul.f32 %v10144_v47, %v10002_v59  ;;  %v6705_v29 = vmul.f32 -1.442695, %v10734_v2  ;;  %v10777_v41 = vmul.f32 %v14398_v19, %v14397_v32  ;;  %v14401_v21 = vld [vmem:[#allocation100_spill] sm:$0xff]  ;;  %v14403_v59 = vld [vmem:[#allocation81_spill] sm:$0xff] }
 0x303   : > { %14391 = vst [vmem:[#allocation157_spill] sm:$0xff] %v10746_v61  ;;  %14392 = vst [vmem:[#allocation158_spill] sm:$0xff] %v10749_v3  ;;  %v7542_v49 = vpop.eup %7541  ;;  %7561 = vrcp.f32 %v2360_v34  ;;  %v10781_v13 = vmul.f32 %v14401_v21, %v14400_v18  ;;  %v2364_v63 = vadd.f32 1.0, %v7538_v25  ;;  %v14404_v47 = vld [vmem:[#allocation63_spill] sm:$0xff]  ;;  %v6686_v44 = vmul.f32 -1.442695, %v10753_v27 }
 0x304   : > { %14393 = vst [vmem:[#allocation159_spill] sm:$0xff] %v10753_v27  ;;  %14394 = vst [vmem:[#allocation160_spill] sm:$0xff] %v10756_v35  ;;  %v7544_v54 = vpop.eup %7543  ;;  %7563 = vrcp.f32 %v2362_v15  ;;  %v10785_v34 = vmul.f32 %v14404_v47, %v14403_v59  ;;  %v14406_v3 = vld [vmem:[#allocation104_spill] sm:$0xff]  ;;  %v7049_v32 = vld [vmem:[%s13866_s6 + $0x128] sm:$0xff]   ;;  %v2366_v59 = vadd.f32 1.0, %v7542_v49 }
 0x305   : > { %14395 = vst [vmem:[#allocation161_spill] sm:$0xff] %v10763_v4  ;;  %14396 = vst [vmem:[#allocation162_spill] sm:$0xff] %v10770_v31  ;;  %v7546_v8 = vpop.eup %7545  ;;  %7565 = vpow2.f32 %v6684_v24  ;;  %v10790_v35 = vadd.f32 %v14406_v3, %v9652_v43  ;;  %v7050_v15 = vld [vmem:[%s13866_s6 + $0x1a8] sm:$0xff]   ;;  %v14408_v19 = vld [vmem:[#allocation82_spill] sm:$0xff]  ;;  %v10806_v3 = vadd.f32 %v10496_v52, %v9542_v23  ;;  %5332 = vmatpush1.bf16.msra.mxu0 %v7049_v32 }
 0x306   : > { %14399 = vst [vmem:[#allocation79_spill] sm:$0xff] %v10777_v41  ;;  %14402 = vst [vmem:[#allocation97_spill] sm:$0xff] %v10781_v13  ;;  %v7548_v25 = vpop.eup %7547  ;;  %v14409_v18 = vld [vmem:[#allocation44_spill] sm:$0xff]  ;;  %7567 = vpow2.f32 %v6703_v12  ;;  %v14413_v36 = vld [vmem:[#allocation87_spill] sm:$0xff]  ;;  %v10818_v12 = vpop.f32.mrb[72].mxu0  ;;  %5533 = vmatpush1.bf16.msra.mxu1 %v7050_v15  ;;  %5333 = vmatprep.subr.bf16.mxu0 %v14232_v28 }
 0x307   : > { %14405 = vst [vmem:[#allocation80_spill] sm:$0xff] %v10785_v34  ;;  %14407 = vst [vmem:[#allocation100_spill] sm:$0xff] %v10790_v35  ;;  %v10800_v21 = vmul.f32 %v14409_v18, %v14408_v19  ;;  %v14411_v24 = vld [vmem:[#allocation8_spill] sm:$0xff]  ;;  %v7550_v47 = vpop.eup %7549  ;;  %v2368_v19 = vadd.f32 1.0, %v7544_v54  ;;  %7569 = vpow2.f32 %v6705_v29  ;;  %v14420_v52 = vld [vmem:[#allocation89_spill] sm:$0xff]  ;;  %v10830_v54 = vpop.f32.mrb[73].mxu0  ;;  %5534 = vmatprep.subr.bf16.mxu1 %v14232_v28 }
 0x308   : > { %3412 = vmatmul.mubr.bf16.gmra.mrb[108].mxu0 %v14411_v24  ;;  %3655 = vmatmul.mubr.bf16.gmra.mrb[108].mxu1 %v14411_v24  ;;  %14412 = vst [vmem:[#allocation63_spill] sm:$0xff] %v10806_v3  ;;  %v14414_v61 = vld [vmem:[#allocation12_spill] sm:$0xff]  ;;  %14419 = vst [vmem:[#allocation44_spill] sm:$0xff] %v10818_v12  ;;  %v7552_v49 = vpop.eup %7551  ;;  %v14421_v18 = vld [vmem:[#allocation13_spill] sm:$0xff]  ;;  %7571 = vrcp.f32 %v2364_v63 }
 0x309   : > { %14410 = vst [vmem:[#allocation81_spill] sm:$0xff] %v10800_v21  ;;  %v10810_v38 = vmul.f32 %v14414_v61, %v14413_v36  ;;  %v14416_v27 = vld [vmem:[#allocation88_spill] sm:$0xff]  ;;  %3421 = vmatprep.mubr.bf16.mxu0 %v14232_v28  ;;  %3664 = vmatprep.mubr.bf16.mxu1 %v14232_v28  ;;  %v10822_v24 = vmul.f32 %v14421_v18, %v14420_v52  ;;  %v14423_v21 = vld [vmem:[#allocation90_spill] sm:$0xff]  ;;  %v7554_v18 = vpop.eup %7553  ;;  %v14428_v12 = vld [vmem:[#allocation39_spill] sm:$0xff]  ;;  %7573 = vpow2.f32 %v6686_v44 }
 0x30a   : > { %v14417_v60 = vld [vmem:[#allocation48_spill] sm:$0xff]  ;;  %14427 = vst [vmem:[#allocation88_spill] sm:$0xff] %v10830_v54  ;;  %v14431_v63 = vld [vmem:[#allocation105_spill] sm:$0xff]  ;;  %v10849_v54 = vpop.f32.mrb[74].mxu0  ;;  %7575 = vrcp.f32 %v2366_v59  ;;  %v10857_v44 = vmul.f32 %v7554_v18, %v10540_v33  ;;  %v10869_v59 = vmul.f32 %v7552_v49, %v10515_v10  ;;  %v2372_v18 = vadd.f32 1.0, %v7548_v25 }
 0x30b   : > { %14415 = vst [vmem:[#allocation104_spill] sm:$0xff] %v10810_v38  ;;  %v10814_v34 = vmul.f32 %v14417_v60, %v14416_v27  ;;  %14422 = vst [vmem:[#allocation8_spill] sm:$0xff] %v10822_v24  ;;  %v14424_v61 = vld [vmem:[#allocation108_spill] sm:$0xff]  ;;  %v2370_v27 = vadd.f32 1.0, %v7546_v8  ;;  %v10828_v60 = vpop.f32.mrb[72].mxu1  ;;  %v10845_v32 = vadd.f32 %v14431_v63, %v9661_v5  ;;  %7577 = vrcp.f32 %v2368_v19  ;;  %v7053_v19 = vld [vmem:[%s13866_s6 + $0x138] sm:$0xff]  }
 0x30c   : > { %v10826_v36 = vmul.f32 %v14424_v61, %v14423_v21  ;;  %14426 = vst [vmem:[#allocation12_spill] sm:$0xff] %v10828_v60  ;;  %v7051_v29 = vld [vmem:[%s13866_s6 + $0x130] sm:$0xff]   ;;  %v14429_v21 = vld [vmem:[#allocation109_spill] sm:$0xff]  ;;  %v6688_v8 = vmul.f32 -1.442695, %v10790_v35  ;;  %v10847_v15 = vpop.f32.mrb[73].mxu1  ;;  %v7556_v60 = vpop.eup %7555 }
 0x30d   : > { %14418 = vst [vmem:[#allocation82_spill] sm:$0xff] %v10814_v34  ;;  %v7052_v52 = vld [vmem:[%s13866_s6 + $0x1b0] sm:$0xff]   ;;  %v10840_v61 = vmul.f32 %v14429_v21, %v14428_v12  ;;  %14432 = vst [vmem:[#allocation89_spill] sm:$0xff] %v10845_v32  ;;  %v10854_v12 = vmul.f32 %v7550_v47, %v10503_v16  ;;  %v6707_v21 = vmul.f32 -1.442695, %v10806_v3  ;;  %v10860_v63 = vpop.f32.mrb[74].mxu1  ;;  %v10872_v16 = vmul.f32 %v7556_v60, %v10545_v53 }
 0x30e   : > { %14425 = vst [vmem:[#allocation87_spill] sm:$0xff] %v10826_v36  ;;  %14433 = vst [vmem:[#allocation13_spill] sm:$0xff] %v10847_v15  ;;  %v10862_v35 = vpop.f32.mrb[75].mxu0  ;;  %v7558_v15 = vpop.eup %7557  ;;  %7579 = vrcp.f32 %v2370_v27  ;;  %5334 = vmatpush1.bf16.msra.mxu0 %v7051_v29  ;;  %5535 = vmatpush1.bf16.msra.mxu1 %v7052_v52  ;;  %v7054_v53 = vld [vmem:[%s13866_s6 + $0x1b8] sm:$0xff]   ;;  %v10890_v27 = vadd.f32 %v10498_v39, %v9547_v17  ;;  %v14450_v39 = vld [vmem:[#allocation4_spill] sm:$0xff] }
 0x30f   : > { %14430 = vst [vmem:[#allocation48_spill] sm:$0xff] %v10840_v61  ;;  %14434 = vst [vmem:[#allocation90_spill] sm:$0xff] %v10849_v54  ;;  %v14439_v54 = vld [vmem:[#allocation40_spill] sm:$0xff]  ;;  %v14440_v61 = vld [vmem:[#allocation115_spill] sm:$0xff]  ;;  %v10874_v33 = vpop.f32.mrb[75].mxu1  ;;  %v7560_v47 = vpop.eup %7559  ;;  %7581 = vpow2.f32 %v6688_v8  ;;  %5335 = vmatprep.subr.bf16.mxu0 %v14232_v28  ;;  %5536 = vmatprep.subr.bf16.mxu1 %v14232_v28 }
 0x310   : > { %14435 = vst [vmem:[#allocation108_spill] sm:$0xff] %v10854_v12  ;;  %14436 = vst [vmem:[#allocation39_spill] sm:$0xff] %v10857_v44  ;;  %v10866_v36 = vmul.f32 %v14440_v61, %v14439_v54  ;;  %v10884_v10 = vpop.eup %7561  ;;  %v2391_v49 = vadd.f32 1.0, %v7560_v47  ;;  %v14446_v54 = vld [vmem:[#allocation32_spill] sm:$0xff]  ;;  %v14447_v29 = vld [vmem:[#allocation121_spill] sm:$0xff]  ;;  %7583 = vpow2.f32 %v6707_v21  ;;  %v10921_v21 = vpop.f32.mrb[76].mxu0 }
 0x311   : > { %14437 = vst [vmem:[#allocation109_spill] sm:$0xff] %v10860_v63  ;;  %14438 = vst [vmem:[#allocation105_spill] sm:$0xff] %v10862_v35  ;;  %v2389_v63 = vadd.f32 1.0, %v7558_v15  ;;  %v10894_v60 = vpop.eup %7563  ;;  %v10898_v52 = vmul.f32 %v14447_v29, %v14446_v54  ;;  %v14449_v61 = vld [vmem:[#allocation9_spill] sm:$0xff]  ;;  %v6690_v8 = vmul.f32 -1.442695, %v10845_v32  ;;  %v10905_v15 = vadd.f32 %v14450_v39, %v9542_v23 }
 0x312   : > { %14441 = vst [vmem:[#allocation40_spill] sm:$0xff] %v10866_v36  ;;  %14442 = vst [vmem:[#allocation115_spill] sm:$0xff] %v10869_v59  ;;  %3422 = vmatmul.mubr.bf16.gmra.mrb[112].mxu0 %v14449_v61  ;;  %3665 = vmatmul.mubr.bf16.gmra.mrb[112].mxu1 %v14449_v61  ;;  %v7566_v47 = vpop.eup %7565  ;;  %v14451_v25 = vld [vmem:[#allocation41_spill] sm:$0xff]  ;;  %v14452_v35 = vld [vmem:[#allocation122_spill] sm:$0xff]  ;;  %v10923_v61 = vpop.f32.mrb[76].mxu1 }
 0x313   : > { %14443 = vst [vmem:[#allocation163_spill] sm:$0xff] %v10872_v16  ;;  %14444 = vst [vmem:[#allocation164_spill] sm:$0xff] %v10874_v33  ;;  %v10909_v59 = vmul.f32 %v14452_v35, %v14451_v25  ;;  %v14454_v16 = vld [vmem:[#allocation66_spill] sm:$0xff]  ;;  %v14455_v12 = vld [vmem:[#allocation125_spill] sm:$0xff]  ;;  %3431 = vmatprep.mubr.bf16.mxu0 %v14232_v28  ;;  %3674 = vmatprep.mubr.bf16.mxu1 %v14232_v28  ;;  %7585 = vrcp.f32 %v2389_v63  ;;  %v7568_v39 = vpop.eup %7567  ;;  %v10937_v33 = vpop.f32.mrb[77].mxu0  ;;  %v2374_v3 = vadd.f32 1.0, %v7566_v47 }
 0x314   : > { %14445 = vst [vmem:[#allocation165_spill] sm:$0xff] %v10890_v27  ;;  %14448 = vst [vmem:[#allocation32_spill] sm:$0xff] %v10898_v52  ;;  %v10913_v54 = vmul.f32 %v14455_v12, %v14454_v16  ;;  %v14457_v29 = vld [vmem:[#allocation45_spill] sm:$0xff]  ;;  %v14461_v35 = vld [vmem:[#allocation47_spill] sm:$0xff]  ;;  %7587 = vrcp.f32 %v2391_v49  ;;  %5336 = vmatpush1.bf16.msra.mxu0 %v7053_v19  ;;  %5537 = vmatpush1.bf16.msra.mxu1 %v7054_v53  ;;  %v6709_v49 = vmul.f32 -1.442695, %v10890_v27 }
 0x315   : > { %14453 = vst [vmem:[#allocation121_spill] sm:$0xff] %v10909_v59  ;;  %v10917_v44 = vmul.f32 %v10565_v58, %v14457_v29  ;;  %14459 = vst [vmem:[#allocation41_spill] sm:$0xff] %v10921_v21  ;;  %v10927_v25 = vmul.f32 %v10581_v46, %v14461_v35  ;;  %v14463_v12 = vld [vmem:[#allocation54_spill] sm:$0xff]  ;;  %v7570_v35 = vpop.eup %7569  ;;  %7589 = vrcp.f32 %v2372_v18  ;;  %5337 = vmatprep.subr.bf16.mxu0 %v14232_v28  ;;  %5538 = vmatprep.subr.bf16.mxu1 %v14232_v28  ;;  %v14471_v53 = vld [vmem:[#allocation55_spill] sm:$0xff] }
 0x316   : > { %14456 = vst [vmem:[#allocation9_spill] sm:$0xff] %v10913_v54  ;;  %14460 = vst [vmem:[#allocation122_spill] sm:$0xff] %v10923_v61  ;;  %v10931_v16 = vmul.f32 %v10614_v26, %v14463_v12  ;;  %v14465_v58 = vld [vmem:[#allocation110_spill] sm:$0xff]  ;;  %v14468_v26 = vld [vmem:[#allocation111_spill] sm:$0xff]  ;;  %v7572_v19 = vpop.eup %7571  ;;  %v10956_v32 = vmul.f32 %v10623_v0, %v14471_v53  ;;  %7591 = vpow2.f32 %v6690_v8  ;;  %v2395_v18 = vadd.f32 1.0, %v7570_v35 }
 0x317   : > { %14458 = vst [vmem:[#allocation4_spill] sm:$0xff] %v10917_v44  ;;  %14462 = vst [vmem:[#allocation66_spill] sm:$0xff] %v10927_v25  ;;  %v10935_v29 = vadd.f32 %v14465_v58, %v9652_v43  ;;  %v7055_v63 = vld [vmem:[%s13866_s6 + $0x140] sm:$0xff]   ;;  %v10947_v12 = vadd.f32 %v14468_v26, %v9661_v5  ;;  %v2393_v58 = vadd.f32 1.0, %v7568_v39  ;;  %v6711_v61 = vmul.f32 -1.442695, %v10905_v15  ;;  %v7574_v21 = vpop.eup %7573 }
 0x318   : > { %14464 = vst [vmem:[#allocation125_spill] sm:$0xff] %v10931_v16  ;;  %14467 = vst [vmem:[#allocation47_spill] sm:$0xff] %v10937_v33  ;;  %v7056_v46 = vld [vmem:[%s13866_s6 + $0x1c0] sm:$0xff]   ;;  %v10950_v33 = vpop.f32.mrb[77].mxu1  ;;  %v10959_v26 = vpop.f32.mrb[78].mxu0  ;;  %5338 = vmatpush1.bf16.msra.mxu0 %v7055_v63  ;;  %v7057_v47 = vld [vmem:[%s13866_s6 + $0x148] sm:$0xff]  }
 0x319   : > { %14466 = vst [vmem:[#allocation45_spill] sm:$0xff] %v10935_v29  ;;  %14469 = vst [vmem:[#allocation54_spill] sm:$0xff] %v10947_v12  ;;  %v10961_v39 = vpop.f32.mrb[78].mxu1  ;;  %v14475_v27 = vld [vmem:[#allocation58_spill] sm:$0xff]  ;;  %7593 = vrcp.f32 %v2393_v58  ;;  %v10971_v0 = vpop.f32.mrb[79].mxu0  ;;  %5539 = vmatpush1.bf16.msra.mxu1 %v7056_v46  ;;  %5339 = vmatprep.subr.bf16.mxu0 %v14232_v28  ;;  %v14545_v34 = vld [vmem:[#allocation44_spill] sm:$0xff] }
 0x31a   : > { %14470 = vst [vmem:[#allocation110_spill] sm:$0xff] %v10950_v33  ;;  %14472 = vst [vmem:[#allocation111_spill] sm:$0xff] %v10956_v32  ;;  %v10965_v33 = vmul.f32 %v10630_v56, %v14475_v27  ;;  %v14477_v16 = vld [vmem:[#allocation126_spill] sm:$0xff]  ;;  %v10973_v8 = vpop.f32.mrb[79].mxu1  ;;  %v10975_v35 = vpop.eup %7575  ;;  %v6692_v53 = vmul.f32 -1.442695, %v10935_v29  ;;  %7595 = vrcp.f32 %v2395_v18  ;;  %5540 = vmatprep.subr.bf16.mxu1 %v14232_v28  ;;  %v11302_v41 = vadd.f32 %v14545_v34, %v9542_v23 }
 0x31b   : > { %14473 = vst [vmem:[#allocation55_spill] sm:$0xff] %v10959_v26  ;;  %14474 = vst [vmem:[#allocation166_spill] sm:$0xff] %v10961_v39  ;;  %v10969_v25 = vadd.f32 %v14477_v16, %v9547_v17  ;;  %v14481_v39 = vld [vmem:[#allocation2_spill] sm:$0xff]  ;;  %v14483_v56 = vld [vmem:[#allocation112_spill] sm:$0xff]  ;;  %v10992_v58 = vpop.eup %7577  ;;  %7597 = vpow2.f32 %v6709_v49 }
 0x31c   : > { %14476 = vst [vmem:[#allocation58_spill] sm:$0xff] %v10965_v33  ;;  %14478 = vst [vmem:[#allocation126_spill] sm:$0xff] %v10971_v0  ;;  %v10980_v26 = vadd.f32 %v14481_v39, %v9652_v43  ;;  %v10984_v27 = vadd.f32 %v14483_v56, %v9661_v5  ;;  %v7058_v16 = vld [vmem:[%s13866_s6 + $0x1c8] sm:$0xff]   ;;  %v6694_v56 = vmul.f32 -1.442695, %v10947_v12  ;;  %v14488_v18 = vld [vmem:[#allocation116_spill] sm:$0xff]  ;;  %v11005_v46 = vpop.eup %7579  ;;  %7599 = vpow2.f32 %v6711_v61  ;;  %5340 = vmatpush1.bf16.msra.mxu0 %v7057_v47 }
 0x31d   : > { %14479 = vst [vmem:[#allocation167_spill] sm:$0xff] %v10973_v8  ;;  %14480 = vst [vmem:[#allocation168_spill] sm:$0xff] %v10975_v35  ;;  %v14486_v8 = vld [vmem:[#allocation61_spill] sm:$0xff]  ;;  %v11001_v63 = vadd.f32 %v14488_v18, %v9652_v43  ;;  %v14491_v0 = vld [vmem:[#allocation64_spill] sm:$0xff]  ;;  %v7582_v49 = vpop.eup %7581  ;;  %7601 = vrcp.f32 %v2374_v3  ;;  %v11034_v3 = vadd.f32 %v10577_v48, %v9542_v23  ;;  %5541 = vmatpush1.bf16.msra.mxu1 %v7058_v16  ;;  %5341 = vmatprep.subr.bf16.mxu0 %v14232_v28 }
 0x31e   : > { %14482 = vst [vmem:[#allocation2_spill] sm:$0xff] %v10980_v26  ;;  %14484 = vst [vmem:[#allocation112_spill] sm:$0xff] %v10984_v27  ;;  %v10996_v39 = vmul.f32 %v10659_v55, %v14486_v8  ;;  %v11009_v29 = vmul.f32 %v10759_v6, %v14491_v0  ;;  %v14493_v55 = vld [vmem:[#allocation10_spill] sm:$0xff]  ;;  %v11015_v8 = vadd.f32 %v10556_v30, %v9542_v23  ;;  %v14494_v18 = vld [vmem:[#allocation3_spill] sm:$0xff]  ;;  %v6713_v6 = vmul.f32 -1.442695, %v10969_v25  ;;  %v7584_v61 = vpop.eup %7583 }
 0x31f   : > { %14485 = vst [vmem:[#allocation169_spill] sm:$0xff] %v10992_v58  ;;  %14489 = vst [vmem:[#allocation116_spill] sm:$0xff] %v11001_v63  ;;  %v2376_v58 = vadd.f32 1.0, %v7574_v21  ;;  %3432 = vmatmul.mubr.bf16.gmra.mrb[116].mxu0 %v14493_v55  ;;  %3675 = vmatmul.mubr.bf16.gmra.mrb[116].mxu1 %v14493_v55  ;;  %v11019_v12 = vmul.f32 %v10884_v10, %v14494_v18  ;;  %v11026_v21 = vadd.f32 %v10558_v1, %v9547_v17  ;;  %v7059_v10 = vld [vmem:[%s13866_s6 + $0x150] sm:$0xff]   ;;  %v14496_v55 = vld [vmem:[#allocation67_spill] sm:$0xff] }
 0x320   : > { %14487 = vst [vmem:[#allocation61_spill] sm:$0xff] %v10996_v39  ;;  %14490 = vst [vmem:[#allocation170_spill] sm:$0xff] %v11005_v46  ;;  %3441 = vmatprep.mubr.bf16.mxu0 %v14232_v28  ;;  %3684 = vmatprep.mubr.bf16.mxu1 %v14232_v28  ;;  %7603 = vpow2.f32 %v6692_v53  ;;  %v6696_v30 = vmul.f32 -1.442695, %v10980_v26  ;;  %v11030_v0 = vmul.f32 -1.442695, %v10984_v27  ;;  %v7586_v53 = vpop.eup %7585  ;;  %v11044_v18 = vmul.f32 %v10894_v60, %v14496_v55 }
 0x321   : > { %14492 = vst [vmem:[#allocation64_spill] sm:$0xff] %v11009_v29  ;;  %14495 = vst [vmem:[#allocation10_spill] sm:$0xff] %v11019_v12  ;;  %v7060_v1 = vld [vmem:[%s13866_s6 + $0x1d0] sm:$0xff]   ;;  %7605 = vpow2.f32 %v6694_v56  ;;  %v11047_v27 = vmul.f32 -1.442695, %v11001_v63  ;;  %v14498_v48 = vld [vmem:[#allocation117_spill] sm:$0xff]  ;;  %5542 = vmatprep.subr.bf16.mxu1 %v14232_v28  ;;  %v7588_v16 = vpop.eup %7587  ;;  %v11056_v26 = vmul.f32 %v7572_v19, %v10585_v62  ;;  %v11067_v62 = vmul.f32 %v7586_v53, %v10667_v9 }
 0x322   : > { %14497 = vst [vmem:[#allocation3_spill] sm:$0xff] %v11044_v18  ;;  %v11051_v47 = vadd.f32 %v14498_v48, %v9661_v5  ;;  %7607 = vrcp.f32 %v2376_v58  ;;  %v2378_v35 = vadd.f32 1.0, %v7582_v49  ;;  %v6715_v60 = vmul.f32 -1.442695, %v11015_v8  ;;  %v11059_v56 = vpop.eup %7589  ;;  %v14501_v58 = vld [vmem:[#allocation134_spill] sm:$0xff]  ;;  %5342 = vmatpush1.bf16.msra.mxu0 %v7059_v10  ;;  %5543 = vmatpush1.bf16.msra.mxu1 %v7060_v1  ;;  %v7062_v63 = vld [vmem:[%s13866_s6 + $0x1d8] sm:$0xff]  }
 0x323   : > { %14499 = vst [vmem:[#allocation67_spill] sm:$0xff] %v11056_v26  ;;  %7609 = vpow2.f32 %v6713_v6  ;;  %v6717_v55 = vmul.f32 -1.442695, %v11026_v21  ;;  %v7592_v46 = vpop.eup %7591  ;;  %14500 = vst [vmem:[#allocation117_spill] sm:$0xff] %v11067_v62  ;;  %v6719_v19 = vmul.f32 -1.442695, %v11034_v3  ;;  %v11072_v49 = vadd.f32 %v14501_v58, %v9547_v17  ;;  %5343 = vmatprep.subr.bf16.mxu0 %v14232_v28  ;;  %5544 = vmatprep.subr.bf16.mxu1 %v14232_v28 }
 0x324   : > { %7611 = vpow2.f32 %v6696_v30  ;;  %v7061_v6 = vld [vmem:[%s13866_s6 + $0x158] sm:$0xff]   ;;  %v7594_v30 = vpop.eup %7593  ;;  %v11081_v9 = vmul.f32 %v7588_v16, %v10677_v57  ;;  %v2397_v53 = vadd.f32 1.0, %v7584_v61  ;;  %v14503_v48 = vld [vmem:[#allocation11_spill] sm:$0xff]  ;;  %v14517_v18 = vld [vmem:[#allocation120_spill] sm:$0xff] }
 0x325   : > { %v7596_v58 = vpop.eup %7595  ;;  %7613 = vrcp.f32 %v2378_v35  ;;  %v11092_v57 = vmul.f32 %v7594_v30, %v10722_v14  ;;  %v6721_v11 = vmul.f32 -1.442695, %v11072_v49  ;;  %v14544_v24 = vld [vmem:[#allocation18_spill] sm:$0xff]  ;;  %v14547_v34 = vld [vmem:[#allocation135_spill] sm:$0xff]  ;;  %v14570_v42 = vld [vmem:[#allocation41_spill] sm:$0xff] }
 0x326   : > { %14502 = vst [vmem:[#allocation134_spill] sm:$0xff] %v11081_v9  ;;  %v7598_v37 = vpop.eup %7597  ;;  %v11099_v10 = vmul.f32 %v7596_v58, %v10734_v2  ;;  %7615 = vpow2.f32 %v6715_v60  ;;  %5344 = vmatpush1.bf16.msra.mxu0 %v7061_v6  ;;  %5545 = vmatpush1.bf16.msra.mxu1 %v7062_v63  ;;  %v14515_v9 = vld [vmem:[#allocation14_spill] sm:$0xff]  ;;  %v11391_v40 = vadd.f32 %v14570_v42, %v9542_v23 }
 0x327   : > { %3442 = vmatmul.mubr.bf16.gmra.mrb[120].mxu0 %v14503_v48  ;;  %3685 = vmatmul.mubr.bf16.gmra.mrb[120].mxu1 %v14503_v48  ;;  %14504 = vst [vmem:[#allocation11_spill] sm:$0xff] %v11092_v57  ;;  %v7600_v30 = vpop.eup %7599  ;;  %7617 = vpow2.f32 %v6717_v55  ;;  %v2399_v63 = vadd.f32 1.0, %v7598_v37 }
 0x328   : > { %14506 = vst [vmem:[#allocation171_spill] sm:$0xff] %v11099_v10  ;;  %3451 = vmatprep.mubr.bf16.mxu0 %v14232_v28  ;;  %3694 = vmatprep.mubr.bf16.mxu1 %v14232_v28  ;;  %v11112_v1 = vpop.eup %7601  ;;  %7619 = vrcp.f32 %v2397_v53  ;;  %v2401_v35 = vadd.f32 1.0, %v7600_v30  ;;  %v2380_v53 = vadd.f32 1.0, %v7592_v46  ;;  %v14514_v30 = vld [vmem:[#allocation140_spill] sm:$0xff] }
 0x329   : > { %5345 = vmatprep.subr.bf16.mxu0 %v14232_v28  ;;  %5546 = vmatprep.subr.bf16.mxu1 %v14232_v28  ;;  %7621 = vpow2.f32 %v11030_v0  ;;  %v14512_v0 = vld [vmem:[#allocation65_spill] sm:$0xff]  ;;  %v11141_v62 = vadd.f32 %v14514_v30, %v9542_v23 }
 0x32a   : > { %v7604_v61 = vpop.eup %7603  ;;  %7623 = vrcp.f32 %v2401_v35  ;;  %v11133_v37 = vadd.f32 %v14512_v0, %v9652_v43 }
 0x32b   : > { %v7606_v60 = vpop.eup %7605  ;;  %7625 = vpow2.f32 %v6719_v19  ;;  %v2382_v19 = vadd.f32 1.0, %v7604_v61  ;;  %v14516_v61 = vld [vmem:[#allocation141_spill] sm:$0xff] }
 0x32c   : > { %v11129_v55 = vpop.eup %7607  ;;  %7627 = vpow2.f32 %v6721_v11  ;;  %v6702_v11 = vmul.f32 -1.442695, %v11051_v47  ;;  %v6704_v10 = vmul.f32 -1.442695, %v11133_v37  ;;  %v11157_v0 = vadd.f32 %v14516_v61, %v9547_v17 }
 0x32d   : > { %v7610_v35 = vpop.eup %7609  ;;  %7629 = vrcp.f32 %v2399_v63  ;;  %v11164_v61 = vadd.f32 %v14517_v18, %v9661_v5  ;;  %v2384_v18 = vadd.f32 1.0, %v7606_v60 }
 0x32e   : > { %v7612_v54 = vpop.eup %7611  ;;  %v2403_v46 = vadd.f32 1.0, %v7610_v35  ;;  %7631 = vrcp.f32 %v2380_v53  ;;  %v6725_v29 = vmul.f32 -1.442695, %v11157_v0 }
 0x32f   : > { %3452 = vmatmul.mubr.bf16.gmra.mrb[124].mxu0 %v14515_v9  ;;  %3695 = vmatmul.mubr.bf16.gmra.mrb[124].mxu1 %v14515_v9  ;;  %v11152_v30 = vpop.eup %7613  ;;  %v6723_v9 = vmul.f32 -1.442695, %v11141_v62  ;;  %v6706_v33 = vmul.f32 -1.442695, %v11164_v61 }
 0x330   : > { %3461 = vmatprep.mubr.bf16.mxu0 %v14232_v28  ;;  %3704 = vmatprep.mubr.bf16.mxu1 %v14232_v28  ;;  %7633 = vrcp.f32 %v2403_v46  ;;  %v7616_v57 = vpop.eup %7615 }
 0x331   : > { %7635 = vpow2.f32 %v11047_v27  ;;  %v7618_v63 = vpop.eup %7617  ;;  %v2405_v53 = vadd.f32 1.0, %v7616_v57  ;;  %v14518_v27 = vld [vmem:[#allocation63_spill] sm:$0xff] }
 0x332   : > { %7637 = vrcp.f32 %v2382_v19  ;;  %v7620_v35 = vpop.eup %7619  ;;  %v2407_v12 = vadd.f32 1.0, %v7618_v63  ;;  %v14520_v19 = vld [vmem:[#allocation123_spill] sm:$0xff] }
 0x333   : > { %7639 = vpow2.f32 %v6702_v11  ;;  %v7622_v26 = vpop.eup %7621  ;;  %v11167_v39 = vmul.f32 %v7620_v35, %v14518_v27  ;;  %v11171_v57 = vadd.f32 %v14520_v19, %v9652_v43  ;;  %v14523_v35 = vld [vmem:[#allocation143_spill] sm:$0xff] }
 0x334   : > { %7641 = vpow2.f32 %v6704_v10  ;;  %v7624_v46 = vpop.eup %7623  ;;  %v14522_v10 = vld [vmem:[#allocation15_spill] sm:$0xff]  ;;  %v11182_v27 = vadd.f32 %v14523_v35, %v9542_v23  ;;  %v2388_v60 = vadd.f32 1.0, %v7622_v26  ;;  %v14525_v35 = vld [vmem:[#allocation124_spill] sm:$0xff] }
 0x335   : > { %7643 = vpow2.f32 %v6723_v9  ;;  %v7626_v32 = vpop.eup %7625  ;;  %14519 = vst [vmem:[#allocation65_spill] sm:$0xff] %v11167_v39  ;;  %v11174_v11 = vmul.f32 %v7624_v46, %v10905_v15  ;;  %v2386_v15 = vadd.f32 1.0, %v7612_v54  ;;  %v11195_v59 = vadd.f32 %v14525_v35, %v9661_v5  ;;  %v14529_v39 = vld [vmem:[#allocation148_spill] sm:$0xff] }
 0x336   : > { %7645 = vrcp.f32 %v2405_v53  ;;  %v7628_v63 = vpop.eup %7627  ;;  %v2409_v9 = vadd.f32 1.0, %v7626_v32  ;;  %v14524_v32 = vld [vmem:[#allocation144_spill] sm:$0xff]  ;;  %v6708_v46 = vmul.f32 -1.442695, %v11171_v57  ;;  %v11209_v35 = vadd.f32 %v14529_v39, %v9542_v23 }
 0x337   : > { %14521 = vst [vmem:[#allocation140_spill] sm:$0xff] %v11174_v11  ;;  %3462 = vmatmul.mubr.bf16.gmra.mrb[128].mxu0 %v14522_v10  ;;  %3705 = vmatmul.mubr.bf16.gmra.mrb[128].mxu1 %v14522_v10  ;;  %7647 = vrcp.f32 %v2407_v12  ;;  %v7630_v19 = vpop.eup %7629  ;;  %v2411_v58 = vadd.f32 1.0, %v7628_v63  ;;  %v11190_v12 = vadd.f32 %v14524_v32, %v9547_v17  ;;  %v14526_v63 = vld [vmem:[#allocation165_spill] sm:$0xff]  ;;  %v6710_v44 = vmul.f32 -1.442695, %v11195_v59 }
 0x338   : > { %3471 = vmatprep.mubr.bf16.mxu0 %v14232_v28  ;;  %3714 = vmatprep.mubr.bf16.mxu1 %v14232_v28  ;;  %7649 = vpow2.f32 %v6725_v29  ;;  %v11186_v53 = vpop.eup %7631  ;;  %v11198_v29 = vmul.f32 %v7630_v19, %v14526_v63  ;;  %v14530_v63 = vld [vmem:[#allocation16_spill] sm:$0xff] }
 0x339   : > { %7651 = vrcp.f32 %v2409_v9  ;;  %v6727_v9 = vmul.f32 -1.442695, %v11182_v27  ;;  %v6729_v19 = vmul.f32 -1.442695, %v11190_v12 }
 0x33a   : > { %v7634_v10 = vpop.eup %7633  ;;  %7653 = vrcp.f32 %v2411_v58  ;;  %14527 = vst [vmem:[#allocation14_spill] sm:$0xff] %v11198_v29 }
 0x33b   : > { %v7636_v54 = vpop.eup %7635  ;;  %7655 = vrcp.f32 %v2384_v18  ;;  %v11201_v26 = vmul.f32 %v7634_v10, %v10969_v25 }
 0x33c   : > { %v11204_v32 = vpop.eup %7637  ;;  %7657 = vrcp.f32 %v2386_v15  ;;  %v2390_v10 = vadd.f32 1.0, %v7636_v54  ;;  %v14531_v15 = vld [vmem:[#allocation150_spill] sm:$0xff]  ;;  %v6731_v54 = vmul.f32 -1.442695, %v11209_v35 }
 0x33d   : > { %14528 = vst [vmem:[#allocation141_spill] sm:$0xff] %v11201_v26  ;;  %v7640_v58 = vpop.eup %7639  ;;  %7659 = vrcp.f32 %v2388_v60  ;;  %v11218_v11 = vadd.f32 %v14531_v15, %v9547_v17  ;;  %v14532_v60 = vld [vmem:[#allocation127_spill] sm:$0xff]  ;;  %v14533_v15 = vld [vmem:[#allocation152_spill] sm:$0xff] }
 0x33e   : > { %v7642_v25 = vpop.eup %7641  ;;  %7661 = vpow2.f32 %v6706_v33  ;;  %v11223_v48 = vadd.f32 %v14532_v60, %v9652_v43  ;;  %v2392_v18 = vadd.f32 1.0, %v7640_v58  ;;  %v11230_v29 = vadd.f32 %v14533_v15, %v9542_v23 }
 0x33f   : > { %3472 = vmatmul.mubr.bf16.gmra.mrb[132].mxu0 %v14530_v63  ;;  %3715 = vmatmul.mubr.bf16.gmra.mrb[132].mxu1 %v14530_v63  ;;  %v7644_v39 = vpop.eup %7643  ;;  %7663 = vpow2.f32 %v6727_v9  ;;  %v6733_v60 = vmul.f32 -1.442695, %v11218_v11  ;;  %v2394_v52 = vadd.f32 1.0, %v7642_v25 }
 0x340   : > { %3481 = vmatprep.mubr.bf16.mxu0 %v14232_v28  ;;  %3724 = vmatprep.mubr.bf16.mxu1 %v14232_v28  ;;  %v7646_v33 = vpop.eup %7645  ;;  %7665 = vpow2.f32 %v6708_v46  ;;  %v6712_v6 = vmul.f32 -1.442695, %v11223_v48 }
 0x341   : > { %v7648_v63 = vpop.eup %7647  ;;  %7667 = vpow2.f32 %v6729_v19  ;;  %v11235_v46 = vmul.f32 %v7646_v33, %v11015_v8  ;;  %v14536_v19 = vld [vmem:[#allocation153_spill] sm:$0xff]  ;;  %v6735_v8 = vmul.f32 -1.442695, %v11230_v29 }
 0x342   : > { %v7650_v26 = vpop.eup %7649  ;;  %7669 = vrcp.f32 %v2390_v10  ;;  %v11242_v15 = vadd.f32 %v14536_v19, %v9547_v17  ;;  %v11247_v25 = vmul.f32 %v7648_v63, %v11026_v21  ;;  %v14540_v21 = vld [vmem:[#allocation128_spill] sm:$0xff]  ;;  %v14541_v19 = vld [vmem:[#allocation131_spill] sm:$0xff] }
 0x343   : > { %v7652_v9 = vpop.eup %7651  ;;  %7671 = vpow2.f32 %v6710_v44  ;;  %14534 = vst [vmem:[#allocation120_spill] sm:$0xff] %v11235_v46  ;;  %v2415_v63 = vadd.f32 1.0, %v7650_v26  ;;  %v14543_v26 = vld [vmem:[#allocation68_spill] sm:$0xff] }
 0x344   : > { %v7654_v36 = vpop.eup %7653  ;;  %v11238_v58 = vmul.f32 %v7652_v9, %v11034_v3  ;;  %7673 = vpow2.f32 %v6731_v54  ;;  %14537 = vst [vmem:[#allocation123_spill] sm:$0xff] %v11247_v25  ;;  %v2413_v54 = vadd.f32 1.0, %v7644_v39  ;;  %v14539_v9 = vld [vmem:[#allocation17_spill] sm:$0xff]  ;;  %v11280_v25 = vadd.f32 %v14543_v26, %v9652_v43  ;;  %v7063_v26 = vld [vmem:[%s13866_s6 + $0x160] sm:$0xff]  }
 0x345   : > { %v11244_v10 = vpop.eup %7655  ;;  %7675 = vrcp.f32 %v2392_v18  ;;  %v11250_v44 = vmul.f32 %v7654_v36, %v11072_v49  ;;  %v11263_v36 = vadd.f32 %v14540_v21, %v9661_v5  ;;  %v6737_v21 = vmul.f32 -1.442695, %v11242_v15  ;;  %5346 = vmatpush1.bf16.msra.mxu0 %v7063_v26 }
 0x346   : > { %14535 = vst [vmem:[#allocation63_spill] sm:$0xff] %v11238_v58  ;;  %v11253_v33 = vpop.eup %7657  ;;  %7677 = vpow2.f32 %v6733_v60  ;;  %v11271_v60 = vadd.f32 %v14541_v19, %v9652_v43  ;;  %5347 = vmatprep.subr.bf16.mxu0 %v14232_v28  ;;  %v11314_v26 = vadd.f32 %v14547_v34, %v9661_v5 }
 0x347   : > { %14538 = vst [vmem:[#allocation15_spill] sm:$0xff] %v11250_v44  ;;  %3482 = vmatmul.mubr.bf16.gmra.mrb[136].mxu0 %v14539_v9  ;;  %3725 = vmatmul.mubr.bf16.gmra.mrb[136].mxu1 %v14539_v9  ;;  %v11259_v18 = vpop.eup %7659  ;;  %7679 = vrcp.f32 %v2394_v52  ;;  %v14542_v52 = vld [vmem:[#allocation132_spill] sm:$0xff]  ;;  %v6714_v46 = vmul.f32 -1.442695, %v11263_v36 }
 0x348   : > { %3491 = vmatprep.mubr.bf16.mxu0 %v14232_v28  ;;  %3734 = vmatprep.mubr.bf16.mxu1 %v14232_v28  ;;  %v7662_v39 = vpop.eup %7661  ;;  %7681 = vpow2.f32 %v6712_v6  ;;  %v11275_v3 = vadd.f32 %v14542_v52, %v9661_v5  ;;  %v6716_v58 = vmul.f32 -1.442695, %v11271_v60 }
 0x349   : > { %v7664_v9 = vpop.eup %7663  ;;  %7683 = vpow2.f32 %v6735_v8 }
 0x34a   : > { %v7666_v49 = vpop.eup %7665  ;;  %7685 = vrcp.f32 %v2413_v54  ;;  %v2417_v44 = vadd.f32 1.0, %v7664_v9  ;;  %v6718_v38 = vmul.f32 -1.442695, %v11275_v3  ;;  %v7064_v54 = vld [vmem:[%s13866_s6 + $0x1e0] sm:$0xff]  }
 0x34b   : > { %v7668_v6 = vpop.eup %7667  ;;  %7687 = vrcp.f32 %v2415_v63  ;;  %v6720_v63 = vmul.f32 -1.442695, %v11280_v25  ;;  %5547 = vmatpush1.bf16.msra.mxu1 %v7064_v54 }
 0x34c   : > { %v11283_v19 = vpop.eup %7669  ;;  %7689 = vrcp.f32 %v2417_v44  ;;  %v2419_v52 = vadd.f32 1.0, %v7668_v6  ;;  %v2396_v6 = vadd.f32 1.0, %v7662_v39  ;;  %v14546_v39 = vld [vmem:[#allocation12_spill] sm:$0xff]  ;;  %5548 = vmatprep.subr.bf16.mxu1 %v14232_v28 }
 0x34d   : > { %v7672_v8 = vpop.eup %7671  ;;  %7691 = vpow2.f32 %v6737_v21 }
 0x34e   : > { %v7674_v9 = vpop.eup %7673  ;;  %7693 = vrcp.f32 %v2419_v52 }
 0x34f   : > { %3492 = vmatmul.mubr.bf16.gmra.mrb[140].mxu0 %v14544_v24  ;;  %3735 = vmatmul.mubr.bf16.gmra.mrb[140].mxu1 %v14544_v24  ;;  %v11296_v44 = vpop.eup %7675  ;;  %7695 = vpow2.f32 %v6714_v46  ;;  %v2421_v2 = vadd.f32 1.0, %v7674_v9  ;;  %v2398_v24 = vadd.f32 1.0, %v7666_v49  ;;  %v11308_v46 = vadd.f32 %v14546_v39, %v9547_v17  ;;  %v14548_v39 = vld [vmem:[#allocation90_spill] sm:$0xff] }
 0x350   : > { %3501 = vmatprep.mubr.bf16.mxu0 %v14232_v28  ;;  %3744 = vmatprep.mubr.bf16.mxu1 %v14232_v28  ;;  %v7678_v21 = vpop.eup %7677  ;;  %7697 = vpow2.f32 %v6716_v58  ;;  %v6739_v49 = vmul.f32 -1.442695, %v11302_v41  ;;  %v11319_v31 = vadd.f32 %v14548_v39, %v9542_v23 }
 0x351   : > { %v11304_v52 = vpop.eup %7679  ;;  %7699 = vpow2.f32 %v6718_v38  ;;  %v2423_v54 = vadd.f32 1.0, %v7678_v21  ;;  %v14550_v21 = vld [vmem:[#allocation19_spill] sm:$0xff] }
 0x352   : > { %v7682_v58 = vpop.eup %7681  ;;  %7701 = vpow2.f32 %v6720_v63  ;;  %v6741_v63 = vmul.f32 -1.442695, %v11308_v46 }
 0x353   : > { %v7684_v9 = vpop.eup %7683  ;;  %7703 = vrcp.f32 %v2396_v6  ;;  %v14549_v6 = vld [vmem:[#allocation109_spill] sm:$0xff]  ;;  %v2402_v22 = vadd.f32 1.0, %v7682_v58 }
 0x354   : > { %v7686_v14 = vpop.eup %7685  ;;  %7705 = vrcp.f32 %v2421_v2  ;;  %v2425_v38 = vadd.f32 1.0, %v7684_v9  ;;  %v11324_v34 = vadd.f32 %v14549_v6, %v9547_v17  ;;  %v2400_v9 = vadd.f32 1.0, %v7672_v8 }
 0x355   : > { %v7688_v13 = vpop.eup %7687  ;;  %7707 = vrcp.f32 %v2398_v24  ;;  %v11329_v4 = vmul.f32 %v7686_v14, %v11141_v62  ;;  %v14558_v62 = vld [vmem:[#allocation139_spill] sm:$0xff] }
 0x356   : > { %v7690_v16 = vpop.eup %7689  ;;  %7709 = vrcp.f32 %v2425_v38  ;;  %v6722_v38 = vmul.f32 -1.442695, %v11314_v26  ;;  %v11339_v8 = vmul.f32 %v7688_v13, %v11157_v0  ;;  %v14564_v13 = vld [vmem:[#allocation145_spill] sm:$0xff] }
 0x357   : > { %3502 = vmatmul.mubr.bf16.gmra.mrb[144].mxu0 %v14550_v21  ;;  %3745 = vmatmul.mubr.bf16.gmra.mrb[144].mxu1 %v14550_v21  ;;  %v7692_v2 = vpop.eup %7691  ;;  %14551 = vst [vmem:[#allocation143_spill] sm:$0xff] %v11329_v4  ;;  %v11332_v39 = vmul.f32 %v7690_v16, %v11182_v27  ;;  %7711 = vrcp.f32 %v2423_v54  ;;  %v6743_v21 = vmul.f32 -1.442695, %v11319_v31  ;;  %v6745_v27 = vmul.f32 -1.442695, %v11324_v34 }
 0x358   : > { %3511 = vmatprep.mubr.bf16.mxu0 %v14232_v28  ;;  %3754 = vmatprep.mubr.bf16.mxu1 %v14232_v28  ;;  %v7694_v24 = vpop.eup %7693  ;;  %v2427_v6 = vadd.f32 1.0, %v7692_v2  ;;  %7713 = vpow2.f32 %v6739_v49  ;;  %14553 = vst [vmem:[#allocation124_spill] sm:$0xff] %v11339_v8  ;;  %v14555_v2 = vld [vmem:[#allocation138_spill] sm:$0xff]  ;;  %v11369_v8 = vadd.f32 %v14564_v13, %v9652_v43 }
 0x359   : > { %14552 = vst [vmem:[#allocation144_spill] sm:$0xff] %v11332_v39  ;;  %v7696_v20 = vpop.eup %7695  ;;  %v11344_v16 = vmul.f32 %v7694_v24, %v11190_v12  ;;  %7715 = vpow2.f32 %v6741_v63  ;;  %v14556_v49 = vld [vmem:[#allocation170_spill] sm:$0xff]  ;;  %v11355_v12 = vmul.f32 %v11059_v56, %v14558_v62  ;;  %v7066_v56 = vld [vmem:[%s13866_s6 + $0x1e8] sm:$0xff]   ;;  %v14565_v62 = vld [vmem:[#allocation137_spill] sm:$0xff] }
 0x35a   : > { %v7698_v14 = vpop.eup %7697  ;;  %7717 = vrcp.f32 %v2427_v6  ;;  %v11349_v45 = vmul.f32 %v14556_v49, %v14555_v2  ;;  %v2404_v63 = vadd.f32 1.0, %v7696_v20  ;;  %v14560_v24 = vld [vmem:[#allocation142_spill] sm:$0xff]  ;;  %v14561_v2 = vld [vmem:[#allocation136_spill] sm:$0xff]  ;;  %v7065_v20 = vld [vmem:[%s13866_s6 + $0x168] sm:$0xff]   ;;  %5549 = vmatpush1.bf16.msra.mxu1 %v7066_v56  ;;  %v6728_v42 = vmul.f32 -1.442695, %v11369_v8 }
 0x35b   : > { %14554 = vst [vmem:[#allocation165_spill] sm:$0xff] %v11344_v16  ;;  %v7700_v54 = vpop.eup %7699  ;;  %7719 = vrcp.f32 %v2400_v9  ;;  %14559 = vst [vmem:[#allocation16_spill] sm:$0xff] %v11355_v12  ;;  %v11359_v6 = vadd.f32 %v14560_v24, %v9652_v43  ;;  %v14562_v49 = vld [vmem:[#allocation168_spill] sm:$0xff]  ;;  %v2406_v58 = vadd.f32 1.0, %v7698_v14  ;;  %v14566_v24 = vld [vmem:[#allocation169_spill] sm:$0xff]  ;;  %5348 = vmatpush1.bf16.msra.mxu0 %v7065_v20  ;;  %5550 = vmatprep.subr.bf16.mxu1 %v14232_v28 }
 0x35c   : > { %14557 = vst [vmem:[#allocation148_spill] sm:$0xff] %v11349_v45  ;;  %v7702_v0 = vpop.eup %7701  ;;  %7721 = vpow2.f32 %v6722_v38  ;;  %v11365_v9 = vmul.f32 %v14562_v49, %v14561_v2  ;;  %v11379_v16 = vmul.f32 %v14566_v24, %v14565_v62  ;;  %v2408_v2 = vadd.f32 1.0, %v7700_v54  ;;  %v14568_v14 = vld [vmem:[#allocation146_spill] sm:$0xff]  ;;  %5349 = vmatprep.subr.bf16.mxu0 %v14232_v28  ;;  %v14573_v56 = vld [vmem:[#allocation147_spill] sm:$0xff] }
 0x35d   : > { %v11361_v4 = vpop.eup %7703  ;;  %7723 = vpow2.f32 %v6743_v21  ;;  %v11383_v49 = vadd.f32 %v14568_v14, %v9661_v5  ;;  %v14569_v21 = vld [vmem:[#allocation20_spill] sm:$0xff]  ;;  %v2410_v39 = vadd.f32 1.0, %v7702_v0 }
 0x35e   : > { %14563 = vst [vmem:[#allocation150_spill] sm:$0xff] %v11365_v9  ;;  %v7706_v38 = vpop.eup %7705  ;;  %14567 = vst [vmem:[#allocation127_spill] sm:$0xff] %v11379_v16  ;;  %7725 = vpow2.f32 %v6745_v27  ;;  %v6724_v27 = vmul.f32 -1.442695, %v11359_v6  ;;  %v14576_v16 = vld [vmem:[#allocation100_spill] sm:$0xff]  ;;  %v14598_v9 = vld [vmem:[#allocation45_spill] sm:$0xff] }
 0x35f   : > { %3512 = vmatmul.mubr.bf16.gmra.mrb[148].mxu0 %v14569_v21  ;;  %3755 = vmatmul.mubr.bf16.gmra.mrb[148].mxu1 %v14569_v21  ;;  %v11387_v13 = vpop.eup %7707  ;;  %7727 = vrcp.f32 %v2402_v22  ;;  %v11402_v24 = vmul.f32 %v7706_v38, %v11209_v35  ;;  %v6730_v35 = vmul.f32 -1.442695, %v11383_v49  ;;  %v6747_v21 = vmul.f32 -1.442695, %v11391_v40 }
 0x360   : > { %3521 = vmatprep.mubr.bf16.mxu0 %v14232_v28  ;;  %3764 = vmatprep.mubr.bf16.mxu1 %v14232_v28  ;;  %v7710_v54 = vpop.eup %7709  ;;  %7729 = vrcp.f32 %v2404_v63  ;;  %v7067_v63 = vld [vmem:[%s13866_s6 + $0x170] sm:$0xff]   ;;  %v11426_v12 = vmul.f32 %v11152_v30, %v14576_v16  ;;  %v14582_v16 = vld [vmem:[#allocation159_spill] sm:$0xff] }
 0x361   : > { %v7712_v0 = vpop.eup %7711  ;;  %7731 = vrcp.f32 %v2406_v58  ;;  %14571 = vst [vmem:[#allocation152_spill] sm:$0xff] %v11402_v24  ;;  %v11405_v14 = vmul.f32 %v7710_v54, %v11230_v29  ;;  %v11414_v58 = vmul.f32 %v11112_v1, %v14573_v56  ;;  %v14575_v54 = vld [vmem:[#allocation122_spill] sm:$0xff]  ;;  %v14578_v1 = vld [vmem:[#allocation89_spill] sm:$0xff]  ;;  %5350 = vmatpush1.bf16.msra.mxu0 %v7067_v63 }
 0x362   : > { %v7714_v20 = vpop.eup %7713  ;;  %7733 = vrcp.f32 %v2408_v2  ;;  %v11422_v22 = vadd.f32 %v14575_v54, %v9547_v17  ;;  %14577 = vst [vmem:[#allocation128_spill] sm:$0xff] %v11426_v12  ;;  %v11430_v2 = vmul.f32 %v11186_v53, %v14578_v1  ;;  %v11435_v29 = vmul.f32 %v7712_v0, %v11218_v11  ;;  %5351 = vmatprep.subr.bf16.mxu0 %v14232_v28  ;;  %v14587_v0 = vld [vmem:[#allocation22_spill] sm:$0xff] }
 0x363   : > { %14572 = vst [vmem:[#allocation153_spill] sm:$0xff] %v11405_v14  ;;  %14574 = vst [vmem:[#allocation17_spill] sm:$0xff] %v11414_v58  ;;  %v7716_v38 = vpop.eup %7715  ;;  %7735 = vrcp.f32 %v2410_v39  ;;  %v2429_v39 = vadd.f32 1.0, %v7714_v20  ;;  %v11443_v53 = vmul.f32 %v11129_v55, %v14582_v16  ;;  %v14588_v55 = vld [vmem:[#allocation154_spill] sm:$0xff] }
 0x364   : > { %v7718_v62 = vpop.eup %7717  ;;  %14579 = vst [vmem:[#allocation131_spill] sm:$0xff] %v11430_v2  ;;  %7737 = vpow2.f32 %v6724_v27  ;;  %14580 = vst [vmem:[#allocation132_spill] sm:$0xff] %v11435_v29  ;;  %v2431_v24 = vadd.f32 1.0, %v7716_v38  ;;  %v14584_v27 = vld [vmem:[#allocation6_spill] sm:$0xff]  ;;  %v11459_v20 = vadd.f32 %v14588_v55, %v9652_v43  ;;  %v6749_v38 = vmul.f32 -1.442695, %v11422_v22 }
 0x365   : > { %v11432_v56 = vpop.eup %7719  ;;  %7739 = vpow2.f32 %v6728_v42  ;;  %v11438_v54 = vmul.f32 %v7718_v62, %v11242_v15  ;;  %14583 = vst [vmem:[#allocation18_spill] sm:$0xff] %v11443_v53  ;;  %v11447_v63 = vadd.f32 %v14584_v27, %v9661_v5  ;;  %v14585_v42 = vld [vmem:[#allocation151_spill] sm:$0xff]  ;;  %v7068_v27 = vld [vmem:[%s13866_s6 + $0x1f0] sm:$0xff]  }
 0x366   : > { %v7722_v30 = vpop.eup %7721  ;;  %7741 = vpow2.f32 %v6730_v35  ;;  %v11451_v11 = vadd.f32 %v14585_v42, %v9652_v43  ;;  %v14589_v55 = vld [vmem:[#allocation55_spill] sm:$0xff]  ;;  %v14596_v2 = vld [vmem:[#allocation112_spill] sm:$0xff]  ;;  %v6736_v12 = vmul.f32 -1.442695, %v11459_v20  ;;  %5551 = vmatpush1.bf16.msra.mxu1 %v7068_v27 }
 0x367   : > { %14581 = vst [vmem:[#allocation68_spill] sm:$0xff] %v11438_v54  ;;  %3522 = vmatmul.mubr.bf16.gmra.mrb[152].mxu0 %v14587_v0  ;;  %3765 = vmatmul.mubr.bf16.gmra.mrb[152].mxu1 %v14587_v0  ;;  %v7724_v15 = vpop.eup %7723  ;;  %7743 = vpow2.f32 %v6747_v21  ;;  %v2412_v0 = vadd.f32 1.0, %v7722_v30  ;;  %v11472_v62 = vadd.f32 %v14589_v55, %v9542_v23  ;;  %v14593_v54 = vld [vmem:[#allocation157_spill] sm:$0xff]  ;;  %v11503_v58 = vmul.f32 %v11259_v18, %v14596_v2 }
 0x368   : > { %14586 = vst [vmem:[#allocation44_spill] sm:$0xff] %v11451_v11  ;;  %3531 = vmatprep.mubr.bf16.mxu0 %v14232_v28  ;;  %3774 = vmatprep.mubr.bf16.mxu1 %v14232_v28  ;;  %v7726_v35 = vpop.eup %7725  ;;  %7745 = vrcp.f32 %v2429_v39  ;;  %v2433_v1 = vadd.f32 1.0, %v7724_v15  ;;  %v6726_v39 = vmul.f32 -1.442695, %v11447_v63  ;;  %v14590_v15 = vld [vmem:[#allocation166_spill] sm:$0xff]  ;;  %v11493_v14 = vadd.f32 %v14593_v54, %v9661_v5 }
 0x369   : > { %v11468_v42 = vpop.eup %7727  ;;  %7747 = vrcp.f32 %v2431_v24  ;;  %v2435_v21 = vadd.f32 1.0, %v7726_v35  ;;  %v11479_v16 = vadd.f32 %v14590_v15, %v9547_v17  ;;  %v6732_v24 = vmul.f32 -1.442695, %v11451_v11  ;;  %v14591_v35 = vld [vmem:[#allocation7_spill] sm:$0xff]  ;;  %v14594_v15 = vld [vmem:[#allocation2_spill] sm:$0xff]  ;;  %14597 = vst [vmem:[#allocation90_spill] sm:$0xff] %v11503_v58  ;;  %5552 = vmatprep.subr.bf16.mxu1 %v14232_v28 }
 0x36a   : > { %v11474_v29 = vpop.eup %7729  ;;  %7749 = vrcp.f32 %v2433_v1  ;;  %v11489_v55 = vadd.f32 %v14591_v35, %v9661_v5  ;;  %v11499_v53 = vmul.f32 %v11253_v33, %v14594_v15  ;;  %v6751_v54 = vmul.f32 -1.442695, %v11472_v62  ;;  %v14600_v15 = vld [vmem:[#allocation54_spill] sm:$0xff] }
 0x36b   : > { %v11484_v30 = vpop.eup %7731  ;;  %7751 = vrcp.f32 %v2435_v21  ;;  %v11512_v33 = vmul.f32 %v11204_v32, %v14598_v9  ;;  %v11516_v18 = vmul.f32 %v11244_v10, %v14600_v15  ;;  %v6753_v2 = vmul.f32 -1.442695, %v11479_v16  ;;  %v14603_v32 = vld [vmem:[#allocation88_spill] sm:$0xff] }
 0x36c   : > { %14592 = vst [vmem:[#allocation12_spill] sm:$0xff] %v11489_v55  ;;  %v11495_v1 = vpop.eup %7733  ;;  %14595 = vst [vmem:[#allocation135_spill] sm:$0xff] %v11499_v53  ;;  %7753 = vpow2.f32 %v6749_v38  ;;  %v14602_v38 = vld [vmem:[#allocation25_spill] sm:$0xff]  ;;  %v6738_v45 = vmul.f32 -1.442695, %v11493_v14  ;;  %v11525_v9 = vadd.f32 %v14603_v32, %v9652_v43 }
 0x36d   : > { %v11506_v35 = vpop.eup %7735  ;;  %7755 = vrcp.f32 %v2412_v0  ;;  %14599 = vst [vmem:[#allocation109_spill] sm:$0xff] %v11512_v33  ;;  %14601 = vst [vmem:[#allocation19_spill] sm:$0xff] %v11516_v18  ;;  %v6734_v0 = vmul.f32 -1.442695, %v11489_v55 }
 0x36e   : > { %v7738_v21 = vpop.eup %7737  ;;  %7757 = vpow2.f32 %v6726_v39  ;;  %v14604_v39 = vld [vmem:[#allocation105_spill] sm:$0xff] }
 0x36f   : > { %3532 = vmatmul.mubr.bf16.gmra.mrb[156].mxu0 %v14602_v38  ;;  %3775 = vmatmul.mubr.bf16.gmra.mrb[156].mxu1 %v14602_v38  ;;  %v7740_v27 = vpop.eup %7739  ;;  %7759 = vpow2.f32 %v6732_v24  ;;  %v11531_v15 = vadd.f32 %v14604_v39, %v9652_v43  ;;  %v2414_v51 = vadd.f32 1.0, %v7738_v21  ;;  %v14605_v39 = vld [vmem:[#allocation164_spill] sm:$0xff]  ;;  %v11544_v24 = vmul.f32 %v11304_v52, %v11133_v37  ;;  %v14625_v38 = vld [vmem:[#allocation110_spill] sm:$0xff] }
 0x370   : > { %3541 = vmatprep.mubr.bf16.mxu0 %v14232_v28  ;;  %3784 = vmatprep.mubr.bf16.mxu1 %v14232_v28  ;;  %v7742_v10 = vpop.eup %7741  ;;  %7761 = vpow2.f32 %v6736_v12  ;;  %v2418_v50 = vadd.f32 1.0, %v7740_v27  ;;  %v6740_v12 = vmul.f32 -1.442695, %v11525_v9  ;;  %v11540_v55 = vadd.f32 %v14605_v39, %v9661_v5 }
 0x371   : > { %v7744_v7 = vpop.eup %7743  ;;  %7763 = vpow2.f32 %v6751_v54  ;;  %v2420_v23 = vadd.f32 1.0, %v7742_v10  ;;  %14606 = vst [vmem:[#allocation138_spill] sm:$0xff] %v11544_v24  ;;  %v11548_v54 = vmul.f32 %v11361_v4, %v11164_v61  ;;  %v6744_v21 = vmul.f32 -1.442695, %v11531_v15 }
 0x372   : > { %v7746_v32 = vpop.eup %7745  ;;  %7765 = vpow2.f32 %v6753_v2  ;;  %v11563_v4 = vmul.f32 %v11296_v44, %v11051_v47  ;;  %v11597_v44 = vmul.f32 %v11468_v42, %v11223_v48  ;;  %v14620_v48 = vld [vmem:[#allocation167_spill] sm:$0xff] }
 0x373   : > { %v7748_v17 = vpop.eup %7747  ;;  %7767 = vpow2.f32 %v6738_v45  ;;  %14607 = vst [vmem:[#allocation170_spill] sm:$0xff] %v11548_v54  ;;  %v14608_v45 = vld [vmem:[#allocation116_spill] sm:$0xff]  ;;  %v11556_v10 = vmul.f32 %v7746_v32, %v11302_v41  ;;  %v11611_v42 = vadd.f32 %v14620_v48, %v9661_v5 }
 0x374   : > { %v7750_v11 = vpop.eup %7749  ;;  %7769 = vpow2.f32 %v6734_v0  ;;  %v11553_v27 = vmul.f32 %v11283_v19, %v14608_v45  ;;  %14612 = vst [vmem:[#allocation168_spill] sm:$0xff] %v11563_v4  ;;  %v11566_v61 = vmul.f32 %v7748_v17, %v11308_v46  ;;  %v14615_v19 = vld [vmem:[#allocation26_spill] sm:$0xff]  ;;  %v6746_v17 = vmul.f32 -1.442695, %v11540_v55  ;;  %14618 = vst [vmem:[#allocation169_spill] sm:$0xff] %v11597_v44 }
 0x375   : > { %v7752_v2 = vpop.eup %7751  ;;  %7771 = vrcp.f32 %v2414_v51  ;;  %14610 = vst [vmem:[#allocation142_spill] sm:$0xff] %v11556_v10  ;;  %v11559_v39 = vmul.f32 %v7750_v11, %v11319_v31  ;;  %v14616_v31 = vld [vmem:[#allocation13_spill] sm:$0xff]  ;;  %v2437_v46 = vadd.f32 1.0, %v7744_v7 }
 0x376   : > { %14609 = vst [vmem:[#allocation139_spill] sm:$0xff] %v11553_v27  ;;  %v7754_v37 = vpop.eup %7753  ;;  %7773 = vrcp.f32 %v2418_v50  ;;  %14613 = vst [vmem:[#allocation145_spill] sm:$0xff] %v11566_v61  ;;  %v11569_v52 = vmul.f32 %v7752_v2, %v11324_v34  ;;  %v11577_v41 = vadd.f32 %v14616_v31, %v9661_v5  ;;  %v11601_v50 = vmul.f32 %v11474_v29, %v11263_v36 }
 0x377   : > { %14611 = vst [vmem:[#allocation136_spill] sm:$0xff] %v11559_v39  ;;  %3542 = vmatmul.mubr.bf16.gmra.mrb[160].mxu0 %v14615_v19  ;;  %3785 = vmatmul.mubr.bf16.gmra.mrb[160].mxu1 %v14615_v19  ;;  %v11573_v51 = vpop.eup %7755  ;;  %7775 = vrcp.f32 %v2420_v23  ;;  %v2439_v0 = vadd.f32 1.0, %v7754_v37  ;;  %v14617_v19 = vld [vmem:[#allocation126_spill] sm:$0xff]  ;;  %v7070_v37 = vld [vmem:[%s13866_s6 + $0x1f8] sm:$0xff]   ;;  %v11615_v29 = vmul.f32 %v11387_v13, %v11171_v57  ;;  %v11629_v57 = vadd.f32 %v14625_v38, %v9661_v5 }
 0x378   : > { %14614 = vst [vmem:[#allocation137_spill] sm:$0xff] %v11569_v52  ;;  %3551 = vmatprep.mubr.bf16.mxu0 %v14232_v28  ;;  %3794 = vmatprep.mubr.bf16.mxu1 %v14232_v28  ;;  %v7758_v47 = vpop.eup %7757  ;;  %7777 = vpow2.f32 %v6740_v12  ;;  %v6742_v45 = vmul.f32 -1.442695, %v11577_v41  ;;  %v11593_v31 = vadd.f32 %v14617_v19, %v9652_v43  ;;  %14619 = vst [vmem:[#allocation146_spill] sm:$0xff] %v11601_v50  ;;  %v14623_v23 = vld [vmem:[#allocation101_spill] sm:$0xff] }
 0x379   : > { %v7760_v11 = vpop.eup %7759  ;;  %7779 = vpow2.f32 %v6744_v21  ;;  %v7069_v21 = vld [vmem:[%s13866_s6 + $0x178] sm:$0xff]   ;;  %v2416_v19 = vadd.f32 1.0, %v7758_v47  ;;  %14621 = vst [vmem:[#allocation20_spill] sm:$0xff] %v11615_v29  ;;  %5553 = vmatpush1.bf16.msra.mxu1 %v7070_v37  ;;  %v11646_v37 = vmul.f32 %v11573_v51, %v11314_v26 }
 0x37a   : > { %v7762_v32 = vpop.eup %7761  ;;  %7781 = vpow2.f32 %v6746_v17  ;;  %5352 = vmatpush1.bf16.msra.mxu0 %v7069_v21  ;;  %6116 = vmatprep.subr.bf16.mxu1 %v14232_v28  ;;  %v6752_v38 = vmul.f32 -1.442695, %v11593_v31  ;;  %v11642_v21 = vmul.f32 %v11506_v35, %v11280_v25 }
 0x37b   : > { %v7764_v2 = vpop.eup %7763  ;;  %7783 = vrcp.f32 %v2437_v46  ;;  %v11619_v46 = vmul.f32 %v11432_v56, %v11195_v59  ;;  %5915 = vmatprep.subr.bf16.mxu0 %v14232_v28  ;;  %14627 = vst [vmem:[#allocation122_spill] sm:$0xff] %v11646_v37 }
 0x37c   : > { %v7766_v7 = vpop.eup %7765  ;;  %v2441_v12 = vadd.f32 1.0, %v7764_v2  ;;  %7785 = vrcp.f32 %v2439_v0  ;;  %v2422_v2 = vadd.f32 1.0, %v7760_v11  ;;  %v2426_v0 = vadd.f32 1.0, %v7762_v32  ;;  %14626 = vst [vmem:[#allocation147_spill] sm:$0xff] %v11642_v21 }
 0x37d   : > { %v7768_v17 = vpop.eup %7767  ;;  %v2443_v34 = vadd.f32 1.0, %v7766_v7  ;;  %14622 = vst [vmem:[#allocation41_spill] sm:$0xff] %v11619_v46  ;;  %v14624_v7 = vld [vmem:[#allocation47_spill] sm:$0xff] }
 0x37e   : > { %v7770_v36 = vpop.eup %7769  ;;  %7787 = vrcp.f32 %v2441_v12  ;;  %v11625_v48 = vadd.f32 %v14624_v7, %v9652_v43  ;;  %v2428_v13 = vadd.f32 1.0, %v7768_v17  ;;  %v6750_v17 = vmul.f32 -1.442695, %v11629_v57 }
 0x37f   : > { %3552 = vmatmul.mubr.bf16.gmra.mrb[164].mxu0 %v14623_v23  ;;  %3795 = vmatmul.mubr.bf16.gmra.mrb[164].mxu1 %v14623_v23  ;;  %v7772_v47 = vpop.eup %7771  ;;  %7789 = vrcp.f32 %v2443_v34  ;;  %v6754_v34 = vmul.f32 -1.442695, %v11611_v42  ;;  %v11655_v23 = vmul.f32 %v11495_v1, %v11275_v3 }
 0x380   : > { %v7774_v59 = vpop.eup %7773  ;;  %7791 = vpow2.f32 %v6742_v45  ;;  %v6748_v45 = vmul.f32 -1.442695, %v11625_v48 }
 0x381   : > { %v7776_v11 = vpop.eup %7775  ;;  %7793 = vrcp.f32 %v2416_v19  ;;  %14629 = vst [vmem:[#allocation89_spill] sm:$0xff] %v11655_v23 }
 0x382   : > { %7795 = vrcp.f32 %v2422_v2  ;;  %v7778_v32 = vpop.eup %7777  ;;  %v2424_v2 = vadd.f32 1.0, %v7770_v36 }
 0x383   : > { %7797 = vrcp.f32 %v2426_v0  ;;  %v7780_v12 = vpop.eup %7779  ;;  %v11651_v0 = vmul.f32 %v11484_v30, %v11271_v60 }
 0x384   : > { %7799 = vrcp.f32 %v2428_v13  ;;  %v7782_v19 = vpop.eup %7781  ;;  %v2434_v1 = vadd.f32 1.0, %v7780_v12 }
 0x385   : > { %7801 = vpow2.f32 %v6752_v38  ;;  %v7784_v7 = vpop.eup %7783  ;;  %14628 = vst [vmem:[#allocation100_spill] sm:$0xff] %v11651_v0 }
 0x386   : > { %7803 = vpow2.f32 %v6754_v34  ;;  %v7786_v25 = vpop.eup %7785  ;;  %v11662_v60 = vmul.f32 %v7784_v7, %v11391_v40  ;;  %v11676_v40 = vmul.f32 %v7774_v59, %v11369_v8  ;;  %v2430_v7 = vadd.f32 1.0, %v7778_v32 }
 0x387   : > { %7805 = vpow2.f32 %v6748_v45  ;;  %v11668_v13 = vmul.f32 %v7786_v25, %v11422_v22  ;;  %v2436_v45 = vadd.f32 1.0, %v7782_v19 }
 0x388   : > { %v7788_v26 = vpop.eup %7787  ;;  %7807 = vpow2.f32 %v6750_v17  ;;  %14630 = vst [vmem:[#allocation159_spill] sm:$0xff] %v11662_v60  ;;  %14634 = vst [vmem:[#allocation154_spill] sm:$0xff] %v11676_v40  ;;  %v14642_v17 = vld [vmem:[#allocation12_spill] sm:$0xff] }
 0x389   : > { %v7790_v36 = vpop.eup %7789  ;;  %7809 = vrcp.f32 %v2424_v2  ;;  %v11665_v30 = vmul.f32 %v7788_v26, %v11472_v62  ;;  %14632 = vst [vmem:[#allocation151_spill] sm:$0xff] %v11668_v13  ;;  %v11679_v62 = vmul.f32 %v7776_v11, %v11383_v49  ;;  %v11684_v26 = vmul.f32 %v7772_v47, %v11359_v6 }
 0x38a   : > { %v7792_v3 = vpop.eup %7791  ;;  %v11671_v38 = vmul.f32 %v7790_v36, %v11479_v16  ;;  %7811 = vrcp.f32 %v2434_v1 }
 0x38b   : > { %14631 = vst [vmem:[#allocation6_spill] sm:$0xff] %v11665_v30  ;;  %v7794_v34 = vpop.eup %7793  ;;  %14635 = vst [vmem:[#allocation55_spill] sm:$0xff] %v11679_v62  ;;  %v2432_v25 = vadd.f32 1.0, %v7792_v3  ;;  %7813 = vrcp.f32 %v2436_v45 }
 0x38c   : > { %14633 = vst [vmem:[#allocation22_spill] sm:$0xff] %v11671_v38  ;;  %v7796_v2 = vpop.eup %7795  ;;  %14636 = vst [vmem:[#allocation166_spill] sm:$0xff] %v11684_v26  ;;  %v11687_v19 = vmul.f32 %v7794_v34, %v11447_v63  ;;  %7815 = vrcp.f32 %v2430_v7  ;;  %v14640_v7 = vld [vmem:[#allocation44_spill] sm:$0xff] }
 0x38d   : > { %v7798_v12 = vpop.eup %7797  ;;  %7817 = vrcp.f32 %v2432_v25  ;;  %v11700_v22 = vmul.f32 %v7796_v2, %v14640_v7 }
 0x38e   : > { %v7800_v16 = vpop.eup %7799  ;;  %14637 = vst [vmem:[#allocation7_spill] sm:$0xff] %v11687_v19  ;;  %v11694_v63 = vmul.f32 %v7798_v12, %v11459_v20 }
 0x38f   : > { %v7802_v36 = vpop.eup %7801  ;;  %v11697_v1 = vmul.f32 %v7800_v16, %v11493_v14  ;;  %14641 = vst [vmem:[#allocation112_spill] sm:$0xff] %v11700_v22 }
 0x390   : > { %v7804_v8 = vpop.eup %7803  ;;  %v2442_v3 = vadd.f32 1.0, %v7802_v36  ;;  %14638 = vst [vmem:[#allocation157_spill] sm:$0xff] %v11694_v63 }
 0x391   : > { %v7806_v11 = vpop.eup %7805  ;;  %v2444_v47 = vadd.f32 1.0, %v7804_v8  ;;  %14639 = vst [vmem:[#allocation2_spill] sm:$0xff] %v11697_v1 }
 0x392   : > { %v7808_v32 = vpop.eup %7807  ;;  %v2438_v34 = vadd.f32 1.0, %v7806_v11  ;;  %7819 = vrcp.f32 %v2442_v3 }
 0x393   : > { %v7810_v6 = vpop.eup %7809  ;;  %v2440_v45 = vadd.f32 1.0, %v7808_v32  ;;  %7821 = vrcp.f32 %v2444_v47 }
 0x394   : > { %v11703_v49 = vmul.f32 %v7810_v6, %v14642_v17  ;;  %v7812_v25 = vpop.eup %7811  ;;  %7823 = vrcp.f32 %v2438_v34 }
 0x395   : > { %v7814_v14 = vpop.eup %7813  ;;  %7825 = vrcp.f32 %v2440_v45  ;;  %v11710_v2 = vmul.f32 %v7812_v25, %v11531_v15  ;;  %v3137_v25 = vld [vmem:[%s13865_s5 + $0x4] sm:$0xf] }
 0x396   : > { %14643 = vst [vmem:[#allocation45_spill] sm:$0xff] %v11703_v49  ;;  %v7816_v12 = vpop.eup %7815  ;;  %v11713_v17 = vmul.f32 %v7814_v14, %v11540_v55 }
 0x397   : > { %v7818_v16 = vpop.eup %7817  ;;  %14644 = vst [vmem:[#allocation54_spill] sm:$0xff] %v11710_v2  ;;  %v11716_v8 = vmul.f32 %v7816_v12, %v11525_v9 }
 0x398   : > { %14645 = vst [vmem:[#allocation25_spill] sm:$0xff] %v11713_v17  ;;  %v11719_v11 = vmul.f32 %v7818_v16, %v11577_v41  ;;  %v14652_v16 = vld [vmem:[#allocation23_spill] sm:$0xff] }
 0x399   : > { %14646 = vst [vmem:[#allocation88_spill] sm:$0xff] %v11716_v8 }
 0x39a   : > { %14647 = vst [vmem:[#allocation105_spill] sm:$0xff] %v11719_v11 }
 0x39c   : > { %v7820_v32 = vpop.eup %7819 }
 0x39d   : > { %v7822_v47 = vpop.eup %7821  ;;  %v11726_v45 = vmul.f32 %v7820_v32, %v11593_v31  ;;  %v14653_v32 = vld [vmem:[#allocation24_spill] sm:$0xff] }
 0x39e   : > { %v7824_v34 = vpop.eup %7823  ;;  %v11729_v55 = vmul.f32 %v7822_v47, %v11611_v42  ;;  %v1529_v14 = vpop.f32.mrb[80].mxu0 }
 0x39f   : > { %v7826_v15 = vpop.eup %7825  ;;  %14648 = vst [vmem:[#allocation164_spill] sm:$0xff] %v11726_v45  ;;  %v11732_v9 = vmul.f32 %v7824_v34, %v11625_v48  ;;  %v1772_v12 = vpop.f32.mrb[80].mxu1  ;;  %v11742_v31 = vadd.f32 %v1529_v14, %v14652_v16 }
 0x3a0   : > { %14649 = vst [vmem:[#allocation116_spill] sm:$0xff] %v11729_v55  ;;  %v11735_v41 = vmul.f32 %v7826_v15, %v11629_v57  ;;  %v11745_v42 = vadd.f32 %v1772_v12, %v14653_v32  ;;  %v1531_v47 = vpop.f32.mrb[81].mxu0  ;;  %v1774_v48 = vpop.f32.mrb[81].mxu1 }
 0x3a1   : > { %14650 = vst [vmem:[#allocation26_spill] sm:$0xff] %v11732_v9  ;;  %v11748_v34 = vadd.f32 %v1531_v47, %v9652_v43  ;;  %v11751_v57 = vadd.f32 %v1774_v48, %v9661_v5  ;;  %v1533_v15 = vpop.f32.mrb[82].mxu0  ;;  %v1776_v7 = vpop.f32.mrb[82].mxu1  ;;  %v6755_v14 = vmul.f32 -1.442695, %v11742_v31 }
 0x3a2   : > { %14651 = vst [vmem:[#allocation13_spill] sm:$0xff] %v11735_v41  ;;  %v6757_v6 = vmul.f32 -1.442695, %v11745_v42  ;;  %v11759_v12 = vadd.f32 %v1533_v15, %v14652_v16  ;;  %v11762_v3 = vadd.f32 %v1776_v7, %v14653_v32  ;;  %v1535_v47 = vpop.f32.mrb[83].mxu0  ;;  %v1778_v20 = vpop.f32.mrb[83].mxu1  ;;  %v14658_v16 = vld [vmem:[#allocation21_spill] sm:$0xff] }
 0x3a3   : > { %14654 = vst [vmem:[#allocation126_spill] sm:$0xff] %v11748_v34  ;;  %14655 = vst [vmem:[#allocation167_spill] sm:$0xff] %v11751_v57  ;;  %v6756_v48 = vmul.f32 -1.442695, %v11748_v34  ;;  %v6758_v36 = vmul.f32 -1.442695, %v11751_v57  ;;  %v11767_v59 = vadd.f32 %v1535_v47, %v9652_v43  ;;  %v11770_v51 = vadd.f32 %v1778_v20, %v9661_v5 }
 0x3a4   : > { %7827 = vpow2.f32 %v6755_v14  ;;  %v6759_v35 = vmul.f32 -1.442695, %v11759_v12  ;;  %v14659_v15 = vsub.s32 0, %v14658_v16  ;;  %v14660_v7 = vsub.s32 2, %v14658_v16 }
 0x3a5   : > { %14656 = vst [vmem:[#allocation101_spill] sm:$0xff] %v11767_v59  ;;  %14657 = vst [vmem:[#allocation47_spill] sm:$0xff] %v11770_v51  ;;  %7829 = vpow2.f32 %v6757_v6  ;;  %v6761_v13 = vmul.f32 -1.442695, %v11762_v3  ;;  %v14661_v43 = vsub.s32 1, %v14658_v16  ;;  %v14662_v5 = vsub.s32 3, %v14658_v16 }
 0x3a6   : > { %v11775_v56 = vrot.slane %v3137_v25, %v14659_v15  ;;  %v11779_v32 = vrot.slane %v3137_v25, %v14660_v7  ;;  %7831 = vpow2.f32 %v6756_v48  ;;  %v6760_v14 = vmul.f32 -1.442695, %v11767_v59 }
 0x3a7   : > { %v11784_v47 = vrot.slane %v3137_v25, %v14661_v43  ;;  %v11788_v20 = vrot.slane %v3137_v25, %v14662_v5  ;;  %7833 = vpow2.f32 %v6758_v36  ;;  %v6762_v15 = vmul.f32 -1.442695, %v11770_v51 }
 0x3a8   : > { %v3353_v38 = vpop.f32.mrb[84].mxu0  ;;  %v3596_v7 = vpop.f32.mrb[84].mxu1  ;;  %7835 = vpow2.f32 %v6759_v35 }
 0x3a9   : > { %v11793_v6 = vadd.f32 %v3353_v38, %v11775_v56  ;;  %v11796_v60 = vadd.f32 %v3596_v7, %v11779_v32  ;;  %v3355_v43 = vpop.f32.mrb[85].mxu0  ;;  %v3598_v30 = vpop.f32.mrb[85].mxu1  ;;  %7837 = vpow2.f32 %v6761_v13 }
 0x3aa   : > { %v11799_v25 = vadd.f32 %v3355_v43, %v11784_v47  ;;  %v11802_v48 = vadd.f32 %v3598_v30, %v11788_v20  ;;  %v3357_v36 = vpop.f32.mrb[86].mxu0  ;;  %v3600_v16 = vpop.f32.mrb[86].mxu1  ;;  %7839 = vpow2.f32 %v6760_v14 }
 0x3ab   : > { %v6795_v35 = vmul.f32 -1.442695, %v11793_v6  ;;  %v6797_v38 = vmul.f32 -1.442695, %v11796_v60  ;;  %v11807_v5 = vadd.f32 %v3357_v36, %v11775_v56  ;;  %v3359_v7 = vpop.f32.mrb[87].mxu0  ;;  %v3602_v41 = vpop.f32.mrb[87].mxu1  ;;  %7841 = vpow2.f32 %v6762_v15 }
 0x3ac   : > { %v6796_v13 = vmul.f32 -1.442695, %v11799_v25  ;;  %v6798_v43 = vmul.f32 -1.442695, %v11802_v48  ;;  %v11813_v22 = vadd.f32 %v3600_v16, %v11779_v32 }
 0x3ad   : > { %7843 = vpow2.f32 %v6795_v35  ;;  %v6799_v30 = vmul.f32 -1.442695, %v11807_v5 }
 0x3ae   : > { %7845 = vpow2.f32 %v6797_v38  ;;  %v7828_v55 = vpop.eup %7827 }
 0x3af   : > { %7847 = vpow2.f32 %v6796_v13  ;;  %v7830_v14 = vpop.eup %7829  ;;  %v2445_v9 = vadd.f32 1.0, %v7828_v55 }
 0x3b0   : > { %7849 = vpow2.f32 %v6798_v43  ;;  %v3363_v45 = vpop.f32.mrb[88].mxu0  ;;  %v3606_v61 = vpop.f32.mrb[88].mxu1  ;;  %v2447_v52 = vadd.f32 1.0, %v7830_v14 }
 0x3b1   : > { %v7832_v36 = vpop.eup %7831  ;;  %7851 = vpow2.f32 %v6799_v30  ;;  %v3365_v10 = vpop.f32.mrb[89].mxu0 }
 0x3b2   : > { %v3608_v15 = vpop.f32.mrb[89].mxu1  ;;  %v7834_v39 = vpop.eup %7833  ;;  %7853 = vrcp.f32 %v2445_v9  ;;  %v2446_v11 = vadd.f32 1.0, %v7832_v36  ;;  %v11835_v19 = vadd.f32 %v3365_v10, %v11784_v47 }
 0x3b3   : > { %v3367_v17 = vpop.f32.mrb[90].mxu0  ;;  %v3610_v35 = vpop.f32.mrb[90].mxu1  ;;  %7855 = vrcp.f32 %v2447_v52  ;;  %v2448_v38 = vadd.f32 1.0, %v7834_v39  ;;  %v11816_v52 = vadd.f32 %v3359_v7, %v11784_v47  ;;  %v11843_v40 = vadd.f32 %v3608_v15, %v11788_v20 }
 0x3b4   : > { %v7836_v8 = vpop.eup %7835  ;;  %v3369_v2 = vpop.f32.mrb[91].mxu0  ;;  %7857 = vrcp.f32 %v2446_v11  ;;  %v11849_v10 = vadd.f32 %v3367_v17, %v11775_v56  ;;  %v6804_v37 = vmul.f32 -1.442695, %v11835_v19  ;;  %v11859_v0 = vadd.f32 %v3610_v35, %v11779_v32 }
 0x3b5   : > { %v7838_v13 = vpop.eup %7837  ;;  %v2449_v55 = vadd.f32 1.0, %v7836_v8  ;;  %v3612_v43 = vpop.f32.mrb[91].mxu1  ;;  %7859 = vrcp.f32 %v2448_v38  ;;  %v6800_v26 = vmul.f32 -1.442695, %v11816_v52  ;;  %v6806_v17 = vmul.f32 -1.442695, %v11843_v40 }
 0x3b6   : > { %v7840_v49 = vpop.eup %7839  ;;  %v2451_v1 = vadd.f32 1.0, %v7838_v13  ;;  %v11819_v13 = vadd.f32 %v3602_v41, %v11788_v20  ;;  %v11832_v41 = vadd.f32 %v3606_v61, %v11779_v32  ;;  %v11863_v21 = vadd.f32 %v3369_v2, %v11784_v47 }
 0x3b7   : > { %v7842_v14 = vpop.eup %7841  ;;  %7861 = vrcp.f32 %v2449_v55  ;;  %v2450_v30 = vadd.f32 1.0, %v7840_v49 }
 0x3b8   : > { %v7844_v9 = vpop.eup %7843  ;;  %7863 = vrcp.f32 %v2451_v1  ;;  %v2452_v36 = vadd.f32 1.0, %v7842_v14  ;;  %v3373_v8 = vpop.f32.mrb[92].mxu0  ;;  %v6801_v14 = vmul.f32 -1.442695, %v11813_v22  ;;  %v6802_v61 = vmul.f32 -1.442695, %v11819_v13 }
 0x3b9   : > { %v7846_v63 = vpop.eup %7845  ;;  %7865 = vrcp.f32 %v2450_v30  ;;  %v4309_v39 = vadd.f32 1.0, %v7844_v9  ;;  %v3616_v49 = vpop.f32.mrb[92].mxu1  ;;  %v11825_v30 = vadd.f32 %v3363_v45, %v11775_v56  ;;  %v6805_v15 = vmul.f32 -1.442695, %v11832_v41 }
 0x3ba   : > { %v7848_v11 = vpop.eup %7847  ;;  %7867 = vrcp.f32 %v2452_v36  ;;  %v4311_v38 = vadd.f32 1.0, %v7846_v63  ;;  %v11821_v55 = vpop.f32.mrb[93].mxu0  ;;  %v6808_v27 = vmul.f32 -1.442695, %v11863_v21 }
 0x3bb   : > { %v7850_v16 = vpop.eup %7849  ;;  %7869 = vrcp.f32 %v4309_v39  ;;  %v4310_v1 = vadd.f32 1.0, %v7848_v11  ;;  %v11827_v7 = vpop.f32.mrb[93].mxu1 }
 0x3bc   : > { %v11829_v9 = vpop.f32.mrb[94].mxu0  ;;  %v7852_v36 = vpop.eup %7851  ;;  %7871 = vrcp.f32 %v4311_v38  ;;  %v4312_v63 = vadd.f32 1.0, %v7850_v16 }
 0x3bd   : > { %v11837_v39 = vpop.f32.mrb[94].mxu1  ;;  %v11839_v11 = vpop.f32.mrb[95].mxu0  ;;  %7873 = vrcp.f32 %v4310_v1  ;;  %v4313_v45 = vadd.f32 1.0, %v7852_v36  ;;  %v6803_v1 = vmul.f32 -1.442695, %v11825_v30 }
 0x3be   : > { %v7854_v62 = vpop.eup %7853  ;;  %v11845_v38 = vpop.f32.mrb[95].mxu1  ;;  %7875 = vrcp.f32 %v4312_v63 }
 0x3bf   : > { %v7856_v16 = vpop.eup %7855  ;;  %7877 = vrcp.f32 %v4313_v45  ;;  %v11866_v45 = vadd.f32 %v3612_v43, %v11788_v20  ;;  %v11873_v29 = vmul.f32 %v7854_v62, %v11742_v31  ;;  %v11892_v62 = vadd.f32 %v3373_v8, %v11775_v56 }
 0x3c0   : > { %v11851_v23 = vpop.eup %7857  ;;  %7879 = vpow2.f32 %v6801_v14  ;;  %v11868_v46 = vpop.f32.mrb[96].mxu0  ;;  %v11886_v4 = vmul.f32 %v7856_v16, %v11745_v42  ;;  %v6809_v42 = vmul.f32 -1.442695, %v11859_v0  ;;  %v11904_v16 = vadd.f32 %v3616_v49, %v11779_v32 }
 0x3c1   : > { %14663 = vst [vmem:[#allocation110_spill] sm:$0xff] %v11851_v23  ;;  %v11854_v36 = vpop.eup %7859  ;;  %7881 = vpow2.f32 %v6800_v26  ;;  %v11870_v14 = vpop.f32.mrb[96].mxu1  ;;  %14665 = vst [vmem:[#allocation12_spill] sm:$0xff] %v11873_v29  ;;  %v6807_v26 = vmul.f32 -1.442695, %v11849_v10 }
 0x3c2   : > { %14664 = vst [vmem:[#allocation44_spill] sm:$0xff] %v11854_v36  ;;  %v7862_v63 = vpop.eup %7861  ;;  %7883 = vpow2.f32 %v6802_v61  ;;  %v11879_v44 = vpop.f32.mrb[97].mxu0  ;;  %14668 = vst [vmem:[#allocation21_spill] sm:$0xff] %v11886_v4  ;;  %v6811_v49 = vmul.f32 -1.442695, %v11892_v62  ;;  %v11948_v36 = vadd.f32 %v11821_v55, %v11784_v47 }
 0x3c3   : > { %v7864_v50 = vpop.eup %7863  ;;  %v11876_v35 = vmul.f32 %v7862_v63, %v11759_v12  ;;  %v11881_v2 = vpop.f32.mrb[97].mxu1  ;;  %7885 = vpow2.f32 %v6803_v1  ;;  %14671 = vst [vmem:[#allocation174_spill] sm:$0xff] %v11904_v16 }
 0x3c4   : > { %v11883_v43 = vpop.eup %7865  ;;  %v11889_v54 = vmul.f32 %v7864_v50, %v11762_v3  ;;  %v11894_v31 = vpop.f32.mrb[98].mxu0  ;;  %7887 = vpow2.f32 %v6805_v15  ;;  %v6810_v15 = vmul.f32 -1.442695, %v11866_v45 }
 0x3c5   : > { %14666 = vst [vmem:[#allocation23_spill] sm:$0xff] %v11876_v35  ;;  %14667 = vst [vmem:[#allocation24_spill] sm:$0xff] %v11883_v43  ;;  %v11896_v12 = vpop.f32.mrb[98].mxu1  ;;  %v11898_v61 = vpop.eup %7867  ;;  %7889 = vpow2.f32 %v6804_v37  ;;  %v6813_v35 = vmul.f32 -1.442695, %v11904_v16 }
 0x3c6   : > { %14669 = vst [vmem:[#allocation172_spill] sm:$0xff] %v11889_v54  ;;  %14670 = vst [vmem:[#allocation173_spill] sm:$0xff] %v11898_v61  ;;  %v11906_v50 = vpop.f32.mrb[99].mxu0  ;;  %v11908_v3 = vpop.f32.mrb[99].mxu1  ;;  %7891 = vpow2.f32 %v6806_v17 }
 0x3c7   : > { %v7870_v8 = vpop.eup %7869  ;;  %7893 = vpow2.f32 %v6807_v26 }
 0x3c8   : > { %v11913_v24 = vpop.eup %7871  ;;  %7895 = vpow2.f32 %v6809_v42  ;;  %v11922_v37 = vpop.f32.mrb[100].mxu0  ;;  %v11927_v17 = vmul.f32 %v7870_v8, %v11793_v6 }
 0x3c9   : > { %v11916_v63 = vpop.eup %7873  ;;  %7897 = vpow2.f32 %v6808_v27  ;;  %v11924_v1 = vpop.f32.mrb[100].mxu1 }
 0x3ca   : > { %v11919_v29 = vpop.eup %7875  ;;  %7899 = vpow2.f32 %v6810_v15  ;;  %v11932_v26 = vpop.f32.mrb[101].mxu0 }
 0x3cb   : > { %v7878_v18 = vpop.eup %7877  ;;  %v11934_v58 = vpop.f32.mrb[101].mxu1  ;;  %7901 = vpow2.f32 %v6811_v49 }
 0x3cc   : > { %v7880_v4 = vpop.eup %7879  ;;  %v11930_v54 = vmul.f32 %v7878_v18, %v11807_v5  ;;  %v11936_v27 = vpop.f32.mrb[102].mxu0  ;;  %7903 = vpow2.f32 %v6813_v35 }
 0x3cd   : > { %v7882_v42 = vpop.eup %7881  ;;  %v4315_v33 = vadd.f32 1.0, %v7880_v4  ;;  %v11938_v53 = vpop.f32.mrb[102].mxu1 }
 0x3ce   : > { %v7884_v61 = vpop.eup %7883  ;;  %v4314_v8 = vadd.f32 1.0, %v7882_v42  ;;  %v11942_v18 = vpop.f32.mrb[103].mxu0  ;;  %v11952_v42 = vadd.f32 %v11827_v7, %v11788_v20  ;;  %v11966_v7 = vadd.f32 %v11839_v11, %v11784_v47 }
 0x3cf   : > { %v11944_v5 = vpop.f32.mrb[103].mxu1  ;;  %v7886_v15 = vpop.eup %7885  ;;  %7905 = vrcp.f32 %v4315_v33  ;;  %v4316_v51 = vadd.f32 1.0, %v7884_v61  ;;  %v11956_v33 = vadd.f32 %v11829_v9, %v11775_v56 }
 0x3d0   : > { %v7888_v43 = vpop.eup %7887  ;;  %7907 = vrcp.f32 %v4314_v8  ;;  %v4317_v4 = vadd.f32 1.0, %v7886_v15  ;;  %14672 = vst [vmem:[#allocation175_spill] sm:$0xff] %v11952_v42  ;;  %v11962_v55 = vpop.f32.mrb[104].mxu0  ;;  %14673 = vst [vmem:[#allocation176_spill] sm:$0xff] %v11966_v7 }
 0x3d1   : > { %v7890_v49 = vpop.eup %7889  ;;  %7909 = vrcp.f32 %v4316_v51  ;;  %v4319_v59 = vadd.f32 1.0, %v7888_v43  ;;  %v11960_v51 = vadd.f32 %v11837_v39, %v11779_v32  ;;  %v11970_v9 = vpop.f32.mrb[105].mxu0  ;;  %v6815_v11 = vmul.f32 -1.442695, %v11956_v33 }
 0x3d2   : > { %v7892_v6 = vpop.eup %7891  ;;  %7911 = vrcp.f32 %v4317_v4  ;;  %v4318_v35 = vadd.f32 1.0, %v7890_v49  ;;  %v11968_v4 = vpop.f32.mrb[104].mxu1  ;;  %14674 = vst [vmem:[#allocation177_spill] sm:$0xff] %v11970_v9 }
 0x3d3   : > { %v7894_v61 = vpop.eup %7893  ;;  %7913 = vrcp.f32 %v4319_v59  ;;  %v4320_v8 = vadd.f32 1.0, %v7892_v6  ;;  %v6812_v6 = vmul.f32 -1.442695, %v11948_v36  ;;  %v11973_v39 = vpop.f32.mrb[105].mxu1 }
 0x3d4   : > { %v7896_v43 = vpop.eup %7895  ;;  %7915 = vrcp.f32 %v4318_v35  ;;  %v4321_v15 = vadd.f32 1.0, %v7894_v61  ;;  %14675 = vst [vmem:[#allocation178_spill] sm:$0xff] %v11973_v39  ;;  %v11975_v57 = vpop.f32.mrb[106].mxu0  ;;  %v6814_v61 = vmul.f32 -1.442695, %v11952_v42  ;;  %v11991_v42 = vadd.f32 %v11868_v46, %v11775_v56 }
 0x3d5   : > { %v7898_v49 = vpop.eup %7897  ;;  %7917 = vrcp.f32 %v4320_v8  ;;  %v4323_v59 = vadd.f32 1.0, %v7896_v43  ;;  %14676 = vst [vmem:[#allocation179_spill] sm:$0xff] %v11975_v57  ;;  %v11979_v34 = vpop.f32.mrb[106].mxu1  ;;  %v6817_v8 = vmul.f32 -1.442695, %v11960_v51  ;;  %v11984_v43 = vadd.f32 %v11845_v38, %v11788_v20 }
 0x3d6   : > { %v7900_v23 = vpop.eup %7899  ;;  %7919 = vrcp.f32 %v4321_v15  ;;  %v4322_v35 = vadd.f32 1.0, %v7898_v49  ;;  %14677 = vst [vmem:[#allocation180_spill] sm:$0xff] %v11979_v34  ;;  %v11986_v39 = vpop.f32.mrb[107].mxu0  ;;  %v6816_v49 = vmul.f32 -1.442695, %v11966_v7  ;;  %v11997_v38 = vadd.f32 %v11870_v14, %v11779_v32 }
 0x3d7   : > { %v7902_v16 = vpop.eup %7901  ;;  %7921 = vrcp.f32 %v4323_v59  ;;  %v4324_v9 = vadd.f32 1.0, %v7900_v23  ;;  %14678 = vst [vmem:[#allocation181_spill] sm:$0xff] %v11986_v39  ;;  %v11993_v34 = vpop.f32.mrb[107].mxu1  ;;  %v12001_v39 = vadd.f32 %v11879_v44, %v11784_v47  ;;  %v4814_v14 = vmul.f32 %v11916_v63, %v11799_v25 }
 0x3d8   : > { %v7904_v57 = vpop.eup %7903  ;;  %7923 = vrcp.f32 %v4322_v35  ;;  %v4325_v15 = vadd.f32 1.0, %v7902_v16  ;;  %14679 = vst [vmem:[#allocation182_spill] sm:$0xff] %v11993_v34  ;;  %v4815_v35 = vmul.f32 %v11913_v24, %v11796_v60  ;;  %v12008_v34 = vadd.f32 %v11881_v2, %v11788_v20 }
 0x3d9   : > { %v7906_v23 = vpop.eup %7905  ;;  %7925 = vrcp.f32 %v4324_v9  ;;  %v4327_v59 = vadd.f32 1.0, %v7904_v57  ;;  %v12015_v44 = vadd.f32 %v11894_v31, %v11775_v56  ;;  %v6818_v31 = vmul.f32 -1.442695, %v11984_v43 }
 0x3da   : > { %v7908_v16 = vpop.eup %7907  ;;  %v4819_v46 = vmul.f32 %v7906_v23, %v11813_v22  ;;  %7927 = vrcp.f32 %v4325_v15  ;;  %14680 = vst [vmem:[#allocation183_spill] sm:$0xff] %v12008_v34  ;;  %v4816_v22 = vmul.f32 %v11919_v29, %v11802_v48  ;;  %v12031_v23 = vadd.f32 %v11896_v12, %v11779_v32  ;;  %v7071_v29 = vld [vmem:[%s13866_s6] sm:$0xff]  }
 0x3db   : > { %v7910_v57 = vpop.eup %7909  ;;  %v4818_v9 = vmul.f32 %v7908_v16, %v11816_v52  ;;  %7929 = vrcp.f32 %v4327_v59  ;;  %v12017_v7 = vpop.f32.mrb[108].mxu0  ;;  %v6819_v16 = vmul.f32 -1.442695, %v11991_v42  ;;  %v7072_v12 = vld [vmem:[%s13866_s6 + $0x80] sm:$0xff]  }
 0x3dc   : > { %v12019_v24 = vpop.f32.mrb[108].mxu1  ;;  %v7912_v60 = vpop.eup %7911  ;;  %v4983_v2 = vpack.c.bf16 %v4819_v46, %v4815_v35  ;;  %v4820_v15 = vmul.f32 %v7910_v57, %v11819_v13  ;;  %7931 = vpow2.f32 %v6812_v6 }
 0x3dd   : > { %v12024_v25 = vpop.f32.mrb[109].mxu0  ;;  %v12026_v52 = vpop.f32.mrb[109].mxu1  ;;  %7933 = vpow2.f32 %v6814_v61  ;;  %v4982_v59 = vpack.c.bf16 %v4818_v9, %v4814_v14  ;;  %v12043_v61 = vadd.f32 %v11906_v50, %v11784_v47  ;;  %v6821_v9 = vmul.f32 -1.442695, %v11997_v38 }
 0x3de   : > { %v7914_v63 = vpop.eup %7913  ;;  %v12036_v48 = vpop.f32.mrb[110].mxu0  ;;  %7935 = vpow2.f32 %v6815_v11  ;;  %v4984_v35 = vpack.c.bf16 %v4820_v15, %v4816_v22  ;;  %v6822_v50 = vmul.f32 -1.442695, %v12008_v34  ;;  %v6823_v22 = vmul.f32 -1.442695, %v12015_v44 }
 0x3df   : > { %v12038_v13 = vpop.f32.mrb[110].mxu1  ;;  %v7916_v6 = vpop.eup %7915  ;;  %7937 = vpow2.f32 %v6817_v8  ;;  %5353 = vmatprep.mubr.bf16.mxu0 %v4982_v59  ;;  %v14684_v15 = vpack.c.bf16 %v11930_v54, %v11927_v17  ;;  %v6825_v59 = vmul.f32 -1.442695, %v12031_v23  ;;  %v6824_v17 = vmul.f32 -1.442695, %v12043_v61 }
 0x3e0   : > { %14681 = vst [vmem:[#allocation184_spill] sm:$0xff] %v12038_v13  ;;  %v12048_v46 = vpop.f32.mrb[111].mxu0  ;;  %v12050_v57 = vpop.f32.mrb[111].mxu1  ;;  %7939 = vpow2.f32 %v6816_v49  ;;  %v6820_v13 = vmul.f32 -1.442695, %v12001_v39  ;;  %5554 = vmatprep.mubr.bf16.mxu1 %v4984_v35  ;;  %v7073_v49 = vld [vmem:[%s13866_s6 + $0x8] sm:$0xff]   ;;  %v4823_v35 = vmul.f32 %v7914_v63, %v11832_v41 }
 0x3e1   : > { %14682 = vst [vmem:[#allocation185_spill] sm:$0xff] %v12048_v46  ;;  %14683 = vst [vmem:[#allocation186_spill] sm:$0xff] %v12050_v57  ;;  %v7918_v14 = vpop.eup %7917  ;;  %5354 = vmatmul.mubr.bf16.vlgmr.msra.gmra.mrb[168].mxu0 %v14684_v15  ;;  %v4821_v57 = vmul.f32 %v7912_v60, %v11825_v30  ;;  %7941 = vpow2.f32 %v6818_v31  ;;  %5555 = vmatmul.mubr.bf16.vlgmr.msra.gmra.mrb[168].mxu1 %v4983_v2  ;;  %v7074_v30 = vld [vmem:[%s13866_s6 + $0x88] sm:$0xff]   ;;  %v4822_v60 = vmul.f32 %v7916_v6, %v11835_v19 }
 0x3e2   : > { %v7920_v11 = vpop.eup %7919  ;;  %5916 = vmatpush1.bf16.msra.mxu0 %v7071_v29  ;;  %7943 = vpow2.f32 %v6819_v16  ;;  %6117 = vmatpush1.bf16.msra.mxu1 %v7072_v12  ;;  %v4824_v29 = vmul.f32 %v7918_v14, %v11843_v40  ;;  %v7075_v40 = vld [vmem:[%s13866_s6 + $0x10] sm:$0xff]  }
 0x3e3   : > { %v7922_v46 = vpop.eup %7921  ;;  %v4825_v8 = vmul.f32 %v7920_v11, %v11849_v10  ;;  %5917 = vmatprep.subr.bf16.mxu0 %v14232_v28  ;;  %7945 = vpow2.f32 %v6821_v9  ;;  %6118 = vmatprep.subr.bf16.mxu1 %v14232_v28  ;;  %v7076_v11 = vld [vmem:[%s13866_s6 + $0x90] sm:$0xff]  }
 0x3e4   : > { %v7924_v34 = vpop.eup %7923  ;;  %v4827_v54 = vmul.f32 %v7922_v46, %v11859_v0  ;;  %7947 = vpow2.f32 %v6820_v13 }
 0x3e5   : > { %v7926_v10 = vpop.eup %7925  ;;  %v4826_v2 = vmul.f32 %v7924_v34, %v11863_v21  ;;  %v4985_v31 = vpack.c.bf16 %v4825_v8, %v4821_v57  ;;  %v12075_v0 = vpop.f32.mrb[112].mxu0  ;;  %7949 = vpow2.f32 %v6822_v50 }
 0x3e6   : > { %v12077_v41 = vpop.f32.mrb[112].mxu1  ;;  %v12079_v63 = vpop.eup %7927  ;;  %v4828_v16 = vmul.f32 %v7926_v10, %v11866_v45  ;;  %v4987_v12 = vpack.c.bf16 %v4827_v54, %v4823_v35  ;;  %5918 = vmatpush1.bf16.msra.mxu0 %v7073_v49  ;;  %7951 = vpow2.f32 %v6823_v22  ;;  %6119 = vmatpush1.bf16.msra.mxu1 %v7074_v30  ;;  %v7077_v54 = vld [vmem:[%s13866_s6 + $0x18] sm:$0xff]  }
 0x3e7   : > { %v12083_v46 = vpop.f32.mrb[113].mxu0  ;;  %v12085_v19 = vpop.f32.mrb[113].mxu1  ;;  %v4986_v34 = vpack.c.bf16 %v4826_v2, %v4822_v60  ;;  %5919 = vmatprep.subr.bf16.mxu0 %v14232_v28  ;;  %7953 = vpow2.f32 %v6825_v59  ;;  %6120 = vmatprep.subr.bf16.mxu1 %v14232_v28  ;;  %v12114_v2 = vadd.f32 %v11908_v3, %v11788_v20  ;;  %v12127_v3 = vadd.f32 %v11922_v37, %v11775_v56 }
 0x3e8   : > { %v12087_v21 = vpop.eup %7929  ;;  %v12089_v6 = vpop.f32.mrb[114].mxu0  ;;  %v4988_v13 = vpack.c.bf16 %v4828_v16, %v4824_v29  ;;  %7955 = vpow2.f32 %v6824_v17  ;;  %v7078_v17 = vld [vmem:[%s13866_s6 + $0x98] sm:$0xff]   ;;  %v12142_v37 = vadd.f32 %v11932_v26, %v11784_v47 }
 0x3e9   : > { %v12091_v57 = vpop.f32.mrb[114].mxu1  ;;  %v7932_v45 = vpop.eup %7931  ;;  %5361 = vmatprep.mubr.bf16.mxu0 %v4986_v34 }
 0x3ea   : > { %v12097_v14 = vpop.f32.mrb[115].mxu0  ;;  %v12099_v9 = vpop.f32.mrb[115].mxu1  ;;  %v4326_v15 = vadd.f32 1.0, %v7932_v45  ;;  %5562 = vmatprep.mubr.bf16.mxu1 %v4988_v13  ;;  %5362 = vmatmul.mubr.bf16.gmra.mrb[172].mxu0 %v4985_v31 }
 0x3eb   : > { %14685 = vst [vmem:[#allocation187_spill] sm:$0xff] %v12097_v14  ;;  %14686 = vst [vmem:[#allocation188_spill] sm:$0xff] %v12099_v9  ;;  %v7934_v50 = vpop.eup %7933  ;;  %5563 = vmatmul.mubr.bf16.gmra.mrb[172].mxu1 %v4987_v12  ;;  %5920 = vmatpush1.bf16.msra.mxu0 %v7075_v40  ;;  %v14707_v9 = vld [vmem:[#allocation178_spill] sm:$0xff] }
 0x3ec   : > { %v7936_v8 = vpop.eup %7935  ;;  %v4328_v22 = vadd.f32 1.0, %v7934_v50  ;;  %7957 = vrcp.f32 %v4326_v15  ;;  %6121 = vmatpush1.bf16.msra.mxu1 %v7076_v11  ;;  %5921 = vmatprep.subr.bf16.mxu0 %v14232_v28  ;;  %v12131_v11 = vadd.f32 %v11924_v1, %v11779_v32  ;;  %v12223_v14 = vadd.f32 %v14707_v9, %v11788_v20 }
 0x3ed   : > { %v7938_v49 = vpop.eup %7937  ;;  %v4329_v35 = vadd.f32 1.0, %v7936_v8  ;;  %6122 = vmatprep.subr.bf16.mxu1 %v14232_v28  ;;  %v7079_v8 = vld [vmem:[%s13866_s6 + $0x20] sm:$0xff]  }
 0x3ee   : > { %v7940_v30 = vpop.eup %7939  ;;  %7959 = vrcp.f32 %v4328_v22  ;;  %v4331_v59 = vadd.f32 1.0, %v7938_v49 }
 0x3ef   : > { %v7942_v10 = vpop.eup %7941  ;;  %7961 = vrcp.f32 %v4329_v35  ;;  %v4330_v60 = vadd.f32 1.0, %v7940_v30  ;;  %5922 = vmatpush1.bf16.msra.mxu0 %v7077_v54  ;;  %v6826_v54 = vmul.f32 -1.442695, %v12114_v2 }
 0x3f0   : > { %v7944_v16 = vpop.eup %7943  ;;  %7963 = vrcp.f32 %v4331_v59  ;;  %v4332_v12 = vadd.f32 1.0, %v7942_v10  ;;  %6123 = vmatpush1.bf16.msra.mxu1 %v7078_v17  ;;  %5923 = vmatprep.subr.bf16.mxu0 %v14232_v28  ;;  %v12150_v59 = vadd.f32 %v11934_v58, %v11788_v20  ;;  %v12157_v17 = vadd.f32 %v11936_v27, %v11775_v56 }
 0x3f1   : > { %v7946_v45 = vpop.eup %7945  ;;  %7965 = vrcp.f32 %v4330_v60  ;;  %v4333_v13 = vadd.f32 1.0, %v7944_v16  ;;  %6124 = vmatprep.subr.bf16.mxu1 %v14232_v28  ;;  %v12161_v16 = vadd.f32 %v11938_v53, %v11779_v32  ;;  %v6827_v58 = vmul.f32 -1.442695, %v12127_v3 }
 0x3f2   : > { %v12116_v31 = vpop.f32.mrb[116].mxu0  ;;  %v12118_v29 = vpop.f32.mrb[116].mxu1  ;;  %7967 = vrcp.f32 %v4332_v12  ;;  %v4335_v49 = vadd.f32 1.0, %v7946_v45  ;;  %v12168_v27 = vadd.f32 %v11942_v18, %v11784_v47 }
 0x3f3   : > { %14687 = vst [vmem:[#allocation189_spill] sm:$0xff] %v12116_v31  ;;  %14688 = vst [vmem:[#allocation190_spill] sm:$0xff] %v12118_v29  ;;  %v12121_v34 = vpop.f32.mrb[117].mxu0  ;;  %v12123_v40 = vpop.f32.mrb[117].mxu1  ;;  %7969 = vrcp.f32 %v4333_v13  ;;  %v6829_v13 = vmul.f32 -1.442695, %v12131_v11  ;;  %5924 = vmatpush1.bf16.msra.mxu0 %v7079_v8 }
 0x3f4   : > { %14689 = vst [vmem:[#allocation191_spill] sm:$0xff] %v12121_v34  ;;  %14690 = vst [vmem:[#allocation192_spill] sm:$0xff] %v12123_v40  ;;  %v12133_v50 = vpop.f32.mrb[118].mxu0  ;;  %v12135_v15 = vpop.f32.mrb[118].mxu1  ;;  %7971 = vrcp.f32 %v4335_v49  ;;  %5925 = vmatprep.subr.bf16.mxu0 %v14232_v28 }
 0x3f5   : > { %14691 = vst [vmem:[#allocation193_spill] sm:$0xff] %v12133_v50  ;;  %14692 = vst [vmem:[#allocation194_spill] sm:$0xff] %v12135_v15  ;;  %v7948_v22 = vpop.eup %7947  ;;  %v12144_v35 = vpop.f32.mrb[119].mxu0 }
 0x3f6   : > { %14693 = vst [vmem:[#allocation195_spill] sm:$0xff] %v12144_v35  ;;  %v7950_v1 = vpop.eup %7949  ;;  %v4334_v30 = vadd.f32 1.0, %v7948_v22  ;;  %v12152_v10 = vpop.f32.mrb[119].mxu1 }
 0x3f7   : > { %14694 = vst [vmem:[#allocation196_spill] sm:$0xff] %v12152_v10  ;;  %v7952_v26 = vpop.eup %7951  ;;  %v4336_v60 = vadd.f32 1.0, %v7950_v1  ;;  %v6828_v1 = vmul.f32 -1.442695, %v12142_v37 }
 0x3f8   : > { %v7954_v12 = vpop.eup %7953  ;;  %7973 = vrcp.f32 %v4334_v30  ;;  %v4337_v45 = vadd.f32 1.0, %v7952_v26  ;;  %v6830_v26 = vmul.f32 -1.442695, %v12150_v59 }
 0x3f9   : > { %v7956_v22 = vpop.eup %7955  ;;  %7975 = vrcp.f32 %v4336_v60  ;;  %v4339_v49 = vadd.f32 1.0, %v7954_v12  ;;  %v6831_v60 = vmul.f32 -1.442695, %v12157_v17  ;;  %v6833_v12 = vmul.f32 -1.442695, %v12161_v16 }
 0x3fa   : > { %v7958_v53 = vpop.eup %7957  ;;  %7977 = vrcp.f32 %v4337_v45  ;;  %v4338_v30 = vadd.f32 1.0, %v7956_v22  ;;  %v12172_v10 = vpop.f32.mrb[120].mxu0  ;;  %v12184_v45 = vadd.f32 %v11944_v5, %v11788_v20  ;;  %v12188_v22 = vadd.f32 %v11962_v55, %v11775_v56 }
 0x3fb   : > { %14695 = vst [vmem:[#allocation197_spill] sm:$0xff] %v12172_v10  ;;  %v12174_v35 = vpop.f32.mrb[120].mxu1  ;;  %v7960_v8 = vpop.eup %7959  ;;  %7979 = vrcp.f32 %v4339_v49  ;;  %v12192_v49 = vadd.f32 %v11968_v4, %v11779_v32  ;;  %v6832_v5 = vmul.f32 -1.442695, %v12168_v27  ;;  %v14703_v4 = vld [vmem:[#allocation174_spill] sm:$0xff] }
 0x3fc   : > { %14696 = vst [vmem:[#allocation198_spill] sm:$0xff] %v12174_v35  ;;  %v12178_v15 = vpop.f32.mrb[121].mxu0  ;;  %v12180_v18 = vpop.f32.mrb[121].mxu1  ;;  %7981 = vrcp.f32 %v4338_v30  ;;  %v4829_v30 = vmul.f32 %v12079_v63, %v11892_v62  ;;  %v4831_v29 = vmul.f32 %v12087_v21, %v14703_v4  ;;  %v7080_v62 = vld [vmem:[%s13866_s6 + $0xa0] sm:$0xff]   ;;  %v4830_v63 = vmul.f32 %v7958_v53, %v11948_v36  ;;  %v14706_v21 = vld [vmem:[#allocation175_spill] sm:$0xff] }
 0x3fd   : > { %14697 = vst [vmem:[#allocation199_spill] sm:$0xff] %v12178_v15  ;;  %14698 = vst [vmem:[#allocation200_spill] sm:$0xff] %v12180_v18  ;;  %v7962_v50 = vpop.eup %7961  ;;  %v12194_v35 = vpop.f32.mrb[122].mxu0  ;;  %7983 = vpow2.f32 %v6826_v54  ;;  %v4832_v4 = vmul.f32 %v7960_v8, %v14706_v21  ;;  %6125 = vmatpush1.bf16.msra.mxu1 %v7080_v62 }
 0x3fe   : > { %14699 = vst [vmem:[#allocation201_spill] sm:$0xff] %v12194_v35  ;;  %v12196_v10 = vpop.f32.mrb[122].mxu1  ;;  %v7964_v15 = vpop.eup %7963  ;;  %v4833_v18 = vmul.f32 %v7962_v50, %v11956_v33  ;;  %7985 = vpow2.f32 %v6827_v58  ;;  %v14705_v50 = vld [vmem:[#allocation176_spill] sm:$0xff]  ;;  %v6834_v58 = vmul.f32 -1.442695, %v12184_v45  ;;  %6126 = vmatprep.subr.bf16.mxu1 %v14232_v28 }
 0x3ff   : > { %14700 = vst [vmem:[#allocation202_spill] sm:$0xff] %v12196_v10  ;;  %v12202_v40 = vpop.f32.mrb[123].mxu0  ;;  %v12204_v55 = vpop.f32.mrb[123].mxu1  ;;  %v4835_v35 = vmul.f32 %v7964_v15, %v11960_v51  ;;  %v14704_v10 = vld [vmem:[#allocation177_spill] sm:$0xff]  ;;  %7987 = vpow2.f32 %v6829_v13  ;;  %v6835_v13 = vmul.f32 -1.442695, %v12188_v22 }
 0x400   : > { %14701 = vst [vmem:[#allocation203_spill] sm:$0xff] %v12202_v40  ;;  %14702 = vst [vmem:[#allocation204_spill] sm:$0xff] %v12204_v55  ;;  %v7966_v34 = vpop.eup %7965  ;;  %v12211_v31 = vadd.f32 %v14704_v10, %v11784_v47  ;;  %v4989_v55 = vpack.c.bf16 %v4833_v18, %v4829_v30  ;;  %7989 = vpow2.f32 %v6828_v1  ;;  %v6837_v1 = vmul.f32 -1.442695, %v12192_v49 }
 0x401   : > { %v7968_v33 = vpop.eup %7967  ;;  %v4834_v54 = vmul.f32 %v7966_v34, %v14705_v50  ;;  %v4991_v15 = vpack.c.bf16 %v4835_v35, %v4831_v29  ;;  %7991 = vpow2.f32 %v6830_v26 }
 0x402   : > { %v7970_v40 = vpop.eup %7969  ;;  %v4836_v51 = vmul.f32 %v7968_v33, %v11984_v43  ;;  %7993 = vpow2.f32 %v6831_v60  ;;  %v12227_v43 = vpop.f32.mrb[124].mxu0  ;;  %v6836_v60 = vmul.f32 -1.442695, %v12211_v31 }
 0x403   : > { %v7972_v10 = vpop.eup %7971  ;;  %v4990_v36 = vpack.c.bf16 %v4834_v54, %v4830_v63  ;;  %v12229_v29 = vpop.f32.mrb[124].mxu1  ;;  %7995 = vpow2.f32 %v6833_v12  ;;  %v4837_v12 = vmul.f32 %v7970_v40, %v11991_v42  ;;  %v6838_v63 = vmul.f32 -1.442695, %v12223_v14 }
 0x404   : > { %v7974_v34 = vpop.eup %7973  ;;  %v4992_v53 = vpack.c.bf16 %v4836_v51, %v4832_v4  ;;  %v12234_v9 = vpop.f32.mrb[125].mxu0  ;;  %7997 = vpow2.f32 %v6832_v5  ;;  %v7081_v51 = vld [vmem:[%s13866_s6 + $0x28] sm:$0xff]  }
 0x405   : > { %v12231_v35 = vpop.eup %7975  ;;  %5369 = vmatprep.mubr.bf16.mxu0 %v4990_v36  ;;  %v12236_v26 = vpop.f32.mrb[125].mxu1  ;;  %7999 = vpow2.f32 %v6834_v58  ;;  %v4838_v42 = vmul.f32 %v7974_v34, %v12001_v39  ;;  %5926 = vmatpush1.bf16.msra.mxu0 %v7081_v51  ;;  %v7082_v39 = vld [vmem:[%s13866_s6 + $0xa8] sm:$0xff]   ;;  %v14716_v51 = vld [vmem:[#allocation180_spill] sm:$0xff] }
 0x406   : > { %v7978_v8 = vpop.eup %7977  ;;  %5570 = vmatprep.mubr.bf16.mxu1 %v4992_v53  ;;  %5370 = vmatmul.mubr.bf16.gmra.mrb[176].mxu0 %v4989_v55  ;;  %v12239_v18 = vpop.f32.mrb[126].mxu0  ;;  %v12251_v55 = vmul.f32 %v7972_v10, %v11997_v38  ;;  %8001 = vpow2.f32 %v6835_v13 }
 0x407   : > { %v12241_v30 = vpop.f32.mrb[126].mxu1  ;;  %v7980_v62 = vpop.eup %7979  ;;  %v4841_v33 = vmul.f32 %v7978_v8, %v12015_v44  ;;  %5571 = vmatmul.mubr.bf16.gmra.mrb[176].mxu1 %v4991_v15  ;;  %8003 = vpow2.f32 %v6837_v1  ;;  %5927 = vmatprep.subr.bf16.mxu0 %v14232_v28 }
 0x408   : > { %v12246_v50 = vpop.f32.mrb[127].mxu0  ;;  %v12248_v5 = vpop.f32.mrb[127].mxu1  ;;  %v12254_v21 = vmul.f32 %v7980_v62, %v12031_v23  ;;  %8005 = vpow2.f32 %v6836_v60  ;;  %6127 = vmatpush1.bf16.msra.mxu1 %v7082_v39 }
 0x409   : > { %14708 = vst [vmem:[#allocation174_spill] sm:$0xff] %v12246_v50  ;;  %14709 = vst [vmem:[#allocation177_spill] sm:$0xff] %v12248_v5  ;;  %v7982_v54 = vpop.eup %7981  ;;  %v4993_v40 = vpack.c.bf16 %v4841_v33, %v4837_v12  ;;  %8007 = vpow2.f32 %v6838_v63  ;;  %v14714_v63 = vld [vmem:[#allocation179_spill] sm:$0xff]  ;;  %6128 = vmatprep.subr.bf16.mxu1 %v14232_v28 }
 0x40a   : > { %v7984_v4 = vpop.eup %7983  ;;  %v4842_v44 = vmul.f32 %v7982_v54, %v12043_v61  ;;  %v12266_v13 = vpop.f32.mrb[128].mxu0  ;;  %v12277_v54 = vadd.f32 %v14714_v63, %v11775_v56 }
 0x40b   : > { %v7986_v15 = vpop.eup %7985  ;;  %v4340_v58 = vadd.f32 1.0, %v7984_v4  ;;  %14710 = vst [vmem:[#allocation176_spill] sm:$0xff] %v12266_v13  ;;  %v12268_v53 = vpop.f32.mrb[128].mxu1 }
 0x40c   : > { %v7988_v23 = vpop.eup %7987  ;;  %v4341_v10 = vadd.f32 1.0, %v7986_v15  ;;  %v4994_v36 = vpack.c.bf16 %v4842_v44, %v4838_v42  ;;  %14711 = vst [vmem:[#allocation175_spill] sm:$0xff] %v12268_v53  ;;  %v12271_v60 = vpop.f32.mrb[129].mxu0  ;;  %v12284_v15 = vadd.f32 %v14716_v51, %v11779_v32  ;;  %v6839_v63 = vmul.f32 -1.442695, %v12277_v54  ;;  %v14733_v53 = vld [vmem:[#allocation186_spill] sm:$0xff] }
 0x40d   : > { %v7990_v61 = vpop.eup %7989  ;;  %8009 = vrcp.f32 %v4340_v58  ;;  %v4343_v34 = vadd.f32 1.0, %v7988_v23  ;;  %14712 = vst [vmem:[#allocation178_spill] sm:$0xff] %v12271_v60  ;;  %v12273_v62 = vpop.f32.mrb[129].mxu1  ;;  %v12359_v13 = vadd.f32 %v14733_v53, %v11788_v20 }
 0x40e   : > { %v7992_v1 = vpop.eup %7991  ;;  %8011 = vrcp.f32 %v4341_v10  ;;  %v4342_v8 = vadd.f32 1.0, %v7990_v61  ;;  %5377 = vmatprep.mubr.bf16.mxu0 %v4994_v36  ;;  %14713 = vst [vmem:[#allocation205_spill] sm:$0xff] %v12273_v62  ;;  %v12279_v4 = vpop.f32.mrb[130].mxu0  ;;  %v14718_v36 = vld [vmem:[#allocation181_spill] sm:$0xff] }
 0x40f   : > { %v7994_v12 = vpop.eup %7993  ;;  %8013 = vrcp.f32 %v4343_v34  ;;  %v4344_v33 = vadd.f32 1.0, %v7992_v1  ;;  %5378 = vmatmul.mubr.bf16.gmra.mrb[180].mxu0 %v4993_v40  ;;  %14715 = vst [vmem:[#allocation179_spill] sm:$0xff] %v12279_v4  ;;  %v12286_v58 = vpop.f32.mrb[130].mxu1  ;;  %v12290_v39 = vadd.f32 %v14718_v36, %v11784_v47  ;;  %v14721_v36 = vld [vmem:[#allocation182_spill] sm:$0xff] }
 0x410   : > { %v7996_v42 = vpop.eup %7995  ;;  %8015 = vrcp.f32 %v4342_v8  ;;  %v4345_v44 = vadd.f32 1.0, %v7994_v12  ;;  %14717 = vst [vmem:[#allocation180_spill] sm:$0xff] %v12286_v58  ;;  %v12292_v40 = vpop.f32.mrb[131].mxu0  ;;  %v12300_v38 = vadd.f32 %v14721_v36, %v11788_v20  ;;  %v12313_v36 = vadd.f32 %v12019_v24, %v11779_v32 }
 0x411   : > { %v7998_v23 = vpop.eup %7997  ;;  %8017 = vrcp.f32 %v4344_v33  ;;  %v4347_v10 = vadd.f32 1.0, %v7996_v42  ;;  %14719 = vst [vmem:[#allocation181_spill] sm:$0xff] %v12292_v40  ;;  %v12294_v61 = vpop.f32.mrb[131].mxu1  ;;  %v6841_v42 = vmul.f32 -1.442695, %v12284_v15 }
 0x412   : > { %14720 = vst [vmem:[#allocation206_spill] sm:$0xff] %v12294_v61  ;;  %v8000_v34 = vpop.eup %7999  ;;  %8019 = vrcp.f32 %v4345_v44  ;;  %v4346_v1 = vadd.f32 1.0, %v7998_v23  ;;  %v6840_v44 = vmul.f32 -1.442695, %v12290_v39  ;;  %v12305_v23 = vadd.f32 %v12017_v7, %v11775_v56 }
 0x413   : > { %v8002_v8 = vpop.eup %8001  ;;  %8021 = vrcp.f32 %v4347_v10  ;;  %v4348_v12 = vadd.f32 1.0, %v8000_v34  ;;  %v12307_v10 = vpop.f32.mrb[132].mxu0 }
 0x414   : > { %v8004_v51 = vpop.eup %8003  ;;  %8023 = vrcp.f32 %v4346_v1  ;;  %v4349_v33 = vadd.f32 1.0, %v8002_v8  ;;  %14722 = vst [vmem:[#allocation182_spill] sm:$0xff] %v12307_v10  ;;  %v12309_v34 = vpop.f32.mrb[132].mxu1 }
 0x415   : > { %v8006_v40 = vpop.eup %8005  ;;  %8025 = vrcp.f32 %v4348_v12  ;;  %v4351_v61 = vadd.f32 1.0, %v8004_v51  ;;  %14723 = vst [vmem:[#allocation207_spill] sm:$0xff] %v12309_v34  ;;  %v12317_v12 = vadd.f32 %v12024_v25, %v11784_v47  ;;  %v12319_v51 = vpop.f32.mrb[133].mxu0  ;;  %v12325_v34 = vadd.f32 %v12026_v52, %v11788_v20  ;;  %v14727_v25 = vld [vmem:[#allocation183_spill] sm:$0xff] }
 0x416   : > { %v8008_v1 = vpop.eup %8007  ;;  %8027 = vrcp.f32 %v4349_v33  ;;  %v4350_v8 = vadd.f32 1.0, %v8006_v40  ;;  %14724 = vst [vmem:[#allocation208_spill] sm:$0xff] %v12319_v51  ;;  %v12321_v58 = vpop.f32.mrb[133].mxu1  ;;  %v12329_v40 = vadd.f32 %v12036_v48, %v11775_v56  ;;  %v4840_v4 = vmul.f32 %v12231_v35, %v14727_v25 }
 0x417   : > { %14725 = vst [vmem:[#allocation209_spill] sm:$0xff] %v12321_v58  ;;  %v8010_v7 = vpop.eup %8009  ;;  %8029 = vrcp.f32 %v4351_v61  ;;  %v4352_v10 = vadd.f32 1.0, %v8008_v1  ;;  %v12331_v24 = vpop.f32.mrb[134].mxu0  ;;  %v14728_v61 = vld [vmem:[#allocation184_spill] sm:$0xff]  ;;  %v6842_v48 = vmul.f32 -1.442695, %v12300_v38 }
 0x418   : > { %14726 = vst [vmem:[#allocation210_spill] sm:$0xff] %v12331_v24  ;;  %v8012_v33 = vpop.eup %8011  ;;  %v4844_v51 = vmul.f32 %v8010_v7, %v12114_v2  ;;  %8031 = vrcp.f32 %v4350_v8  ;;  %v12338_v1 = vadd.f32 %v14728_v61, %v11779_v32  ;;  %v12340_v58 = vpop.f32.mrb[134].mxu1  ;;  %v6843_v35 = vmul.f32 -1.442695, %v12305_v23  ;;  %v14732_v2 = vld [vmem:[#allocation185_spill] sm:$0xff] }
 0x419   : > { %14729 = vst [vmem:[#allocation183_spill] sm:$0xff] %v12340_v58  ;;  %v12342_v52 = vpop.f32.mrb[135].mxu0  ;;  %v8014_v62 = vpop.eup %8013  ;;  %8033 = vrcp.f32 %v4352_v10  ;;  %v12350_v8 = vadd.f32 %v14732_v2, %v11784_v47  ;;  %v6845_v61 = vmul.f32 -1.442695, %v12313_v36  ;;  %v6846_v10 = vmul.f32 -1.442695, %v12325_v34 }
 0x41a   : > { %14730 = vst [vmem:[#allocation184_spill] sm:$0xff] %v12342_v52  ;;  %v12345_v24 = vpop.f32.mrb[135].mxu1  ;;  %v8016_v60 = vpop.eup %8015  ;;  %8035 = vpow2.f32 %v6839_v63  ;;  %v4996_v7 = vpack.c.bf16 %v4844_v51, %v4840_v4  ;;  %v6844_v52 = vmul.f32 -1.442695, %v12317_v12  ;;  %v6849_v63 = vmul.f32 -1.442695, %v12338_v1 }
 0x41b   : > { %14731 = vst [vmem:[#allocation211_spill] sm:$0xff] %v12345_v24  ;;  %v8018_v25 = vpop.eup %8017  ;;  %8037 = vpow2.f32 %v6841_v42  ;;  %v6847_v24 = vmul.f32 -1.442695, %v12329_v40  ;;  %v4845_v42 = vmul.f32 %v8012_v33, %v12127_v3  ;;  %v12365_v2 = vadd.f32 %v12075_v0, %v11775_v56  ;;  %v12370_v5 = vpop.f32.mrb[136].mxu0 }
 0x41c   : > { %v8020_v58 = vpop.eup %8019  ;;  %8039 = vpow2.f32 %v6840_v44  ;;  %5578 = vmatprep.mubr.bf16.mxu1 %v4996_v7  ;;  %v14734_v44 = vpack.c.bf16 %v12254_v21, %v12251_v55  ;;  %v12372_v50 = vpop.f32.mrb[136].mxu1  ;;  %v4847_v7 = vmul.f32 %v8014_v62, %v12131_v11  ;;  %v4846_v55 = vmul.f32 %v8016_v60, %v12142_v37 }
 0x41d   : > { %v8022_v4 = vpop.eup %8021  ;;  %v4849_v51 = vmul.f32 %v8020_v58, %v12157_v17  ;;  %8041 = vpow2.f32 %v6842_v48  ;;  %14735 = vst [vmem:[#allocation185_spill] sm:$0xff] %v12372_v50  ;;  %v6848_v17 = vmul.f32 -1.442695, %v12350_v8  ;;  %v12377_v58 = vpop.f32.mrb[137].mxu0 }
 0x41e   : > { %5579 = vmatmul.mubr.bf16.gmra.mrb[180].mxu1 %v14734_v44  ;;  %v8024_v53 = vpop.eup %8023  ;;  %v4851_v3 = vmul.f32 %v8022_v4, %v12161_v16  ;;  %8043 = vpow2.f32 %v6843_v35  ;;  %v12379_v0 = vpop.f32.mrb[137].mxu1  ;;  %v4848_v16 = vmul.f32 %v8018_v25, %v12150_v59  ;;  %v6851_v59 = vmul.f32 -1.442695, %v12365_v2 }
 0x41f   : > { %14736 = vst [vmem:[#allocation186_spill] sm:$0xff] %v12379_v0  ;;  %v8026_v33 = vpop.eup %8025  ;;  %v4850_v21 = vmul.f32 %v8024_v53, %v12168_v27  ;;  %8045 = vpow2.f32 %v6845_v61  ;;  %v4997_v48 = vpack.c.bf16 %v4849_v51, %v4845_v42  ;;  %v12383_v44 = vpop.f32.mrb[138].mxu0  ;;  %v6850_v27 = vmul.f32 -1.442695, %v12359_v13  ;;  %v7083_v61 = vld [vmem:[%s13866_s6 + $0x30] sm:$0xff]  }
 0x420   : > { %v12385_v50 = vpop.f32.mrb[138].mxu1  ;;  %v12387_v11 = vpop.eup %8027  ;;  %v4852_v62 = vmul.f32 %v8026_v33, %v12184_v45  ;;  %8047 = vpow2.f32 %v6844_v52  ;;  %v4999_v35 = vpack.c.bf16 %v4851_v3, %v4847_v7  ;;  %v7084_v52 = vld [vmem:[%s13866_s6 + $0xb0] sm:$0xff]   ;;  %5928 = vmatpush1.bf16.msra.mxu0 %v7083_v61 }
 0x421   : > { %14737 = vst [vmem:[#allocation212_spill] sm:$0xff] %v12385_v50  ;;  %v12391_v4 = vpop.f32.mrb[139].mxu0  ;;  %v12393_v0 = vpop.f32.mrb[139].mxu1  ;;  %8049 = vpow2.f32 %v6846_v10  ;;  %v4998_v60 = vpack.c.bf16 %v4850_v21, %v4846_v55  ;;  %5929 = vmatprep.subr.bf16.mxu0 %v14232_v28  ;;  %6129 = vmatpush1.bf16.msra.mxu1 %v7084_v52 }
 0x422   : > { %14738 = vst [vmem:[#allocation213_spill] sm:$0xff] %v12391_v4  ;;  %14739 = vst [vmem:[#allocation214_spill] sm:$0xff] %v12393_v0  ;;  %v12395_v37 = vpop.eup %8029  ;;  %8051 = vpow2.f32 %v6847_v24  ;;  %v5000_v45 = vpack.c.bf16 %v4852_v62, %v4848_v16  ;;  %v12410_v24 = vpop.f32.mrb[140].mxu0  ;;  %6130 = vmatprep.subr.bf16.mxu1 %v14232_v28 }
 0x423   : > { %v12401_v42 = vpop.eup %8031  ;;  %8053 = vpow2.f32 %v6849_v63  ;;  %5385 = vmatprep.mubr.bf16.mxu0 %v4998_v60  ;;  %14740 = vst [vmem:[#allocation215_spill] sm:$0xff] %v12410_v24  ;;  %v12412_v33 = vpop.f32.mrb[140].mxu1 }
 0x424   : > { %v12407_v25 = vpop.eup %8033  ;;  %8055 = vpow2.f32 %v6848_v17  ;;  %5586 = vmatprep.mubr.bf16.mxu1 %v5000_v45  ;;  %5386 = vmatmul.mubr.bf16.gmra.mrb[184].mxu0 %v4997_v48  ;;  %14741 = vst [vmem:[#allocation216_spill] sm:$0xff] %v12412_v33  ;;  %v12414_v63 = vpop.f32.mrb[141].mxu0  ;;  %v12431_v45 = vadd.f32 %v12083_v46, %v11784_v47  ;;  %v12445_v46 = vadd.f32 %v12091_v57, %v11779_v32 }
 0x425   : > { %v8036_v10 = vpop.eup %8035  ;;  %8057 = vpow2.f32 %v6850_v27  ;;  %14742 = vst [vmem:[#allocation217_spill] sm:$0xff] %v12414_v63  ;;  %v12417_v21 = vpop.f32.mrb[141].mxu1 }
 0x426   : > { %v8038_v51 = vpop.eup %8037  ;;  %v4353_v53 = vadd.f32 1.0, %v8036_v10  ;;  %5587 = vmatmul.mubr.bf16.gmra.mrb[184].mxu1 %v4999_v35  ;;  %8059 = vpow2.f32 %v6851_v59  ;;  %14743 = vst [vmem:[#allocation218_spill] sm:$0xff] %v12417_v21  ;;  %v12419_v48 = vpop.f32.mrb[142].mxu0  ;;  %v12423_v35 = vadd.f32 %v12077_v41, %v11779_v32  ;;  %v12437_v41 = vadd.f32 %v12085_v19, %v11788_v20 }
 0x427   : > { %v8040_v7 = vpop.eup %8039  ;;  %v4355_v3 = vadd.f32 1.0, %v8038_v51  ;;  %14744 = vst [vmem:[#allocation219_spill] sm:$0xff] %v12419_v48  ;;  %v12425_v27 = vpop.f32.mrb[142].mxu1  ;;  %v6857_v48 = vmul.f32 -1.442695, %v12445_v46 }
 0x428   : > { %v8042_v55 = vpop.eup %8041  ;;  %8061 = vrcp.f32 %v4353_v53  ;;  %v4354_v17 = vadd.f32 1.0, %v8040_v7  ;;  %14745 = vst [vmem:[#allocation220_spill] sm:$0xff] %v12425_v27  ;;  %v12427_v60 = vpop.f32.mrb[143].mxu0 }
 0x429   : > { %v8044_v16 = vpop.eup %8043  ;;  %8063 = vrcp.f32 %v4355_v3  ;;  %v4356_v62 = vadd.f32 1.0, %v8042_v55  ;;  %14746 = vst [vmem:[#allocation221_spill] sm:$0xff] %v12427_v60  ;;  %v12433_v52 = vpop.f32.mrb[143].mxu1  ;;  %v12441_v3 = vadd.f32 %v12089_v6, %v11775_v56  ;;  %v6854_v60 = vmul.f32 -1.442695, %v12437_v41 }
 0x42a   : > { %v8046_v61 = vpop.eup %8045  ;;  %8065 = vrcp.f32 %v4354_v17  ;;  %v4357_v59 = vadd.f32 1.0, %v8044_v16  ;;  %14747 = vst [vmem:[#allocation222_spill] sm:$0xff] %v12433_v52  ;;  %v6853_v16 = vmul.f32 -1.442695, %v12423_v35  ;;  %v12453_v6 = vpop.f32.mrb[144].mxu0 }
 0x42b   : > { %v8048_v10 = vpop.eup %8047  ;;  %8067 = vrcp.f32 %v4356_v62  ;;  %v4359_v51 = vadd.f32 1.0, %v8046_v61  ;;  %v6852_v61 = vmul.f32 -1.442695, %v12431_v45 }
 0x42c   : > { %v8050_v53 = vpop.eup %8049  ;;  %8069 = vrcp.f32 %v4357_v59  ;;  %v4358_v7 = vadd.f32 1.0, %v8048_v10  ;;  %v14748_v59 = vld [vmem:[#allocation187_spill] sm:$0xff] }
 0x42d   : > { %v8052_v55 = vpop.eup %8051  ;;  %8071 = vrcp.f32 %v4359_v51  ;;  %v4360_v17 = vadd.f32 1.0, %v8050_v53  ;;  %v12451_v10 = vadd.f32 %v14748_v59, %v11784_v47  ;;  %14749 = vst [vmem:[#allocation187_spill] sm:$0xff] %v12453_v6  ;;  %v12456_v51 = vpop.f32.mrb[144].mxu1  ;;  %v14752_v6 = vld [vmem:[#allocation188_spill] sm:$0xff] }
 0x42e   : > { %v8054_v62 = vpop.eup %8053  ;;  %8073 = vrcp.f32 %v4358_v7  ;;  %v4361_v19 = vadd.f32 1.0, %v8052_v55  ;;  %14750 = vst [vmem:[#allocation223_spill] sm:$0xff] %v12456_v51  ;;  %v12458_v53 = vpop.f32.mrb[145].mxu0  ;;  %v6855_v55 = vmul.f32 -1.442695, %v12441_v3 }
 0x42f   : > { %v8056_v52 = vpop.eup %8055  ;;  %8075 = vrcp.f32 %v4360_v17  ;;  %v4363_v57 = vadd.f32 1.0, %v8054_v62  ;;  %14751 = vst [vmem:[#allocation224_spill] sm:$0xff] %v12458_v53  ;;  %v12464_v17 = vadd.f32 %v14752_v6, %v11788_v20  ;;  %v14753_v62 = vld [vmem:[#allocation189_spill] sm:$0xff]  ;;  %v12475_v24 = vpop.f32.mrb[145].mxu1  ;;  %v4853_v6 = vmul.f32 %v12387_v11, %v12188_v22 }
 0x430   : > { %v8058_v27 = vpop.eup %8057  ;;  %8077 = vrcp.f32 %v4361_v19  ;;  %v4362_v7 = vadd.f32 1.0, %v8056_v52  ;;  %v12468_v63 = vadd.f32 %v14753_v62, %v11775_v56  ;;  %v6856_v52 = vmul.f32 -1.442695, %v12451_v10  ;;  %v14754_v19 = vld [vmem:[#allocation190_spill] sm:$0xff]  ;;  %14755 = vst [vmem:[#allocation188_spill] sm:$0xff] %v12475_v24  ;;  %v14756_v62 = vld [vmem:[#allocation191_spill] sm:$0xff] }
 0x431   : > { %v8060_v59 = vpop.eup %8059  ;;  %8079 = vrcp.f32 %v4363_v57  ;;  %v4364_v21 = vadd.f32 1.0, %v8058_v27  ;;  %v12473_v33 = vadd.f32 %v14754_v19, %v11779_v32  ;;  %v12482_v0 = vadd.f32 %v14756_v62, %v11784_v47  ;;  %v14757_v24 = vld [vmem:[#allocation192_spill] sm:$0xff]  ;;  %v12491_v50 = vpop.f32.mrb[146].mxu0 }
 0x432   : > { %v8062_v51 = vpop.eup %8061  ;;  %8081 = vrcp.f32 %v4362_v7  ;;  %v4365_v53 = vadd.f32 1.0, %v8060_v59  ;;  %v4855_v59 = vmul.f32 %v12395_v37, %v12192_v49  ;;  %v12489_v4 = vadd.f32 %v14757_v24, %v11788_v20  ;;  %v12493_v22 = vpop.f32.mrb[146].mxu1 }
 0x433   : > { %v8064_v27 = vpop.eup %8063  ;;  %v4857_v57 = vmul.f32 %v8062_v51, %v12277_v54  ;;  %8083 = vrcp.f32 %v4364_v21  ;;  %v4854_v11 = vmul.f32 %v12401_v42, %v12211_v31  ;;  %v6858_v31 = vmul.f32 -1.442695, %v12464_v17 }
 0x434   : > { %v8066_v7 = vpop.eup %8065  ;;  %v4859_v19 = vmul.f32 %v8064_v27, %v12284_v15  ;;  %8085 = vrcp.f32 %v4365_v53  ;;  %v4856_v15 = vmul.f32 %v12407_v25, %v12223_v14  ;;  %v12501_v53 = vpop.f32.mrb[147].mxu0  ;;  %v7085_v14 = vld [vmem:[%s13866_s6 + $0x38] sm:$0xff]   ;;  %v6859_v25 = vmul.f32 -1.442695, %v12468_v63 }
 0x435   : > { %v8068_v54 = vpop.eup %8067  ;;  %v4858_v21 = vmul.f32 %v8066_v7, %v12290_v39  ;;  %8087 = vpow2.f32 %v6853_v16  ;;  %v5001_v51 = vpack.c.bf16 %v4857_v57, %v4853_v6  ;;  %v12503_v27 = vpop.f32.mrb[147].mxu1  ;;  %v14758_v39 = vld [vmem:[#allocation193_spill] sm:$0xff]  ;;  %v6861_v7 = vmul.f32 -1.442695, %v12473_v33  ;;  %5930 = vmatpush1.bf16.msra.mxu0 %v7085_v14 }
 0x436   : > { %v8070_v49 = vpop.eup %8069  ;;  %v4860_v37 = vmul.f32 %v8068_v54, %v12300_v38  ;;  %8089 = vpow2.f32 %v6852_v61  ;;  %v5003_v24 = vpack.c.bf16 %v4859_v19, %v4855_v59  ;;  %v12508_v42 = vadd.f32 %v14758_v39, %v11775_v56  ;;  %v14759_v61 = vld [vmem:[#allocation194_spill] sm:$0xff]  ;;  %5931 = vmatprep.subr.bf16.mxu0 %v14232_v28 }
 0x437   : > { %v8072_v62 = vpop.eup %8071  ;;  %8091 = vpow2.f32 %v6854_v60  ;;  %v5002_v16 = vpack.c.bf16 %v4858_v21, %v4854_v11  ;;  %v12516_v6 = vadd.f32 %v14759_v61, %v11779_v32  ;;  %v6860_v19 = vmul.f32 -1.442695, %v12482_v0 }
 0x438   : > { %v8074_v38 = vpop.eup %8073  ;;  %8093 = vpow2.f32 %v6855_v55  ;;  %v5004_v60 = vpack.c.bf16 %v4860_v37, %v4856_v15  ;;  %v6862_v54 = vmul.f32 -1.442695, %v12489_v4  ;;  %v4861_v11 = vmul.f32 %v8070_v49, %v12305_v23  ;;  %v7086_v15 = vld [vmem:[%s13866_s6 + $0xb8] sm:$0xff]   ;;  %v12531_v49 = vpop.f32.mrb[148].mxu0 }
 0x439   : > { %v8076_v57 = vpop.eup %8075  ;;  %8095 = vpow2.f32 %v6857_v48  ;;  %5393 = vmatprep.mubr.bf16.mxu0 %v5002_v16  ;;  %v6863_v48 = vmul.f32 -1.442695, %v12508_v42  ;;  %v4863_v37 = vmul.f32 %v8072_v62, %v12313_v36  ;;  %v6865_v23 = vmul.f32 -1.442695, %v12516_v6  ;;  %14760 = vst [vmem:[#allocation189_spill] sm:$0xff] %v12531_v49  ;;  %6131 = vmatpush1.bf16.msra.mxu1 %v7086_v15  ;;  %v12537_v14 = vpop.f32.mrb[149].mxu0 }
 0x43a   : > { %v8078_v59 = vpop.eup %8077  ;;  %8097 = vpow2.f32 %v6856_v52  ;;  %5594 = vmatprep.mubr.bf16.mxu1 %v5004_v60  ;;  %5394 = vmatmul.mubr.bf16.gmra.mrb[188].mxu0 %v5001_v51  ;;  %14762 = vst [vmem:[#allocation191_spill] sm:$0xff] %v12537_v14  ;;  %v4864_v62 = vmul.f32 %v8076_v57, %v12325_v34  ;;  %v12624_v49 = vadd.f32 %v12227_v43, %v11775_v56 }
 0x43b   : > { %v8080_v55 = vpop.eup %8079  ;;  %v4865_v21 = vmul.f32 %v8078_v59, %v12329_v40  ;;  %8099 = vpow2.f32 %v6858_v31  ;;  %5595 = vmatmul.mubr.bf16.gmra.mrb[188].mxu1 %v5003_v24  ;;  %v12533_v40 = vpop.f32.mrb[148].mxu1  ;;  %v4862_v24 = vmul.f32 %v8074_v38, %v12317_v12  ;;  %6132 = vmatprep.subr.bf16.mxu1 %v14232_v28 }
 0x43c   : > { %v8082_v52 = vpop.eup %8081  ;;  %v4867_v51 = vmul.f32 %v8080_v55, %v12338_v1  ;;  %8101 = vpow2.f32 %v6859_v25  ;;  %14761 = vst [vmem:[#allocation190_spill] sm:$0xff] %v12533_v40  ;;  %v12539_v36 = vpop.f32.mrb[149].mxu1 }
 0x43d   : > { %v8084_v31 = vpop.eup %8083  ;;  %v4866_v39 = vmul.f32 %v8082_v52, %v12350_v8  ;;  %8103 = vpow2.f32 %v6861_v7  ;;  %v5005_v16 = vpack.c.bf16 %v4865_v21, %v4861_v11  ;;  %14763 = vst [vmem:[#allocation192_spill] sm:$0xff] %v12539_v36  ;;  %v12546_v12 = vpop.f32.mrb[150].mxu0 }
 0x43e   : > { %v12541_v1 = vpop.eup %8085  ;;  %v4868_v25 = vmul.f32 %v8084_v31, %v12359_v13  ;;  %8105 = vpow2.f32 %v6860_v19  ;;  %v5007_v61 = vpack.c.bf16 %v4867_v51, %v4863_v37  ;;  %14764 = vst [vmem:[#allocation193_spill] sm:$0xff] %v12546_v12  ;;  %v12548_v8 = vpop.f32.mrb[150].mxu1  ;;  %v14768_v51 = vld [vmem:[#allocation195_spill] sm:$0xff] }
 0x43f   : > { %14765 = vst [vmem:[#allocation194_spill] sm:$0xff] %v12548_v8  ;;  %v8088_v38 = vpop.eup %8087  ;;  %8107 = vpow2.f32 %v6862_v54  ;;  %v5006_v60 = vpack.c.bf16 %v4866_v39, %v4862_v24  ;;  %v12550_v7 = vpop.f32.mrb[151].mxu0  ;;  %v14769_v24 = vld [vmem:[#allocation126_spill] sm:$0xff] }
 0x440   : > { %14766 = vst [vmem:[#allocation225_spill] sm:$0xff] %v12550_v7  ;;  %v12552_v59 = vpop.f32.mrb[151].mxu1  ;;  %v8090_v55 = vpop.eup %8089  ;;  %v4367_v11 = vadd.f32 1.0, %v8088_v38  ;;  %8109 = vpow2.f32 %v6863_v48  ;;  %v5008_v34 = vpack.c.bf16 %v4868_v25, %v4864_v62  ;;  %v12556_v48 = vadd.f32 %v14768_v51, %v11784_v47  ;;  %v14772_v62 = vld [vmem:[#allocation167_spill] sm:$0xff]  ;;  %v14773_v25 = vld [vmem:[#allocation44_spill] sm:$0xff] }
 0x441   : > { %14767 = vst [vmem:[#allocation226_spill] sm:$0xff] %v12552_v59  ;;  %v8092_v13 = vpop.eup %8091  ;;  %v4366_v57 = vadd.f32 1.0, %v8090_v55  ;;  %8111 = vpow2.f32 %v6865_v23  ;;  %5401 = vmatprep.mubr.bf16.mxu0 %v5006_v60  ;;  %v14770_v23 = vld [vmem:[#allocation110_spill] sm:$0xff]  ;;  %v12564_v38 = vmul.f32 %v14773_v25, %v14772_v62  ;;  %v14776_v55 = vld [vmem:[#allocation24_spill] sm:$0xff] }
 0x442   : > { %v8094_v19 = vpop.eup %8093  ;;  %8113 = vrcp.f32 %v4367_v11  ;;  %v4368_v21 = vadd.f32 1.0, %v8092_v13  ;;  %5602 = vmatprep.mubr.bf16.mxu1 %v5008_v34  ;;  %5402 = vmatmul.mubr.bf16.gmra.mrb[192].mxu0 %v5005_v16  ;;  %v12560_v39 = vmul.f32 %v14770_v23, %v14769_v24  ;;  %v14778_v34 = vld [vmem:[#allocation47_spill] sm:$0xff]  ;;  %v14779_v13 = vld [vmem:[#allocation173_spill] sm:$0xff]  ;;  %v14781_v51 = vld [vmem:[#allocation196_spill] sm:$0xff]  ;;  %v6864_v25 = vmul.f32 -1.442695, %v12556_v48 }
 0x443   : > { %v8096_v15 = vpop.eup %8095  ;;  %8115 = vrcp.f32 %v4366_v57  ;;  %v4369_v54 = vadd.f32 1.0, %v8094_v19  ;;  %5603 = vmatmul.mubr.bf16.gmra.mrb[192].mxu1 %v5007_v61  ;;  %14774 = vst [vmem:[#allocation126_spill] sm:$0xff] %v12564_v38  ;;  %v14775_v61 = vld [vmem:[#allocation101_spill] sm:$0xff]  ;;  %v12572_v57 = vmul.f32 %v14779_v13, %v14778_v34  ;;  %v12576_v24 = vadd.f32 %v14781_v51, %v11788_v20  ;;  %v14785_v34 = vld [vmem:[#allocation200_spill] sm:$0xff] }
 0x444   : > { %v8098_v52 = vpop.eup %8097  ;;  %8117 = vrcp.f32 %v4368_v21  ;;  %v4371_v37 = vadd.f32 1.0, %v8096_v15  ;;  %14771 = vst [vmem:[#allocation195_spill] sm:$0xff] %v12560_v39  ;;  %v12568_v11 = vmul.f32 %v14776_v55, %v14775_v61  ;;  %v14783_v61 = vld [vmem:[#allocation198_spill] sm:$0xff]  ;;  %v12593_v13 = vadd.f32 %v14785_v34, %v11788_v20 }
 0x445   : > { %v8100_v31 = vpop.eup %8099  ;;  %8119 = vrcp.f32 %v4369_v54  ;;  %v4370_v16 = vadd.f32 1.0, %v8098_v52  ;;  %14780 = vst [vmem:[#allocation167_spill] sm:$0xff] %v12572_v57  ;;  %v14782_v54 = vld [vmem:[#allocation197_spill] sm:$0xff]  ;;  %v4869_v39 = vmul.f32 %v12541_v1, %v12365_v2  ;;  %v12643_v2 = vpop.f32.mrb[152].mxu0 }
 0x446   : > { %v8102_v60 = vpop.eup %8101  ;;  %14777 = vst [vmem:[#allocation110_spill] sm:$0xff] %v12568_v11  ;;  %8121 = vrcp.f32 %v4371_v37  ;;  %v4372_v19 = vadd.f32 1.0, %v8100_v31  ;;  %v12580_v52 = vadd.f32 %v14782_v54, %v11775_v56  ;;  %v12585_v37 = vadd.f32 %v14783_v61, %v11779_v32  ;;  %v14787_v61 = vld [vmem:[#allocation202_spill] sm:$0xff] }
 0x447   : > { %v8104_v21 = vpop.eup %8103  ;;  %8123 = vrcp.f32 %v4370_v16  ;;  %v4373_v15 = vadd.f32 1.0, %v8102_v60  ;;  %v14784_v60 = vld [vmem:[#allocation199_spill] sm:$0xff]  ;;  %v12601_v59 = vadd.f32 %v14787_v61, %v11779_v32 }
 0x448   : > { %v8106_v23 = vpop.eup %8105  ;;  %8125 = vrcp.f32 %v4372_v19  ;;  %v4375_v62 = vadd.f32 1.0, %v8104_v21  ;;  %v12589_v55 = vadd.f32 %v14784_v60, %v11784_v47  ;;  %v14786_v21 = vld [vmem:[#allocation201_spill] sm:$0xff]  ;;  %v6866_v60 = vmul.f32 -1.442695, %v12576_v24 }
 0x449   : > { %v8108_v31 = vpop.eup %8107  ;;  %8127 = vrcp.f32 %v4373_v15  ;;  %v4374_v16 = vadd.f32 1.0, %v8106_v23  ;;  %v12597_v54 = vadd.f32 %v14786_v21, %v11775_v56  ;;  %v6867_v7 = vmul.f32 -1.442695, %v12580_v52 }
 0x44a   : > { %v8110_v51 = vpop.eup %8109  ;;  %8129 = vrcp.f32 %v4375_v62  ;;  %v4376_v19 = vadd.f32 1.0, %v8108_v31  ;;  %v6869_v62 = vmul.f32 -1.442695, %v12585_v37  ;;  %v14788_v31 = vld [vmem:[#allocation203_spill] sm:$0xff]  ;;  %v6868_v61 = vmul.f32 -1.442695, %v12589_v55 }
 0x44b   : > { %v8112_v15 = vpop.eup %8111  ;;  %8131 = vrcp.f32 %v4374_v16  ;;  %v4377_v23 = vadd.f32 1.0, %v8110_v51  ;;  %v12608_v21 = vadd.f32 %v14788_v31, %v11784_v47  ;;  %v6870_v16 = vmul.f32 -1.442695, %v12593_v13 }
 0x44c   : > { %v8114_v34 = vpop.eup %8113  ;;  %8133 = vrcp.f32 %v4376_v19  ;;  %v4379_v8 = vadd.f32 1.0, %v8112_v15  ;;  %v6871_v19 = vmul.f32 -1.442695, %v12597_v54  ;;  %v6873_v15 = vmul.f32 -1.442695, %v12601_v59 }
 0x44d   : > { %v8116_v12 = vpop.eup %8115  ;;  %8135 = vrcp.f32 %v4377_v23  ;;  %v14789_v23 = vld [vmem:[#allocation204_spill] sm:$0xff]  ;;  %v4871_v43 = vmul.f32 %v8114_v34, %v12423_v35  ;;  %v12649_v35 = vpop.f32.mrb[153].mxu0 }
 0x44e   : > { %v8118_v36 = vpop.eup %8117  ;;  %8137 = vrcp.f32 %v4379_v8  ;;  %v12620_v40 = vadd.f32 %v14789_v23, %v11788_v20  ;;  %v12628_v8 = vadd.f32 %v12229_v29, %v11779_v32  ;;  %v7087_v23 = vld [vmem:[%s13866_s6 + $0x40] sm:$0xff]   ;;  %v12641_v29 = vadd.f32 %v12234_v9, %v11784_v47 }
 0x44f   : > { %v8120_v31 = vpop.eup %8119  ;;  %8139 = vpow2.f32 %v6864_v25  ;;  %v6872_v25 = vmul.f32 -1.442695, %v12608_v21  ;;  %5932 = vmatpush1.bf16.msra.mxu0 %v7087_v23  ;;  %v4872_v9 = vmul.f32 %v8118_v36, %v12437_v41 }
 0x450   : > { %v8122_v51 = vpop.eup %8121  ;;  %v4873_v14 = vmul.f32 %v8120_v31, %v12441_v3  ;;  %8141 = vpow2.f32 %v6866_v60  ;;  %v12645_v3 = vpop.f32.mrb[152].mxu1  ;;  %v4870_v60 = vmul.f32 %v8116_v12, %v12431_v45  ;;  %5933 = vmatprep.subr.bf16.mxu0 %v14232_v28  ;;  %v6876_v23 = vmul.f32 -1.442695, %v12641_v29 }
 0x451   : > { %v8124_v38 = vpop.eup %8123  ;;  %v4875_v57 = vmul.f32 %v8122_v51, %v12445_v46  ;;  %8143 = vpow2.f32 %v6867_v7  ;;  %14790 = vst [vmem:[#allocation44_spill] sm:$0xff] %v12645_v3  ;;  %v12651_v46 = vpop.f32.mrb[153].mxu1 }
 0x452   : > { %v8126_v1 = vpop.eup %8125  ;;  %v4874_v31 = vmul.f32 %v8124_v38, %v12451_v10  ;;  %8145 = vpow2.f32 %v6869_v62  ;;  %v5009_v11 = vpack.c.bf16 %v4873_v14, %v4869_v39  ;;  %v12656_v3 = vpop.f32.mrb[154].mxu0  ;;  %v6874_v14 = vmul.f32 -1.442695, %v12620_v40  ;;  %v7088_v39 = vld [vmem:[%s13866_s6 + $0xc0] sm:$0xff]  }
 0x453   : > { %v8128_v7 = vpop.eup %8127  ;;  %v4876_v34 = vmul.f32 %v8126_v1, %v12464_v17  ;;  %8147 = vpow2.f32 %v6868_v61  ;;  %v5011_v51 = vpack.c.bf16 %v4875_v57, %v4871_v43  ;;  %v12658_v45 = vpop.f32.mrb[154].mxu1  ;;  %v6875_v38 = vmul.f32 -1.442695, %v12624_v49  ;;  %6133 = vmatpush1.bf16.msra.mxu1 %v7088_v39 }
 0x454   : > { %14791 = vst [vmem:[#allocation101_spill] sm:$0xff] %v12658_v45  ;;  %v8130_v10 = vpop.eup %8129  ;;  %8149 = vpow2.f32 %v6870_v16  ;;  %v5010_v12 = vpack.c.bf16 %v4874_v31, %v4870_v60  ;;  %v12664_v41 = vpop.f32.mrb[155].mxu0  ;;  %v6877_v61 = vmul.f32 -1.442695, %v12628_v8  ;;  %v12676_v1 = vmul.f32 %v8128_v7, %v12468_v63  ;;  %6134 = vmatprep.subr.bf16.mxu1 %v14232_v28 }
 0x455   : > { %14792 = vst [vmem:[#allocation24_spill] sm:$0xff] %v12664_v41  ;;  %v12666_v17 = vpop.f32.mrb[155].mxu1  ;;  %v12668_v36 = vpop.eup %8131  ;;  %8151 = vpow2.f32 %v6871_v19  ;;  %v5012_v57 = vpack.c.bf16 %v4876_v34, %v4872_v9  ;;  %v12683_v60 = vmul.f32 %v8130_v10, %v12473_v33 }
 0x456   : > { %14793 = vst [vmem:[#allocation47_spill] sm:$0xff] %v12666_v17  ;;  %v12671_v62 = vpop.eup %8133  ;;  %8153 = vpow2.f32 %v6873_v15  ;;  %5409 = vmatprep.mubr.bf16.mxu0 %v5010_v12  ;;  %v12690_v31 = vpop.f32.mrb[156].mxu1 }
 0x457   : > { %v8136_v16 = vpop.eup %8135  ;;  %8155 = vpow2.f32 %v6872_v25  ;;  %5610 = vmatprep.mubr.bf16.mxu1 %v5012_v57  ;;  %5410 = vmatmul.mubr.bf16.gmra.mrb[196].mxu0 %v5009_v11  ;;  %v12688_v11 = vpop.f32.mrb[156].mxu0  ;;  %14795 = vst [vmem:[#allocation196_spill] sm:$0xff] %v12690_v31 }
 0x458   : > { %v8138_v43 = vpop.eup %8137  ;;  %v12679_v19 = vmul.f32 %v8136_v16, %v12508_v42  ;;  %8157 = vpow2.f32 %v6874_v14  ;;  %5611 = vmatmul.mubr.bf16.gmra.mrb[196].mxu1 %v5011_v51  ;;  %14794 = vst [vmem:[#allocation173_spill] sm:$0xff] %v12688_v11  ;;  %v12694_v9 = vpop.f32.mrb[157].mxu0  ;;  %v14801_v42 = vld [vmem:[#allocation176_spill] sm:$0xff] }
 0x459   : > { %v8140_v15 = vpop.eup %8139  ;;  %v12686_v25 = vmul.f32 %v8138_v43, %v12516_v6  ;;  %8159 = vpow2.f32 %v6875_v38  ;;  %14796 = vst [vmem:[#allocation197_spill] sm:$0xff] %v12694_v9  ;;  %v12696_v34 = vpop.f32.mrb[157].mxu1  ;;  %v14803_v9 = vld [vmem:[#allocation178_spill] sm:$0xff] }
 0x45a   : > { %v8142_v63 = vpop.eup %8141  ;;  %v4378_v7 = vadd.f32 1.0, %v8140_v15  ;;  %8161 = vpow2.f32 %v6877_v61  ;;  %14797 = vst [vmem:[#allocation198_spill] sm:$0xff] %v12696_v34  ;;  %v12700_v10 = vpop.f32.mrb[158].mxu0  ;;  %v12708_v15 = vadd.f32 %v12239_v18, %v11775_v56 }
 0x45b   : > { %v8144_v33 = vpop.eup %8143  ;;  %v4380_v51 = vadd.f32 1.0, %v8142_v63  ;;  %8163 = vpow2.f32 %v6876_v23  ;;  %14798 = vst [vmem:[#allocation199_spill] sm:$0xff] %v12700_v10  ;;  %v12704_v23 = vadd.f32 %v12236_v26, %v11788_v20  ;;  %v14799_v26 = vld [vmem:[#allocation174_spill] sm:$0xff]  ;;  %v12738_v31 = vpop.f32.mrb[158].mxu1 }
 0x45c   : > { %v8146_v14 = vpop.eup %8145  ;;  %8165 = vrcp.f32 %v4378_v7  ;;  %v4381_v12 = vadd.f32 1.0, %v8144_v33  ;;  %v12712_v33 = vadd.f32 %v12241_v30, %v11779_v32  ;;  %14804 = vst [vmem:[#allocation200_spill] sm:$0xff] %v12738_v31  ;;  %v14806_v31 = vld [vmem:[#allocation179_spill] sm:$0xff]  ;;  %v12754_v41 = vpop.f32.mrb[159].mxu0 }
 0x45d   : > { %v8148_v39 = vpop.eup %8147  ;;  %8167 = vrcp.f32 %v4380_v51  ;;  %v4383_v38 = vadd.f32 1.0, %v8146_v14  ;;  %v12752_v17 = vadd.f32 %v14806_v31, %v11775_v56  ;;  %14807 = vst [vmem:[#allocation201_spill] sm:$0xff] %v12754_v41 }
 0x45e   : > { %v8150_v57 = vpop.eup %8149  ;;  %8169 = vrcp.f32 %v4381_v12  ;;  %v4382_v61 = vadd.f32 1.0, %v8148_v39 }
 0x45f   : > { %v8152_v16 = vpop.eup %8151  ;;  %8171 = vrcp.f32 %v4383_v38  ;;  %v4384_v43 = vadd.f32 1.0, %v8150_v57  ;;  %v12716_v38 = vadd.f32 %v14799_v26, %v11784_v47 }
 0x460   : > { %v8154_v63 = vpop.eup %8153  ;;  %8173 = vrcp.f32 %v4382_v61  ;;  %v4385_v7 = vadd.f32 1.0, %v8152_v16  ;;  %v6878_v61 = vmul.f32 -1.442695, %v12704_v23  ;;  %v6879_v16 = vmul.f32 -1.442695, %v12708_v15 }
 0x461   : > { %v8156_v51 = vpop.eup %8155  ;;  %8175 = vrcp.f32 %v4384_v43  ;;  %v4387_v14 = vadd.f32 1.0, %v8154_v63  ;;  %v6881_v43 = vmul.f32 -1.442695, %v12712_v33  ;;  %v14800_v63 = vld [vmem:[#allocation177_spill] sm:$0xff] }
 0x462   : > { %v8158_v12 = vpop.eup %8157  ;;  %8177 = vrcp.f32 %v4385_v7  ;;  %v4386_v39 = vadd.f32 1.0, %v8156_v51  ;;  %v12723_v7 = vadd.f32 %v14800_v63, %v11788_v20  ;;  %v12736_v63 = vadd.f32 %v14803_v9, %v11784_v47 }
 0x463   : > { %v8160_v57 = vpop.eup %8159  ;;  %8179 = vrcp.f32 %v4387_v14  ;;  %v4388_v18 = vadd.f32 1.0, %v8158_v12  ;;  %v12727_v14 = vadd.f32 %v14801_v42, %v11775_v56  ;;  %v14802_v12 = vld [vmem:[#allocation175_spill] sm:$0xff]  ;;  %v4878_v42 = vmul.f32 %v12668_v36, %v12482_v0  ;;  %v12756_v0 = vpop.f32.mrb[159].mxu1 }
 0x464   : > { %v8162_v6 = vpop.eup %8161  ;;  %8181 = vrcp.f32 %v4386_v39  ;;  %v4389_v30 = vadd.f32 1.0, %v8160_v57  ;;  %v12731_v10 = vadd.f32 %v14802_v12, %v11779_v32  ;;  %v6880_v57 = vmul.f32 -1.442695, %v12716_v38  ;;  %v14805_v12 = vld [vmem:[#allocation205_spill] sm:$0xff]  ;;  %14808 = vst [vmem:[#allocation202_spill] sm:$0xff] %v12756_v0 }
 0x465   : > { %v8164_v51 = vpop.eup %8163  ;;  %8183 = vrcp.f32 %v4388_v18  ;;  %v4391_v26 = vadd.f32 1.0, %v8162_v6  ;;  %v12745_v11 = vadd.f32 %v14805_v12, %v11788_v20  ;;  %v6882_v36 = vmul.f32 -1.442695, %v12723_v7  ;;  %v7090_v12 = vld [vmem:[%s13866_s6 + $0xc8] sm:$0xff]  }
 0x466   : > { %v8166_v34 = vpop.eup %8165  ;;  %8185 = vrcp.f32 %v4389_v30  ;;  %v4390_v39 = vadd.f32 1.0, %v8164_v51  ;;  %v4880_v51 = vmul.f32 %v12671_v62, %v12489_v4  ;;  %v6883_v31 = vmul.f32 -1.442695, %v12727_v14  ;;  %6135 = vmatpush1.bf16.msra.mxu1 %v7090_v12 }
 0x467   : > { %v8168_v6 = vpop.eup %8167  ;;  %v4882_v18 = vmul.f32 %v8166_v34, %v12556_v48  ;;  %8187 = vrcp.f32 %v4391_v26  ;;  %v14809_v34 = vld [vmem:[#allocation180_spill] sm:$0xff]  ;;  %v6886_v0 = vmul.f32 -1.442695, %v12745_v11  ;;  %6136 = vmatprep.subr.bf16.mxu1 %v14232_v28 }
 0x468   : > { %v8170_v30 = vpop.eup %8169  ;;  %v4884_v9 = vmul.f32 %v8168_v6, %v12576_v24  ;;  %8189 = vrcp.f32 %v4390_v39  ;;  %v12761_v26 = vadd.f32 %v14809_v34, %v11779_v32  ;;  %v7089_v24 = vld [vmem:[%s13866_s6 + $0x48] sm:$0xff]   ;;  %v14810_v39 = vld [vmem:[#allocation181_spill] sm:$0xff] }
 0x469   : > { %v8172_v48 = vpop.eup %8171  ;;  %8191 = vpow2.f32 %v6878_v61  ;;  %v5014_v4 = vpack.c.bf16 %v4882_v18, %v4878_v42  ;;  %v12769_v6 = vadd.f32 %v14810_v39, %v11784_v47  ;;  %v6885_v42 = vmul.f32 -1.442695, %v12731_v10  ;;  %5934 = vmatpush1.bf16.msra.mxu0 %v7089_v24 }
 0x46a   : > { %v8174_v62 = vpop.eup %8173  ;;  %8193 = vpow2.f32 %v6879_v16  ;;  %v5016_v61 = vpack.c.bf16 %v4884_v9, %v4880_v51  ;;  %v6884_v18 = vmul.f32 -1.442695, %v12736_v63  ;;  %v6887_v39 = vmul.f32 -1.442695, %v12752_v17  ;;  %v14811_v51 = vld [vmem:[#allocation206_spill] sm:$0xff]  ;;  %5935 = vmatprep.subr.bf16.mxu0 %v14232_v28 }
 0x46b   : > { %v8176_v34 = vpop.eup %8175  ;;  %8195 = vpow2.f32 %v6881_v43  ;;  %5417 = vmatprep.mubr.bf16.mxu0 %v5014_v4  ;;  %v12780_v9 = vadd.f32 %v14811_v51, %v11788_v20  ;;  %v14812_v43 = vpack.c.bf16 %v12679_v19, %v12676_v1  ;;  %v4885_v45 = vmul.f32 %v8170_v30, %v12580_v52  ;;  %v12795_v52 = vpop.f32.mrb[160].mxu0 }
 0x46c   : > { %v8178_v16 = vpop.eup %8177  ;;  %8197 = vpow2.f32 %v6880_v57  ;;  %5618 = vmatprep.mubr.bf16.mxu1 %v5016_v61  ;;  %v6889_v57 = vmul.f32 -1.442695, %v12761_v26  ;;  %v14813_v24 = vpack.c.bf16 %v12686_v25, %v12683_v60  ;;  %v4887_v61 = vmul.f32 %v8172_v48, %v12585_v37  ;;  %v12802_v37 = vpop.f32.mrb[161].mxu0 }
 0x46d   : > { %5418 = vmatmul.mubr.bf16.gmra.mrb[200].mxu0 %v14812_v43  ;;  %v8180_v41 = vpop.eup %8179  ;;  %v4889_v4 = vmul.f32 %v8178_v16, %v12597_v54  ;;  %8199 = vpow2.f32 %v6882_v36  ;;  %v6888_v19 = vmul.f32 -1.442695, %v12769_v6  ;;  %v12797_v54 = vpop.f32.mrb[160].mxu1  ;;  %v4886_v36 = vmul.f32 %v8174_v62, %v12589_v55  ;;  %14815 = vst [vmem:[#allocation204_spill] sm:$0xff] %v12802_v37 }
 0x46e   : > { %5619 = vmatmul.mubr.bf16.gmra.mrb[200].mxu1 %v14813_v24  ;;  %v8182_v51 = vpop.eup %8181  ;;  %v4891_v1 = vmul.f32 %v8180_v41, %v12601_v59  ;;  %8201 = vpow2.f32 %v6883_v31  ;;  %14814 = vst [vmem:[#allocation203_spill] sm:$0xff] %v12797_v54  ;;  %v12804_v59 = vpop.f32.mrb[161].mxu1  ;;  %v4888_v48 = vmul.f32 %v8176_v34, %v12593_v13 }
 0x46f   : > { %v8184_v30 = vpop.eup %8183  ;;  %v4890_v60 = vmul.f32 %v8182_v51, %v12608_v21  ;;  %8203 = vpow2.f32 %v6885_v42  ;;  %v5017_v25 = vpack.c.bf16 %v4889_v4, %v4885_v45  ;;  %14816 = vst [vmem:[#allocation174_spill] sm:$0xff] %v12804_v59  ;;  %v12810_v16 = vpop.f32.mrb[162].mxu0  ;;  %v6890_v45 = vmul.f32 -1.442695, %v12780_v9  ;;  %v7091_v42 = vld [vmem:[%s13866_s6 + $0x50] sm:$0xff]  }
 0x470   : > { %v12806_v41 = vpop.eup %8185  ;;  %v4892_v31 = vmul.f32 %v8184_v30, %v12620_v40  ;;  %8205 = vpow2.f32 %v6884_v18  ;;  %v5019_v12 = vpack.c.bf16 %v4891_v1, %v4887_v61  ;;  %14817 = vst [vmem:[#allocation177_spill] sm:$0xff] %v12810_v16  ;;  %v12812_v55 = vpop.f32.mrb[162].mxu1  ;;  %5936 = vmatpush1.bf16.msra.mxu0 %v7091_v42 }
 0x471   : > { %14818 = vst [vmem:[#allocation176_spill] sm:$0xff] %v12812_v55  ;;  %v12814_v21 = vpop.eup %8187  ;;  %8207 = vpow2.f32 %v6886_v0  ;;  %v5018_v62 = vpack.c.bf16 %v4890_v60, %v4886_v36  ;;  %v12820_v43 = vpop.f32.mrb[163].mxu0  ;;  %v7092_v0 = vld [vmem:[%s13866_s6 + $0xd0] sm:$0xff]   ;;  %5937 = vmatprep.subr.bf16.mxu0 %v14232_v28  ;;  %v4893_v16 = vmul.f32 %v12806_v41, %v12624_v49 }
 0x472   : > { %14819 = vst [vmem:[#allocation175_spill] sm:$0xff] %v12820_v43  ;;  %v12822_v13 = vpop.f32.mrb[163].mxu1  ;;  %v12824_v40 = vpop.eup %8189  ;;  %8209 = vpow2.f32 %v6887_v39  ;;  %v5020_v34 = vpack.c.bf16 %v4892_v31, %v4888_v48  ;;  %6137 = vmatpush1.bf16.msra.mxu1 %v7092_v0 }
 0x473   : > { %14820 = vst [vmem:[#allocation178_spill] sm:$0xff] %v12822_v13  ;;  %v8192_v18 = vpop.eup %8191  ;;  %8211 = vpow2.f32 %v6889_v57  ;;  %5425 = vmatprep.mubr.bf16.mxu0 %v5018_v62  ;;  %v12830_v1 = vpop.f32.mrb[164].mxu0  ;;  %6138 = vmatprep.subr.bf16.mxu1 %v14232_v28  ;;  %v14823_v62 = vld [vmem:[#allocation182_spill] sm:$0xff]  ;;  %v14830_v13 = vld [vmem:[#allocation211_spill] sm:$0xff]  ;;  %v4894_v41 = vmul.f32 %v12824_v40, %v12641_v29 }
 0x474   : > { %v8194_v4 = vpop.eup %8193  ;;  %v4392_v24 = vadd.f32 1.0, %v8192_v18  ;;  %8213 = vpow2.f32 %v6888_v19  ;;  %5626 = vmatprep.mubr.bf16.mxu1 %v5020_v34  ;;  %14821 = vst [vmem:[#allocation205_spill] sm:$0xff] %v12830_v1  ;;  %v12833_v19 = vpop.f32.mrb[164].mxu1  ;;  %v12837_v42 = vadd.f32 %v14823_v62, %v11775_v56  ;;  %v14824_v34 = vld [vmem:[#allocation207_spill] sm:$0xff]  ;;  %v14829_v62 = vld [vmem:[#allocation184_spill] sm:$0xff]  ;;  %v14837_v29 = vld [vmem:[#allocation186_spill] sm:$0xff] }
 0x475   : > { %5426 = vmatmul.mubr.bf16.gmra.mrb[204].mxu0 %v5017_v25  ;;  %v8196_v51 = vpop.eup %8195  ;;  %v4393_v61 = vadd.f32 1.0, %v8194_v4  ;;  %8215 = vpow2.f32 %v6890_v45  ;;  %14822 = vst [vmem:[#allocation179_spill] sm:$0xff] %v12833_v19  ;;  %v12841_v18 = vadd.f32 %v14824_v34, %v11779_v32  ;;  %v12861_v34 = vadd.f32 %v14829_v62, %v11784_v47  ;;  %v12878_v55 = vpop.f32.mrb[165].mxu0 }
 0x476   : > { %5627 = vmatmul.mubr.bf16.gmra.mrb[204].mxu1 %v5019_v12  ;;  %v8198_v39 = vpop.eup %8197  ;;  %8217 = vrcp.f32 %v4392_v24  ;;  %v4395_v57 = vadd.f32 1.0, %v8196_v51  ;;  %v14825_v24 = vld [vmem:[#allocation208_spill] sm:$0xff]  ;;  %14831 = vst [vmem:[#allocation180_spill] sm:$0xff] %v12878_v55  ;;  %v12896_v55 = vpop.f32.mrb[166].mxu0 }
 0x477   : > { %v8200_v30 = vpop.eup %8199  ;;  %8219 = vrcp.f32 %v4393_v61  ;;  %v4394_v36 = vadd.f32 1.0, %v8198_v39  ;;  %v12845_v51 = vadd.f32 %v14825_v24, %v11784_v47  ;;  %v14826_v61 = vld [vmem:[#allocation209_spill] sm:$0xff] }
 0x478   : > { %v8202_v60 = vpop.eup %8201  ;;  %8221 = vrcp.f32 %v4395_v57  ;;  %v4396_v25 = vadd.f32 1.0, %v8200_v30  ;;  %v12849_v39 = vadd.f32 %v14826_v61, %v11788_v20 }
 0x479   : > { %v8204_v48 = vpop.eup %8203  ;;  %8223 = vrcp.f32 %v4394_v36  ;;  %v4397_v31 = vadd.f32 1.0, %v8202_v60  ;;  %v14827_v36 = vld [vmem:[#allocation210_spill] sm:$0xff] }
 0x47a   : > { %v8206_v12 = vpop.eup %8205  ;;  %8225 = vrcp.f32 %v4396_v25  ;;  %v4399_v45 = vadd.f32 1.0, %v8204_v48  ;;  %v12853_v60 = vadd.f32 %v14827_v36, %v11775_v56 }
 0x47b   : > { %v8208_v0 = vpop.eup %8207  ;;  %8227 = vrcp.f32 %v4397_v31  ;;  %v4398_v4 = vadd.f32 1.0, %v8206_v12  ;;  %v14828_v31 = vld [vmem:[#allocation183_spill] sm:$0xff] }
 0x47c   : > { %v8210_v57 = vpop.eup %8209  ;;  %8229 = vrcp.f32 %v4399_v45  ;;  %v4400_v30 = vadd.f32 1.0, %v8208_v0  ;;  %v12857_v12 = vadd.f32 %v14828_v31, %v11779_v32  ;;  %v6891_v45 = vmul.f32 -1.442695, %v12837_v42 }
 0x47d   : > { %v8212_v25 = vpop.eup %8211  ;;  %8231 = vrcp.f32 %v4398_v4  ;;  %v4401_v48 = vadd.f32 1.0, %v8210_v57  ;;  %v6893_v0 = vmul.f32 -1.442695, %v12841_v18  ;;  %v6892_v4 = vmul.f32 -1.442695, %v12845_v51 }
 0x47e   : > { %v8214_v24 = vpop.eup %8213  ;;  %8233 = vrcp.f32 %v4400_v30  ;;  %v4403_v61 = vadd.f32 1.0, %v8212_v25  ;;  %v6894_v57 = vmul.f32 -1.442695, %v12849_v39  ;;  %v6895_v62 = vmul.f32 -1.442695, %v12853_v60 }
 0x47f   : > { %v8216_v36 = vpop.eup %8215  ;;  %8235 = vrcp.f32 %v4401_v48  ;;  %v4402_v19 = vadd.f32 1.0, %v8214_v24  ;;  %v12870_v30 = vadd.f32 %v14830_v13, %v11788_v20  ;;  %v6897_v43 = vmul.f32 -1.442695, %v12857_v12 }
 0x480   : > { %v8218_v31 = vpop.eup %8217  ;;  %8237 = vrcp.f32 %v4403_v61  ;;  %v4404_v1 = vadd.f32 1.0, %v8216_v36  ;;  %v6896_v48 = vmul.f32 -1.442695, %v12861_v34  ;;  %v12876_v24 = vadd.f32 %v12370_v5, %v11775_v56  ;;  %v12880_v61 = vpop.f32.mrb[165].mxu1 }
 0x481   : > { %v8220_v25 = vpop.eup %8219  ;;  %8239 = vrcp.f32 %v4402_v19  ;;  %14832 = vst [vmem:[#allocation181_spill] sm:$0xff] %v12880_v61  ;;  %v14833_v19 = vld [vmem:[#allocation185_spill] sm:$0xff]  ;;  %v4895_v5 = vmul.f32 %v12814_v21, %v12628_v8  ;;  %v12894_v61 = vadd.f32 %v12377_v58, %v11784_v47  ;;  %v12898_v49 = vpop.f32.mrb[166].mxu1 }
 0x482   : > { %v8222_v36 = vpop.eup %8221  ;;  %v4897_v13 = vmul.f32 %v8220_v25, %v12708_v15  ;;  %8241 = vrcp.f32 %v4404_v1  ;;  %v12887_v59 = vadd.f32 %v14833_v19, %v11779_v32  ;;  %14834 = vst [vmem:[#allocation206_spill] sm:$0xff] %v12898_v49  ;;  %v6898_v49 = vmul.f32 -1.442695, %v12870_v30 }
 0x483   : > { %v8224_v37 = vpop.eup %8223  ;;  %v4899_v54 = vmul.f32 %v8222_v36, %v12712_v33  ;;  %8243 = vpow2.f32 %v6891_v45  ;;  %v4896_v33 = vmul.f32 %v8218_v31, %v12704_v23  ;;  %v12905_v45 = vpop.f32.mrb[167].mxu0  ;;  %v6899_v23 = vmul.f32 -1.442695, %v12876_v24 }
 0x484   : > { %v8226_v15 = vpop.eup %8225  ;;  %v4898_v1 = vmul.f32 %v8224_v37, %v12716_v38  ;;  %8245 = vpow2.f32 %v6893_v0  ;;  %v5021_v25 = vpack.c.bf16 %v4897_v13, %v4893_v16  ;;  %14835 = vst [vmem:[#allocation182_spill] sm:$0xff] %v12905_v45  ;;  %v12907_v36 = vpop.f32.mrb[167].mxu1  ;;  %v12912_v38 = vadd.f32 %v14837_v29, %v11788_v20 }
 0x485   : > { %v8228_v8 = vpop.eup %8227  ;;  %v4900_v21 = vmul.f32 %v8226_v15, %v12723_v7  ;;  %8247 = vpow2.f32 %v6892_v4  ;;  %v5023_v58 = vpack.c.bf16 %v4899_v54, %v4895_v5  ;;  %14836 = vst [vmem:[#allocation207_spill] sm:$0xff] %v12907_v36  ;;  %v12917_v7 = vadd.f32 %v12383_v44, %v11775_v56 }
 0x486   : > { %v8230_v19 = vpop.eup %8229  ;;  %8249 = vpow2.f32 %v6894_v57  ;;  %v5022_v37 = vpack.c.bf16 %v4898_v1, %v4894_v41  ;;  %v6901_v0 = vmul.f32 -1.442695, %v12887_v59  ;;  %v6900_v57 = vmul.f32 -1.442695, %v12894_v61 }
 0x487   : > { %v8232_v16 = vpop.eup %8231  ;;  %8251 = vpow2.f32 %v6895_v62  ;;  %v5024_v54 = vpack.c.bf16 %v4900_v21, %v4896_v33  ;;  %v4901_v62 = vmul.f32 %v8228_v8, %v12727_v14  ;;  %v6902_v44 = vmul.f32 -1.442695, %v12912_v38 }
 0x488   : > { %v8234_v40 = vpop.eup %8233  ;;  %8253 = vpow2.f32 %v6897_v43  ;;  %5433 = vmatprep.mubr.bf16.mxu0 %v5022_v37  ;;  %v7093_v43 = vld [vmem:[%s13866_s6 + $0x58] sm:$0xff]   ;;  %v6903_v41 = vmul.f32 -1.442695, %v12917_v7  ;;  %v4902_v14 = vmul.f32 %v8232_v16, %v12736_v63 }
 0x489   : > { %v8236_v4 = vpop.eup %8235  ;;  %8255 = vpow2.f32 %v6896_v48  ;;  %5634 = vmatprep.mubr.bf16.mxu1 %v5024_v54  ;;  %5434 = vmatmul.mubr.bf16.gmra.mrb[208].mxu0 %v5021_v25  ;;  %v4903_v48 = vmul.f32 %v8230_v19, %v12731_v10  ;;  %v4904_v8 = vmul.f32 %v8234_v40, %v12745_v11  ;;  %v7094_v63 = vld [vmem:[%s13866_s6 + $0xd8] sm:$0xff]   ;;  %v14838_v40 = vld [vmem:[#allocation212_spill] sm:$0xff] }
 0x48a   : > { %v8238_v31 = vpop.eup %8237  ;;  %v4905_v13 = vmul.f32 %v8236_v4, %v12752_v17  ;;  %8257 = vpow2.f32 %v6898_v49  ;;  %5635 = vmatmul.mubr.bf16.gmra.mrb[208].mxu1 %v5023_v58  ;;  %5938 = vmatpush1.bf16.msra.mxu0 %v7093_v43 }
 0x48b   : > { %v8240_v5 = vpop.eup %8239  ;;  %v4907_v15 = vmul.f32 %v8238_v31, %v12761_v26  ;;  %8259 = vpow2.f32 %v6899_v23  ;;  %5939 = vmatprep.subr.bf16.mxu0 %v14232_v28  ;;  %6139 = vmatpush1.bf16.msra.mxu1 %v7094_v63  ;;  %v14839_v31 = vld [vmem:[#allocation213_spill] sm:$0xff] }
 0x48c   : > { %v8242_v1 = vpop.eup %8241  ;;  %v4906_v17 = vmul.f32 %v8240_v5, %v12769_v6  ;;  %8261 = vpow2.f32 %v6901_v0  ;;  %v5025_v49 = vpack.c.bf16 %v4905_v13, %v4901_v62  ;;  %v12940_v0 = vadd.f32 %v14838_v40, %v11779_v32  ;;  %6140 = vmatprep.subr.bf16.mxu1 %v14232_v28  ;;  %v14843_v63 = vld [vmem:[#allocation217_spill] sm:$0xff]  ;;  %v14846_v40 = vld [vmem:[#allocation220_spill] sm:$0xff] }
 0x48d   : > { %v8244_v25 = vpop.eup %8243  ;;  %v4908_v33 = vmul.f32 %v8242_v1, %v12780_v9  ;;  %8263 = vpow2.f32 %v6900_v57  ;;  %v5027_v10 = vpack.c.bf16 %v4907_v15, %v4903_v48  ;;  %v12945_v62 = vadd.f32 %v14839_v31, %v11784_v47  ;;  %v14840_v1 = vld [vmem:[#allocation214_spill] sm:$0xff] }
 0x48e   : > { %v8246_v26 = vpop.eup %8245  ;;  %v4405_v21 = vadd.f32 1.0, %v8244_v25  ;;  %8265 = vpow2.f32 %v6902_v44  ;;  %v5026_v58 = vpack.c.bf16 %v4906_v17, %v4902_v14  ;;  %v12950_v14 = vadd.f32 %v14840_v1, %v11788_v20 }
 0x48f   : > { %v8248_v6 = vpop.eup %8247  ;;  %v4407_v19 = vadd.f32 1.0, %v8246_v26  ;;  %8267 = vpow2.f32 %v6903_v41  ;;  %v5028_v29 = vpack.c.bf16 %v4908_v33, %v4904_v8  ;;  %v6905_v41 = vmul.f32 -1.442695, %v12940_v0  ;;  %v14841_v8 = vld [vmem:[#allocation215_spill] sm:$0xff] }
 0x490   : > { %v8250_v37 = vpop.eup %8249  ;;  %8269 = vrcp.f32 %v4405_v21  ;;  %v4406_v11 = vadd.f32 1.0, %v8248_v6  ;;  %5441 = vmatprep.mubr.bf16.mxu0 %v5026_v58  ;;  %v6904_v25 = vmul.f32 -1.442695, %v12945_v62  ;;  %v12955_v33 = vadd.f32 %v14841_v8, %v11775_v56  ;;  %v14842_v21 = vld [vmem:[#allocation216_spill] sm:$0xff] }
 0x491   : > { %v8252_v9 = vpop.eup %8251  ;;  %8271 = vrcp.f32 %v4407_v19  ;;  %v4408_v16 = vadd.f32 1.0, %v8250_v37  ;;  %5642 = vmatprep.mubr.bf16.mxu1 %v5028_v29  ;;  %5442 = vmatmul.mubr.bf16.gmra.mrb[212].mxu0 %v5025_v49  ;;  %v12959_v58 = vadd.f32 %v14842_v21, %v11779_v32  ;;  %v12963_v6 = vadd.f32 %v14843_v63, %v11784_v47  ;;  %v14844_v37 = vld [vmem:[#allocation218_spill] sm:$0xff] }
 0x492   : > { %v8254_v23 = vpop.eup %8253  ;;  %8273 = vrcp.f32 %v4406_v11  ;;  %v4409_v54 = vadd.f32 1.0, %v8252_v9  ;;  %5643 = vmatmul.mubr.bf16.gmra.mrb[212].mxu1 %v5027_v10  ;;  %v12967_v11 = vadd.f32 %v14844_v37, %v11788_v20  ;;  %v14845_v9 = vld [vmem:[#allocation219_spill] sm:$0xff]  ;;  %v14848_v21 = vld [vmem:[#allocation222_spill] sm:$0xff] }
 0x493   : > { %v8256_v4 = vpop.eup %8255  ;;  %8275 = vrcp.f32 %v4408_v16  ;;  %v4411_v57 = vadd.f32 1.0, %v8254_v23  ;;  %v12971_v16 = vadd.f32 %v14845_v9, %v11775_v56  ;;  %v6908_v1 = vmul.f32 -1.442695, %v12963_v6  ;;  %v14849_v37 = vld [vmem:[#allocation187_spill] sm:$0xff] }
 0x494   : > { %v8258_v13 = vpop.eup %8257  ;;  %8277 = vrcp.f32 %v4409_v54  ;;  %v4410_v44 = vadd.f32 1.0, %v8256_v4  ;;  %v12975_v4 = vadd.f32 %v14846_v40, %v11779_v32  ;;  %v12991_v63 = vadd.f32 %v14848_v21, %v11788_v20 }
 0x495   : > { %v8260_v43 = vpop.eup %8259  ;;  %8279 = vrcp.f32 %v4411_v57  ;;  %v4412_v5 = vadd.f32 1.0, %v8258_v13  ;;  %v14847_v57 = vld [vmem:[#allocation221_spill] sm:$0xff]  ;;  %v12997_v9 = vadd.f32 %v14849_v37, %v11775_v56 }
 0x496   : > { %v8262_v48 = vpop.eup %8261  ;;  %8281 = vrcp.f32 %v4410_v44  ;;  %v4413_v15 = vadd.f32 1.0, %v8260_v43  ;;  %v12979_v31 = vadd.f32 %v14847_v57, %v11784_v47  ;;  %v6906_v44 = vmul.f32 -1.442695, %v12950_v14 }
 0x497   : > { %v8264_v17 = vpop.eup %8263  ;;  %8283 = vrcp.f32 %v4412_v5  ;;  %v4415_v49 = vadd.f32 1.0, %v8262_v48  ;;  %v6907_v5 = vmul.f32 -1.442695, %v12955_v33  ;;  %v6909_v48 = vmul.f32 -1.442695, %v12959_v58 }
 0x498   : > { %v8266_v10 = vpop.eup %8265  ;;  %8285 = vrcp.f32 %v4413_v15  ;;  %v4414_v26 = vadd.f32 1.0, %v8264_v17  ;;  %v6910_v17 = vmul.f32 -1.442695, %v12967_v11 }
 0x499   : > { %v8268_v19 = vpop.eup %8267  ;;  %8287 = vrcp.f32 %v4415_v49  ;;  %v4416_v29 = vadd.f32 1.0, %v8266_v10  ;;  %v6911_v49 = vmul.f32 -1.442695, %v12971_v16  ;;  %v6913_v10 = vmul.f32 -1.442695, %v12975_v4 }
 0x49a   : > { %v8270_v23 = vpop.eup %8269  ;;  %8289 = vrcp.f32 %v4414_v26  ;;  %v4417_v54 = vadd.f32 1.0, %v8268_v19  ;;  %v6912_v26 = vmul.f32 -1.442695, %v12979_v31 }
 0x49b   : > { %v8272_v13 = vpop.eup %8271  ;;  %8291 = vrcp.f32 %v4416_v29  ;;  %v4909_v29 = vmul.f32 %v8270_v23, %v12837_v42 }
 0x49c   : > { %v8274_v43 = vpop.eup %8273  ;;  %8293 = vrcp.f32 %v4417_v54  ;;  %v7096_v54 = vld [vmem:[%s13866_s6 + $0xe0] sm:$0xff]   ;;  %v4911_v57 = vmul.f32 %v8272_v13, %v12841_v18 }
 0x49d   : > { %v8276_v15 = vpop.eup %8275  ;;  %8295 = vpow2.f32 %v6905_v41  ;;  %6141 = vmatpush1.bf16.msra.mxu1 %v7096_v54 }
 0x49e   : > { %v8278_v8 = vpop.eup %8277  ;;  %8297 = vpow2.f32 %v6904_v25  ;;  %v7095_v25 = vld [vmem:[%s13866_s6 + $0x60] sm:$0xff]   ;;  %v4912_v45 = vmul.f32 %v8276_v15, %v12849_v39  ;;  %6142 = vmatprep.subr.bf16.mxu1 %v14232_v28  ;;  %v6915_v39 = vmul.f32 -1.442695, %v12997_v9 }
 0x49f   : > { %v8280_v19 = vpop.eup %8279  ;;  %v4913_v41 = vmul.f32 %v8278_v8, %v12853_v60  ;;  %8299 = vpow2.f32 %v6906_v44  ;;  %v14850_v60 = vld [vmem:[#allocation223_spill] sm:$0xff]  ;;  %v4910_v8 = vmul.f32 %v8274_v43, %v12845_v51  ;;  %5940 = vmatpush1.bf16.msra.mxu0 %v7095_v25  ;;  %v6914_v51 = vmul.f32 -1.442695, %v12991_v63 }
 0x4a0   : > { %v8282_v40 = vpop.eup %8281  ;;  %v4915_v42 = vmul.f32 %v8280_v19, %v12857_v12  ;;  %8301 = vpow2.f32 %v6907_v5  ;;  %v13009_v23 = vadd.f32 %v14850_v60, %v11779_v32  ;;  %5941 = vmatprep.subr.bf16.mxu0 %v14232_v28  ;;  %v7097_v43 = vld [vmem:[%s13866_s6 + $0x68] sm:$0xff]  }
 0x4a1   : > { %v8284_v44 = vpop.eup %8283  ;;  %v4914_v21 = vmul.f32 %v8282_v40, %v12861_v34  ;;  %8303 = vpow2.f32 %v6909_v48  ;;  %v5029_v37 = vpack.c.bf16 %v4913_v41, %v4909_v29  ;;  %v7098_v48 = vld [vmem:[%s13866_s6 + $0xe8] sm:$0xff]  }
 0x4a2   : > { %v8286_v36 = vpop.eup %8285  ;;  %v4916_v18 = vmul.f32 %v8284_v44, %v12870_v30  ;;  %8305 = vpow2.f32 %v6908_v1  ;;  %v5031_v12 = vpack.c.bf16 %v4915_v42, %v4911_v57  ;;  %v6917_v1 = vmul.f32 -1.442695, %v13009_v23  ;;  %6143 = vmatpush1.bf16.msra.mxu1 %v7098_v48 }
 0x4a3   : > { %v13017_v13 = vpop.eup %8287  ;;  %8307 = vpow2.f32 %v6910_v17  ;;  %v5030_v34 = vpack.c.bf16 %v4914_v21, %v4910_v8  ;;  %5942 = vmatpush1.bf16.msra.mxu0 %v7097_v43  ;;  %v7099_v17 = vld [vmem:[%s13866_s6 + $0x70] sm:$0xff]   ;;  %6144 = vmatprep.subr.bf16.mxu1 %v14232_v28  ;;  %v13065_v43 = vadd.f32 %v12491_v50, %v11775_v56  ;;  %v13070_v48 = vadd.f32 %v12493_v22, %v11779_v32 }
 0x4a4   : > { %v13023_v5 = vpop.eup %8289  ;;  %8309 = vpow2.f32 %v6911_v49  ;;  %v5032_v30 = vpack.c.bf16 %v4916_v18, %v4912_v45  ;;  %v13036_v49 = vmul.f32 %v8286_v36, %v12876_v24  ;;  %5943 = vmatprep.subr.bf16.mxu0 %v14232_v28  ;;  %v7101_v36 = vld [vmem:[%s13866_s6 + $0x78] sm:$0xff]   ;;  %v14851_v8 = vld [vmem:[#allocation224_spill] sm:$0xff] }
 0x4a5   : > { %v13029_v15 = vpop.eup %8291  ;;  %8311 = vpow2.f32 %v6913_v10  ;;  %5449 = vmatprep.mubr.bf16.mxu0 %v5030_v34  ;;  %v13054_v21 = vadd.f32 %v14851_v8, %v11784_v47  ;;  %v6919_v22 = vmul.f32 -1.442695, %v13065_v43 }
 0x4a6   : > { %v8294_v19 = vpop.eup %8293  ;;  %8313 = vpow2.f32 %v6912_v26  ;;  %5650 = vmatprep.mubr.bf16.mxu1 %v5032_v30  ;;  %5450 = vmatmul.mubr.bf16.gmra.mrb[216].mxu0 %v5029_v37  ;;  %v7100_v26 = vld [vmem:[%s13866_s6 + $0xf0] sm:$0xff]   ;;  %v7102_v37 = vld [vmem:[%s13866_s6 + $0xf8] sm:$0xff]  }
 0x4a7   : > { %v8296_v45 = vpop.eup %8295  ;;  %v13039_v29 = vmul.f32 %v8294_v19, %v12917_v7  ;;  %8315 = vpow2.f32 %v6914_v51  ;;  %5651 = vmatmul.mubr.bf16.gmra.mrb[216].mxu1 %v5031_v12  ;;  %5944 = vmatpush1.bf16.msra.mxu0 %v7099_v17  ;;  %v14852_v51 = vld [vmem:[#allocation188_spill] sm:$0xff]  ;;  %v13074_v19 = vadd.f32 %v12501_v53, %v11784_v47  ;;  %v13082_v53 = vadd.f32 %v12503_v27, %v11788_v20 }
 0x4a8   : > { %v8298_v10 = vpop.eup %8297  ;;  %v4419_v41 = vadd.f32 1.0, %v8296_v45  ;;  %8317 = vpow2.f32 %v6915_v39  ;;  %5945 = vmatprep.subr.bf16.mxu0 %v14232_v28  ;;  %6145 = vmatpush1.bf16.msra.mxu1 %v7100_v26  ;;  %v13061_v34 = vadd.f32 %v14852_v51, %v11788_v20 }
 0x4a9   : > { %v8300_v25 = vpop.eup %8299  ;;  %v4418_v54 = vadd.f32 1.0, %v8298_v10  ;;  %8319 = vpow2.f32 %v6917_v1  ;;  %v5033_v24 = vpack.c.bf16 %v13039_v29, %v13036_v49  ;;  %6146 = vmatprep.subr.bf16.mxu1 %v14232_v28  ;;  %v6916_v10 = vmul.f32 -1.442695, %v13054_v21 }
 0x4aa   : > { %v8302_v7 = vpop.eup %8301  ;;  %8321 = vrcp.f32 %v4419_v41  ;;  %v4420_v40 = vadd.f32 1.0, %v8300_v25  ;;  %v6918_v26 = vmul.f32 -1.442695, %v13061_v34 }
 0x4ab   : > { %v8304_v57 = vpop.eup %8303  ;;  %8323 = vrcp.f32 %v4418_v54  ;;  %v4421_v42 = vadd.f32 1.0, %v8302_v7  ;;  %5946 = vmatpush1.bf16.msra.mxu0 %v7101_v36  ;;  %v6921_v36 = vmul.f32 -1.442695, %v13070_v48 }
 0x4ac   : > { %v8306_v60 = vpop.eup %8305  ;;  %8325 = vrcp.f32 %v4420_v40  ;;  %v4423_v44 = vadd.f32 1.0, %v8304_v57  ;;  %6147 = vmatpush1.bf16.msra.mxu1 %v7102_v37  ;;  %v6920_v57 = vmul.f32 -1.442695, %v13074_v19  ;;  %v14854_v37 = vld [vmem:[#allocation190_spill] sm:$0xff] }
 0x4ad   : > { %v8308_v18 = vpop.eup %8307  ;;  %8327 = vrcp.f32 %v4421_v42  ;;  %v4422_v12 = vadd.f32 1.0, %v8306_v60  ;;  %v14853_v42 = vld [vmem:[#allocation189_spill] sm:$0xff] }
 0x4ae   : > { %v8310_v39 = vpop.eup %8309  ;;  %8329 = vrcp.f32 %v4423_v44  ;;  %v4424_v30 = vadd.f32 1.0, %v8308_v18  ;;  %v13087_v60 = vadd.f32 %v14853_v42, %v11775_v56  ;;  %v13091_v18 = vadd.f32 %v14854_v37, %v11779_v32 }
 0x4af   : > { %v8312_v1 = vpop.eup %8311  ;;  %8331 = vrcp.f32 %v4422_v12  ;;  %v4425_v17 = vadd.f32 1.0, %v8310_v39  ;;  %v14855_v12 = vld [vmem:[#allocation191_spill] sm:$0xff]  ;;  %v4919_v39 = vmul.f32 %v13017_v13, %v12887_v59  ;;  %v4920_v59 = vmul.f32 %v13029_v15, %v12912_v38 }
 0x4b0   : > { %v8314_v45 = vpop.eup %8313  ;;  %8333 = vrcp.f32 %v4424_v30  ;;  %v4427_v50 = vadd.f32 1.0, %v8312_v1  ;;  %v13095_v27 = vadd.f32 %v14855_v12, %v11784_v47  ;;  %v14856_v1 = vld [vmem:[#allocation192_spill] sm:$0xff] }
 0x4b1   : > { %v8316_v28 = vpop.eup %8315  ;;  %8335 = vrcp.f32 %v4425_v17  ;;  %v4426_v41 = vadd.f32 1.0, %v8314_v45  ;;  %v13102_v17 = vadd.f32 %v14856_v1, %v11788_v20 }
 0x4b2   : > { %v8318_v25 = vpop.eup %8317  ;;  %8337 = vrcp.f32 %v4427_v50  ;;  %v4428_v54 = vadd.f32 1.0, %v8316_v28  ;;  %v4918_v50 = vmul.f32 %v13023_v5, %v12894_v61  ;;  %v14858_v61 = vld [vmem:[#allocation194_spill] sm:$0xff]  ;;  %v6924_v37 = vmul.f32 -1.442695, %v13095_v27 }
 0x4b3   : > { %v8320_v7 = vpop.eup %8319  ;;  %8339 = vrcp.f32 %v4426_v41  ;;  %v4429_v40 = vadd.f32 1.0, %v8318_v25  ;;  %v14857_v41 = vld [vmem:[#allocation193_spill] sm:$0xff]  ;;  %v6926_v12 = vmul.f32 -1.442695, %v13102_v17 }
 0x4b4   : > { %v8322_v44 = vpop.eup %8321  ;;  %8341 = vrcp.f32 %v4428_v54  ;;  %v4431_v8 = vadd.f32 1.0, %v8320_v7  ;;  %v13109_v25 = vadd.f32 %v14857_v41, %v11775_v56 }
 0x4b5   : > { %v8324_v51 = vpop.eup %8323  ;;  %v4923_v30 = vmul.f32 %v8322_v44, %v12940_v0  ;;  %8343 = vrcp.f32 %v4429_v40  ;;  %v6922_v40 = vmul.f32 -1.442695, %v13082_v53  ;;  %v6923_v44 = vmul.f32 -1.442695, %v13087_v60 }
 0x4b6   : > { %v8326_v45 = vpop.eup %8325  ;;  %v4922_v28 = vmul.f32 %v8324_v51, %v12945_v62  ;;  %8345 = vrcp.f32 %v4431_v8  ;;  %v13117_v62 = vadd.f32 %v14858_v61, %v11779_v32  ;;  %v14859_v8 = vld [vmem:[#allocation225_spill] sm:$0xff] }
 0x4b7   : > { %v8328_v54 = vpop.eup %8327  ;;  %v4924_v0 = vmul.f32 %v8326_v45, %v12950_v14  ;;  %8347 = vpow2.f32 %v6916_v10  ;;  %v5035_v13 = vpack.c.bf16 %v4923_v30, %v4919_v39  ;;  %v13122_v38 = vadd.f32 %v14859_v8, %v11784_v47 }
 0x4b8   : > { %v8330_v7 = vpop.eup %8329  ;;  %8349 = vpow2.f32 %v6918_v26  ;;  %v5034_v5 = vpack.c.bf16 %v4922_v28, %v4918_v50  ;;  %v6925_v10 = vmul.f32 -1.442695, %v13091_v18  ;;  %v4925_v39 = vmul.f32 %v8328_v54, %v12955_v33 }
 0x4b9   : > { %v8332_v42 = vpop.eup %8331  ;;  %8351 = vpow2.f32 %v6919_v22  ;;  %v5036_v14 = vpack.c.bf16 %v4924_v0, %v4920_v59  ;;  %v6927_v22 = vmul.f32 -1.442695, %v13109_v25  ;;  %v6929_v30 = vmul.f32 -1.442695, %v13117_v62 }
 0x4ba   : > { %v8334_v15 = vpop.eup %8333  ;;  %8353 = vpow2.f32 %v6921_v36  ;;  %5457 = vmatprep.mubr.bf16.mxu0 %v5034_v5  ;;  %v4927_v1 = vmul.f32 %v8330_v7, %v12959_v58  ;;  %v6928_v50 = vmul.f32 -1.442695, %v13122_v38  ;;  %v4926_v49 = vmul.f32 %v8332_v42, %v12963_v6 }
 0x4bb   : > { %v8336_v26 = vpop.eup %8335  ;;  %8355 = vpow2.f32 %v6920_v57  ;;  %5658 = vmatprep.mubr.bf16.mxu1 %v5036_v14  ;;  %5458 = vmatmul.mubr.bf16.gmra.mrb[220].mxu0 %v5033_v24  ;;  %v4928_v24 = vmul.f32 %v8334_v15, %v12967_v11 }
 0x4bc   : > { %v8338_v51 = vpop.eup %8337  ;;  %v4929_v36 = vmul.f32 %v8336_v26, %v12971_v16  ;;  %8357 = vpow2.f32 %v6922_v40  ;;  %5659 = vmatmul.mubr.bf16.gmra.mrb[220].mxu1 %v5035_v13 }
 0x4bd   : > { %v8340_v57 = vpop.eup %8339  ;;  %v4931_v45 = vmul.f32 %v8338_v51, %v12975_v4  ;;  %8359 = vpow2.f32 %v6923_v44  ;;  %v14861_v51 = vld [vmem:[#allocation44_spill] sm:$0xff] }
 0x4be   : > { %v8342_v28 = vpop.eup %8341  ;;  %v4930_v29 = vmul.f32 %v8340_v57, %v12979_v31  ;;  %8361 = vpow2.f32 %v6925_v10  ;;  %v5037_v33 = vpack.c.bf16 %v4929_v36, %v4925_v39  ;;  %v14860_v10 = vld [vmem:[#allocation226_spill] sm:$0xff]  ;;  %v13155_v39 = vadd.f32 %v14861_v51, %v11779_v32 }
 0x4bf   : > { %v13139_v16 = vpop.eup %8343  ;;  %v4932_v41 = vmul.f32 %v8342_v28, %v12991_v63  ;;  %8363 = vpow2.f32 %v6924_v37  ;;  %v5039_v58 = vpack.c.bf16 %v4931_v45, %v4927_v1  ;;  %v13147_v26 = vadd.f32 %v14860_v10, %v11788_v20  ;;  %v14862_v28 = vld [vmem:[#allocation101_spill] sm:$0xff]  ;;  %v14866_v10 = vld [vmem:[#allocation196_spill] sm:$0xff] }
 0x4c0   : > { %v13143_v54 = vpop.eup %8345  ;;  %8365 = vpow2.f32 %v6926_v12  ;;  %v5038_v4 = vpack.c.bf16 %v4930_v29, %v4926_v49  ;;  %v13159_v57 = vadd.f32 %v12649_v35, %v11784_v47  ;;  %v13163_v1 = vadd.f32 %v12651_v46, %v11788_v20  ;;  %v14863_v35 = vld [vmem:[#allocation24_spill] sm:$0xff] }
 0x4c1   : > { %v8348_v59 = vpop.eup %8347  ;;  %8367 = vpow2.f32 %v6927_v22  ;;  %v5040_v0 = vpack.c.bf16 %v4932_v41, %v4928_v24  ;;  %v13151_v22 = vadd.f32 %v12643_v2, %v11775_v56  ;;  %v13167_v2 = vadd.f32 %v12656_v3, %v11775_v56 }
 0x4c2   : > { %v8350_v6 = vpop.eup %8349  ;;  %v4430_v13 = vadd.f32 1.0, %v8348_v59  ;;  %8369 = vpow2.f32 %v6929_v30  ;;  %5465 = vmatprep.mubr.bf16.mxu0 %v5038_v4  ;;  %v13171_v49 = vadd.f32 %v14862_v28, %v11779_v32  ;;  %v13175_v24 = vadd.f32 %v14863_v35, %v11784_v47  ;;  %v14868_v35 = vld [vmem:[#allocation198_spill] sm:$0xff] }
 0x4c3   : > { %v8352_v31 = vpop.eup %8351  ;;  %v4432_v7 = vadd.f32 1.0, %v8350_v6  ;;  %8371 = vpow2.f32 %v6928_v50  ;;  %5666 = vmatprep.mubr.bf16.mxu1 %v5040_v0  ;;  %5466 = vmatmul.mubr.bf16.gmra.mrb[224].mxu0 %v5037_v33  ;;  %v6931_v4 = vmul.f32 -1.442695, %v13151_v22  ;;  %v6933_v0 = vmul.f32 -1.442695, %v13155_v39 }
 0x4c4   : > { %v8354_v11 = vpop.eup %8353  ;;  %8373 = vrcp.f32 %v4430_v13  ;;  %v4433_v63 = vadd.f32 1.0, %v8352_v31  ;;  %5667 = vmatmul.mubr.bf16.gmra.mrb[224].mxu1 %v5039_v58  ;;  %v6930_v58 = vmul.f32 -1.442695, %v13147_v26  ;;  %v6932_v6 = vmul.f32 -1.442695, %v13159_v57 }
 0x4c5   : > { %v8356_v40 = vpop.eup %8355  ;;  %8375 = vrcp.f32 %v4432_v7  ;;  %v4435_v61 = vadd.f32 1.0, %v8354_v11  ;;  %v6934_v31 = vmul.f32 -1.442695, %v13163_v1  ;;  %v6935_v7 = vmul.f32 -1.442695, %v13167_v2 }
 0x4c6   : > { %v8358_v5 = vpop.eup %8357  ;;  %8377 = vrcp.f32 %v4433_v63  ;;  %v4434_v42 = vadd.f32 1.0, %v8356_v40  ;;  %v6937_v11 = vmul.f32 -1.442695, %v13171_v49  ;;  %v6936_v40 = vmul.f32 -1.442695, %v13175_v24 }
 0x4c7   : > { %v8360_v44 = vpop.eup %8359  ;;  %8379 = vrcp.f32 %v4435_v61  ;;  %v4436_v8 = vadd.f32 1.0, %v8358_v5  ;;  %v14864_v61 = vld [vmem:[#allocation47_spill] sm:$0xff]  ;;  %v4935_v51 = vmul.f32 %v13143_v54, %v13009_v23 }
 0x4c8   : > { %v8362_v14 = vpop.eup %8361  ;;  %8381 = vrcp.f32 %v4434_v42  ;;  %v4437_v15 = vadd.f32 1.0, %v8360_v44  ;;  %v13187_v5 = vadd.f32 %v14864_v61, %v11788_v20  ;;  %v14865_v42 = vld [vmem:[#allocation173_spill] sm:$0xff] }
 0x4c9   : > { %v8364_v37 = vpop.eup %8363  ;;  %8383 = vrcp.f32 %v4436_v8  ;;  %v4439_v12 = vadd.f32 1.0, %v8362_v14  ;;  %v13191_v44 = vadd.f32 %v14865_v42, %v11775_v56  ;;  %v4933_v14 = vmul.f32 %v13139_v16, %v12997_v9 }
 0x4ca   : > { %v8366_v36 = vpop.eup %8365  ;;  %8385 = vrcp.f32 %v4437_v15  ;;  %v4438_v30 = vadd.f32 1.0, %v8364_v37  ;;  %v13198_v37 = vadd.f32 %v14866_v10, %v11779_v32  ;;  %v6938_v54 = vmul.f32 -1.442695, %v13187_v5 }
 0x4cb   : > { %v8368_v45 = vpop.eup %8367  ;;  %8387 = vrcp.f32 %v4439_v12  ;;  %v4440_v50 = vadd.f32 1.0, %v8366_v36 }
 0x4cc   : > { %v8370_v29 = vpop.eup %8369  ;;  %8389 = vrcp.f32 %v4438_v30  ;;  %v4441_v33 = vadd.f32 1.0, %v8368_v45  ;;  %v14867_v30 = vld [vmem:[#allocation197_spill] sm:$0xff] }
 0x4cd   : > { %v8372_v46 = vpop.eup %8371  ;;  %8391 = vrcp.f32 %v4440_v50  ;;  %v4443_v41 = vadd.f32 1.0, %v8370_v29  ;;  %v13205_v45 = vadd.f32 %v14867_v30, %v11784_v47 }
 0x4ce   : > { %v8374_v3 = vpop.eup %8373  ;;  %8393 = vrcp.f32 %v4441_v33  ;;  %v4442_v59 = vadd.f32 1.0, %v8372_v46  ;;  %v13214_v46 = vadd.f32 %v14868_v35, %v11788_v20 }
 0x4cf   : > { %v8376_v13 = vpop.eup %8375  ;;  %8395 = vrcp.f32 %v4443_v41  ;;  %v4934_v9 = vmul.f32 %v8374_v3, %v13054_v21  ;;  %v6940_v3 = vmul.f32 -1.442695, %v13205_v45 }
 0x4d0   : > { %v8378_v63 = vpop.eup %8377  ;;  %8397 = vrcp.f32 %v4442_v59  ;;  %v4936_v29 = vmul.f32 %v8376_v13, %v13061_v34  ;;  %v6941_v34 = vmul.f32 -1.442695, %v13198_v37  ;;  %v6942_v13 = vmul.f32 -1.442695, %v13214_v46 }
 0x4d1   : > { %v8380_v8 = vpop.eup %8379  ;;  %v4937_v15 = vmul.f32 %v8378_v63, %v13065_v43  ;;  %8399 = vpow2.f32 %v6930_v58 }
 0x4d2   : > { %v8382_v12 = vpop.eup %8381  ;;  %v4939_v36 = vmul.f32 %v8380_v8, %v13070_v48  ;;  %8401 = vpow2.f32 %v6931_v4 }
 0x4d3   : > { %v8384_v50 = vpop.eup %8383  ;;  %v4938_v43 = vmul.f32 %v8382_v12, %v13074_v19  ;;  %8403 = vpow2.f32 %v6933_v0  ;;  %v5041_v16 = vpack.c.bf16 %v4937_v15, %v4933_v14  ;;  %v6939_v19 = vmul.f32 -1.442695, %v13191_v44 }
 0x4d4   : > { %v8386_v28 = vpop.eup %8385  ;;  %v4940_v33 = vmul.f32 %v8384_v50, %v13082_v53  ;;  %8405 = vpow2.f32 %v6932_v6  ;;  %v5043_v23 = vpack.c.bf16 %v4939_v36, %v4935_v51 }
 0x4d5   : > { %v8388_v48 = vpop.eup %8387  ;;  %8407 = vpow2.f32 %v6934_v31  ;;  %v5042_v21 = vpack.c.bf16 %v4938_v43, %v4934_v9  ;;  %v4941_v0 = vmul.f32 %v8386_v28, %v13087_v60  ;;  %v5355_v31 = vpop.f32.mrb[168].mxu0 }
 0x4d6   : > { %v8390_v41 = vpop.eup %8389  ;;  %8409 = vpow2.f32 %v6935_v7  ;;  %v5044_v58 = vpack.c.bf16 %v4940_v33, %v4936_v29  ;;  %v5556_v7 = vpop.f32.mrb[168].mxu1  ;;  %v13225_v63 = vmul.f32 %v8388_v48, %v13091_v18  ;;  %v14869_v48 = vld [vmem:[#allocation199_spill] sm:$0xff] }
 0x4d7   : > { %v13217_v4 = vpop.eup %8391  ;;  %8411 = vpow2.f32 %v6937_v11  ;;  %5473 = vmatprep.mubr.bf16.mxu0 %v5042_v21  ;;  %v13230_v61 = vadd.f32 %v5556_v7, %v5355_v31  ;;  %v5357_v42 = vpop.f32.mrb[169].mxu0 }
 0x4d8   : > { %v8394_v53 = vpop.eup %8393  ;;  %8413 = vpow2.f32 %v6936_v40  ;;  %5674 = vmatprep.mubr.bf16.mxu1 %v5044_v58  ;;  %5474 = vmatmul.mubr.bf16.gmra.mrb[228].mxu0 %v5041_v16  ;;  %v5558_v60 = vpop.f32.mrb[169].mxu1 }
 0x4d9   : > { %v8396_v59 = vpop.eup %8395  ;;  %v4945_v6 = vmul.f32 %v8394_v53, %v13109_v25  ;;  %8415 = vpow2.f32 %v6938_v54  ;;  %5675 = vmatmul.mubr.bf16.gmra.mrb[228].mxu1 %v5043_v23  ;;  %v4942_v25 = vmul.f32 %v8390_v41, %v13095_v27  ;;  %v5358_v10 = vpop.f32.mrb[170].mxu0  ;;  %v13240_v54 = vadd.f32 %v14869_v48, %v11775_v56  ;;  %v14870_v41 = vld [vmem:[#allocation200_spill] sm:$0xff] }
 0x4da   : > { %v8398_v11 = vpop.eup %8397  ;;  %v13228_v40 = vmul.f32 %v8396_v59, %v13117_v62  ;;  %8417 = vpow2.f32 %v6939_v19  ;;  %v5559_v12 = vpop.f32.mrb[170].mxu1  ;;  %v13244_v19 = vadd.f32 %v14870_v41, %v11779_v32  ;;  %v14871_v59 = vld [vmem:[#allocation201_spill] sm:$0xff]  ;;  %v14874_v48 = vld [vmem:[#allocation204_spill] sm:$0xff] }
 0x4db   : > { %v8400_v8 = vpop.eup %8399  ;;  %v4946_v14 = vmul.f32 %v8398_v11, %v13122_v38  ;;  %8419 = vpow2.f32 %v6941_v34  ;;  %v5045_v15 = vpack.c.bf16 %v4945_v6, %v4941_v0  ;;  %v13236_v36 = vadd.f32 %v5559_v12, %v5358_v10  ;;  %v5360_v30 = vpop.f32.mrb[171].mxu0 }
 0x4dc   : > { %v8402_v51 = vpop.eup %8401  ;;  %v4444_v18 = vadd.f32 1.0, %v8400_v8  ;;  %8421 = vpow2.f32 %v6940_v3  ;;  %v5047_v62 = vpack.c.bf16 %v13228_v40, %v13225_v63  ;;  %v5561_v50 = vpop.f32.mrb[171].mxu1  ;;  %v13248_v0 = vadd.f32 %v14871_v59, %v11784_v47 }
 0x4dd   : > { %v8404_v9 = vpop.eup %8403  ;;  %v4445_v43 = vadd.f32 1.0, %v8402_v51  ;;  %8423 = vpow2.f32 %v6942_v13  ;;  %v5046_v27 = vpack.c.bf16 %v4946_v14, %v4942_v25  ;;  %v5363_v58 = vpop.f32.mrb[172].mxu0  ;;  %v6943_v14 = vmul.f32 -1.442695, %v13240_v54  ;;  %v14872_v50 = vld [vmem:[#allocation202_spill] sm:$0xff] }
 0x4de   : > { %v8406_v16 = vpop.eup %8405  ;;  %8425 = vrcp.f32 %v4444_v18  ;;  %v4447_v38 = vadd.f32 1.0, %v8404_v9  ;;  %v5564_v34 = vpop.f32.mrb[172].mxu1  ;;  %v6945_v30 = vmul.f32 -1.442695, %v13244_v19  ;;  %v13258_v9 = vadd.f32 %v14872_v50, %v11788_v20 }
 0x4df   : > { %v8408_v28 = vpop.eup %8407  ;;  %8427 = vrcp.f32 %v4445_v43  ;;  %v4446_v29 = vadd.f32 1.0, %v8406_v16  ;;  %5481 = vmatprep.mubr.bf16.mxu0 %v5046_v27  ;;  %v13250_v6 = vadd.f32 %v5564_v34, %v5363_v58  ;;  %v5365_v13 = vpop.f32.mrb[173].mxu0  ;;  %v6944_v16 = vmul.f32 -1.442695, %v13248_v0  ;;  %v14875_v58 = vld [vmem:[#allocation174_spill] sm:$0xff] }
 0x4e0   : > { %v8410_v33 = vpop.eup %8409  ;;  %8429 = vrcp.f32 %v4447_v38  ;;  %v4448_v23 = vadd.f32 1.0, %v8408_v28  ;;  %5482 = vmatmul.mubr.bf16.gmra.mrb[232].mxu0 %v5045_v15  ;;  %v5566_v31 = vpop.f32.mrb[173].mxu1  ;;  %v13263_v38 = vadd.f32 %v12795_v52, %v11775_v56  ;;  %v13275_v34 = vadd.f32 %v14875_v58, %v11788_v20  ;;  %v14876_v52 = vld [vmem:[#allocation177_spill] sm:$0xff] }
 0x4e1   : > { %v8412_v35 = vpop.eup %8411  ;;  %8431 = vrcp.f32 %v4446_v29  ;;  %v4449_v21 = vadd.f32 1.0, %v8410_v33  ;;  %v5366_v42 = vpop.f32.mrb[174].mxu0  ;;  %v14873_v33 = vld [vmem:[#allocation203_spill] sm:$0xff]  ;;  %v4944_v59 = vmul.f32 %v13217_v4, %v13102_v17  ;;  %v14877_v31 = vld [vmem:[#allocation176_spill] sm:$0xff] }
 0x4e2   : > { %v8414_v53 = vpop.eup %8413  ;;  %8433 = vrcp.f32 %v4448_v23  ;;  %v4451_v3 = vadd.f32 1.0, %v8412_v35  ;;  %v5567_v60 = vpop.f32.mrb[174].mxu1  ;;  %v13267_v23 = vadd.f32 %v14873_v33, %v11779_v32  ;;  %v13271_v35 = vadd.f32 %v14874_v48, %v11784_v47  ;;  %v14878_v4 = vld [vmem:[#allocation175_spill] sm:$0xff] }
 0x4e3   : > { %v8416_v7 = vpop.eup %8415  ;;  %8435 = vrcp.f32 %v4449_v21  ;;  %v4450_v11 = vadd.f32 1.0, %v8414_v53  ;;  %v13253_v15 = vadd.f32 %v5567_v60, %v5366_v42  ;;  %v5368_v10 = vpop.f32.mrb[175].mxu0  ;;  %v13279_v53 = vadd.f32 %v14876_v52, %v11775_v56 }
 0x4e4   : > { %v8418_v8 = vpop.eup %8417  ;;  %8437 = vrcp.f32 %v4451_v3  ;;  %v4452_v25 = vadd.f32 1.0, %v8416_v7  ;;  %v5569_v12 = vpop.f32.mrb[175].mxu1  ;;  %v13286_v7 = vadd.f32 %v14877_v31, %v11779_v32  ;;  %v6950_v33 = vmul.f32 -1.442695, %v13275_v34 }
 0x4e5   : > { %v8420_v51 = vpop.eup %8419  ;;  %8439 = vrcp.f32 %v4450_v11  ;;  %v4453_v18 = vadd.f32 1.0, %v8418_v8  ;;  %v5371_v11 = vpop.f32.mrb[176].mxu0  ;;  %v6946_v8 = vmul.f32 -1.442695, %v13258_v9  ;;  %v6951_v58 = vmul.f32 -1.442695, %v13279_v53 }
 0x4e6   : > { %v8422_v43 = vpop.eup %8421  ;;  %8441 = vrcp.f32 %v4452_v25  ;;  %v4455_v27 = vadd.f32 1.0, %v8420_v51  ;;  %v5572_v42 = vpop.f32.mrb[176].mxu1  ;;  %v6947_v25 = vmul.f32 -1.442695, %v13263_v38  ;;  %v6953_v52 = vmul.f32 -1.442695, %v13286_v7 }
 0x4e7   : > { %v8424_v28 = vpop.eup %8423  ;;  %8443 = vrcp.f32 %v4453_v18  ;;  %v4454_v29 = vadd.f32 1.0, %v8422_v43  ;;  %v13290_v10 = vadd.f32 %v5572_v42, %v5371_v11  ;;  %v5373_v12 = vpop.f32.mrb[177].mxu0  ;;  %v13295_v18 = vadd.f32 %v14878_v4, %v11784_v47  ;;  %v14880_v42 = vld [vmem:[#allocation205_spill] sm:$0xff] }
 0x4e8   : > { %v8426_v21 = vpop.eup %8425  ;;  %8445 = vrcp.f32 %v4455_v27  ;;  %v4456_v41 = vadd.f32 1.0, %v8424_v28  ;;  %v5574_v51 = vpop.f32.mrb[177].mxu1  ;;  %v13311_v12 = vadd.f32 %v14880_v42, %v11775_v56 }
 0x4e9   : > { %v8428_v3 = vpop.eup %8427  ;;  %v4948_v13 = vmul.f32 %v8426_v21, %v13147_v26  ;;  %8447 = vrcp.f32 %v4454_v29  ;;  %v6949_v26 = vmul.f32 -1.442695, %v13267_v23  ;;  %v5374_v43 = vpop.f32.mrb[178].mxu0  ;;  %v6948_v29 = vmul.f32 -1.442695, %v13271_v35 }
 0x4ea   : > { %v8430_v60 = vpop.eup %8429  ;;  %8449 = vrcp.f32 %v4456_v41  ;;  %v5575_v27 = vpop.f32.mrb[178].mxu1  ;;  %v4949_v31 = vmul.f32 %v8428_v3, %v13151_v22 }
 0x4eb   : > { %v8432_v17 = vpop.eup %8431  ;;  %8451 = vpow2.f32 %v6943_v14  ;;  %v5048_v50 = vpack.c.bf16 %v4948_v13, %v4944_v59  ;;  %v13299_v48 = vadd.f32 %v5575_v27, %v5374_v43  ;;  %v5376_v21 = vpop.f32.mrb[179].mxu0  ;;  %v14879_v59 = vld [vmem:[#allocation178_spill] sm:$0xff]  ;;  %v4951_v51 = vmul.f32 %v8430_v60, %v13155_v39 }
 0x4ec   : > { %v8434_v28 = vpop.eup %8433  ;;  %8453 = vpow2.f32 %v6945_v30  ;;  %v5577_v41 = vpop.f32.mrb[179].mxu1  ;;  %v13305_v13 = vadd.f32 %v14879_v59, %v11788_v20 }
 0x4ed   : > { %v8436_v14 = vpop.eup %8435  ;;  %8455 = vpow2.f32 %v6944_v16  ;;  %5682 = vmatprep.mubr.bf16.mxu1 %v5048_v50  ;;  %v6952_v50 = vmul.f32 -1.442695, %v13295_v18  ;;  %v4952_v63 = vmul.f32 %v8434_v28, %v13163_v1  ;;  %v6955_v1 = vmul.f32 -1.442695, %v13311_v12 }
 0x4ee   : > { %v8438_v30 = vpop.eup %8437  ;;  %v4953_v11 = vmul.f32 %v8436_v14, %v13167_v2  ;;  %8457 = vpow2.f32 %v6946_v8  ;;  %5683 = vmatmul.mubr.bf16.gmra.mrb[232].mxu1 %v5047_v62  ;;  %v4950_v2 = vmul.f32 %v8432_v17, %v13159_v57  ;;  %v5379_v62 = vpop.f32.mrb[180].mxu0 }
 0x4ef   : > { %v8440_v16 = vpop.eup %8439  ;;  %v4955_v4 = vmul.f32 %v8438_v30, %v13171_v49  ;;  %8459 = vpow2.f32 %v6947_v25  ;;  %v6954_v25 = vmul.f32 -1.442695, %v13305_v13 }
 0x4f0   : > { %v8442_v22 = vpop.eup %8441  ;;  %v4954_v3 = vmul.f32 %v8440_v16, %v13175_v24  ;;  %8461 = vpow2.f32 %v6949_v26  ;;  %v5049_v8 = vpack.c.bf16 %v4953_v11, %v4949_v31  ;;  %v5381_v24 = vpop.f32.mrb[181].mxu0 }
 0x4f1   : > { %v13321_v43 = vpop.eup %8443  ;;  %v4956_v40 = vmul.f32 %v8442_v22, %v13187_v5  ;;  %8463 = vpow2.f32 %v6948_v29  ;;  %v5051_v39 = vpack.c.bf16 %v4955_v4, %v4951_v51  ;;  %v5580_v49 = vpop.f32.mrb[180].mxu1 }
 0x4f2   : > { %v13325_v60 = vpop.eup %8445  ;;  %8465 = vpow2.f32 %v6950_v33  ;;  %v5050_v57 = vpack.c.bf16 %v4954_v3, %v4950_v2  ;;  %v13328_v17 = vadd.f32 %v5580_v49, %v5379_v62  ;;  %v5582_v26 = vpop.f32.mrb[181].mxu1 }
 0x4f3   : > { %v13330_v27 = vpop.eup %8447  ;;  %8467 = vpow2.f32 %v6951_v58  ;;  %v5052_v5 = vpack.c.bf16 %v4956_v40, %v4952_v63  ;;  %v5382_v28 = vpop.f32.mrb[182].mxu0 }
 0x4f4   : > { %v5583_v29 = vpop.f32.mrb[182].mxu1  ;;  %v13333_v21 = vpop.eup %8449  ;;  %8469 = vpow2.f32 %v6953_v52  ;;  %5489 = vmatprep.mubr.bf16.mxu0 %v5050_v57 }
 0x4f5   : > { %v13335_v33 = vadd.f32 %v5583_v29, %v5382_v28  ;;  %v5384_v41 = vpop.f32.mrb[183].mxu0  ;;  %v5585_v14 = vpop.f32.mrb[183].mxu1  ;;  %8471 = vpow2.f32 %v6952_v50  ;;  %5690 = vmatprep.mubr.bf16.mxu1 %v5052_v5  ;;  %5490 = vmatmul.mubr.bf16.gmra.mrb[236].mxu0 %v5049_v8  ;;  %v14881_v29 = vld [vmem:[#allocation179_spill] sm:$0xff] }
 0x4f6   : > { %v8452_v59 = vpop.eup %8451  ;;  %8473 = vpow2.f32 %v6954_v25  ;;  %5691 = vmatmul.mubr.bf16.gmra.mrb[236].mxu1 %v5051_v39  ;;  %v13343_v41 = vadd.f32 %v14881_v29, %v11779_v32  ;;  %v14882_v14 = vld [vmem:[#allocation180_spill] sm:$0xff] }
 0x4f7   : > { %v8454_v30 = vpop.eup %8453  ;;  %v4457_v31 = vadd.f32 1.0, %v8452_v59  ;;  %8475 = vpow2.f32 %v6955_v1  ;;  %v5387_v4 = vpop.f32.mrb[184].mxu0  ;;  %v13347_v59 = vadd.f32 %v14882_v14, %v11784_v47 }
 0x4f8   : > { %v8456_v58 = vpop.eup %8455  ;;  %v4459_v11 = vadd.f32 1.0, %v8454_v30  ;;  %v5389_v8 = vpop.f32.mrb[185].mxu0 }
 0x4f9   : > { %v8458_v42 = vpop.eup %8457  ;;  %8477 = vrcp.f32 %v4457_v31  ;;  %v4458_v16 = vadd.f32 1.0, %v8456_v58  ;;  %v5588_v22 = vpop.f32.mrb[184].mxu1  ;;  %v14883_v58 = vld [vmem:[#allocation181_spill] sm:$0xff] }
 0x4fa   : > { %v8460_v52 = vpop.eup %8459  ;;  %8479 = vrcp.f32 %v4459_v11  ;;  %v4460_v51 = vadd.f32 1.0, %v8458_v42  ;;  %v13337_v3 = vadd.f32 %v5588_v22, %v5387_v4  ;;  %v5590_v63 = vpop.f32.mrb[185].mxu1  ;;  %v13351_v11 = vadd.f32 %v14883_v58, %v11788_v20  ;;  %v14884_v22 = vld [vmem:[#allocation206_spill] sm:$0xff] }
 0x4fb   : > { %v8462_v2 = vpop.eup %8461  ;;  %8481 = vrcp.f32 %v4458_v16  ;;  %v4461_v50 = vadd.f32 1.0, %v8460_v52  ;;  %v5390_v62 = vpop.f32.mrb[186].mxu0  ;;  %v13355_v42 = vadd.f32 %v12896_v55, %v11775_v56  ;;  %v6957_v56 = vmul.f32 -1.442695, %v13343_v41 }
 0x4fc   : > { %v8464_v40 = vpop.eup %8463  ;;  %8483 = vrcp.f32 %v4460_v51  ;;  %v4463_v39 = vadd.f32 1.0, %v8462_v2  ;;  %v5591_v49 = vpop.f32.mrb[186].mxu1  ;;  %v13359_v2 = vadd.f32 %v14884_v22, %v11779_v32  ;;  %v4957_v32 = vmul.f32 %v13321_v43, %v13191_v44 }
 0x4fd   : > { %v8466_v25 = vpop.eup %8465  ;;  %8485 = vrcp.f32 %v4461_v50  ;;  %v4462_v57 = vadd.f32 1.0, %v8464_v40  ;;  %v13339_v24 = vadd.f32 %v5591_v49, %v5390_v62  ;;  %v5392_v26 = vpop.f32.mrb[187].mxu0  ;;  %v14885_v50 = vld [vmem:[#allocation182_spill] sm:$0xff]  ;;  %v6958_v62 = vmul.f32 -1.442695, %v13351_v11 }
 0x4fe   : > { %v5593_v1 = vpop.f32.mrb[187].mxu1  ;;  %v8468_v5 = vpop.eup %8467  ;;  %8487 = vrcp.f32 %v4463_v39  ;;  %v4464_v28 = vadd.f32 1.0, %v8466_v25  ;;  %v13363_v8 = vadd.f32 %v14885_v50, %v11784_v47  ;;  %v6956_v39 = vmul.f32 -1.442695, %v13347_v59 }
 0x4ff   : > { %v8470_v30 = vpop.eup %8469  ;;  %8489 = vrcp.f32 %v4462_v57  ;;  %v4465_v31 = vadd.f32 1.0, %v8468_v5  ;;  %v6959_v49 = vmul.f32 -1.442695, %v13355_v42  ;;  %v14886_v57 = vld [vmem:[#allocation207_spill] sm:$0xff]  ;;  %v4959_v5 = vmul.f32 %v13325_v60, %v13198_v37 }
 0x500   : > { %v8472_v16 = vpop.eup %8471  ;;  %8491 = vrcp.f32 %v4464_v28  ;;  %v4467_v52 = vadd.f32 1.0, %v8470_v30  ;;  %v13374_v26 = vadd.f32 %v14886_v57, %v11788_v20  ;;  %v6961_v29 = vmul.f32 -1.442695, %v13359_v2 }
 0x501   : > { %v8474_v51 = vpop.eup %8473  ;;  %8493 = vrcp.f32 %v4465_v31  ;;  %v4466_v4 = vadd.f32 1.0, %v8472_v16  ;;  %v6960_v14 = vmul.f32 -1.442695, %v13363_v8  ;;  %v4958_v44 = vmul.f32 %v13330_v27, %v13205_v45 }
 0x502   : > { %v8476_v63 = vpop.eup %8475  ;;  %8495 = vrcp.f32 %v4467_v52  ;;  %v4468_v40 = vadd.f32 1.0, %v8474_v51  ;;  %v4960_v31 = vmul.f32 %v13333_v21, %v13214_v46  ;;  %v6962_v58 = vmul.f32 -1.442695, %v13374_v26 }
 0x503   : > { %v8478_v55 = vpop.eup %8477  ;;  %8497 = vrcp.f32 %v4466_v4 }
 0x504   : > { %v8480_v25 = vpop.eup %8479  ;;  %v4961_v47 = vmul.f32 %v8478_v55, %v13240_v54  ;;  %8499 = vrcp.f32 %v4468_v40  ;;  %v4469_v55 = vadd.f32 1.0, %v8476_v63 }
 0x505   : > { %v8482_v1 = vpop.eup %8481  ;;  %v4963_v28 = vmul.f32 %v8480_v25, %v13244_v19  ;;  %8501 = vpow2.f32 %v6957_v56 }
 0x506   : > { %v8484_v30 = vpop.eup %8483  ;;  %v4962_v54 = vmul.f32 %v8482_v1, %v13248_v0  ;;  %v5053_v43 = vpack.c.bf16 %v4961_v47, %v4957_v32  ;;  %8503 = vpow2.f32 %v6956_v39 }
 0x507   : > { %v8486_v20 = vpop.eup %8485  ;;  %v4964_v37 = vmul.f32 %v8484_v30, %v13258_v9  ;;  %v5055_v19 = vpack.c.bf16 %v4963_v28, %v4959_v5  ;;  %8505 = vpow2.f32 %v6958_v62 }
 0x508   : > { %v8488_v60 = vpop.eup %8487  ;;  %v5054_v16 = vpack.c.bf16 %v4962_v54, %v4958_v44  ;;  %8507 = vpow2.f32 %v6959_v49  ;;  %v4965_v9 = vmul.f32 %v8486_v20, %v13263_v38 }
 0x509   : > { %v8490_v52 = vpop.eup %8489  ;;  %v5056_v45 = vpack.c.bf16 %v4964_v37, %v4960_v31  ;;  %8509 = vpow2.f32 %v6961_v29  ;;  %v4967_v4 = vmul.f32 %v8488_v60, %v13267_v23 }
 0x50a   : > { %v8492_v27 = vpop.eup %8491  ;;  %5497 = vmatprep.mubr.bf16.mxu0 %v5054_v16  ;;  %8511 = vpow2.f32 %v6960_v14  ;;  %v4966_v40 = vmul.f32 %v8490_v52, %v13271_v35 }
 0x50b   : > { %v8494_v0 = vpop.eup %8493  ;;  %5698 = vmatprep.mubr.bf16.mxu1 %v5056_v45  ;;  %5498 = vmatmul.mubr.bf16.gmra.mrb[240].mxu0 %v5053_v43  ;;  %8513 = vpow2.f32 %v6962_v58  ;;  %v4968_v49 = vmul.f32 %v8492_v27, %v13275_v34 }
 0x50c   : > { %v8496_v46 = vpop.eup %8495  ;;  %v4969_v21 = vmul.f32 %v8494_v0, %v13279_v53  ;;  %5699 = vmatmul.mubr.bf16.gmra.mrb[240].mxu1 %v5055_v19  ;;  %8515 = vrcp.f32 %v4469_v55 }
 0x50d   : > { %v8498_v51 = vpop.eup %8497  ;;  %v4971_v22 = vmul.f32 %v8496_v46, %v13286_v7  ;;  %v5395_v62 = vpop.f32.mrb[188].mxu0 }
 0x50e   : > { %v8500_v50 = vpop.eup %8499  ;;  %v4970_v56 = vmul.f32 %v8498_v51, %v13295_v18  ;;  %v5057_v39 = vpack.c.bf16 %v4969_v21, %v4965_v9  ;;  %v5596_v25 = vpop.f32.mrb[188].mxu1 }
 0x50f   : > { %v4972_v38 = vmul.f32 %v8500_v50, %v13305_v13  ;;  %v5059_v53 = vpack.c.bf16 %v4971_v22, %v4967_v4  ;;  %v5397_v32 = vpop.f32.mrb[189].mxu0  ;;  %v8502_v47 = vpop.eup %8501  ;;  %v13396_v23 = vadd.f32 %v5596_v25, %v5395_v62 }
 0x510   : > { %v5058_v57 = vpack.c.bf16 %v4970_v56, %v4966_v40  ;;  %v5598_v7 = vpop.f32.mrb[189].mxu1  ;;  %v5398_v1 = vpop.f32.mrb[190].mxu0  ;;  %v4471_v35 = vadd.f32 1.0, %v8502_v47 }
 0x511   : > { %v8504_v5 = vpop.eup %8503  ;;  %v5060_v28 = vpack.c.bf16 %v4972_v38, %v4968_v49  ;;  %v5599_v18 = vpop.f32.mrb[190].mxu1 }
 0x512   : > { %v5400_v63 = vpop.f32.mrb[191].mxu0  ;;  %v8506_v29 = vpop.eup %8505  ;;  %v4470_v14 = vadd.f32 1.0, %v8504_v5  ;;  %5505 = vmatprep.mubr.bf16.mxu0 %v5058_v57  ;;  %v13398_v34 = vadd.f32 %v5599_v18, %v5398_v1  ;;  %8517 = vrcp.f32 %v4471_v35 }
 0x513   : > { %v5601_v13 = vpop.f32.mrb[191].mxu1  ;;  %v8508_v30 = vpop.eup %8507  ;;  %v4472_v44 = vadd.f32 1.0, %v8506_v29  ;;  %5706 = vmatprep.mubr.bf16.mxu1 %v5060_v28  ;;  %5506 = vmatmul.mubr.bf16.gmra.mrb[244].mxu0 %v5057_v39  ;;  %v14890_v28 = vld [vmem:[#allocation34_spill] sm:$0xff] }
 0x514   : > { %v8510_v54 = vpop.eup %8509  ;;  %8519 = vrcp.f32 %v4470_v14  ;;  %v4473_v43 = vadd.f32 1.0, %v8508_v30  ;;  %5707 = vmatmul.mubr.bf16.gmra.mrb[244].mxu1 %v5059_v53 }
 0x515   : > { %v8512_v20 = vpop.eup %8511  ;;  %8521 = vrcp.f32 %v4472_v44  ;;  %v4475_v31 = vadd.f32 1.0, %v8510_v54  ;;  %v5403_v60 = vpop.f32.mrb[192].mxu0 }
 0x516   : > { %v8514_v37 = vpop.eup %8513  ;;  %8523 = vrcp.f32 %v4473_v43  ;;  %v4474_v19 = vadd.f32 1.0, %v8512_v20  ;;  %v5604_v16 = vpop.f32.mrb[192].mxu1  ;;  %v14893_v43 = vld [vmem:[#allocation29_spill] sm:$0xff]  ;;  %v14894_v20 = vld [vmem:[#allocation27_spill] sm:$0xff] }
 0x517   : > { %8525 = vrcp.f32 %v4475_v31  ;;  %v4476_v58 = vadd.f32 1.0, %v8514_v37  ;;  %v5405_v52 = vpop.f32.mrb[193].mxu0  ;;  %v13400_v45 = vadd.f32 %v5604_v16, %v5403_v60  ;;  %v5606_v27 = vpop.f32.mrb[193].mxu1  ;;  %v14895_v31 = vpack.c.bf16 %v14893_v43, %v14894_v20  ;;  %v14896_v37 = vld [vmem:[#allocation31_spill] sm:$0xff]  ;;  %v14900_v16 = vld [vmem:[#allocation37_spill] sm:$0xff] }
 0x518   : > { %8527 = vrcp.f32 %v4474_v19  ;;  %v5406_v0 = vpop.f32.mrb[194].mxu0  ;;  %v5607_v46 = vpop.f32.mrb[194].mxu1  ;;  %v14897_v19 = vld [vmem:[#allocation30_spill] sm:$0xff]  ;;  %v14902_v27 = vld [vmem:[#allocation49_spill] sm:$0xff] }
 0x519   : > { %8529 = vrcp.f32 %v4476_v58  ;;  %v5408_v9 = vpop.f32.mrb[195].mxu0  ;;  %v13402_v21 = vadd.f32 %v5607_v46, %v5406_v0  ;;  %v5609_v51 = vpop.f32.mrb[195].mxu1  ;;  %v14898_v60 = vpack.c.bf16 %v14896_v37, %v14897_v19  ;;  %v14899_v58 = vld [vmem:[#allocation46_spill] sm:$0xff]  ;;  %v14933_v37 = vld [vmem:[#allocation73_spill] sm:$0xff] }
 0x51a   : > { %v8516_v4 = vpop.eup %8515  ;;  %v14901_v52 = vpack.c.bf16 %v14899_v58, %v14900_v16  ;;  %v14903_v0 = vld [vmem:[#allocation38_spill] sm:$0xff]  ;;  %v14905_v9 = vld [vmem:[#allocation36_spill] sm:$0xff]  ;;  %v14906_v51 = vld [vmem:[#allocation35_spill] sm:$0xff] }
 0x51b   : > { %v4973_v39 = vmul.f32 %v8516_v4, %v13311_v12  ;;  %v14904_v46 = vpack.c.bf16 %v14902_v27, %v14903_v0  ;;  %v14907_v4 = vpack.c.bf16 %v14905_v9, %v14906_v51  ;;  %v14936_v58 = vld [vmem:[#allocation162_spill] sm:$0xff]  ;;  %v14938_v0 = vld [vmem:[#allocation80_spill] sm:$0xff] }
 0x51c   : > { %v8518_v22 = vpop.eup %8517 }
 0x51d   : > { %v4975_v38 = vmul.f32 %v8518_v22, %v13343_v41  ;;  %v14887_v41 = vld [vmem:[#allocation33_spill] sm:$0xff]  ;;  %v14908_v22 = vld [vmem:[#allocation43_spill] sm:$0xff] }
 0x51e   : > { %v8520_v50 = vpop.eup %8519 }
 0x51f   : > { %v8522_v40 = vpop.eup %8521  ;;  %v4974_v32 = vmul.f32 %v8520_v50, %v13347_v59  ;;  %v14891_v59 = vld [vmem:[#allocation59_spill] sm:$0xff]  ;;  %v14909_v50 = vld [vmem:[#allocation42_spill] sm:$0xff] }
 0x520   : > { %v8524_v56 = vpop.eup %8523  ;;  %v4976_v7 = vmul.f32 %v8522_v40, %v13351_v11  ;;  %v14892_v18 = vpack.c.bf16 %v14890_v28, %v14891_v59  ;;  %v14910_v40 = vpack.c.bf16 %v14908_v22, %v14909_v50  ;;  %v14927_v28 = vld [vmem:[#allocation70_spill] sm:$0xff] }
 0x521   : > { %v8526_v55 = vpop.eup %8525  ;;  %v4977_v62 = vmul.f32 %v8524_v56, %v13355_v42  ;;  %v14888_v42 = vld [vmem:[#allocation28_spill] sm:$0xff] }
 0x522   : > { %v8528_v49 = vpop.eup %8527  ;;  %v4979_v53 = vmul.f32 %v8526_v55, %v13359_v2  ;;  %v14889_v2 = vpack.c.bf16 %v14887_v41, %v14888_v42  ;;  %v14911_v56 = vld [vmem:[#allocation60_spill] sm:$0xff] }
 0x523   : > { %v8530_v25 = vpop.eup %8529  ;;  %v4978_v47 = vmul.f32 %v8528_v49, %v13363_v8  ;;  %v5061_v57 = vpack.c.bf16 %v4977_v62, %v4973_v39  ;;  %v14912_v55 = vld [vmem:[#allocation56_spill] sm:$0xff]  ;;  %v14914_v62 = vld [vmem:[#allocation62_spill] sm:$0xff]  ;;  %v14915_v49 = vld [vmem:[#allocation57_spill] sm:$0xff] }
 0x524   : > { %v4980_v1 = vmul.f32 %v8530_v25, %v13374_v26  ;;  %v5063_v5 = vpack.c.bf16 %v4979_v53, %v4975_v38  ;;  %v14913_v39 = vpack.c.bf16 %v14911_v56, %v14912_v55  ;;  %v14916_v38 = vpack.c.bf16 %v14914_v62, %v14915_v49  ;;  %v14917_v53 = vld [vmem:[#allocation51_spill] sm:$0xff]  ;;  %v14918_v25 = vld [vmem:[#allocation50_spill] sm:$0xff] }
 0x525   : > { %v5062_v35 = vpack.c.bf16 %v4978_v47, %v4974_v32  ;;  %v14919_v32 = vpack.c.bf16 %v14917_v53, %v14918_v25  ;;  %v14942_v62 = vld [vmem:[#allocation75_spill] sm:$0xff]  ;;  %v14945_v53 = vld [vmem:[#allocation77_spill] sm:$0xff] }
 0x526   : > { %v5064_v12 = vpack.c.bf16 %v4980_v1, %v4976_v7  ;;  %v14921_v7 = vld [vmem:[#allocation52_spill] sm:$0xff] }
 0x527   : > { %5513 = vmatprep.mubr.bf16.mxu0 %v5062_v35  ;;  %v14924_v35 = vld [vmem:[#allocation69_spill] sm:$0xff] }
 0x528   : > { %5714 = vmatprep.mubr.bf16.mxu1 %v5064_v12  ;;  %5514 = vmatmul.mubr.bf16.gmra.mrb[248].mxu0 %v5061_v57  ;;  %v14920_v57 = vld [vmem:[#allocation53_spill] sm:$0xff] }
 0x529   : > { %5715 = vmatmul.mubr.bf16.gmra.mrb[248].mxu1 %v5063_v5  ;;  %5947 = vmatprep.mubr.bf16.mxu0 %v14889_v2  ;;  %v14922_v1 = vpack.c.bf16 %v14920_v57, %v14921_v7  ;;  %v14923_v5 = vld [vmem:[#allocation149_spill] sm:$0xff]  ;;  %v14950_v7 = vld [vmem:[#allocation8_spill] sm:$0xff] }
 0x52a   : > { %6148 = vmatprep.mubr.bf16.mxu1 %v14892_v18  ;;  %v5411_v8 = vpop.f32.mrb[196].mxu0  ;;  %v14925_v12 = vpack.c.bf16 %v14923_v5, %v14924_v35  ;;  %v14926_v2 = vld [vmem:[#allocation161_spill] sm:$0xff]  ;;  %v14953_v35 = vld [vmem:[#allocation84_spill] sm:$0xff] }
 0x52b   : > { %v5612_v63 = vpop.f32.mrb[196].mxu1  ;;  %v5413_v11 = vpop.f32.mrb[197].mxu0  ;;  %v14928_v59 = vpack.c.bf16 %v14926_v2, %v14927_v28  ;;  %v14957_v2 = vld [vmem:[#allocation85_spill] sm:$0xff] }
 0x52c   : > { %v13418_v29 = vadd.f32 %v5612_v63, %v5411_v8  ;;  %v5614_v26 = vpop.f32.mrb[197].mxu1  ;;  %v5414_v14 = vpop.f32.mrb[198].mxu0 }
 0x52d   : > { %v5615_v13 = vpop.f32.mrb[198].mxu1  ;;  %v5416_v30 = vpop.f32.mrb[199].mxu0 }
 0x52e   : > { %v13420_v44 = vadd.f32 %v5615_v13, %v5414_v14  ;;  %v5617_v54 = vpop.f32.mrb[199].mxu1  ;;  %v14929_v30 = vld [vmem:[#allocation72_spill] sm:$0xff] }
 0x52f   : > { %v14930_v54 = vld [vmem:[#allocation71_spill] sm:$0xff] }
 0x530   : > { %5948 = vmatmul.mubr.bf16.vlgmr.msra.gmra.mrb[252].mxu0 %v14895_v31  ;;  %v14931_v43 = vpack.c.bf16 %v14929_v30, %v14930_v54  ;;  %v14932_v31 = vld [vmem:[#allocation74_spill] sm:$0xff] }
 0x531   : > { %6149 = vmatmul.mubr.bf16.vlgmr.msra.gmra.mrb[252].mxu1 %v14898_v60  ;;  %5955 = vmatprep.mubr.bf16.mxu0 %v14901_v52  ;;  %v14934_v19 = vpack.c.bf16 %v14932_v31, %v14933_v37  ;;  %v14935_v60 = vld [vmem:[#allocation97_spill] sm:$0xff] }
 0x532   : > { %6156 = vmatprep.mubr.bf16.mxu1 %v14904_v46  ;;  %v14937_v16 = vpack.c.bf16 %v14935_v60, %v14936_v58  ;;  %v14939_v46 = vld [vmem:[#allocation79_spill] sm:$0xff] }
 0x533   : > { %v14940_v9 = vpack.c.bf16 %v14938_v0, %v14939_v46  ;;  %v14966_v60 = vld [vmem:[#allocation91_spill] sm:$0xff]  ;;  %v14969_v0 = vld [vmem:[#allocation93_spill] sm:$0xff] }
 0x538   : > { %5956 = vmatmul.mubr.bf16.gmra.mrb[0].mxu0 %v14907_v4 }
 0x539   : > { %6157 = vmatmul.mubr.bf16.gmra.mrb[0].mxu1 %v14910_v40  ;;  %5963 = vmatprep.mubr.bf16.mxu0 %v14913_v39  ;;  %v14941_v39 = vld [vmem:[#allocation76_spill] sm:$0xff] }
 0x53a   : > { %6164 = vmatprep.mubr.bf16.mxu1 %v14916_v38  ;;  %v14943_v49 = vpack.c.bf16 %v14941_v39, %v14942_v62  ;;  %v14944_v38 = vld [vmem:[#allocation78_spill] sm:$0xff]  ;;  %v14975_v39 = vld [vmem:[#allocation9_spill] sm:$0xff] }
 0x53b   : > { %v14946_v25 = vpack.c.bf16 %v14944_v38, %v14945_v53 }
 0x540   : > { %5964 = vmatmul.mubr.bf16.gmra.mrb[4].mxu0 %v14919_v32  ;;  %v5419_v47 = vpop.f32.mrb[200].mxu0  ;;  %v14947_v32 = vld [vmem:[#allocation82_spill] sm:$0xff] }
 0x541   : > { %6165 = vmatmul.mubr.bf16.gmra.mrb[4].mxu1 %v14922_v1  ;;  %5971 = vmatprep.mubr.bf16.mxu0 %v14925_v12  ;;  %v5620_v41 = vpop.f32.mrb[200].mxu1  ;;  %v5421_v42 = vpop.f32.mrb[201].mxu0  ;;  %v14951_v1 = vld [vmem:[#allocation104_spill] sm:$0xff]  ;;  %v14954_v12 = vld [vmem:[#allocation83_spill] sm:$0xff] }
 0x542   : > { %6172 = vmatprep.mubr.bf16.mxu1 %v14928_v59  ;;  %v13458_v18 = vadd.f32 %v5620_v41, %v5419_v47  ;;  %v5622_v8 = vpop.f32.mrb[201].mxu1  ;;  %v5422_v63 = vpop.f32.mrb[202].mxu0  ;;  %v14948_v47 = vld [vmem:[#allocation81_spill] sm:$0xff]  ;;  %v14952_v5 = vpack.c.bf16 %v14950_v7, %v14951_v1  ;;  %v14955_v41 = vpack.c.bf16 %v14953_v35, %v14954_v12  ;;  %v14956_v42 = vld [vmem:[#allocation86_spill] sm:$0xff]  ;;  %v14959_v59 = vld [vmem:[#allocation40_spill] sm:$0xff] }
 0x543   : > { %v5623_v11 = vpop.f32.mrb[202].mxu1  ;;  %v5424_v26 = vpop.f32.mrb[203].mxu0  ;;  %v14949_v57 = vpack.c.bf16 %v14947_v32, %v14948_v47  ;;  %v14958_v28 = vpack.c.bf16 %v14956_v42, %v14957_v2  ;;  %v14960_v8 = vld [vmem:[#allocation87_spill] sm:$0xff]  ;;  %v14983_v2 = vld [vmem:[#allocation58_spill] sm:$0xff] }
 0x544   : > { %v13460_v14 = vadd.f32 %v5623_v11, %v5422_v63  ;;  %v5625_v13 = vpop.f32.mrb[203].mxu1  ;;  %v14961_v63 = vpack.c.bf16 %v14959_v59, %v14960_v8  ;;  %v14962_v11 = vld [vmem:[#allocation32_spill] sm:$0xff]  ;;  %v14978_v7 = vld [vmem:[#allocation95_spill] sm:$0xff] }
 0x545   : > { %v14963_v26 = vld [vmem:[#allocation48_spill] sm:$0xff]  ;;  %v14980_v12 = vld [vmem:[#allocation99_spill] sm:$0xff] }
 0x546   : > { %v14964_v13 = vpack.c.bf16 %v14962_v11, %v14963_v26  ;;  %v14986_v11 = vld [vmem:[#allocation61_spill] sm:$0xff]  ;;  %v14987_v26 = vld [vmem:[#allocation111_spill] sm:$0xff] }
 0x548   : > { %5972 = vmatmul.mubr.bf16.gmra.mrb[8].mxu0 %v14931_v43  ;;  %v5427_v20 = vpop.f32.mrb[204].mxu0 }
 0x549   : > { %6173 = vmatmul.mubr.bf16.gmra.mrb[8].mxu1 %v14934_v19  ;;  %5979 = vmatprep.mubr.bf16.mxu0 %v14937_v16  ;;  %v5628_v52 = vpop.f32.mrb[204].mxu1  ;;  %v5429_v27 = vpop.f32.mrb[205].mxu0  ;;  %v14965_v19 = vld [vmem:[#allocation92_spill] sm:$0xff] }
 0x54a   : > { %6180 = vmatprep.mubr.bf16.mxu1 %v14940_v9  ;;  %v13474_v51 = vadd.f32 %v5628_v52, %v5427_v20  ;;  %v5630_v4 = vpop.f32.mrb[205].mxu1  ;;  %v5430_v22 = vpop.f32.mrb[206].mxu0  ;;  %v14967_v58 = vpack.c.bf16 %v14965_v19, %v14966_v60  ;;  %v14968_v27 = vld [vmem:[#allocation94_spill] sm:$0xff]  ;;  %v14971_v9 = vld [vmem:[#allocation4_spill] sm:$0xff]  ;;  %v14995_v60 = vld [vmem:[#allocation3_spill] sm:$0xff] }
 0x54b   : > { %v5631_v50 = vpop.f32.mrb[206].mxu1  ;;  %v5432_v40 = vpop.f32.mrb[207].mxu0  ;;  %v14970_v46 = vpack.c.bf16 %v14968_v27, %v14969_v0  ;;  %v14972_v4 = vld [vmem:[#allocation121_spill] sm:$0xff]  ;;  %v14999_v27 = vld [vmem:[#allocation10_spill] sm:$0xff] }
 0x54c   : > { %v13476_v56 = vadd.f32 %v5631_v50, %v5430_v22  ;;  %v5633_v55 = vpop.f32.mrb[207].mxu1  ;;  %v14973_v22 = vpack.c.bf16 %v14971_v9, %v14972_v4  ;;  %v15002_v9 = vld [vmem:[#allocation113_spill] sm:$0xff] }
 0x54d   : > { %v14974_v55 = vld [vmem:[#allocation66_spill] sm:$0xff] }
 0x54e   : > { %v14976_v62 = vpack.c.bf16 %v14974_v55, %v14975_v39  ;;  %v15007_v39 = vld [vmem:[#allocation148_spill] sm:$0xff] }
 0x550   : > { %5980 = vmatmul.mubr.bf16.gmra.mrb[12].mxu0 %v14943_v49 }
 0x551   : > { %6181 = vmatmul.mubr.bf16.gmra.mrb[12].mxu1 %v14946_v25  ;;  %5987 = vmatprep.mubr.bf16.mxu0 %v14949_v57  ;;  %v14977_v57 = vld [vmem:[#allocation96_spill] sm:$0xff] }
 0x552   : > { %6188 = vmatprep.mubr.bf16.mxu1 %v14952_v5  ;;  %v14979_v1 = vpack.c.bf16 %v14977_v57, %v14978_v7 }
 0x558   : > { %5988 = vmatmul.mubr.bf16.gmra.mrb[16].mxu0 %v14955_v41  ;;  %v14981_v41 = vld [vmem:[#allocation98_spill] sm:$0xff] }
 0x559   : > { %6189 = vmatmul.mubr.bf16.gmra.mrb[16].mxu1 %v14958_v28  ;;  %5995 = vmatprep.mubr.bf16.mxu0 %v14961_v63  ;;  %v14982_v42 = vpack.c.bf16 %v14980_v12, %v14981_v41  ;;  %v14984_v28 = vld [vmem:[#allocation125_spill] sm:$0xff] }
 0x55a   : > { %6196 = vmatprep.mubr.bf16.mxu1 %v14964_v13  ;;  %v14985_v59 = vpack.c.bf16 %v14983_v2, %v14984_v28  ;;  %v14988_v13 = vpack.c.bf16 %v14986_v11, %v14987_v26  ;;  %v15013_v28 = vld [vmem:[#allocation130_spill] sm:$0xff]  ;;  %v15016_v11 = vld [vmem:[#allocation133_spill] sm:$0xff] }
 0x55b   : > { %v15017_v26 = vld [vmem:[#allocation5_spill] sm:$0xff] }
 0x55c   : > { %v5435_v30 = vpop.f32.mrb[208].mxu0 }
 0x55d   : > { %v5636_v54 = vpop.f32.mrb[208].mxu1  ;;  %v5437_v43 = vpop.f32.mrb[209].mxu0 }
 0x55e   : > { %v13502_v20 = vadd.f32 %v5636_v54, %v5435_v30  ;;  %v5638_v31 = vpop.f32.mrb[209].mxu1  ;;  %v5438_v37 = vpop.f32.mrb[210].mxu0  ;;  %v14989_v30 = vld [vmem:[#allocation103_spill] sm:$0xff]  ;;  %v14990_v54 = vld [vmem:[#allocation102_spill] sm:$0xff] }
 0x55f   : > { %v5639_v16 = vpop.f32.mrb[210].mxu1  ;;  %v5440_v52 = vpop.f32.mrb[211].mxu0  ;;  %v14991_v43 = vpack.c.bf16 %v14989_v30, %v14990_v54  ;;  %v14992_v31 = vld [vmem:[#allocation107_spill] sm:$0xff]  ;;  %v15019_v30 = vld [vmem:[#allocation128_spill] sm:$0xff]  ;;  %v15020_v54 = vld [vmem:[#allocation17_spill] sm:$0xff] }
 0x560   : > { %5996 = vmatmul.mubr.bf16.gmra.mrb[20].mxu0 %v14967_v58  ;;  %v13513_v50 = vadd.f32 %v5639_v16, %v5438_v37  ;;  %v5641_v40 = vpop.f32.mrb[211].mxu1  ;;  %v14993_v37 = vld [vmem:[#allocation106_spill] sm:$0xff]  ;;  %v14996_v58 = vld [vmem:[#allocation64_spill] sm:$0xff]  ;;  %v14998_v52 = vld [vmem:[#allocation67_spill] sm:$0xff] }
 0x561   : > { %6197 = vmatmul.mubr.bf16.gmra.mrb[20].mxu1 %v14970_v46  ;;  %6003 = vmatprep.mubr.bf16.mxu0 %v14973_v22  ;;  %v14994_v19 = vpack.c.bf16 %v14992_v31, %v14993_v37  ;;  %v14997_v16 = vpack.c.bf16 %v14995_v60, %v14996_v58  ;;  %v15000_v0 = vpack.c.bf16 %v14998_v52, %v14999_v27  ;;  %v15001_v46 = vld [vmem:[#allocation114_spill] sm:$0xff]  ;;  %v15004_v22 = vld [vmem:[#allocation119_spill] sm:$0xff]  ;;  %v15025_v60 = vld [vmem:[#allocation156_spill] sm:$0xff] }
 0x562   : > { %6204 = vmatprep.mubr.bf16.mxu1 %v14976_v62  ;;  %v15003_v4 = vpack.c.bf16 %v15001_v46, %v15002_v9  ;;  %v15005_v40 = vld [vmem:[#allocation118_spill] sm:$0xff]  ;;  %v15022_v31 = vld [vmem:[#allocation131_spill] sm:$0xff]  ;;  %v15028_v52 = vld [vmem:[#allocation160_spill] sm:$0xff] }
 0x563   : > { %v15006_v55 = vpack.c.bf16 %v15004_v22, %v15005_v40  ;;  %v15008_v62 = vld [vmem:[#allocation150_spill] sm:$0xff]  ;;  %v15026_v58 = vld [vmem:[#allocation155_spill] sm:$0xff]  ;;  %v15032_v9 = vld [vmem:[#allocation109_spill] sm:$0xff] }
 0x564   : > { %v5443_v49 = vpop.f32.mrb[212].mxu0  ;;  %v15023_v37 = vld [vmem:[#allocation18_spill] sm:$0xff]  ;;  %v15031_v46 = vld [vmem:[#allocation135_spill] sm:$0xff] }
 0x565   : > { %v5644_v38 = vpop.f32.mrb[212].mxu1  ;;  %v5445_v53 = vpop.f32.mrb[213].mxu0  ;;  %v15029_v27 = vld [vmem:[#allocation158_spill] sm:$0xff]  ;;  %v15035_v40 = vld [vmem:[#allocation19_spill] sm:$0xff] }
 0x566   : > { %v13518_v25 = vadd.f32 %v5644_v38, %v5443_v49  ;;  %v5646_v32 = vpop.f32.mrb[213].mxu1  ;;  %v5446_v47 = vpop.f32.mrb[214].mxu0  ;;  %v15009_v49 = vpack.c.bf16 %v15007_v39, %v15008_v62  ;;  %v15010_v38 = vld [vmem:[#allocation16_spill] sm:$0xff]  ;;  %v15011_v53 = vld [vmem:[#allocation127_spill] sm:$0xff]  ;;  %v15034_v22 = vld [vmem:[#allocation90_spill] sm:$0xff] }
 0x567   : > { %v5647_v5 = vpop.f32.mrb[214].mxu1  ;;  %v5448_v35 = vpop.f32.mrb[215].mxu0  ;;  %v15012_v32 = vpack.c.bf16 %v15010_v38, %v15011_v53  ;;  %v15037_v62 = vld [vmem:[#allocation39_spill] sm:$0xff] }
 0x568   : > { %6004 = vmatmul.mubr.bf16.gmra.mrb[24].mxu0 %v14979_v1  ;;  %v13529_v8 = vadd.f32 %v5647_v5, %v5446_v47  ;;  %v5649_v63 = vpop.f32.mrb[215].mxu1 }
 0x569   : > { %6205 = vmatmul.mubr.bf16.gmra.mrb[24].mxu1 %v14982_v42  ;;  %6011 = vmatprep.mubr.bf16.mxu0 %v14985_v59  ;;  %v15014_v59 = vld [vmem:[#allocation129_spill] sm:$0xff] }
 0x56a   : > { %6212 = vmatprep.mubr.bf16.mxu1 %v14988_v13  ;;  %v15015_v63 = vpack.c.bf16 %v15013_v28, %v15014_v59  ;;  %v15018_v13 = vpack.c.bf16 %v15016_v11, %v15017_v26  ;;  %v15046_v59 = vld [vmem:[#allocation170_spill] sm:$0xff] }
 0x570   : > { %6012 = vmatmul.mubr.bf16.gmra.mrb[28].mxu0 %v14991_v43  ;;  %v15021_v43 = vpack.c.bf16 %v15019_v30, %v15020_v54 }
 0x571   : > { %6213 = vmatmul.mubr.bf16.gmra.mrb[28].mxu1 %v14994_v19  ;;  %6019 = vmatprep.mubr.bf16.mxu0 %v14997_v16  ;;  %v15024_v19 = vpack.c.bf16 %v15022_v31, %v15023_v37  ;;  %v15027_v16 = vpack.c.bf16 %v15025_v60, %v15026_v58  ;;  %v15049_v31 = vld [vmem:[#allocation11_spill] sm:$0xff]  ;;  %v15050_v37 = vld [vmem:[#allocation117_spill] sm:$0xff] }
 0x572   : > { %6220 = vmatprep.mubr.bf16.mxu1 %v15000_v0  ;;  %v15030_v0 = vpack.c.bf16 %v15028_v52, %v15029_v27  ;;  %v15053_v52 = vld [vmem:[#allocation134_spill] sm:$0xff] }
 0x578   : > { %6020 = vmatmul.mubr.bf16.gmra.mrb[32].mxu0 %v15003_v4  ;;  %v15033_v4 = vpack.c.bf16 %v15031_v46, %v15032_v9  ;;  %v15056_v46 = vld [vmem:[#allocation20_spill] sm:$0xff] }
 0x579   : > { %6221 = vmatmul.mubr.bf16.gmra.mrb[32].mxu1 %v15006_v55  ;;  %6027 = vmatprep.mubr.bf16.mxu0 %v15009_v49  ;;  %v5451_v47 = vpop.f32.mrb[216].mxu0  ;;  %v15036_v55 = vpack.c.bf16 %v15034_v22, %v15035_v40  ;;  %v15038_v49 = vld [vmem:[#allocation108_spill] sm:$0xff] }
 0x57a   : > { %6228 = vmatprep.mubr.bf16.mxu1 %v15012_v32  ;;  %v5652_v57 = vpop.f32.mrb[216].mxu1  ;;  %v5453_v7 = vpop.f32.mrb[217].mxu0  ;;  %v15039_v38 = vpack.c.bf16 %v15037_v62, %v15038_v49 }
 0x57b   : > { %v13558_v1 = vadd.f32 %v5652_v57, %v5451_v47  ;;  %v5654_v5 = vpop.f32.mrb[217].mxu1  ;;  %v5454_v35 = vpop.f32.mrb[218].mxu0  ;;  %v15040_v47 = vld [vmem:[#allocation163_spill] sm:$0xff] }
 0x57c   : > { %v5655_v12 = vpop.f32.mrb[218].mxu1  ;;  %v5456_v41 = vpop.f32.mrb[219].mxu0  ;;  %v15041_v57 = vld [vmem:[#allocation115_spill] sm:$0xff]  ;;  %v15043_v5 = vld [vmem:[#allocation138_spill] sm:$0xff] }
 0x57d   : > { %v13560_v42 = vadd.f32 %v5655_v12, %v5454_v35  ;;  %v5657_v2 = vpop.f32.mrb[219].mxu1  ;;  %v15042_v7 = vpack.c.bf16 %v15040_v47, %v15041_v57  ;;  %v15044_v35 = vld [vmem:[#allocation139_spill] sm:$0xff]  ;;  %v15061_v47 = vld [vmem:[#allocation140_spill] sm:$0xff]  ;;  %v15062_v57 = vld [vmem:[#allocation65_spill] sm:$0xff] }
 0x57e   : > { %v15045_v12 = vpack.c.bf16 %v15043_v5, %v15044_v35  ;;  %v15064_v5 = vld [vmem:[#allocation141_spill] sm:$0xff]  ;;  %v15065_v35 = vld [vmem:[#allocation14_spill] sm:$0xff] }
 0x580   : > { %6028 = vmatmul.mubr.bf16.gmra.mrb[36].mxu0 %v15015_v63  ;;  %v15047_v63 = vld [vmem:[#allocation168_spill] sm:$0xff] }
 0x581   : > { %6229 = vmatmul.mubr.bf16.gmra.mrb[36].mxu1 %v15018_v13  ;;  %6035 = vmatprep.mubr.bf16.mxu0 %v15021_v43  ;;  %v15048_v11 = vpack.c.bf16 %v15046_v59, %v15047_v63  ;;  %v15070_v63 = vld [vmem:[#allocation122_spill] sm:$0xff] }
 0x582   : > { %6236 = vmatprep.mubr.bf16.mxu1 %v15024_v19  ;;  %v15051_v19 = vpack.c.bf16 %v15049_v31, %v15050_v37  ;;  %v15076_v31 = vld [vmem:[#allocation15_spill] sm:$0xff] }
 0x583   : > { %v15077_v37 = vld [vmem:[#allocation123_spill] sm:$0xff] }
 0x588   : > { %6036 = vmatmul.mubr.bf16.gmra.mrb[40].mxu0 %v15027_v16  ;;  %v15052_v16 = vld [vmem:[#allocation171_spill] sm:$0xff] }
 0x589   : > { %6237 = vmatmul.mubr.bf16.gmra.mrb[40].mxu1 %v15030_v0  ;;  %6043 = vmatprep.mubr.bf16.mxu0 %v15033_v4  ;;  %v15054_v27 = vpack.c.bf16 %v15052_v16, %v15053_v52  ;;  %v15055_v0 = vld [vmem:[#allocation169_spill] sm:$0xff]  ;;  %v15082_v52 = vld [vmem:[#allocation55_spill] sm:$0xff] }
 0x58a   : > { %6244 = vmatprep.mubr.bf16.mxu1 %v15036_v55  ;;  %v15057_v9 = vpack.c.bf16 %v15055_v0, %v15056_v46  ;;  %v15058_v55 = vld [vmem:[#allocation146_spill] sm:$0xff] }
 0x58e   : > { %v5459_v39 = vpop.f32.mrb[220].mxu0 }
 0x58f   : > { %v5660_v53 = vpop.f32.mrb[220].mxu1  ;;  %v5461_v32 = vpop.f32.mrb[221].mxu0 }
 0x590   : > { %6044 = vmatmul.mubr.bf16.gmra.mrb[44].mxu0 %v15039_v38  ;;  %v13595_v41 = vadd.f32 %v5660_v53, %v5459_v39  ;;  %v5662_v2 = vpop.f32.mrb[221].mxu1  ;;  %v5462_v28 = vpop.f32.mrb[222].mxu0  ;;  %v15059_v39 = vld [vmem:[#allocation41_spill] sm:$0xff] }
 0x591   : > { %6245 = vmatmul.mubr.bf16.gmra.mrb[44].mxu1 %v15042_v7  ;;  %6051 = vmatprep.mubr.bf16.mxu0 %v15045_v12  ;;  %v5663_v26 = vpop.f32.mrb[222].mxu1  ;;  %v5464_v13 = vpop.f32.mrb[223].mxu0  ;;  %v15060_v62 = vpack.c.bf16 %v15058_v55, %v15059_v39  ;;  %v15063_v7 = vpack.c.bf16 %v15061_v47, %v15062_v57  ;;  %v15066_v12 = vpack.c.bf16 %v15064_v5, %v15065_v35  ;;  %v15067_v2 = vld [vmem:[#allocation147_spill] sm:$0xff]  ;;  %v15088_v5 = vld [vmem:[#allocation165_spill] sm:$0xff]  ;;  %v15089_v35 = vld [vmem:[#allocation124_spill] sm:$0xff] }
 0x592   : > { %6252 = vmatprep.mubr.bf16.mxu1 %v15048_v11  ;;  %v13600_v30 = vadd.f32 %v5663_v26, %v5462_v28  ;;  %v5665_v54 = vpop.f32.mrb[223].mxu1  ;;  %v15068_v28 = vld [vmem:[#allocation100_spill] sm:$0xff]  ;;  %v15071_v11 = vld [vmem:[#allocation89_spill] sm:$0xff]  ;;  %v15073_v13 = vld [vmem:[#allocation63_spill] sm:$0xff] }
 0x593   : > { %v15069_v59 = vpack.c.bf16 %v15067_v2, %v15068_v28  ;;  %v15072_v26 = vpack.c.bf16 %v15070_v63, %v15071_v11  ;;  %v15074_v54 = vld [vmem:[#allocation120_spill] sm:$0xff]  ;;  %v15091_v2 = vld [vmem:[#allocation157_spill] sm:$0xff]  ;;  %v15094_v63 = vld [vmem:[#allocation2_spill] sm:$0xff] }
 0x594   : > { %v15092_v28 = vld [vmem:[#allocation112_spill] sm:$0xff]  ;;  %v15095_v11 = vld [vmem:[#allocation45_spill] sm:$0xff] }
 0x596   : > { %v5467_v43 = vpop.f32.mrb[224].mxu0 }
 0x597   : > { %v5668_v60 = vpop.f32.mrb[224].mxu1  ;;  %v5469_v58 = vpop.f32.mrb[225].mxu0 }
 0x598   : > { %6052 = vmatmul.mubr.bf16.gmra.mrb[48].mxu0 %v15051_v19  ;;  %v13611_v4 = vadd.f32 %v5668_v60, %v5467_v43  ;;  %v5670_v22 = vpop.f32.mrb[225].mxu1  ;;  %v5470_v40 = vpop.f32.mrb[226].mxu0  ;;  %v15075_v43 = vpack.c.bf16 %v15073_v13, %v15074_v54  ;;  %v15078_v19 = vpack.c.bf16 %v15076_v31, %v15077_v37  ;;  %v15079_v60 = vld [vmem:[#allocation154_spill] sm:$0xff]  ;;  %v15097_v37 = vld [vmem:[#allocation153_spill] sm:$0xff] }
 0x599   : > { %6253 = vmatmul.mubr.bf16.gmra.mrb[48].mxu1 %v15054_v27  ;;  %6059 = vmatprep.mubr.bf16.mxu0 %v15057_v9  ;;  %v5671_v49 = vpop.f32.mrb[226].mxu1  ;;  %v5472_v38 = vpop.f32.mrb[227].mxu0  ;;  %v15080_v58 = vld [vmem:[#allocation166_spill] sm:$0xff]  ;;  %v15083_v27 = vld [vmem:[#allocation7_spill] sm:$0xff] }
 0x59a   : > { %6260 = vmatprep.mubr.bf16.mxu1 %v15060_v62  ;;  %v13616_v53 = vadd.f32 %v5671_v49, %v5470_v40  ;;  %v5673_v32 = vpop.f32.mrb[227].mxu1  ;;  %v15081_v16 = vpack.c.bf16 %v15079_v60, %v15080_v58  ;;  %v15084_v0 = vpack.c.bf16 %v15082_v52, %v15083_v27  ;;  %v15085_v38 = vld [vmem:[#allocation144_spill] sm:$0xff]  ;;  %v15103_v27 = vld [vmem:[#allocation54_spill] sm:$0xff] }
 0x59b   : > { %v15086_v32 = vld [vmem:[#allocation143_spill] sm:$0xff]  ;;  %v15100_v58 = vld [vmem:[#allocation68_spill] sm:$0xff] }
 0x59c   : > { %v15087_v47 = vpack.c.bf16 %v15085_v38, %v15086_v32  ;;  %v15112_v38 = vld [vmem:[#allocation137_spill] sm:$0xff] }
 0x59d   : > { %v15113_v32 = vld [vmem:[#allocation145_spill] sm:$0xff] }
 0x5a0   : > { %6060 = vmatmul.mubr.bf16.gmra.mrb[52].mxu0 %v15063_v7 }
 0x5a1   : > { %6261 = vmatmul.mubr.bf16.gmra.mrb[52].mxu1 %v15066_v12  ;;  %6067 = vmatprep.mubr.bf16.mxu0 %v15069_v59  ;;  %v15090_v12 = vpack.c.bf16 %v15088_v5, %v15089_v35  ;;  %v15093_v59 = vpack.c.bf16 %v15091_v2, %v15092_v28  ;;  %v15116_v5 = vld [vmem:[#allocation26_spill] sm:$0xff]  ;;  %v15119_v2 = vld [vmem:[#allocation13_spill] sm:$0xff] }
 0x5a2   : > { %6268 = vmatprep.mubr.bf16.mxu1 %v15072_v26  ;;  %v15096_v26 = vpack.c.bf16 %v15094_v63, %v15095_v11 }
 0x5a8   : > { %6068 = vmatmul.mubr.bf16.gmra.mrb[56].mxu0 %v15075_v43 }
 0x5a9   : > { %6269 = vmatmul.mubr.bf16.gmra.mrb[56].mxu1 %v15078_v19  ;;  %6075 = vmatprep.mubr.bf16.mxu0 %v15081_v16  ;;  %v15098_v19 = vld [vmem:[#allocation152_spill] sm:$0xff] }
 0x5aa   : > { %6276 = vmatprep.mubr.bf16.mxu1 %v15084_v0  ;;  %v15099_v60 = vpack.c.bf16 %v15097_v37, %v15098_v19  ;;  %v15101_v16 = vld [vmem:[#allocation132_spill] sm:$0xff]  ;;  %v15121_v37 = vld [vmem:[#allocation6_spill] sm:$0xff]  ;;  %v15122_v19 = vld [vmem:[#allocation159_spill] sm:$0xff] }
 0x5ab   : > { %v5475_v46 = vpop.f32.mrb[228].mxu0  ;;  %v15102_v52 = vpack.c.bf16 %v15100_v58, %v15101_v16  ;;  %v15104_v0 = vld [vmem:[#allocation88_spill] sm:$0xff]  ;;  %v15124_v58 = vld [vmem:[#allocation22_spill] sm:$0xff]  ;;  %v15125_v16 = vld [vmem:[#allocation151_spill] sm:$0xff] }
 0x5ac   : > { %v5676_v9 = vpop.f32.mrb[228].mxu1  ;;  %v5477_v22 = vpop.f32.mrb[229].mxu0 }
 0x5ad   : > { %v13642_v40 = vadd.f32 %v5676_v9, %v5475_v46  ;;  %v5678_v55 = vpop.f32.mrb[229].mxu1  ;;  %v5478_v39 = vpop.f32.mrb[230].mxu0  ;;  %v15105_v46 = vpack.c.bf16 %v15103_v27, %v15104_v0  ;;  %v15106_v9 = vld [vmem:[#allocation25_spill] sm:$0xff]  ;;  %v15127_v27 = vld [vmem:[#allocation110_spill] sm:$0xff]  ;;  %v15128_v0 = vld [vmem:[#allocation195_spill] sm:$0xff] }
 0x5ae   : > { %v5679_v62 = vpop.f32.mrb[230].mxu1  ;;  %v5480_v49 = vpop.f32.mrb[231].mxu0  ;;  %v15107_v22 = vld [vmem:[#allocation105_spill] sm:$0xff] }
 0x5af   : > { %v13647_v57 = vadd.f32 %v5679_v62, %v5478_v39  ;;  %v5681_v7 = vpop.f32.mrb[231].mxu1  ;;  %v15108_v55 = vpack.c.bf16 %v15106_v9, %v15107_v22  ;;  %v15109_v39 = vld [vmem:[#allocation136_spill] sm:$0xff]  ;;  %v15110_v62 = vld [vmem:[#allocation142_spill] sm:$0xff] }
 0x5b0   : > { %6076 = vmatmul.mubr.bf16.gmra.mrb[60].mxu0 %v15087_v47  ;;  %v15111_v49 = vpack.c.bf16 %v15109_v39, %v15110_v62  ;;  %v15114_v47 = vpack.c.bf16 %v15112_v38, %v15113_v32  ;;  %v15115_v7 = vld [vmem:[#allocation164_spill] sm:$0xff]  ;;  %v15131_v22 = vld [vmem:[#allocation126_spill] sm:$0xff] }
 0x5b1   : > { %6277 = vmatmul.mubr.bf16.gmra.mrb[60].mxu1 %v15090_v12  ;;  %6083 = vmatprep.mubr.bf16.mxu0 %v15093_v59  ;;  %v15117_v35 = vpack.c.bf16 %v15115_v7, %v15116_v5  ;;  %v15118_v12 = vld [vmem:[#allocation116_spill] sm:$0xff] }
 0x5b2   : > { %6284 = vmatprep.mubr.bf16.mxu1 %v15096_v26  ;;  %v15120_v28 = vpack.c.bf16 %v15118_v12, %v15119_v2  ;;  %v15134_v12 = vld [vmem:[#allocation12_spill] sm:$0xff] }
 0x5b3   : > { %v5483_v13 = vpop.f32.mrb[232].mxu0 }
 0x5b4   : > { %v5485_v54 = vpop.f32.mrb[233].mxu0 }
 0x5b5   : > { %v5486_v43 = vpop.f32.mrb[234].mxu0 }
 0x5b6   : > { %v5488_v31 = vpop.f32.mrb[235].mxu0 }
 0x5b8   : > { %6084 = vmatmul.mubr.bf16.gmra.mrb[64].mxu0 %v15099_v60  ;;  %v15123_v60 = vpack.c.bf16 %v15121_v37, %v15122_v19 }
 0x5b9   : > { %6285 = vmatmul.mubr.bf16.gmra.mrb[64].mxu1 %v15102_v52  ;;  %6091 = vmatprep.mubr.bf16.mxu0 %v15105_v46  ;;  %v15126_v52 = vpack.c.bf16 %v15124_v58, %v15125_v16  ;;  %v15129_v46 = vpack.c.bf16 %v15127_v27, %v15128_v0 }
 0x5ba   : > { %6292 = vmatprep.mubr.bf16.mxu1 %v15108_v55 }
 0x5c0   : > { %6092 = vmatmul.mubr.bf16.gmra.mrb[68].mxu0 %v15111_v49 }
 0x5c1   : > { %6293 = vmatmul.mubr.bf16.gmra.mrb[68].mxu1 %v15114_v47  ;;  %6099 = vmatprep.mubr.bf16.mxu0 %v15117_v35  ;;  %v5684_v59 = vpop.f32.mrb[232].mxu1  ;;  %v15133_v35 = vld [vmem:[#allocation23_spill] sm:$0xff] }
 0x5c2   : > { %6300 = vmatprep.mubr.bf16.mxu1 %v15120_v28  ;;  %v13682_v63 = vadd.f32 %v5684_v59, %v5483_v13  ;;  %v5686_v11 = vpop.f32.mrb[233].mxu1  ;;  %v15130_v13 = vld [vmem:[#allocation167_spill] sm:$0xff]  ;;  %v15135_v2 = vpack.c.bf16 %v15133_v35, %v15134_v12  ;;  %v15136_v28 = vld [vmem:[#allocation172_spill] sm:$0xff]  ;;  %v15137_v59 = vld [vmem:[#allocation21_spill] sm:$0xff] }
 0x5c3   : > { %v5687_v26 = vpop.f32.mrb[234].mxu1  ;;  %v15132_v55 = vpack.c.bf16 %v15130_v13, %v15131_v22  ;;  %v15138_v11 = vpack.c.bf16 %v15136_v28, %v15137_v59 }
 0x5c4   : > { %v13684_v54 = vadd.f32 %v5687_v26, %v5486_v43  ;;  %v5689_v31 = vpop.f32.mrb[235].mxu1 }
 0x5c8   : > { %6100 = vmatmul.mubr.bf16.gmra.mrb[72].mxu0 %v15123_v60  ;;  %v5491_v9 = vpop.f32.mrb[236].mxu0 }
 0x5c9   : > { %6301 = vmatmul.mubr.bf16.gmra.mrb[72].mxu1 %v15126_v52  ;;  %6107 = vmatprep.mubr.bf16.mxu0 %v15129_v46  ;;  %v5692_v43 = vpop.f32.mrb[236].mxu1  ;;  %v5493_v39 = vpop.f32.mrb[237].mxu0 }
 0x5ca   : > { %6308 = vmatprep.mubr.bf16.mxu1 %v15132_v55  ;;  %v13698_v62 = vadd.f32 %v5692_v43, %v5491_v9  ;;  %v5694_v49 = vpop.f32.mrb[237].mxu1  ;;  %v5494_v38 = vpop.f32.mrb[238].mxu0 }
 0x5cb   : > { %v5695_v32 = vpop.f32.mrb[238].mxu1  ;;  %v5496_v47 = vpop.f32.mrb[239].mxu0 }
 0x5cc   : > { %v13700_v7 = vadd.f32 %v5695_v32, %v5494_v38  ;;  %v5697_v5 = vpop.f32.mrb[239].mxu1 }
 0x5d0   : > { %6108 = vmatmul.mubr.bf16.gmra.mrb[76].mxu0 %v15135_v2 }
 0x5d1   : > { %6309 = vmatmul.mubr.bf16.gmra.mrb[76].mxu1 %v15138_v11 }
 0x5de   : > { %v5499_v26 = vpop.f32.mrb[240].mxu0 }
 0x5df   : > { %v5700_v31 = vpop.f32.mrb[240].mxu1  ;;  %v5501_v37 = vpop.f32.mrb[241].mxu0 }
 0x5e0   : > { %v13708_v19 = vadd.f32 %v5700_v31, %v5499_v26  ;;  %v5702_v60 = vpop.f32.mrb[241].mxu1  ;;  %v5502_v58 = vpop.f32.mrb[242].mxu0 }
 0x5e1   : > { %v5703_v16 = vpop.f32.mrb[242].mxu1  ;;  %v5504_v52 = vpop.f32.mrb[243].mxu0 }
 0x5e2   : > { %v13710_v27 = vadd.f32 %v5703_v16, %v5502_v58  ;;  %v5705_v0 = vpop.f32.mrb[243].mxu1  ;;  %v13724_v52 = vld [vmem:[%s13867_s7] ss:$0 sm:$0xff] }
 0x5e6   : > { %v5507_v46 = vpop.f32.mrb[244].mxu0 }
 0x5e7   : > { %v5708_v9 = vpop.f32.mrb[244].mxu1  ;;  %v5509_v13 = vpop.f32.mrb[245].mxu0 }
 0x5e8   : > { %v13712_v22 = vadd.f32 %v5708_v9, %v5507_v46  ;;  %v5710_v55 = vpop.f32.mrb[245].mxu1  ;;  %v5510_v43 = vpop.f32.mrb[246].mxu0 }
 0x5e9   : > { %v5711_v39 = vpop.f32.mrb[246].mxu1  ;;  %v5512_v49 = vpop.f32.mrb[247].mxu0 }
 0x5ea   : > { %v13714_v38 = vadd.f32 %v5711_v39, %v5510_v43  ;;  %v5713_v32 = vpop.f32.mrb[247].mxu1 }
 0x5fb   : > { %v5515_v47 = vpop.f32.mrb[248].mxu0 }
 0x5fc   : > { %v5716_v5 = vpop.f32.mrb[248].mxu1  ;;  %v5517_v35 = vpop.f32.mrb[249].mxu0 }
 0x5fd   : > { %v13716_v12 = vadd.f32 %v5716_v5, %v5515_v47  ;;  %v5718_v2 = vpop.f32.mrb[249].mxu1  ;;  %v5518_v28 = vpop.f32.mrb[250].mxu0 }
 0x5fe   : > { %v5719_v59 = vpop.f32.mrb[250].mxu1  ;;  %v5520_v11 = vpop.f32.mrb[251].mxu0 }
 0x5ff   : > { %v13718_v26 = vadd.f32 %v5719_v59, %v5518_v28  ;;  %v5721_v31 = vpop.f32.mrb[251].mxu1 }
 0x603   : > { %v5949_v37 = vpop.f32.mrb[252].mxu0 }
 0x604   : > { %v5950_v60 = vadd.f32 %v5949_v37, %v13230_v61  ;;  %v6150_v58 = vpop.f32.mrb[252].mxu1  ;;  %v5951_v16 = vpop.f32.mrb[253].mxu0 }
 0x605   : > { %v6152_v0 = vpop.f32.mrb[253].mxu1  ;;  %v5952_v46 = vpop.f32.mrb[254].mxu0 }
 0x606   : > { %v6151_v9 = vadd.f32 %v6150_v58, %v5950_v60  ;;  %v5953_v13 = vadd.f32 %v5952_v46, %v13236_v36  ;;  %v6153_v55 = vpop.f32.mrb[254].mxu1  ;;  %v5954_v43 = vpop.f32.mrb[255].mxu0 }
 0x607   : > { %v6155_v61 = vpop.f32.mrb[255].mxu1 }
 0x608   : > { %v6324_v39 = vadd.f32 %v13724_v52, %v6151_v9  ;;  %v6154_v49 = vadd.f32 %v6153_v55, %v5953_v13 }
 0x60a   : > { %6366 = vst [vmem:[%s13731_s23] sm:$0xff] %v6324_v39  ;;  %v6325_v32 = vadd.f32 %v13724_v52, %v6154_v49 }
 0x60b   : > { %v5957_v47 = vpop.f32.mrb[0].mxu0 }
 0x60c   : > { %6367 = vst [vmem:[%s13731_s23 + $0x8] sm:$0xff] %v6325_v32  ;;  %v5958_v36 = vadd.f32 %v5957_v47, %v13250_v6  ;;  %v6158_v5 = vpop.f32.mrb[0].mxu1  ;;  %v5959_v35 = vpop.f32.mrb[1].mxu0 }
 0x60d   : > { %v6160_v2 = vpop.f32.mrb[1].mxu1  ;;  %v5960_v28 = vpop.f32.mrb[2].mxu0 }
 0x60e   : > { %v6159_v59 = vadd.f32 %v6158_v5, %v5958_v36  ;;  %v5961_v11 = vadd.f32 %v5960_v28, %v13253_v15  ;;  %v6161_v31 = vpop.f32.mrb[2].mxu1  ;;  %v5962_v37 = vpop.f32.mrb[3].mxu0 }
 0x60f   : > { %v6163_v60 = vpop.f32.mrb[3].mxu1 }
 0x610   : > { %v6326_v58 = vadd.f32 %v13724_v52, %v6159_v59  ;;  %v6162_v16 = vadd.f32 %v6161_v31, %v5961_v11 }
 0x612   : > { %6368 = vst [vmem:[%s13731_s23 + $0x10] sm:$0xff] %v6326_v58  ;;  %v6327_v0 = vadd.f32 %v13724_v52, %v6162_v16 }
 0x613   : > { %v5965_v46 = vpop.f32.mrb[4].mxu0 }
 0x614   : > { %6369 = vst [vmem:[%s13731_s23 + $0x18] sm:$0xff] %v6327_v0  ;;  %v5966_v6 = vadd.f32 %v5965_v46, %v13290_v10  ;;  %v6166_v9 = vpop.f32.mrb[4].mxu1  ;;  %v5967_v13 = vpop.f32.mrb[5].mxu0 }
 0x615   : > { %v6168_v55 = vpop.f32.mrb[5].mxu1  ;;  %v5968_v43 = vpop.f32.mrb[6].mxu0 }
 0x616   : > { %v6167_v15 = vadd.f32 %v6166_v9, %v5966_v6  ;;  %v5969_v61 = vadd.f32 %v5968_v43, %v13299_v48  ;;  %v6169_v39 = vpop.f32.mrb[6].mxu1  ;;  %v5970_v49 = vpop.f32.mrb[7].mxu0 }
 0x617   : > { %v6171_v32 = vpop.f32.mrb[7].mxu1 }
 0x618   : > { %v6328_v47 = vadd.f32 %v13724_v52, %v6167_v15  ;;  %v6170_v36 = vadd.f32 %v6169_v39, %v5969_v61 }
 0x61a   : > { %6370 = vst [vmem:[%s13731_s23 + $0x20] sm:$0xff] %v6328_v47  ;;  %v6329_v5 = vadd.f32 %v13724_v52, %v6170_v36 }
 0x61b   : > { %v5973_v35 = vpop.f32.mrb[8].mxu0 }
 0x61c   : > { %6371 = vst [vmem:[%s13731_s23 + $0x28] sm:$0xff] %v6329_v5  ;;  %v5974_v10 = vadd.f32 %v5973_v35, %v13328_v17  ;;  %v6174_v2 = vpop.f32.mrb[8].mxu1  ;;  %v5975_v28 = vpop.f32.mrb[9].mxu0 }
 0x61d   : > { %v6176_v59 = vpop.f32.mrb[9].mxu1  ;;  %v5976_v11 = vpop.f32.mrb[10].mxu0 }
 0x61e   : > { %v6175_v48 = vadd.f32 %v6174_v2, %v5974_v10  ;;  %v5977_v31 = vadd.f32 %v5976_v11, %v13335_v33  ;;  %v6177_v37 = vpop.f32.mrb[10].mxu1  ;;  %v5978_v60 = vpop.f32.mrb[11].mxu0 }
 0x61f   : > { %v6179_v58 = vpop.f32.mrb[11].mxu1 }
 0x620   : > { %v6330_v16 = vadd.f32 %v13724_v52, %v6175_v48  ;;  %v6178_v0 = vadd.f32 %v6177_v37, %v5977_v31 }
 0x622   : > { %6372 = vst [vmem:[%s13731_s23 + $0x30] sm:$0xff] %v6330_v16  ;;  %v6331_v46 = vadd.f32 %v13724_v52, %v6178_v0 }
 0x623   : > { %v5981_v6 = vpop.f32.mrb[12].mxu0 }
 0x624   : > { %6373 = vst [vmem:[%s13731_s23 + $0x38] sm:$0xff] %v6331_v46  ;;  %v5982_v17 = vadd.f32 %v5981_v6, %v13337_v3  ;;  %v6182_v9 = vpop.f32.mrb[12].mxu1  ;;  %v5983_v13 = vpop.f32.mrb[13].mxu0 }
 0x625   : > { %v6184_v55 = vpop.f32.mrb[13].mxu1  ;;  %v5984_v43 = vpop.f32.mrb[14].mxu0 }
 0x626   : > { %v6183_v33 = vadd.f32 %v6182_v9, %v5982_v17  ;;  %v5985_v15 = vadd.f32 %v5984_v43, %v13339_v24  ;;  %v6185_v61 = vpop.f32.mrb[14].mxu1  ;;  %v5986_v39 = vpop.f32.mrb[15].mxu0 }
 0x627   : > { %v6187_v49 = vpop.f32.mrb[15].mxu1 }
 0x628   : > { %v6332_v32 = vadd.f32 %v13724_v52, %v6183_v33  ;;  %v6186_v47 = vadd.f32 %v6185_v61, %v5985_v15 }
 0x62a   : > { %6374 = vst [vmem:[%s13731_s23 + $0x40] sm:$0xff] %v6332_v32  ;;  %v6333_v36 = vadd.f32 %v13724_v52, %v6186_v47 }
 0x62b   : > { %v5989_v5 = vpop.f32.mrb[16].mxu0 }
 0x62c   : > { %6375 = vst [vmem:[%s13731_s23 + $0x48] sm:$0xff] %v6333_v36  ;;  %v5990_v3 = vadd.f32 %v5989_v5, %v13396_v23  ;;  %v6190_v35 = vpop.f32.mrb[16].mxu1  ;;  %v5991_v10 = vpop.f32.mrb[17].mxu0 }
 0x62d   : > { %v6192_v2 = vpop.f32.mrb[17].mxu1  ;;  %v5992_v28 = vpop.f32.mrb[18].mxu0 }
 0x62e   : > { %v6191_v24 = vadd.f32 %v6190_v35, %v5990_v3  ;;  %v5993_v59 = vadd.f32 %v5992_v28, %v13398_v34  ;;  %v6193_v11 = vpop.f32.mrb[18].mxu1  ;;  %v5994_v48 = vpop.f32.mrb[19].mxu0 }
 0x62f   : > { %v6195_v31 = vpop.f32.mrb[19].mxu1 }
 0x630   : > { %v6334_v37 = vadd.f32 %v13724_v52, %v6191_v24  ;;  %v6194_v60 = vadd.f32 %v6193_v11, %v5993_v59 }
 0x632   : > { %6376 = vst [vmem:[%s13731_s23 + $0x50] sm:$0xff] %v6334_v37  ;;  %v6335_v58 = vadd.f32 %v13724_v52, %v6194_v60 }
 0x633   : > { %v5997_v16 = vpop.f32.mrb[20].mxu0 }
 0x634   : > { %6377 = vst [vmem:[%s13731_s23 + $0x58] sm:$0xff] %v6335_v58  ;;  %v5998_v23 = vadd.f32 %v5997_v16, %v13400_v45  ;;  %v6198_v0 = vpop.f32.mrb[20].mxu1  ;;  %v5999_v46 = vpop.f32.mrb[21].mxu0 }
 0x635   : > { %v6200_v6 = vpop.f32.mrb[21].mxu1  ;;  %v6000_v17 = vpop.f32.mrb[22].mxu0 }
 0x636   : > { %v6199_v34 = vadd.f32 %v6198_v0, %v5998_v23  ;;  %v6001_v9 = vadd.f32 %v6000_v17, %v13402_v21  ;;  %v6201_v13 = vpop.f32.mrb[22].mxu1  ;;  %v6002_v55 = vpop.f32.mrb[23].mxu0 }
 0x637   : > { %v6203_v43 = vpop.f32.mrb[23].mxu1 }
 0x638   : > { %v6336_v33 = vadd.f32 %v13724_v52, %v6199_v34  ;;  %v6202_v15 = vadd.f32 %v6201_v13, %v6001_v9 }
 0x63a   : > { %6378 = vst [vmem:[%s13731_s23 + $0x60] sm:$0xff] %v6336_v33  ;;  %v6337_v61 = vadd.f32 %v13724_v52, %v6202_v15 }
 0x63b   : > { %v6005_v39 = vpop.f32.mrb[24].mxu0 }
 0x63c   : > { %6379 = vst [vmem:[%s13731_s23 + $0x68] sm:$0xff] %v6337_v61  ;;  %v6006_v45 = vadd.f32 %v6005_v39, %v13418_v29  ;;  %v6206_v49 = vpop.f32.mrb[24].mxu1  ;;  %v6007_v32 = vpop.f32.mrb[25].mxu0 }
 0x63d   : > { %v6208_v47 = vpop.f32.mrb[25].mxu1  ;;  %v6008_v36 = vpop.f32.mrb[26].mxu0 }
 0x63e   : > { %v6207_v21 = vadd.f32 %v6206_v49, %v6006_v45  ;;  %v6009_v5 = vadd.f32 %v6008_v36, %v13420_v44  ;;  %v6209_v3 = vpop.f32.mrb[26].mxu1  ;;  %v6010_v35 = vpop.f32.mrb[27].mxu0 }
 0x63f   : > { %v6211_v10 = vpop.f32.mrb[27].mxu1 }
 0x640   : > { %v6338_v2 = vadd.f32 %v13724_v52, %v6207_v21  ;;  %v6210_v28 = vadd.f32 %v6209_v3, %v6009_v5 }
 0x642   : > { %6380 = vst [vmem:[%s13731_s23 + $0x70] sm:$0xff] %v6338_v2  ;;  %v6339_v24 = vadd.f32 %v13724_v52, %v6210_v28 }
 0x643   : > { %v6013_v59 = vpop.f32.mrb[28].mxu0 }
 0x644   : > { %6381 = vst [vmem:[%s13731_s23 + $0x78] sm:$0xff] %v6339_v24  ;;  %v6014_v29 = vadd.f32 %v6013_v59, %v13458_v18  ;;  %v6214_v11 = vpop.f32.mrb[28].mxu1  ;;  %v6015_v48 = vpop.f32.mrb[29].mxu0 }
 0x645   : > { %v6216_v31 = vpop.f32.mrb[29].mxu1  ;;  %v6016_v37 = vpop.f32.mrb[30].mxu0 }
 0x646   : > { %v6215_v44 = vadd.f32 %v6214_v11, %v6014_v29  ;;  %v6017_v60 = vadd.f32 %v6016_v37, %v13460_v14  ;;  %v6217_v58 = vpop.f32.mrb[30].mxu1  ;;  %v6018_v16 = vpop.f32.mrb[31].mxu0 }
 0x647   : > { %v6219_v23 = vpop.f32.mrb[31].mxu1 }
 0x648   : > { %v6340_v0 = vadd.f32 %v13724_v52, %v6215_v44  ;;  %v6218_v46 = vadd.f32 %v6217_v58, %v6017_v60 }
 0x64a   : > { %6382 = vst [vmem:[%s13731_s23 + $0x80] sm:$0xff] %v6340_v0  ;;  %v6341_v6 = vadd.f32 %v13724_v52, %v6218_v46 }
 0x64b   : > { %v6021_v17 = vpop.f32.mrb[32].mxu0 }
 0x64c   : > { %6383 = vst [vmem:[%s13731_s23 + $0x88] sm:$0xff] %v6341_v6  ;;  %v6022_v18 = vadd.f32 %v6021_v17, %v13474_v51  ;;  %v6222_v34 = vpop.f32.mrb[32].mxu1  ;;  %v6023_v9 = vpop.f32.mrb[33].mxu0 }
 0x64d   : > { %v6224_v13 = vpop.f32.mrb[33].mxu1  ;;  %v6024_v55 = vpop.f32.mrb[34].mxu0 }
 0x64e   : > { %v6223_v14 = vadd.f32 %v6222_v34, %v6022_v18  ;;  %v6025_v43 = vadd.f32 %v6024_v55, %v13476_v56  ;;  %v6225_v33 = vpop.f32.mrb[34].mxu1  ;;  %v6026_v15 = vpop.f32.mrb[35].mxu0 }
 0x64f   : > { %v6227_v61 = vpop.f32.mrb[35].mxu1 }
 0x650   : > { %v6342_v39 = vadd.f32 %v13724_v52, %v6223_v14  ;;  %v6226_v45 = vadd.f32 %v6225_v33, %v6025_v43 }
 0x652   : > { %6384 = vst [vmem:[%s13731_s23 + $0x90] sm:$0xff] %v6342_v39  ;;  %v6343_v49 = vadd.f32 %v13724_v52, %v6226_v45 }
 0x653   : > { %v6029_v32 = vpop.f32.mrb[36].mxu0 }
 0x654   : > { %6385 = vst [vmem:[%s13731_s23 + $0x98] sm:$0xff] %v6343_v49  ;;  %v6030_v51 = vadd.f32 %v6029_v32, %v13502_v20  ;;  %v6230_v47 = vpop.f32.mrb[36].mxu1  ;;  %v6031_v36 = vpop.f32.mrb[37].mxu0 }
 0x655   : > { %v6232_v21 = vpop.f32.mrb[37].mxu1  ;;  %v6032_v5 = vpop.f32.mrb[38].mxu0 }
 0x656   : > { %v6231_v56 = vadd.f32 %v6230_v47, %v6030_v51  ;;  %v6033_v3 = vadd.f32 %v6032_v5, %v13513_v50  ;;  %v6233_v35 = vpop.f32.mrb[38].mxu1  ;;  %v6034_v10 = vpop.f32.mrb[39].mxu0 }
 0x657   : > { %v6235_v2 = vpop.f32.mrb[39].mxu1 }
 0x658   : > { %v6344_v28 = vadd.f32 %v13724_v52, %v6231_v56  ;;  %v6234_v24 = vadd.f32 %v6233_v35, %v6033_v3 }
 0x65a   : > { %6386 = vst [vmem:[%s13731_s23 + $0xa0] sm:$0xff] %v6344_v28  ;;  %v6345_v59 = vadd.f32 %v13724_v52, %v6234_v24 }
 0x65b   : > { %v6037_v29 = vpop.f32.mrb[40].mxu0 }
 0x65c   : > { %6387 = vst [vmem:[%s13731_s23 + $0xa8] sm:$0xff] %v6345_v59  ;;  %v6038_v20 = vadd.f32 %v6037_v29, %v13518_v25  ;;  %v6238_v11 = vpop.f32.mrb[40].mxu1  ;;  %v6039_v48 = vpop.f32.mrb[41].mxu0 }
 0x65d   : > { %v6240_v31 = vpop.f32.mrb[41].mxu1  ;;  %v6040_v37 = vpop.f32.mrb[42].mxu0 }
 0x65e   : > { %v6239_v50 = vadd.f32 %v6238_v11, %v6038_v20  ;;  %v6041_v44 = vadd.f32 %v6040_v37, %v13529_v8  ;;  %v6241_v60 = vpop.f32.mrb[42].mxu1  ;;  %v6042_v58 = vpop.f32.mrb[43].mxu0 }
 0x65f   : > { %v6243_v16 = vpop.f32.mrb[43].mxu1 }
 0x660   : > { %v6346_v23 = vadd.f32 %v13724_v52, %v6239_v50  ;;  %v6242_v0 = vadd.f32 %v6241_v60, %v6041_v44 }
 0x662   : > { %6388 = vst [vmem:[%s13731_s23 + $0xb0] sm:$0xff] %v6346_v23  ;;  %v6347_v46 = vadd.f32 %v13724_v52, %v6242_v0 }
 0x663   : > { %v6045_v6 = vpop.f32.mrb[44].mxu0 }
 0x664   : > { %6389 = vst [vmem:[%s13731_s23 + $0xb8] sm:$0xff] %v6347_v46  ;;  %v6046_v25 = vadd.f32 %v6045_v6, %v13558_v1  ;;  %v6246_v17 = vpop.f32.mrb[44].mxu1  ;;  %v6047_v18 = vpop.f32.mrb[45].mxu0 }
 0x665   : > { %v6248_v34 = vpop.f32.mrb[45].mxu1  ;;  %v6048_v9 = vpop.f32.mrb[46].mxu0 }
 0x666   : > { %v6247_v8 = vadd.f32 %v6246_v17, %v6046_v25  ;;  %v6049_v13 = vadd.f32 %v6048_v9, %v13560_v42  ;;  %v6249_v55 = vpop.f32.mrb[46].mxu1  ;;  %v6050_v14 = vpop.f32.mrb[47].mxu0 }
 0x667   : > { %v6251_v43 = vpop.f32.mrb[47].mxu1 }
 0x668   : > { %v6348_v33 = vadd.f32 %v13724_v52, %v6247_v8  ;;  %v6250_v15 = vadd.f32 %v6249_v55, %v6049_v13 }
 0x66a   : > { %6390 = vst [vmem:[%s13731_s23 + $0xc0] sm:$0xff] %v6348_v33  ;;  %v6349_v61 = vadd.f32 %v13724_v52, %v6250_v15 }
 0x66b   : > { %v6053_v39 = vpop.f32.mrb[48].mxu0 }
 0x66c   : > { %6391 = vst [vmem:[%s13731_s23 + $0xc8] sm:$0xff] %v6349_v61  ;;  %v6054_v1 = vadd.f32 %v6053_v39, %v13595_v41  ;;  %v6254_v45 = vpop.f32.mrb[48].mxu1  ;;  %v6055_v49 = vpop.f32.mrb[49].mxu0 }
 0x66d   : > { %v6256_v32 = vpop.f32.mrb[49].mxu1  ;;  %v6056_v51 = vpop.f32.mrb[50].mxu0 }
 0x66e   : > { %v6255_v42 = vadd.f32 %v6254_v45, %v6054_v1  ;;  %v6057_v47 = vadd.f32 %v6056_v51, %v13600_v30  ;;  %v6257_v36 = vpop.f32.mrb[50].mxu1  ;;  %v6058_v21 = vpop.f32.mrb[51].mxu0 }
 0x66f   : > { %v6259_v5 = vpop.f32.mrb[51].mxu1 }
 0x670   : > { %v6350_v56 = vadd.f32 %v13724_v52, %v6255_v42  ;;  %v6258_v3 = vadd.f32 %v6257_v36, %v6057_v47 }
 0x672   : > { %6392 = vst [vmem:[%s13731_s23 + $0xd0] sm:$0xff] %v6350_v56  ;;  %v6351_v35 = vadd.f32 %v13724_v52, %v6258_v3 }
 0x673   : > { %v6061_v10 = vpop.f32.mrb[52].mxu0 }
 0x674   : > { %6393 = vst [vmem:[%s13731_s23 + $0xd8] sm:$0xff] %v6351_v35  ;;  %v6062_v41 = vadd.f32 %v6061_v10, %v13611_v4  ;;  %v6262_v2 = vpop.f32.mrb[52].mxu1  ;;  %v6063_v28 = vpop.f32.mrb[53].mxu0 }
 0x675   : > { %v6264_v24 = vpop.f32.mrb[53].mxu1  ;;  %v6064_v59 = vpop.f32.mrb[54].mxu0 }
 0x676   : > { %v6263_v30 = vadd.f32 %v6262_v2, %v6062_v41  ;;  %v6065_v29 = vadd.f32 %v6064_v59, %v13616_v53  ;;  %v6265_v20 = vpop.f32.mrb[54].mxu1  ;;  %v6066_v11 = vpop.f32.mrb[55].mxu0 }
 0x677   : > { %v6267_v48 = vpop.f32.mrb[55].mxu1 }
 0x678   : > { %v6352_v31 = vadd.f32 %v13724_v52, %v6263_v30  ;;  %v6266_v37 = vadd.f32 %v6265_v20, %v6065_v29 }
 0x67a   : > { %6394 = vst [vmem:[%s13731_s23 + $0xe0] sm:$0xff] %v6352_v31  ;;  %v6353_v50 = vadd.f32 %v13724_v52, %v6266_v37 }
 0x67b   : > { %v6069_v44 = vpop.f32.mrb[56].mxu0 }
 0x67c   : > { %6395 = vst [vmem:[%s13731_s23 + $0xe8] sm:$0xff] %v6353_v50  ;;  %v6070_v4 = vadd.f32 %v6069_v44, %v13642_v40  ;;  %v6270_v60 = vpop.f32.mrb[56].mxu1  ;;  %v6071_v58 = vpop.f32.mrb[57].mxu0 }
 0x67d   : > { %v6272_v16 = vpop.f32.mrb[57].mxu1  ;;  %v6072_v23 = vpop.f32.mrb[58].mxu0 }
 0x67e   : > { %v6271_v53 = vadd.f32 %v6270_v60, %v6070_v4  ;;  %v6073_v0 = vadd.f32 %v6072_v23, %v13647_v57  ;;  %v6273_v46 = vpop.f32.mrb[58].mxu1  ;;  %v6074_v6 = vpop.f32.mrb[59].mxu0 }
 0x67f   : > { %v6275_v25 = vpop.f32.mrb[59].mxu1 }
 0x680   : > { %v6354_v17 = vadd.f32 %v13724_v52, %v6271_v53  ;;  %v6274_v18 = vadd.f32 %v6273_v46, %v6073_v0 }
 0x682   : > { %6396 = vst [vmem:[%s13731_s23 + $0xf0] sm:$0xff] %v6354_v17  ;;  %v6355_v34 = vadd.f32 %v13724_v52, %v6274_v18 }
 0x683   : > { %v6077_v9 = vpop.f32.mrb[60].mxu0 }
 0x684   : > { %6397 = vst [vmem:[%s13731_s23 + $0xf8] sm:$0xff] %v6355_v34  ;;  %v6078_v40 = vadd.f32 %v6077_v9, %v13682_v63  ;;  %v6278_v8 = vpop.f32.mrb[60].mxu1  ;;  %v6079_v13 = vpop.f32.mrb[61].mxu0 }
 0x685   : > { %v6280_v55 = vpop.f32.mrb[61].mxu1  ;;  %v6080_v14 = vpop.f32.mrb[62].mxu0 }
 0x686   : > { %v6279_v57 = vadd.f32 %v6278_v8, %v6078_v40  ;;  %v6081_v43 = vadd.f32 %v6080_v14, %v13684_v54  ;;  %v6281_v33 = vpop.f32.mrb[62].mxu1  ;;  %v6082_v15 = vpop.f32.mrb[63].mxu0 }
 0x687   : > { %v6283_v61 = vpop.f32.mrb[63].mxu1 }
 0x688   : > { %v6356_v39 = vadd.f32 %v13724_v52, %v6279_v57  ;;  %v6282_v1 = vadd.f32 %v6281_v33, %v6081_v43 }
 0x68a   : > { %6398 = vst [vmem:[%s13731_s23 + $0x100] sm:$0xff] %v6356_v39  ;;  %v6357_v45 = vadd.f32 %v13724_v52, %v6282_v1 }
 0x68b   : > { %v6085_v49 = vpop.f32.mrb[64].mxu0 }
 0x68c   : > { %6399 = vst [vmem:[%s13731_s23 + $0x108] sm:$0xff] %v6357_v45  ;;  %v6086_v63 = vadd.f32 %v6085_v49, %v13698_v62  ;;  %v6286_v32 = vpop.f32.mrb[64].mxu1  ;;  %v6087_v51 = vpop.f32.mrb[65].mxu0 }
 0x68d   : > { %v6288_v42 = vpop.f32.mrb[65].mxu1  ;;  %v6088_v47 = vpop.f32.mrb[66].mxu0 }
 0x68e   : > { %v6287_v54 = vadd.f32 %v6286_v32, %v6086_v63  ;;  %v6089_v36 = vadd.f32 %v6088_v47, %v13700_v7  ;;  %v6289_v21 = vpop.f32.mrb[66].mxu1  ;;  %v6090_v5 = vpop.f32.mrb[67].mxu0 }
 0x68f   : > { %v6291_v56 = vpop.f32.mrb[67].mxu1 }
 0x690   : > { %v6358_v3 = vadd.f32 %v13724_v52, %v6287_v54  ;;  %v6290_v35 = vadd.f32 %v6289_v21, %v6089_v36 }
 0x692   : > { %6400 = vst [vmem:[%s13731_s23 + $0x110] sm:$0xff] %v6358_v3  ;;  %v6359_v10 = vadd.f32 %v13724_v52, %v6290_v35 }
 0x693   : > { %v6093_v41 = vpop.f32.mrb[68].mxu0 }
 0x694   : > { %6401 = vst [vmem:[%s13731_s23 + $0x118] sm:$0xff] %v6359_v10  ;;  %v6094_v62 = vadd.f32 %v6093_v41, %v13708_v19  ;;  %v6294_v2 = vpop.f32.mrb[68].mxu1  ;;  %v6095_v28 = vpop.f32.mrb[69].mxu0 }
 0x695   : > { %v6296_v24 = vpop.f32.mrb[69].mxu1  ;;  %v6096_v59 = vpop.f32.mrb[70].mxu0 }
 0x696   : > { %v6295_v7 = vadd.f32 %v6294_v2, %v6094_v62  ;;  %v6097_v30 = vadd.f32 %v6096_v59, %v13710_v27  ;;  %v6297_v29 = vpop.f32.mrb[70].mxu1  ;;  %v6098_v20 = vpop.f32.mrb[71].mxu0 }
 0x697   : > { %v6299_v11 = vpop.f32.mrb[71].mxu1 }
 0x698   : > { %v6360_v48 = vadd.f32 %v13724_v52, %v6295_v7  ;;  %v6298_v31 = vadd.f32 %v6297_v29, %v6097_v30 }
 0x69a   : > { %6402 = vst [vmem:[%s13731_s23 + $0x120] sm:$0xff] %v6360_v48  ;;  %v6361_v37 = vadd.f32 %v13724_v52, %v6298_v31 }
 0x69b   : > { %v6101_v50 = vpop.f32.mrb[72].mxu0 }
 0x69c   : > { %6403 = vst [vmem:[%s13731_s23 + $0x128] sm:$0xff] %v6361_v37  ;;  %v6102_v19 = vadd.f32 %v6101_v50, %v13712_v22  ;;  %v6302_v44 = vpop.f32.mrb[72].mxu1  ;;  %v6103_v4 = vpop.f32.mrb[73].mxu0 }
 0x69d   : > { %v6304_v60 = vpop.f32.mrb[73].mxu1  ;;  %v6104_v58 = vpop.f32.mrb[74].mxu0 }
 0x69e   : > { %v6303_v27 = vadd.f32 %v6302_v44, %v6102_v19  ;;  %v6105_v16 = vadd.f32 %v6104_v58, %v13714_v38  ;;  %v6305_v23 = vpop.f32.mrb[74].mxu1  ;;  %v6106_v53 = vpop.f32.mrb[75].mxu0 }
 0x69f   : > { %v6307_v0 = vpop.f32.mrb[75].mxu1 }
 0x6a0   : > { %v6362_v46 = vadd.f32 %v13724_v52, %v6303_v27  ;;  %v6306_v6 = vadd.f32 %v6305_v23, %v6105_v16 }
 0x6a2   : > { %6404 = vst [vmem:[%s13731_s23 + $0x130] sm:$0xff] %v6362_v46  ;;  %v6363_v25 = vadd.f32 %v13724_v52, %v6306_v6 }
 0x6a3   : > { %v6109_v17 = vpop.f32.mrb[76].mxu0 }
 0x6a4   : > { %6405 = vst [vmem:[%s13731_s23 + $0x138] sm:$0xff] %v6363_v25  ;;  %v6110_v22 = vadd.f32 %v6109_v17, %v13716_v12  ;;  %v6310_v18 = vpop.f32.mrb[76].mxu1  ;;  %v6111_v34 = vpop.f32.mrb[77].mxu0 }
 0x6a5   : > { %v6312_v9 = vpop.f32.mrb[77].mxu1  ;;  %v6112_v40 = vpop.f32.mrb[78].mxu0 }
 0x6a6   : > { %v6311_v38 = vadd.f32 %v6310_v18, %v6110_v22  ;;  %v6113_v8 = vadd.f32 %v6112_v40, %v13718_v26  ;;  %v6313_v13 = vpop.f32.mrb[78].mxu1  ;;  %v6114_v55 = vpop.f32.mrb[79].mxu0 }
 0x6a7   : > { %v6315_v14 = vpop.f32.mrb[79].mxu1 }
 0x6a8   : > { %v6364_v57 = vadd.f32 %v13724_v52, %v6311_v38  ;;  %v6314_v43 = vadd.f32 %v6313_v13, %v6113_v8 }
 0x6aa   : > { %6406 = vst [vmem:[%s13731_s23 + $0x140] sm:$0xff] %v6364_v57  ;;  %v6365_v33 = vadd.f32 %v13724_v52, %v6314_v43 }
 0x6ac   : > { %6407 = vst [vmem:[%s13731_s23 + $0x148] sm:$0xff] %v6365_v33 }
 0x6ad PF: > { %s20_s30 = sadd.s32 1, %s8543_s30  }
 0x6ae   : > { %p17_p4 = scmp.ge.s32.totalorder %s20_s30, 4  }
 0x6b0   :  { %19 = sbr.rel (!%p17_p4) target bundleno = 1 (0x1), region = 97 }

</bundles_post_ra>
